<compile_context>
chip_gen: v6e
topology: v6e:2x2x1
jax: 0.10.0
libtpu: 0.0.40
codegen_flags: <defaults>
</compile_context>

<pallas_src>
import functools
import math

import jax
import jax.numpy as jnp
from jax.experimental import pallas as pl
from jax.experimental.pallas import tpu as pltpu


# ---------------------------------------------------------------------------
# Fused kernel: 3x (conv 'same' + SiLU)  ->  [proj + 3x (MHA + SiLU + residual)]
# One batch element per grid step, everything channels-major.
# ---------------------------------------------------------------------------
def _backbone_kernel(*refs, n_heads, n_attn_layers, use_objs, wc):
    if use_objs:
        (x_ref, obj_ref, mcol_ref, keep_ref,
         cw_ref, cb_ref, cmask_ref,
         pw_ref, pb_ref, aw_ref, abc_ref, abk_ref, bm_ref,
         out_ref, can_a, can_b) = refs
    else:
        (x_ref, cw_ref, cb_ref, cmask_ref, out_ref, can_a, can_b) = refs

    f32 = jnp.float32
    C = can_a.shape[0]                 # padded channel count (32)
    ncan = can_a.shape[1]              # canvas size = (H+4)*(W+4)
    int0 = 2 * wc + 2                  # flat canvas index of interior (2, 2)
    segw = ncan - 2 * int0             # contiguous span covering the interior
    seg = out_ref.shape[2]             # H * wc  (row-slab token count)

    def silu(v):
        return v * jax.nn.sigmoid(v)

    def conv(src, ci, ksize, n):
        # 'same' conv as a sum of shifted-slab matmuls on the zero-padded
        # canvas: each tap is one (C,C)@(C,n) MXU op on a contiguous lane slice.
        half = ksize // 2
        acc = jnp.zeros((C, n), f32)
        for dy in range(ksize):
            for dx in range(ksize):
                start = int0 + (dy - half) * wc + (dx - half)
                acc = acc + jnp.dot(cw_ref[ci, dy * ksize + dx],
                                    src(start, n),
                                    preferred_element_type=f32)
        return acc + cb_ref[ci]

    int_mask = cmask_ref[:, int0:int0 + segw]          # (1, segw) interior mask

    # conv1: padded input block -> canvas A
    y = silu(conv(lambda st, n: x_ref[0, :, st:st + n], 0, 5, segw))
    can_a[...] = jnp.zeros((C, ncan), f32)
    can_a[:, int0:int0 + segw] = y * int_mask

    # conv2: canvas A -> canvas B
    y = silu(conv(lambda st, n: can_a[:, st:st + n], 1, 3, segw))
    can_b[...] = jnp.zeros((C, ncan), f32)
    can_b[:, int0:int0 + segw] = y * int_mask

    # conv3: canvas B -> row-slab grid features (C, H*wc); the wc-W junk
    # columns per row are dropped by the wrapper slice.
    g = silu(conv(lambda st, n: can_b[:, st:st + n], 2, 3, seg))

    if use_objs:
        hd = C // n_heads
        scale = 1.0 / math.sqrt(hd)
        bmask = bm_ref[...]            # (C, C) block-diagonal head mask
        mcol = mcol_ref[0]             # (C, 1) additive key mask (tiled per head)
        keep = keep_ref[0]             # (1, 1) 0.0 iff the batch has no valid objects
        # object projection (Conv1d, kernel 1): key-major (L, C)
        kv = jnp.dot(obj_ref[0], pw_ref[...],
                     preferred_element_type=f32) + pb_ref[...]

        for li in range(n_attn_layers):
            wq, wk, wv, wo = (aw_ref[li, 0], aw_ref[li, 1],
                              aw_ref[li, 2], aw_ref[li, 3])
            bq, bv, bo = abc_ref[li, 0], abc_ref[li, 1], abc_ref[li, 2]
            bk = abk_ref[li]                                        # (1, C)

            q = jnp.dot(wq, g, preferred_element_type=f32) + bq     # (C, S)
            k = jnp.dot(kv, wk, preferred_element_type=f32) + bk    # (L, C)
            v = jax.lax.dot_general(wv, kv, (((1,), (1,)), ((), ())),
                                    preferred_element_type=f32) + bv  # (C, L)

            # Block-diagonal key/value matrices: all per-head math becomes
            # dense (C,C)@(C,S) matmuls (no 8-wide slices / tiny MXU pushes).
            kbd = jnp.concatenate([k] * n_heads, axis=0) * bmask    # (C, C)
            vbd = jnp.concatenate([v] * n_heads, axis=1) * bmask    # (C, C)

            s = jnp.dot(kbd, q, preferred_element_type=f32) * scale + mcol
            # Per-head softmax over the L key rows of each head block.  The max
            # is taken over all rows of the column, which is a per-column
            # constant and therefore exact for each head's softmax.
            m = jnp.max(s, axis=0, keepdims=True)
            p = jnp.exp(s - m)
            denom = jnp.dot(bmask, p, preferred_element_type=f32)   # per-head sums
            p = p * pl.reciprocal(denom, approx=True)
            oh = jnp.dot(vbd, p, preferred_element_type=f32)        # (C, S)

            a = jnp.dot(wo, oh, preferred_element_type=f32) + bo
            a = a * keep                     # zero fully-masked batches
            a = silu(a)                      # (second keep-zero is a no-op: SiLU(0)=0)
            g = g + a                        # residual

    out_ref[0] = g


# ---------------------------------------------------------------------------
# Deterministic parameter initialization (synthetic weights, not a checkpoint),
# already packed in the fused-kernel layout.
# ---------------------------------------------------------------------------
def init_backbone_params(key, channels, out_channels, size, use_pos, objs_shape,
                         n_heads=4):
    del size
    CP = 32                                        # padded channel count
    assert out_channels <= CP
    num_in = channels + (2 if use_pos else 0)
    mid = 16
    keys = iter(jax.random.split(key, 64))

    def rnd(shape, fan_in):
        return (jax.random.normal(next(keys), shape, jnp.float32)
                / math.sqrt(fan_in)).astype(jnp.float32)

    conv_defs = [(num_in, mid, 5), (mid, 2 * mid, 3), (2 * mid, out_channels, 3)]
    convW = jnp.zeros((3, 25, CP, CP), jnp.float32)       # (conv, tap, Cout, Cin)
    convB = jnp.zeros((3, CP, 1), jnp.float32)
    for i, (cin, cout, k) in enumerate(conv_defs):
        w = rnd((k * k, cout, cin), cin * k * k)
        b = rnd((cout, 1), cin * k * k)
        convW = convW.at[i, :k * k, :cout, :cin].set(w)
        convB = convB.at[i, :cout].set(b)
    params = {"convW": convW, "convB": convB}

    if objs_shape is not None:
        _, obj_dim = objs_shape
        C = CP
        params["projW"] = rnd((obj_dim, C), obj_dim)      # right-multiply
        params["projB"] = rnd((1, C), obj_dim)
        attW, attBc, attBk = [], [], []
        for _ in range(3):
            wq = rnd((C, C), C); wk = rnd((C, C), C)
            wv = rnd((C, C), C); wo = rnd((C, C), C)
            bq = rnd((C, 1), C); bk = rnd((1, C), C)
            bv = rnd((C, 1), C); bo = rnd((C, 1), C)
            attW.append(jnp.stack([wq, wk, wv, wo]))
            attBc.append(jnp.stack([bq, bv, bo]))
            attBk.append(bk)
        params["attW"] = jnp.stack(attW)                  # (3, 4, C, C)
        params["attBc"] = jnp.stack(attBc)                # (3, 3, C, 1)
        params["attBk"] = jnp.stack(attBk)                # (3, 1, C)
    return params


# ---------------------------------------------------------------------------
# Full forward pass (matches Backbone.forward semantics, use_bn=False).
# ---------------------------------------------------------------------------
def backbone_forward(params, grid_nchw, objs=None, objs_attn_mask=None, *,
                     use_pos, use_objs, size, out_channels=32, n_heads=4):
    B = grid_nchw.shape[0]
    C = 32
    WC = size + 4                                 # canvas width (border 2 each side)
    NCAN = WC * WC                                # flat canvas length
    SEG = size * WC                               # row-slab token count

    x = grid_nchw.astype(jnp.float32)
    if use_pos:
        col = jnp.arange(size, dtype=jnp.float32) / size
        xc = jnp.broadcast_to(col[None, :], (size, size))   # x_channel[i, j] = j / size
        yc = jnp.broadcast_to(col[:, None], (size, size))   # y_channel[i, j] = i / size
        pos = jnp.broadcast_to(jnp.stack([xc, yc])[None], (B, 2, size, size))
        x = jnp.concatenate([x, pos], axis=1)
    cin = x.shape[1]
    if cin < C:
        x = jnp.concatenate(
            [x, jnp.zeros((B, C - cin, size, size), jnp.float32)], axis=1)
    # pad once for the whole conv chain; flatten to the (C, canvas) layout.
    x = jnp.pad(x, ((0, 0), (0, 0), (2, 2), (2, 2))).reshape(B, C, NCAN)

    cmask = jnp.zeros((WC, WC), jnp.float32).at[2:2 + size, 2:2 + size].set(1.0)
    cmask = cmask.reshape(1, NCAN)

    kernel = functools.partial(_backbone_kernel, n_heads=n_heads,
                               n_attn_layers=3, use_objs=use_objs, wc=WC)

    perb3 = lambda b: (b, 0, 0)
    const2 = lambda b: (0, 0)
    const3 = lambda b: (0, 0, 0)
    const4 = lambda b: (0, 0, 0, 0)

    operands = [x]
    in_specs = [pl.BlockSpec((1, C, NCAN), perb3)]

    if use_objs:
        L = objs.shape[1]
        hd = C // n_heads
        assert n_heads * L == C, \
            "fused kernel assumes n_objs == out_channels // n_heads"
        mask_bool = objs_attn_mask.astype(bool)
        # True iff ALL objects of the batch element are masked (computed on the
        # original mask, like the reference).
        batch_all_masked = jnp.logical_not(jnp.any(jnp.logical_not(mask_bool), axis=1))
        keep = jnp.where(batch_all_masked, 0.0, 1.0).astype(jnp.float32)
        keep = keep.reshape(B, 1, 1)
        # objs_attn_mask[:, 0] = False  (guarantees >=1 valid key per row)
        mask2 = mask_bool.at[:, 0].set(False)
        add_l = jnp.where(mask2, jnp.float32(-1e30), jnp.float32(0.0))   # (B, L)
        mcol = jnp.tile(add_l, (1, n_heads)).reshape(B, C, 1)
        head_id = jnp.arange(C, dtype=jnp.int32) // hd
        bmask = (head_id[:, None] == head_id[None, :]).astype(jnp.float32)

        operands += [objs.astype(jnp.float32), mcol, keep,
                     params["convW"], params["convB"], cmask,
                     params["projW"], params["projB"],
                     params["attW"], params["attBc"], params["attBk"], bmask]
        in_specs += [
            pl.BlockSpec((1, L, objs.shape[2]), perb3),
            pl.BlockSpec((1, C, 1), perb3),
            pl.BlockSpec((1, 1, 1), perb3),
            pl.BlockSpec(params["convW"].shape, const4),
            pl.BlockSpec(params["convB"].shape, const3),
            pl.BlockSpec((1, NCAN), const2),
            pl.BlockSpec(params["projW"].shape, const2),
            pl.BlockSpec(params["projB"].shape, const2),
            pl.BlockSpec(params["attW"].shape, const4),
            pl.BlockSpec(params["attBc"].shape, const4),
            pl.BlockSpec(params["attBk"].shape, const3),
            pl.BlockSpec((C, C), const2),
        ]
    else:
        operands += [params["convW"], params["convB"], cmask]
        in_specs += [
            pl.BlockSpec(params["convW"].shape, const4),
            pl.BlockSpec(params["convB"].shape, const3),
            pl.BlockSpec((1, NCAN), const2),
        ]

    out = pl.pallas_call(
        kernel,
        out_shape=jax.ShapeDtypeStruct((B, C, SEG), jnp.float32),
        grid=(B,),
        in_specs=in_specs,
        out_specs=pl.BlockSpec((1, C, SEG), perb3),
        scratch_shapes=[pltpu.VMEM((C, NCAN), jnp.float32),
                        pltpu.VMEM((C, NCAN), jnp.float32)],
        compiler_params=pltpu.CompilerParams(dimension_semantics=("parallel",)),
    )(*operands)

    # Row-slab -> NCHW: free reshape + tiny slice (drops the wc-W junk columns
    # and the padded output channels).
    out = out.reshape(B, C, size, WC)[:, :, :, :size]
    return out[:, :out_channels]


if __name__ == "__main__":
    B, channels, size, out_channels = 2, 4, 16, 32
    n_objs, obj_dim = 8, 6
    use_pos = True

    key = jax.random.PRNGKey(0)
    kp, kg, ko = jax.random.split(key, 3)
    params = init_backbone_params(kp, channels, out_channels, size, use_pos,
                                  (n_objs, obj_dim))

    grid = jax.random.normal(kg, (B, channels, size, size), jnp.float32)
    objs = jax.random.normal(ko, (B, n_objs, obj_dim), jnp.float32)
    # batch 0: first 3 objects valid; batch 1: all masked (exercises batch_attn_mask).
    objs_attn_mask = jnp.array(
        [[False, False, False, True, True, True, True, True],
         [True, True, True, True, True, True, True, True]], dtype=bool)

    fwd = jax.jit(lambda g_, o_, m_: backbone_forward(
        params, g_, o_, m_, use_pos=use_pos, use_objs=True, size=size,
        out_channels=out_channels))

    out = jax.block_until_ready(fwd(grid, objs, objs_attn_mask))
    assert out.shape == (B, out_channels, size, size), out.shape
    assert bool(jnp.all(jnp.isfinite(out)))
    print("KERNEL_OK")
</pallas_src>

<mosaic_0001>
module attributes {stable_mosaic.version = 11 : i64} {
  func.func @_backbone_kernel(%arg0: i32, %arg1: memref<1x32x400xf32, #tpu.memory_space<vmem>>, %arg2: memref<1x8x6xf32, #tpu.memory_space<vmem>>, %arg3: memref<1x32x1xf32, #tpu.memory_space<vmem>>, %arg4: memref<1x1x1xf32, #tpu.memory_space<vmem>>, %arg5: memref<3x25x32x32xf32, #tpu.memory_space<vmem>>, %arg6: memref<3x32x1xf32, #tpu.memory_space<vmem>>, %arg7: memref<1x400xf32, #tpu.memory_space<vmem>>, %arg8: memref<6x32xf32, #tpu.memory_space<vmem>>, %arg9: memref<1x32xf32, #tpu.memory_space<vmem>>, %arg10: memref<3x4x32x32xf32, #tpu.memory_space<vmem>>, %arg11: memref<3x3x32x1xf32, #tpu.memory_space<vmem>>, %arg12: memref<3x1x32xf32, #tpu.memory_space<vmem>>, %arg13: memref<32x32xf32, #tpu.memory_space<vmem>>, %arg14: memref<1x32x320xf32, #tpu.memory_space<vmem>>, %arg15: memref<32x400xf32, #tpu.memory_space<vmem>>, %arg16: memref<32x400xf32, #tpu.memory_space<vmem>>) attributes {dimension_semantics = [#tpu.dimension_semantics<parallel>], iteration_bounds = array<i64: 2>, scalar_prefetch = 0 : i64, scratch_operands = 2 : i64, tpu.core_type = #tpu.core_type<tc>, window_params = [{transform_indices = @transform_0, window_bounds = array<i64: 1, 32, 400>}, {transform_indices = @transform_1, window_bounds = array<i64: 1, 8, 6>}, {transform_indices = @transform_2, window_bounds = array<i64: 1, 32, 1>}, {transform_indices = @transform_3, window_bounds = array<i64: 1, 1, 1>}, {pipeline_mode = #tpu.pipeline_mode<synchronous>, transform_indices = @transform_4, window_bounds = array<i64: 3, 25, 32, 32>}, {pipeline_mode = #tpu.pipeline_mode<synchronous>, transform_indices = @transform_5, window_bounds = array<i64: 3, 32, 1>}, {pipeline_mode = #tpu.pipeline_mode<synchronous>, transform_indices = @transform_6, window_bounds = array<i64: 1, 400>}, {pipeline_mode = #tpu.pipeline_mode<synchronous>, transform_indices = @transform_7, window_bounds = array<i64: 6, 32>}, {pipeline_mode = #tpu.pipeline_mode<synchronous>, transform_indices = @transform_8, window_bounds = array<i64: 1, 32>}, {pipeline_mode = #tpu.pipeline_mode<synchronous>, transform_indices = @transform_9, window_bounds = array<i64: 3, 4, 32, 32>}, {pipeline_mode = #tpu.pipeline_mode<synchronous>, transform_indices = @transform_10, window_bounds = array<i64: 3, 3, 32, 1>}, {pipeline_mode = #tpu.pipeline_mode<synchronous>, transform_indices = @transform_11, window_bounds = array<i64: 3, 1, 32>}, {pipeline_mode = #tpu.pipeline_mode<synchronous>, transform_indices = @transform_12, window_bounds = array<i64: 32, 32>}, {transform_indices = @transform_13, window_bounds = array<i64: 1, 32, 320>}]} {
    %c0 = arith.constant 0 : index
    %c42 = arith.constant 42 : index
    %0 = vector.load %arg7[%c0, %c42] : memref<1x400xf32, #tpu.memory_space<vmem>>, vector<1x316xf32>
    %cst = arith.constant 0.000000e+00 : f32
    %1 = vector.broadcast %cst : f32 to vector<32x316xf32>
    %c0_0 = arith.constant 0 : index
    %c0_1 = arith.constant 0 : index
    %c0_2 = arith.constant 0 : index
    %c0_3 = arith.constant 0 : index
    %2 = vector.load %arg5[%c0_0, %c0_1, %c0_2, %c0_3] : memref<3x25x32x32xf32, #tpu.memory_space<vmem>>, vector<1x1x32x32xf32>
    %3 = vector.shape_cast %2 : vector<1x1x32x32xf32> to vector<32x32xf32>
    %c0_4 = arith.constant 0 : index
    %c0_5 = arith.constant 0 : index
    %c0_6 = arith.constant 0 : index
    %4 = vector.load %arg1[%c0_4, %c0_5, %c0_6] : memref<1x32x400xf32, #tpu.memory_space<vmem>>, vector<1x32x316xf32>
    %5 = vector.shape_cast %4 : vector<1x32x316xf32> to vector<32x316xf32>
    %cst_7 = arith.constant dense<0.000000e+00> : vector<32x316xf32>
    %6 = tpu.matmul %3, %5, %cst_7 {dimension_numbers = #tpu.dot_dimension_numbers<[1], [0], [0], [1], [0, 0, 1, 1], [], []>} : vector<32x32xf32>, vector<32x316xf32>, vector<32x316xf32> -> vector<32x316xf32>
    %7 = arith.addf %1, %6 : vector<32x316xf32>
    %c0_8 = arith.constant 0 : index
    %c1 = arith.constant 1 : index
    %c0_9 = arith.constant 0 : index
    %c0_10 = arith.constant 0 : index
    %8 = vector.load %arg5[%c0_8, %c1, %c0_9, %c0_10] : memref<3x25x32x32xf32, #tpu.memory_space<vmem>>, vector<1x1x32x32xf32>
    %9 = vector.shape_cast %8 : vector<1x1x32x32xf32> to vector<32x32xf32>
    %c0_11 = arith.constant 0 : index
    %c0_12 = arith.constant 0 : index
    %c1_13 = arith.constant 1 : index
    %10 = vector.load %arg1[%c0_11, %c0_12, %c1_13] : memref<1x32x400xf32, #tpu.memory_space<vmem>>, vector<1x32x316xf32>
    %11 = vector.shape_cast %10 : vector<1x32x316xf32> to vector<32x316xf32>
    %cst_14 = arith.constant dense<0.000000e+00> : vector<32x316xf32>
    %12 = tpu.matmul %9, %11, %cst_14 {dimension_numbers = #tpu.dot_dimension_numbers<[1], [0], [0], [1], [0, 0, 1, 1], [], []>} : vector<32x32xf32>, vector<32x316xf32>, vector<32x316xf32> -> vector<32x316xf32>
    %13 = arith.addf %7, %12 : vector<32x316xf32>
    %c0_15 = arith.constant 0 : index
    %c2 = arith.constant 2 : index
    %c0_16 = arith.constant 0 : index
    %c0_17 = arith.constant 0 : index
    %14 = vector.load %arg5[%c0_15, %c2, %c0_16, %c0_17] : memref<3x25x32x32xf32, #tpu.memory_space<vmem>>, vector<1x1x32x32xf32>
    %15 = vector.shape_cast %14 : vector<1x1x32x32xf32> to vector<32x32xf32>
    %c0_18 = arith.constant 0 : index
    %c0_19 = arith.constant 0 : index
    %c2_20 = arith.constant 2 : index
    %16 = vector.load %arg1[%c0_18, %c0_19, %c2_20] : memref<1x32x400xf32, #tpu.memory_space<vmem>>, vector<1x32x316xf32>
    %17 = vector.shape_cast %16 : vector<1x32x316xf32> to vector<32x316xf32>
    %cst_21 = arith.constant dense<0.000000e+00> : vector<32x316xf32>
    %18 = tpu.matmul %15, %17, %cst_21 {dimension_numbers = #tpu.dot_dimension_numbers<[1], [0], [0], [1], [0, 0, 1, 1], [], []>} : vector<32x32xf32>, vector<32x316xf32>, vector<32x316xf32> -> vector<32x316xf32>
    %19 = arith.addf %13, %18 : vector<32x316xf32>
    %c0_22 = arith.constant 0 : index
    %c3 = arith.constant 3 : index
    %c0_23 = arith.constant 0 : index
    %c0_24 = arith.constant 0 : index
    %20 = vector.load %arg5[%c0_22, %c3, %c0_23, %c0_24] : memref<3x25x32x32xf32, #tpu.memory_space<vmem>>, vector<1x1x32x32xf32>
    %21 = vector.shape_cast %20 : vector<1x1x32x32xf32> to vector<32x32xf32>
    %c0_25 = arith.constant 0 : index
    %c0_26 = arith.constant 0 : index
    %c3_27 = arith.constant 3 : index
    %22 = vector.load %arg1[%c0_25, %c0_26, %c3_27] : memref<1x32x400xf32, #tpu.memory_space<vmem>>, vector<1x32x316xf32>
    %23 = vector.shape_cast %22 : vector<1x32x316xf32> to vector<32x316xf32>
    %cst_28 = arith.constant dense<0.000000e+00> : vector<32x316xf32>
    %24 = tpu.matmul %21, %23, %cst_28 {dimension_numbers = #tpu.dot_dimension_numbers<[1], [0], [0], [1], [0, 0, 1, 1], [], []>} : vector<32x32xf32>, vector<32x316xf32>, vector<32x316xf32> -> vector<32x316xf32>
    %25 = arith.addf %19, %24 : vector<32x316xf32>
    %c0_29 = arith.constant 0 : index
    %c4 = arith.constant 4 : index
    %c0_30 = arith.constant 0 : index
    %c0_31 = arith.constant 0 : index
    %26 = vector.load %arg5[%c0_29, %c4, %c0_30, %c0_31] : memref<3x25x32x32xf32, #tpu.memory_space<vmem>>, vector<1x1x32x32xf32>
    %27 = vector.shape_cast %26 : vector<1x1x32x32xf32> to vector<32x32xf32>
    %c0_32 = arith.constant 0 : index
    %c0_33 = arith.constant 0 : index
    %c4_34 = arith.constant 4 : index
    %28 = vector.load %arg1[%c0_32, %c0_33, %c4_34] : memref<1x32x400xf32, #tpu.memory_space<vmem>>, vector<1x32x316xf32>
    %29 = vector.shape_cast %28 : vector<1x32x316xf32> to vector<32x316xf32>
    %cst_35 = arith.constant dense<0.000000e+00> : vector<32x316xf32>
    %30 = tpu.matmul %27, %29, %cst_35 {dimension_numbers = #tpu.dot_dimension_numbers<[1], [0], [0], [1], [0, 0, 1, 1], [], []>} : vector<32x32xf32>, vector<32x316xf32>, vector<32x316xf32> -> vector<32x316xf32>
    %31 = arith.addf %25, %30 : vector<32x316xf32>
    %c0_36 = arith.constant 0 : index
    %c5 = arith.constant 5 : index
    %c0_37 = arith.constant 0 : index
    %c0_38 = arith.constant 0 : index
    %32 = vector.load %arg5[%c0_36, %c5, %c0_37, %c0_38] : memref<3x25x32x32xf32, #tpu.memory_space<vmem>>, vector<1x1x32x32xf32>
    %33 = vector.shape_cast %32 : vector<1x1x32x32xf32> to vector<32x32xf32>
    %c0_39 = arith.constant 0 : index
    %c0_40 = arith.constant 0 : index
    %c20 = arith.constant 20 : index
    %34 = vector.load %arg1[%c0_39, %c0_40, %c20] : memref<1x32x400xf32, #tpu.memory_space<vmem>>, vector<1x32x316xf32>
    %35 = vector.shape_cast %34 : vector<1x32x316xf32> to vector<32x316xf32>
    %cst_41 = arith.constant dense<0.000000e+00> : vector<32x316xf32>
    %36 = tpu.matmul %33, %35, %cst_41 {dimension_numbers = #tpu.dot_dimension_numbers<[1], [0], [0], [1], [0, 0, 1, 1], [], []>} : vector<32x32xf32>, vector<32x316xf32>, vector<32x316xf32> -> vector<32x316xf32>
    %37 = arith.addf %31, %36 : vector<32x316xf32>
    %c0_42 = arith.constant 0 : index
    %c6 = arith.constant 6 : index
    %c0_43 = arith.constant 0 : index
    %c0_44 = arith.constant 0 : index
    %38 = vector.load %arg5[%c0_42, %c6, %c0_43, %c0_44] : memref<3x25x32x32xf32, #tpu.memory_space<vmem>>, vector<1x1x32x32xf32>
    %39 = vector.shape_cast %38 : vector<1x1x32x32xf32> to vector<32x32xf32>
    %c0_45 = arith.constant 0 : index
    %c0_46 = arith.constant 0 : index
    %c21 = arith.constant 21 : index
    %40 = vector.load %arg1[%c0_45, %c0_46, %c21] : memref<1x32x400xf32, #tpu.memory_space<vmem>>, vector<1x32x316xf32>
    %41 = vector.shape_cast %40 : vector<1x32x316xf32> to vector<32x316xf32>
    %cst_47 = arith.constant dense<0.000000e+00> : vector<32x316xf32>
    %42 = tpu.matmul %39, %41, %cst_47 {dimension_numbers = #tpu.dot_dimension_numbers<[1], [0], [0], [1], [0, 0, 1, 1], [], []>} : vector<32x32xf32>, vector<32x316xf32>, vector<32x316xf32> -> vector<32x316xf32>
    %43 = arith.addf %37, %42 : vector<32x316xf32>
    %c0_48 = arith.constant 0 : index
    %c7 = arith.constant 7 : index
    %c0_49 = arith.constant 0 : index
    %c0_50 = arith.constant 0 : index
    %44 = vector.load %arg5[%c0_48, %c7, %c0_49, %c0_50] : memref<3x25x32x32xf32, #tpu.memory_space<vmem>>, vector<1x1x32x32xf32>
    %45 = vector.shape_cast %44 : vector<1x1x32x32xf32> to vector<32x32xf32>
    %c0_51 = arith.constant 0 : index
    %c0_52 = arith.constant 0 : index
    %c22 = arith.constant 22 : index
    %46 = vector.load %arg1[%c0_51, %c0_52, %c22] : memref<1x32x400xf32, #tpu.memory_space<vmem>>, vector<1x32x316xf32>
    %47 = vector.shape_cast %46 : vector<1x32x316xf32> to vector<32x316xf32>
    %cst_53 = arith.constant dense<0.000000e+00> : vector<32x316xf32>
    %48 = tpu.matmul %45, %47, %cst_53 {dimension_numbers = #tpu.dot_dimension_numbers<[1], [0], [0], [1], [0, 0, 1, 1], [], []>} : vector<32x32xf32>, vector<32x316xf32>, vector<32x316xf32> -> vector<32x316xf32>
    %49 = arith.addf %43, %48 : vector<32x316xf32>
    %c0_54 = arith.constant 0 : index
    %c8 = arith.constant 8 : index
    %c0_55 = arith.constant 0 : index
    %c0_56 = arith.constant 0 : index
    %50 = vector.load %arg5[%c0_54, %c8, %c0_55, %c0_56] : memref<3x25x32x32xf32, #tpu.memory_space<vmem>>, vector<1x1x32x32xf32>
    %51 = vector.shape_cast %50 : vector<1x1x32x32xf32> to vector<32x32xf32>
    %c0_57 = arith.constant 0 : index
    %c0_58 = arith.constant 0 : index
    %c23 = arith.constant 23 : index
    %52 = vector.load %arg1[%c0_57, %c0_58, %c23] : memref<1x32x400xf32, #tpu.memory_space<vmem>>, vector<1x32x316xf32>
    %53 = vector.shape_cast %52 : vector<1x32x316xf32> to vector<32x316xf32>
    %cst_59 = arith.constant dense<0.000000e+00> : vector<32x316xf32>
    %54 = tpu.matmul %51, %53, %cst_59 {dimension_numbers = #tpu.dot_dimension_numbers<[1], [0], [0], [1], [0, 0, 1, 1], [], []>} : vector<32x32xf32>, vector<32x316xf32>, vector<32x316xf32> -> vector<32x316xf32>
    %55 = arith.addf %49, %54 : vector<32x316xf32>
    %c0_60 = arith.constant 0 : index
    %c9 = arith.constant 9 : index
    %c0_61 = arith.constant 0 : index
    %c0_62 = arith.constant 0 : index
    %56 = vector.load %arg5[%c0_60, %c9, %c0_61, %c0_62] : memref<3x25x32x32xf32, #tpu.memory_space<vmem>>, vector<1x1x32x32xf32>
    %57 = vector.shape_cast %56 : vector<1x1x32x32xf32> to vector<32x32xf32>
    %c0_63 = arith.constant 0 : index
    %c0_64 = arith.constant 0 : index
    %c24 = arith.constant 24 : index
    %58 = vector.load %arg1[%c0_63, %c0_64, %c24] : memref<1x32x400xf32, #tpu.memory_space<vmem>>, vector<1x32x316xf32>
    %59 = vector.shape_cast %58 : vector<1x32x316xf32> to vector<32x316xf32>
    %cst_65 = arith.constant dense<0.000000e+00> : vector<32x316xf32>
    %60 = tpu.matmul %57, %59, %cst_65 {dimension_numbers = #tpu.dot_dimension_numbers<[1], [0], [0], [1], [0, 0, 1, 1], [], []>} : vector<32x32xf32>, vector<32x316xf32>, vector<32x316xf32> -> vector<32x316xf32>
    %61 = arith.addf %55, %60 : vector<32x316xf32>
    %c0_66 = arith.constant 0 : index
    %c10 = arith.constant 10 : index
    %c0_67 = arith.constant 0 : index
    %c0_68 = arith.constant 0 : index
    %62 = vector.load %arg5[%c0_66, %c10, %c0_67, %c0_68] : memref<3x25x32x32xf32, #tpu.memory_space<vmem>>, vector<1x1x32x32xf32>
    %63 = vector.shape_cast %62 : vector<1x1x32x32xf32> to vector<32x32xf32>
    %c0_69 = arith.constant 0 : index
    %c0_70 = arith.constant 0 : index
    %c40 = arith.constant 40 : index
    %64 = vector.load %arg1[%c0_69, %c0_70, %c40] : memref<1x32x400xf32, #tpu.memory_space<vmem>>, vector<1x32x316xf32>
    %65 = vector.shape_cast %64 : vector<1x32x316xf32> to vector<32x316xf32>
    %cst_71 = arith.constant dense<0.000000e+00> : vector<32x316xf32>
    %66 = tpu.matmul %63, %65, %cst_71 {dimension_numbers = #tpu.dot_dimension_numbers<[1], [0], [0], [1], [0, 0, 1, 1], [], []>} : vector<32x32xf32>, vector<32x316xf32>, vector<32x316xf32> -> vector<32x316xf32>
    %67 = arith.addf %61, %66 : vector<32x316xf32>
    %c0_72 = arith.constant 0 : index
    %c11 = arith.constant 11 : index
    %c0_73 = arith.constant 0 : index
    %c0_74 = arith.constant 0 : index
    %68 = vector.load %arg5[%c0_72, %c11, %c0_73, %c0_74] : memref<3x25x32x32xf32, #tpu.memory_space<vmem>>, vector<1x1x32x32xf32>
    %69 = vector.shape_cast %68 : vector<1x1x32x32xf32> to vector<32x32xf32>
    %c0_75 = arith.constant 0 : index
    %c0_76 = arith.constant 0 : index
    %c41 = arith.constant 41 : index
    %70 = vector.load %arg1[%c0_75, %c0_76, %c41] : memref<1x32x400xf32, #tpu.memory_space<vmem>>, vector<1x32x316xf32>
    %71 = vector.shape_cast %70 : vector<1x32x316xf32> to vector<32x316xf32>
    %cst_77 = arith.constant dense<0.000000e+00> : vector<32x316xf32>
    %72 = tpu.matmul %69, %71, %cst_77 {dimension_numbers = #tpu.dot_dimension_numbers<[1], [0], [0], [1], [0, 0, 1, 1], [], []>} : vector<32x32xf32>, vector<32x316xf32>, vector<32x316xf32> -> vector<32x316xf32>
    %73 = arith.addf %67, %72 : vector<32x316xf32>
    %c0_78 = arith.constant 0 : index
    %c12 = arith.constant 12 : index
    %c0_79 = arith.constant 0 : index
    %c0_80 = arith.constant 0 : index
    %74 = vector.load %arg5[%c0_78, %c12, %c0_79, %c0_80] : memref<3x25x32x32xf32, #tpu.memory_space<vmem>>, vector<1x1x32x32xf32>
    %75 = vector.shape_cast %74 : vector<1x1x32x32xf32> to vector<32x32xf32>
    %c0_81 = arith.constant 0 : index
    %c0_82 = arith.constant 0 : index
    %c42_83 = arith.constant 42 : index
    %76 = vector.load %arg1[%c0_81, %c0_82, %c42_83] : memref<1x32x400xf32, #tpu.memory_space<vmem>>, vector<1x32x316xf32>
    %77 = vector.shape_cast %76 : vector<1x32x316xf32> to vector<32x316xf32>
    %cst_84 = arith.constant dense<0.000000e+00> : vector<32x316xf32>
    %78 = tpu.matmul %75, %77, %cst_84 {dimension_numbers = #tpu.dot_dimension_numbers<[1], [0], [0], [1], [0, 0, 1, 1], [], []>} : vector<32x32xf32>, vector<32x316xf32>, vector<32x316xf32> -> vector<32x316xf32>
    %79 = arith.addf %73, %78 : vector<32x316xf32>
    %c0_85 = arith.constant 0 : index
    %c13 = arith.constant 13 : index
    %c0_86 = arith.constant 0 : index
    %c0_87 = arith.constant 0 : index
    %80 = vector.load %arg5[%c0_85, %c13, %c0_86, %c0_87] : memref<3x25x32x32xf32, #tpu.memory_space<vmem>>, vector<1x1x32x32xf32>
    %81 = vector.shape_cast %80 : vector<1x1x32x32xf32> to vector<32x32xf32>
    %c0_88 = arith.constant 0 : index
    %c0_89 = arith.constant 0 : index
    %c43 = arith.constant 43 : index
    %82 = vector.load %arg1[%c0_88, %c0_89, %c43] : memref<1x32x400xf32, #tpu.memory_space<vmem>>, vector<1x32x316xf32>
    %83 = vector.shape_cast %82 : vector<1x32x316xf32> to vector<32x316xf32>
    %cst_90 = arith.constant dense<0.000000e+00> : vector<32x316xf32>
    %84 = tpu.matmul %81, %83, %cst_90 {dimension_numbers = #tpu.dot_dimension_numbers<[1], [0], [0], [1], [0, 0, 1, 1], [], []>} : vector<32x32xf32>, vector<32x316xf32>, vector<32x316xf32> -> vector<32x316xf32>
    %85 = arith.addf %79, %84 : vector<32x316xf32>
    %c0_91 = arith.constant 0 : index
    %c14 = arith.constant 14 : index
    %c0_92 = arith.constant 0 : index
    %c0_93 = arith.constant 0 : index
    %86 = vector.load %arg5[%c0_91, %c14, %c0_92, %c0_93] : memref<3x25x32x32xf32, #tpu.memory_space<vmem>>, vector<1x1x32x32xf32>
    %87 = vector.shape_cast %86 : vector<1x1x32x32xf32> to vector<32x32xf32>
    %c0_94 = arith.constant 0 : index
    %c0_95 = arith.constant 0 : index
    %c44 = arith.constant 44 : index
    %88 = vector.load %arg1[%c0_94, %c0_95, %c44] : memref<1x32x400xf32, #tpu.memory_space<vmem>>, vector<1x32x316xf32>
    %89 = vector.shape_cast %88 : vector<1x32x316xf32> to vector<32x316xf32>
    %cst_96 = arith.constant dense<0.000000e+00> : vector<32x316xf32>
    %90 = tpu.matmul %87, %89, %cst_96 {dimension_numbers = #tpu.dot_dimension_numbers<[1], [0], [0], [1], [0, 0, 1, 1], [], []>} : vector<32x32xf32>, vector<32x316xf32>, vector<32x316xf32> -> vector<32x316xf32>
    %91 = arith.addf %85, %90 : vector<32x316xf32>
    %c0_97 = arith.constant 0 : index
    %c15 = arith.constant 15 : index
    %c0_98 = arith.constant 0 : index
    %c0_99 = arith.constant 0 : index
    %92 = vector.load %arg5[%c0_97, %c15, %c0_98, %c0_99] : memref<3x25x32x32xf32, #tpu.memory_space<vmem>>, vector<1x1x32x32xf32>
    %93 = vector.shape_cast %92 : vector<1x1x32x32xf32> to vector<32x32xf32>
    %c0_100 = arith.constant 0 : index
    %c0_101 = arith.constant 0 : index
    %c60 = arith.constant 60 : index
    %94 = vector.load %arg1[%c0_100, %c0_101, %c60] : memref<1x32x400xf32, #tpu.memory_space<vmem>>, vector<1x32x316xf32>
    %95 = vector.shape_cast %94 : vector<1x32x316xf32> to vector<32x316xf32>
    %cst_102 = arith.constant dense<0.000000e+00> : vector<32x316xf32>
    %96 = tpu.matmul %93, %95, %cst_102 {dimension_numbers = #tpu.dot_dimension_numbers<[1], [0], [0], [1], [0, 0, 1, 1], [], []>} : vector<32x32xf32>, vector<32x316xf32>, vector<32x316xf32> -> vector<32x316xf32>
    %97 = arith.addf %91, %96 : vector<32x316xf32>
    %c0_103 = arith.constant 0 : index
    %c16 = arith.constant 16 : index
    %c0_104 = arith.constant 0 : index
    %c0_105 = arith.constant 0 : index
    %98 = vector.load %arg5[%c0_103, %c16, %c0_104, %c0_105] : memref<3x25x32x32xf32, #tpu.memory_space<vmem>>, vector<1x1x32x32xf32>
    %99 = vector.shape_cast %98 : vector<1x1x32x32xf32> to vector<32x32xf32>
    %c0_106 = arith.constant 0 : index
    %c0_107 = arith.constant 0 : index
    %c61 = arith.constant 61 : index
    %100 = vector.load %arg1[%c0_106, %c0_107, %c61] : memref<1x32x400xf32, #tpu.memory_space<vmem>>, vector<1x32x316xf32>
    %101 = vector.shape_cast %100 : vector<1x32x316xf32> to vector<32x316xf32>
    %cst_108 = arith.constant dense<0.000000e+00> : vector<32x316xf32>
    %102 = tpu.matmul %99, %101, %cst_108 {dimension_numbers = #tpu.dot_dimension_numbers<[1], [0], [0], [1], [0, 0, 1, 1], [], []>} : vector<32x32xf32>, vector<32x316xf32>, vector<32x316xf32> -> vector<32x316xf32>
    %103 = arith.addf %97, %102 : vector<32x316xf32>
    %c0_109 = arith.constant 0 : index
    %c17 = arith.constant 17 : index
    %c0_110 = arith.constant 0 : index
    %c0_111 = arith.constant 0 : index
    %104 = vector.load %arg5[%c0_109, %c17, %c0_110, %c0_111] : memref<3x25x32x32xf32, #tpu.memory_space<vmem>>, vector<1x1x32x32xf32>
    %105 = vector.shape_cast %104 : vector<1x1x32x32xf32> to vector<32x32xf32>
    %c0_112 = arith.constant 0 : index
    %c0_113 = arith.constant 0 : index
    %c62 = arith.constant 62 : index
    %106 = vector.load %arg1[%c0_112, %c0_113, %c62] : memref<1x32x400xf32, #tpu.memory_space<vmem>>, vector<1x32x316xf32>
    %107 = vector.shape_cast %106 : vector<1x32x316xf32> to vector<32x316xf32>
    %cst_114 = arith.constant dense<0.000000e+00> : vector<32x316xf32>
    %108 = tpu.matmul %105, %107, %cst_114 {dimension_numbers = #tpu.dot_dimension_numbers<[1], [0], [0], [1], [0, 0, 1, 1], [], []>} : vector<32x32xf32>, vector<32x316xf32>, vector<32x316xf32> -> vector<32x316xf32>
    %109 = arith.addf %103, %108 : vector<32x316xf32>
    %c0_115 = arith.constant 0 : index
    %c18 = arith.constant 18 : index
    %c0_116 = arith.constant 0 : index
    %c0_117 = arith.constant 0 : index
    %110 = vector.load %arg5[%c0_115, %c18, %c0_116, %c0_117] : memref<3x25x32x32xf32, #tpu.memory_space<vmem>>, vector<1x1x32x32xf32>
    %111 = vector.shape_cast %110 : vector<1x1x32x32xf32> to vector<32x32xf32>
    %c0_118 = arith.constant 0 : index
    %c0_119 = arith.constant 0 : index
    %c63 = arith.constant 63 : index
    %112 = vector.load %arg1[%c0_118, %c0_119, %c63] : memref<1x32x400xf32, #tpu.memory_space<vmem>>, vector<1x32x316xf32>
    %113 = vector.shape_cast %112 : vector<1x32x316xf32> to vector<32x316xf32>
    %cst_120 = arith.constant dense<0.000000e+00> : vector<32x316xf32>
    %114 = tpu.matmul %111, %113, %cst_120 {dimension_numbers = #tpu.dot_dimension_numbers<[1], [0], [0], [1], [0, 0, 1, 1], [], []>} : vector<32x32xf32>, vector<32x316xf32>, vector<32x316xf32> -> vector<32x316xf32>
    %115 = arith.addf %109, %114 : vector<32x316xf32>
    %c0_121 = arith.constant 0 : index
    %c19 = arith.constant 19 : index
    %c0_122 = arith.constant 0 : index
    %c0_123 = arith.constant 0 : index
    %116 = vector.load %arg5[%c0_121, %c19, %c0_122, %c0_123] : memref<3x25x32x32xf32, #tpu.memory_space<vmem>>, vector<1x1x32x32xf32>
    %117 = vector.shape_cast %116 : vector<1x1x32x32xf32> to vector<32x32xf32>
    %c0_124 = arith.constant 0 : index
    %c0_125 = arith.constant 0 : index
    %c64 = arith.constant 64 : index
    %118 = vector.load %arg1[%c0_124, %c0_125, %c64] : memref<1x32x400xf32, #tpu.memory_space<vmem>>, vector<1x32x316xf32>
    %119 = vector.shape_cast %118 : vector<1x32x316xf32> to vector<32x316xf32>
    %cst_126 = arith.constant dense<0.000000e+00> : vector<32x316xf32>
    %120 = tpu.matmul %117, %119, %cst_126 {dimension_numbers = #tpu.dot_dimension_numbers<[1], [0], [0], [1], [0, 0, 1, 1], [], []>} : vector<32x32xf32>, vector<32x316xf32>, vector<32x316xf32> -> vector<32x316xf32>
    %121 = arith.addf %115, %120 : vector<32x316xf32>
    %c0_127 = arith.constant 0 : index
    %c20_128 = arith.constant 20 : index
    %c0_129 = arith.constant 0 : index
    %c0_130 = arith.constant 0 : index
    %122 = vector.load %arg5[%c0_127, %c20_128, %c0_129, %c0_130] : memref<3x25x32x32xf32, #tpu.memory_space<vmem>>, vector<1x1x32x32xf32>
    %123 = vector.shape_cast %122 : vector<1x1x32x32xf32> to vector<32x32xf32>
    %c0_131 = arith.constant 0 : index
    %c0_132 = arith.constant 0 : index
    %c80 = arith.constant 80 : index
    %124 = vector.load %arg1[%c0_131, %c0_132, %c80] : memref<1x32x400xf32, #tpu.memory_space<vmem>>, vector<1x32x316xf32>
    %125 = vector.shape_cast %124 : vector<1x32x316xf32> to vector<32x316xf32>
    %cst_133 = arith.constant dense<0.000000e+00> : vector<32x316xf32>
    %126 = tpu.matmul %123, %125, %cst_133 {dimension_numbers = #tpu.dot_dimension_numbers<[1], [0], [0], [1], [0, 0, 1, 1], [], []>} : vector<32x32xf32>, vector<32x316xf32>, vector<32x316xf32> -> vector<32x316xf32>
    %127 = arith.addf %121, %126 : vector<32x316xf32>
    %c0_134 = arith.constant 0 : index
    %c21_135 = arith.constant 21 : index
    %c0_136 = arith.constant 0 : index
    %c0_137 = arith.constant 0 : index
    %128 = vector.load %arg5[%c0_134, %c21_135, %c0_136, %c0_137] : memref<3x25x32x32xf32, #tpu.memory_space<vmem>>, vector<1x1x32x32xf32>
    %129 = vector.shape_cast %128 : vector<1x1x32x32xf32> to vector<32x32xf32>
    %c0_138 = arith.constant 0 : index
    %c0_139 = arith.constant 0 : index
    %c81 = arith.constant 81 : index
    %130 = vector.load %arg1[%c0_138, %c0_139, %c81] : memref<1x32x400xf32, #tpu.memory_space<vmem>>, vector<1x32x316xf32>
    %131 = vector.shape_cast %130 : vector<1x32x316xf32> to vector<32x316xf32>
    %cst_140 = arith.constant dense<0.000000e+00> : vector<32x316xf32>
    %132 = tpu.matmul %129, %131, %cst_140 {dimension_numbers = #tpu.dot_dimension_numbers<[1], [0], [0], [1], [0, 0, 1, 1], [], []>} : vector<32x32xf32>, vector<32x316xf32>, vector<32x316xf32> -> vector<32x316xf32>
    %133 = arith.addf %127, %132 : vector<32x316xf32>
    %c0_141 = arith.constant 0 : index
    %c22_142 = arith.constant 22 : index
    %c0_143 = arith.constant 0 : index
    %c0_144 = arith.constant 0 : index
    %134 = vector.load %arg5[%c0_141, %c22_142, %c0_143, %c0_144] : memref<3x25x32x32xf32, #tpu.memory_space<vmem>>, vector<1x1x32x32xf32>
    %135 = vector.shape_cast %134 : vector<1x1x32x32xf32> to vector<32x32xf32>
    %c0_145 = arith.constant 0 : index
    %c0_146 = arith.constant 0 : index
    %c82 = arith.constant 82 : index
    %136 = vector.load %arg1[%c0_145, %c0_146, %c82] : memref<1x32x400xf32, #tpu.memory_space<vmem>>, vector<1x32x316xf32>
    %137 = vector.shape_cast %136 : vector<1x32x316xf32> to vector<32x316xf32>
    %cst_147 = arith.constant dense<0.000000e+00> : vector<32x316xf32>
    %138 = tpu.matmul %135, %137, %cst_147 {dimension_numbers = #tpu.dot_dimension_numbers<[1], [0], [0], [1], [0, 0, 1, 1], [], []>} : vector<32x32xf32>, vector<32x316xf32>, vector<32x316xf32> -> vector<32x316xf32>
    %139 = arith.addf %133, %138 : vector<32x316xf32>
    %c0_148 = arith.constant 0 : index
    %c23_149 = arith.constant 23 : index
    %c0_150 = arith.constant 0 : index
    %c0_151 = arith.constant 0 : index
    %140 = vector.load %arg5[%c0_148, %c23_149, %c0_150, %c0_151] : memref<3x25x32x32xf32, #tpu.memory_space<vmem>>, vector<1x1x32x32xf32>
    %141 = vector.shape_cast %140 : vector<1x1x32x32xf32> to vector<32x32xf32>
    %c0_152 = arith.constant 0 : index
    %c0_153 = arith.constant 0 : index
    %c83 = arith.constant 83 : index
    %142 = vector.load %arg1[%c0_152, %c0_153, %c83] : memref<1x32x400xf32, #tpu.memory_space<vmem>>, vector<1x32x316xf32>
    %143 = vector.shape_cast %142 : vector<1x32x316xf32> to vector<32x316xf32>
    %cst_154 = arith.constant dense<0.000000e+00> : vector<32x316xf32>
    %144 = tpu.matmul %141, %143, %cst_154 {dimension_numbers = #tpu.dot_dimension_numbers<[1], [0], [0], [1], [0, 0, 1, 1], [], []>} : vector<32x32xf32>, vector<32x316xf32>, vector<32x316xf32> -> vector<32x316xf32>
    %145 = arith.addf %139, %144 : vector<32x316xf32>
    %c0_155 = arith.constant 0 : index
    %c24_156 = arith.constant 24 : index
    %c0_157 = arith.constant 0 : index
    %c0_158 = arith.constant 0 : index
    %146 = vector.load %arg5[%c0_155, %c24_156, %c0_157, %c0_158] : memref<3x25x32x32xf32, #tpu.memory_space<vmem>>, vector<1x1x32x32xf32>
    %147 = vector.shape_cast %146 : vector<1x1x32x32xf32> to vector<32x32xf32>
    %c0_159 = arith.constant 0 : index
    %c0_160 = arith.constant 0 : index
    %c84 = arith.constant 84 : index
    %148 = vector.load %arg1[%c0_159, %c0_160, %c84] : memref<1x32x400xf32, #tpu.memory_space<vmem>>, vector<1x32x316xf32>
    %149 = vector.shape_cast %148 : vector<1x32x316xf32> to vector<32x316xf32>
    %cst_161 = arith.constant dense<0.000000e+00> : vector<32x316xf32>
    %150 = tpu.matmul %147, %149, %cst_161 {dimension_numbers = #tpu.dot_dimension_numbers<[1], [0], [0], [1], [0, 0, 1, 1], [], []>} : vector<32x32xf32>, vector<32x316xf32>, vector<32x316xf32> -> vector<32x316xf32>
    %151 = arith.addf %145, %150 : vector<32x316xf32>
    %c0_162 = arith.constant 0 : index
    %c0_163 = arith.constant 0 : index
    %c0_164 = arith.constant 0 : index
    %152 = vector.load %arg6[%c0_162, %c0_163, %c0_164] : memref<3x32x1xf32, #tpu.memory_space<vmem>>, vector<1x32x1xf32>
    %153 = vector.shape_cast %152 : vector<1x32x1xf32> to vector<32x1xf32>
    %154 = vector.broadcast %153 : vector<32x1xf32> to vector<32x316xf32>
    %155 = arith.addf %151, %154 : vector<32x316xf32>
    %156 = arith.negf %155 : vector<32x316xf32>
    %157 = math.exp %156 : vector<32x316xf32>
    %cst_165 = arith.constant 1.000000e+00 : f32
    %158 = vector.broadcast %cst_165 : f32 to vector<32x316xf32>
    %159 = arith.addf %158, %157 : vector<32x316xf32>
    %160 = arith.divf %158, %159 : vector<32x316xf32>
    %161 = arith.mulf %155, %160 : vector<32x316xf32>
    %cst_166 = arith.constant 0.000000e+00 : f32
    %162 = vector.broadcast %cst_166 : f32 to vector<32x400xf32>
    %c0_167 = arith.constant 0 : index
    %c0_168 = arith.constant 0 : index
    %163 = vector.load %arg15[%c0_167, %c0_168] : memref<32x400xf32, #tpu.memory_space<vmem>>, vector<32x400xf32>
    tpu.vector_store %arg15[%c0_167, %c0_168], %162 {strides = array<i32>} : memref<32x400xf32, #tpu.memory_space<vmem>>, vector<32x400xf32>,
    %164 = vector.broadcast %0 : vector<1x316xf32> to vector<32x316xf32>
    %165 = arith.mulf %161, %164 : vector<32x316xf32>
    %c0_169 = arith.constant 0 : index
    %c42_170 = arith.constant 42 : index
    %166 = vector.load %arg15[%c0_169, %c42_170] : memref<32x400xf32, #tpu.memory_space<vmem>>, vector<32x316xf32>
    tpu.vector_store %arg15[%c0_169, %c42_170], %165 {strides = array<i32>} : memref<32x400xf32, #tpu.memory_space<vmem>>, vector<32x316xf32>,
    %cst_171 = arith.constant 0.000000e+00 : f32
    %167 = vector.broadcast %cst_171 : f32 to vector<32x316xf32>
    %c1_172 = arith.constant 1 : index
    %c0_173 = arith.constant 0 : index
    %c0_174 = arith.constant 0 : index
    %c0_175 = arith.constant 0 : index
    %168 = vector.load %arg5[%c1_172, %c0_173, %c0_174, %c0_175] : memref<3x25x32x32xf32, #tpu.memory_space<vmem>>, vector<1x1x32x32xf32>
    %169 = vector.shape_cast %168 : vector<1x1x32x32xf32> to vector<32x32xf32>
    %c0_176 = arith.constant 0 : index
    %c21_177 = arith.constant 21 : index
    %170 = vector.load %arg15[%c0_176, %c21_177] : memref<32x400xf32, #tpu.memory_space<vmem>>, vector<32x316xf32>
    %cst_178 = arith.constant dense<0.000000e+00> : vector<32x316xf32>
    %171 = tpu.matmul %169, %170, %cst_178 {dimension_numbers = #tpu.dot_dimension_numbers<[1], [0], [0], [1], [0, 0, 1, 1], [], []>} : vector<32x32xf32>, vector<32x316xf32>, vector<32x316xf32> -> vector<32x316xf32>
    %172 = arith.addf %167, %171 : vector<32x316xf32>
    %c1_179 = arith.constant 1 : index
    %c1_180 = arith.constant 1 : index
    %c0_181 = arith.constant 0 : index
    %c0_182 = arith.constant 0 : index
    %173 = vector.load %arg5[%c1_179, %c1_180, %c0_181, %c0_182] : memref<3x25x32x32xf32, #tpu.memory_space<vmem>>, vector<1x1x32x32xf32>
    %174 = vector.shape_cast %173 : vector<1x1x32x32xf32> to vector<32x32xf32>
    %c0_183 = arith.constant 0 : index
    %c22_184 = arith.constant 22 : index
    %175 = vector.load %arg15[%c0_183, %c22_184] : memref<32x400xf32, #tpu.memory_space<vmem>>, vector<32x316xf32>
    %cst_185 = arith.constant dense<0.000000e+00> : vector<32x316xf32>
    %176 = tpu.matmul %174, %175, %cst_185 {dimension_numbers = #tpu.dot_dimension_numbers<[1], [0], [0], [1], [0, 0, 1, 1], [], []>} : vector<32x32xf32>, vector<32x316xf32>, vector<32x316xf32> -> vector<32x316xf32>
    %177 = arith.addf %172, %176 : vector<32x316xf32>
    %c1_186 = arith.constant 1 : index
    %c2_187 = arith.constant 2 : index
    %c0_188 = arith.constant 0 : index
    %c0_189 = arith.constant 0 : index
    %178 = vector.load %arg5[%c1_186, %c2_187, %c0_188, %c0_189] : memref<3x25x32x32xf32, #tpu.memory_space<vmem>>, vector<1x1x32x32xf32>
    %179 = vector.shape_cast %178 : vector<1x1x32x32xf32> to vector<32x32xf32>
    %c0_190 = arith.constant 0 : index
    %c23_191 = arith.constant 23 : index
    %180 = vector.load %arg15[%c0_190, %c23_191] : memref<32x400xf32, #tpu.memory_space<vmem>>, vector<32x316xf32>
    %cst_192 = arith.constant dense<0.000000e+00> : vector<32x316xf32>
    %181 = tpu.matmul %179, %180, %cst_192 {dimension_numbers = #tpu.dot_dimension_numbers<[1], [0], [0], [1], [0, 0, 1, 1], [], []>} : vector<32x32xf32>, vector<32x316xf32>, vector<32x316xf32> -> vector<32x316xf32>
    %182 = arith.addf %177, %181 : vector<32x316xf32>
    %c1_193 = arith.constant 1 : index
    %c3_194 = arith.constant 3 : index
    %c0_195 = arith.constant 0 : index
    %c0_196 = arith.constant 0 : index
    %183 = vector.load %arg5[%c1_193, %c3_194, %c0_195, %c0_196] : memref<3x25x32x32xf32, #tpu.memory_space<vmem>>, vector<1x1x32x32xf32>
    %184 = vector.shape_cast %183 : vector<1x1x32x32xf32> to vector<32x32xf32>
    %c0_197 = arith.constant 0 : index
    %c41_198 = arith.constant 41 : index
    %185 = vector.load %arg15[%c0_197, %c41_198] : memref<32x400xf32, #tpu.memory_space<vmem>>, vector<32x316xf32>
    %cst_199 = arith.constant dense<0.000000e+00> : vector<32x316xf32>
    %186 = tpu.matmul %184, %185, %cst_199 {dimension_numbers = #tpu.dot_dimension_numbers<[1], [0], [0], [1], [0, 0, 1, 1], [], []>} : vector<32x32xf32>, vector<32x316xf32>, vector<32x316xf32> -> vector<32x316xf32>
    %187 = arith.addf %182, %186 : vector<32x316xf32>
    %c1_200 = arith.constant 1 : index
    %c4_201 = arith.constant 4 : index
    %c0_202 = arith.constant 0 : index
    %c0_203 = arith.constant 0 : index
    %188 = vector.load %arg5[%c1_200, %c4_201, %c0_202, %c0_203] : memref<3x25x32x32xf32, #tpu.memory_space<vmem>>, vector<1x1x32x32xf32>
    %189 = vector.shape_cast %188 : vector<1x1x32x32xf32> to vector<32x32xf32>
    %c0_204 = arith.constant 0 : index
    %c42_205 = arith.constant 42 : index
    %190 = vector.load %arg15[%c0_204, %c42_205] : memref<32x400xf32, #tpu.memory_space<vmem>>, vector<32x316xf32>
    %cst_206 = arith.constant dense<0.000000e+00> : vector<32x316xf32>
    %191 = tpu.matmul %189, %190, %cst_206 {dimension_numbers = #tpu.dot_dimension_numbers<[1], [0], [0], [1], [0, 0, 1, 1], [], []>} : vector<32x32xf32>, vector<32x316xf32>, vector<32x316xf32> -> vector<32x316xf32>
    %192 = arith.addf %187, %191 : vector<32x316xf32>
    %c1_207 = arith.constant 1 : index
    %c5_208 = arith.constant 5 : index
    %c0_209 = arith.constant 0 : index
    %c0_210 = arith.constant 0 : index
    %193 = vector.load %arg5[%c1_207, %c5_208, %c0_209, %c0_210] : memref<3x25x32x32xf32, #tpu.memory_space<vmem>>, vector<1x1x32x32xf32>
    %194 = vector.shape_cast %193 : vector<1x1x32x32xf32> to vector<32x32xf32>
    %c0_211 = arith.constant 0 : index
    %c43_212 = arith.constant 43 : index
    %195 = vector.load %arg15[%c0_211, %c43_212] : memref<32x400xf32, #tpu.memory_space<vmem>>, vector<32x316xf32>
    %cst_213 = arith.constant dense<0.000000e+00> : vector<32x316xf32>
    %196 = tpu.matmul %194, %195, %cst_213 {dimension_numbers = #tpu.dot_dimension_numbers<[1], [0], [0], [1], [0, 0, 1, 1], [], []>} : vector<32x32xf32>, vector<32x316xf32>, vector<32x316xf32> -> vector<32x316xf32>
    %197 = arith.addf %192, %196 : vector<32x316xf32>
    %c1_214 = arith.constant 1 : index
    %c6_215 = arith.constant 6 : index
    %c0_216 = arith.constant 0 : index
    %c0_217 = arith.constant 0 : index
    %198 = vector.load %arg5[%c1_214, %c6_215, %c0_216, %c0_217] : memref<3x25x32x32xf32, #tpu.memory_space<vmem>>, vector<1x1x32x32xf32>
    %199 = vector.shape_cast %198 : vector<1x1x32x32xf32> to vector<32x32xf32>
    %c0_218 = arith.constant 0 : index
    %c61_219 = arith.constant 61 : index
    %200 = vector.load %arg15[%c0_218, %c61_219] : memref<32x400xf32, #tpu.memory_space<vmem>>, vector<32x316xf32>
    %cst_220 = arith.constant dense<0.000000e+00> : vector<32x316xf32>
    %201 = tpu.matmul %199, %200, %cst_220 {dimension_numbers = #tpu.dot_dimension_numbers<[1], [0], [0], [1], [0, 0, 1, 1], [], []>} : vector<32x32xf32>, vector<32x316xf32>, vector<32x316xf32> -> vector<32x316xf32>
    %202 = arith.addf %197, %201 : vector<32x316xf32>
    %c1_221 = arith.constant 1 : index
    %c7_222 = arith.constant 7 : index
    %c0_223 = arith.constant 0 : index
    %c0_224 = arith.constant 0 : index
    %203 = vector.load %arg5[%c1_221, %c7_222, %c0_223, %c0_224] : memref<3x25x32x32xf32, #tpu.memory_space<vmem>>, vector<1x1x32x32xf32>
    %204 = vector.shape_cast %203 : vector<1x1x32x32xf32> to vector<32x32xf32>
    %c0_225 = arith.constant 0 : index
    %c62_226 = arith.constant 62 : index
    %205 = vector.load %arg15[%c0_225, %c62_226] : memref<32x400xf32, #tpu.memory_space<vmem>>, vector<32x316xf32>
    %cst_227 = arith.constant dense<0.000000e+00> : vector<32x316xf32>
    %206 = tpu.matmul %204, %205, %cst_227 {dimension_numbers = #tpu.dot_dimension_numbers<[1], [0], [0], [1], [0, 0, 1, 1], [], []>} : vector<32x32xf32>, vector<32x316xf32>, vector<32x316xf32> -> vector<32x316xf32>
    %207 = arith.addf %202, %206 : vector<32x316xf32>
    %c1_228 = arith.constant 1 : index
    %c8_229 = arith.constant 8 : index
    %c0_230 = arith.constant 0 : index
    %c0_231 = arith.constant 0 : index
    %208 = vector.load %arg5[%c1_228, %c8_229, %c0_230, %c0_231] : memref<3x25x32x32xf32, #tpu.memory_space<vmem>>, vector<1x1x32x32xf32>
    %209 = vector.shape_cast %208 : vector<1x1x32x32xf32> to vector<32x32xf32>
    %c0_232 = arith.constant 0 : index
    %c63_233 = arith.constant 63 : index
    %210 = vector.load %arg15[%c0_232, %c63_233] : memref<32x400xf32, #tpu.memory_space<vmem>>, vector<32x316xf32>
    %cst_234 = arith.constant dense<0.000000e+00> : vector<32x316xf32>
    %211 = tpu.matmul %209, %210, %cst_234 {dimension_numbers = #tpu.dot_dimension_numbers<[1], [0], [0], [1], [0, 0, 1, 1], [], []>} : vector<32x32xf32>, vector<32x316xf32>, vector<32x316xf32> -> vector<32x316xf32>
    %212 = arith.addf %207, %211 : vector<32x316xf32>
    %c1_235 = arith.constant 1 : index
    %c0_236 = arith.constant 0 : index
    %c0_237 = arith.constant 0 : index
    %213 = vector.load %arg6[%c1_235, %c0_236, %c0_237] : memref<3x32x1xf32, #tpu.memory_space<vmem>>, vector<1x32x1xf32>
    %214 = vector.shape_cast %213 : vector<1x32x1xf32> to vector<32x1xf32>
    %215 = vector.broadcast %214 : vector<32x1xf32> to vector<32x316xf32>
    %216 = arith.addf %212, %215 : vector<32x316xf32>
    %217 = arith.negf %216 : vector<32x316xf32>
    %218 = math.exp %217 : vector<32x316xf32>
    %cst_238 = arith.constant 1.000000e+00 : f32
    %219 = vector.broadcast %cst_238 : f32 to vector<32x316xf32>
    %220 = arith.addf %219, %218 : vector<32x316xf32>
    %221 = arith.divf %219, %220 : vector<32x316xf32>
    %222 = arith.mulf %216, %221 : vector<32x316xf32>
    %cst_239 = arith.constant 0.000000e+00 : f32
    %223 = vector.broadcast %cst_239 : f32 to vector<32x400xf32>
    %c0_240 = arith.constant 0 : index
    %c0_241 = arith.constant 0 : index
    %224 = vector.load %arg16[%c0_240, %c0_241] : memref<32x400xf32, #tpu.memory_space<vmem>>, vector<32x400xf32>
    tpu.vector_store %arg16[%c0_240, %c0_241], %223 {strides = array<i32>} : memref<32x400xf32, #tpu.memory_space<vmem>>, vector<32x400xf32>,
    %225 = vector.broadcast %0 : vector<1x316xf32> to vector<32x316xf32>
    %226 = arith.mulf %222, %225 : vector<32x316xf32>
    %c0_242 = arith.constant 0 : index
    %c42_243 = arith.constant 42 : index
    %227 = vector.load %arg16[%c0_242, %c42_243] : memref<32x400xf32, #tpu.memory_space<vmem>>, vector<32x316xf32>
    tpu.vector_store %arg16[%c0_242, %c42_243], %226 {strides = array<i32>} : memref<32x400xf32, #tpu.memory_space<vmem>>, vector<32x316xf32>,
    %cst_244 = arith.constant 0.000000e+00 : f32
    %228 = vector.broadcast %cst_244 : f32 to vector<32x320xf32>
    %c2_245 = arith.constant 2 : index
    %c0_246 = arith.constant 0 : index
    %c0_247 = arith.constant 0 : index
    %c0_248 = arith.constant 0 : index
    %229 = vector.load %arg5[%c2_245, %c0_246, %c0_247, %c0_248] : memref<3x25x32x32xf32, #tpu.memory_space<vmem>>, vector<1x1x32x32xf32>
    %230 = vector.shape_cast %229 : vector<1x1x32x32xf32> to vector<32x32xf32>
    %c0_249 = arith.constant 0 : index
    %c21_250 = arith.constant 21 : index
    %231 = vector.load %arg16[%c0_249, %c21_250] : memref<32x400xf32, #tpu.memory_space<vmem>>, vector<32x320xf32>
    %cst_251 = arith.constant dense<0.000000e+00> : vector<32x320xf32>
    %232 = tpu.matmul %230, %231, %cst_251 {dimension_numbers = #tpu.dot_dimension_numbers<[1], [0], [0], [1], [0, 0, 1, 1], [], []>} : vector<32x32xf32>, vector<32x320xf32>, vector<32x320xf32> -> vector<32x320xf32>
    %233 = arith.addf %228, %232 : vector<32x320xf32>
    %c2_252 = arith.constant 2 : index
    %c1_253 = arith.constant 1 : index
    %c0_254 = arith.constant 0 : index
    %c0_255 = arith.constant 0 : index
    %234 = vector.load %arg5[%c2_252, %c1_253, %c0_254, %c0_255] : memref<3x25x32x32xf32, #tpu.memory_space<vmem>>, vector<1x1x32x32xf32>
    %235 = vector.shape_cast %234 : vector<1x1x32x32xf32> to vector<32x32xf32>
    %c0_256 = arith.constant 0 : index
    %c22_257 = arith.constant 22 : index
    %236 = vector.load %arg16[%c0_256, %c22_257] : memref<32x400xf32, #tpu.memory_space<vmem>>, vector<32x320xf32>
    %cst_258 = arith.constant dense<0.000000e+00> : vector<32x320xf32>
    %237 = tpu.matmul %235, %236, %cst_258 {dimension_numbers = #tpu.dot_dimension_numbers<[1], [0], [0], [1], [0, 0, 1, 1], [], []>} : vector<32x32xf32>, vector<32x320xf32>, vector<32x320xf32> -> vector<32x320xf32>
    %238 = arith.addf %233, %237 : vector<32x320xf32>
    %c2_259 = arith.constant 2 : index
    %c2_260 = arith.constant 2 : index
    %c0_261 = arith.constant 0 : index
    %c0_262 = arith.constant 0 : index
    %239 = vector.load %arg5[%c2_259, %c2_260, %c0_261, %c0_262] : memref<3x25x32x32xf32, #tpu.memory_space<vmem>>, vector<1x1x32x32xf32>
    %240 = vector.shape_cast %239 : vector<1x1x32x32xf32> to vector<32x32xf32>
    %c0_263 = arith.constant 0 : index
    %c23_264 = arith.constant 23 : index
    %241 = vector.load %arg16[%c0_263, %c23_264] : memref<32x400xf32, #tpu.memory_space<vmem>>, vector<32x320xf32>
    %cst_265 = arith.constant dense<0.000000e+00> : vector<32x320xf32>
    %242 = tpu.matmul %240, %241, %cst_265 {dimension_numbers = #tpu.dot_dimension_numbers<[1], [0], [0], [1], [0, 0, 1, 1], [], []>} : vector<32x32xf32>, vector<32x320xf32>, vector<32x320xf32> -> vector<32x320xf32>
    %243 = arith.addf %238, %242 : vector<32x320xf32>
    %c2_266 = arith.constant 2 : index
    %c3_267 = arith.constant 3 : index
    %c0_268 = arith.constant 0 : index
    %c0_269 = arith.constant 0 : index
    %244 = vector.load %arg5[%c2_266, %c3_267, %c0_268, %c0_269] : memref<3x25x32x32xf32, #tpu.memory_space<vmem>>, vector<1x1x32x32xf32>
    %245 = vector.shape_cast %244 : vector<1x1x32x32xf32> to vector<32x32xf32>
    %c0_270 = arith.constant 0 : index
    %c41_271 = arith.constant 41 : index
    %246 = vector.load %arg16[%c0_270, %c41_271] : memref<32x400xf32, #tpu.memory_space<vmem>>, vector<32x320xf32>
    %cst_272 = arith.constant dense<0.000000e+00> : vector<32x320xf32>
    %247 = tpu.matmul %245, %246, %cst_272 {dimension_numbers = #tpu.dot_dimension_numbers<[1], [0], [0], [1], [0, 0, 1, 1], [], []>} : vector<32x32xf32>, vector<32x320xf32>, vector<32x320xf32> -> vector<32x320xf32>
    %248 = arith.addf %243, %247 : vector<32x320xf32>
    %c2_273 = arith.constant 2 : index
    %c4_274 = arith.constant 4 : index
    %c0_275 = arith.constant 0 : index
    %c0_276 = arith.constant 0 : index
    %249 = vector.load %arg5[%c2_273, %c4_274, %c0_275, %c0_276] : memref<3x25x32x32xf32, #tpu.memory_space<vmem>>, vector<1x1x32x32xf32>
    %250 = vector.shape_cast %249 : vector<1x1x32x32xf32> to vector<32x32xf32>
    %c0_277 = arith.constant 0 : index
    %c42_278 = arith.constant 42 : index
    %251 = vector.load %arg16[%c0_277, %c42_278] : memref<32x400xf32, #tpu.memory_space<vmem>>, vector<32x320xf32>
    %cst_279 = arith.constant dense<0.000000e+00> : vector<32x320xf32>
    %252 = tpu.matmul %250, %251, %cst_279 {dimension_numbers = #tpu.dot_dimension_numbers<[1], [0], [0], [1], [0, 0, 1, 1], [], []>} : vector<32x32xf32>, vector<32x320xf32>, vector<32x320xf32> -> vector<32x320xf32>
    %253 = arith.addf %248, %252 : vector<32x320xf32>
    %c2_280 = arith.constant 2 : index
    %c5_281 = arith.constant 5 : index
    %c0_282 = arith.constant 0 : index
    %c0_283 = arith.constant 0 : index
    %254 = vector.load %arg5[%c2_280, %c5_281, %c0_282, %c0_283] : memref<3x25x32x32xf32, #tpu.memory_space<vmem>>, vector<1x1x32x32xf32>
    %255 = vector.shape_cast %254 : vector<1x1x32x32xf32> to vector<32x32xf32>
    %c0_284 = arith.constant 0 : index
    %c43_285 = arith.constant 43 : index
    %256 = vector.load %arg16[%c0_284, %c43_285] : memref<32x400xf32, #tpu.memory_space<vmem>>, vector<32x320xf32>
    %cst_286 = arith.constant dense<0.000000e+00> : vector<32x320xf32>
    %257 = tpu.matmul %255, %256, %cst_286 {dimension_numbers = #tpu.dot_dimension_numbers<[1], [0], [0], [1], [0, 0, 1, 1], [], []>} : vector<32x32xf32>, vector<32x320xf32>, vector<32x320xf32> -> vector<32x320xf32>
    %258 = arith.addf %253, %257 : vector<32x320xf32>
    %c2_287 = arith.constant 2 : index
    %c6_288 = arith.constant 6 : index
    %c0_289 = arith.constant 0 : index
    %c0_290 = arith.constant 0 : index
    %259 = vector.load %arg5[%c2_287, %c6_288, %c0_289, %c0_290] : memref<3x25x32x32xf32, #tpu.memory_space<vmem>>, vector<1x1x32x32xf32>
    %260 = vector.shape_cast %259 : vector<1x1x32x32xf32> to vector<32x32xf32>
    %c0_291 = arith.constant 0 : index
    %c61_292 = arith.constant 61 : index
    %261 = vector.load %arg16[%c0_291, %c61_292] : memref<32x400xf32, #tpu.memory_space<vmem>>, vector<32x320xf32>
    %cst_293 = arith.constant dense<0.000000e+00> : vector<32x320xf32>
    %262 = tpu.matmul %260, %261, %cst_293 {dimension_numbers = #tpu.dot_dimension_numbers<[1], [0], [0], [1], [0, 0, 1, 1], [], []>} : vector<32x32xf32>, vector<32x320xf32>, vector<32x320xf32> -> vector<32x320xf32>
    %263 = arith.addf %258, %262 : vector<32x320xf32>
    %c2_294 = arith.constant 2 : index
    %c7_295 = arith.constant 7 : index
    %c0_296 = arith.constant 0 : index
    %c0_297 = arith.constant 0 : index
    %264 = vector.load %arg5[%c2_294, %c7_295, %c0_296, %c0_297] : memref<3x25x32x32xf32, #tpu.memory_space<vmem>>, vector<1x1x32x32xf32>
    %265 = vector.shape_cast %264 : vector<1x1x32x32xf32> to vector<32x32xf32>
    %c0_298 = arith.constant 0 : index
    %c62_299 = arith.constant 62 : index
    %266 = vector.load %arg16[%c0_298, %c62_299] : memref<32x400xf32, #tpu.memory_space<vmem>>, vector<32x320xf32>
    %cst_300 = arith.constant dense<0.000000e+00> : vector<32x320xf32>
    %267 = tpu.matmul %265, %266, %cst_300 {dimension_numbers = #tpu.dot_dimension_numbers<[1], [0], [0], [1], [0, 0, 1, 1], [], []>} : vector<32x32xf32>, vector<32x320xf32>, vector<32x320xf32> -> vector<32x320xf32>
    %268 = arith.addf %263, %267 : vector<32x320xf32>
    %c2_301 = arith.constant 2 : index
    %c8_302 = arith.constant 8 : index
    %c0_303 = arith.constant 0 : index
    %c0_304 = arith.constant 0 : index
    %269 = vector.load %arg5[%c2_301, %c8_302, %c0_303, %c0_304] : memref<3x25x32x32xf32, #tpu.memory_space<vmem>>, vector<1x1x32x32xf32>
    %270 = vector.shape_cast %269 : vector<1x1x32x32xf32> to vector<32x32xf32>
    %c0_305 = arith.constant 0 : index
    %c63_306 = arith.constant 63 : index
    %271 = vector.load %arg16[%c0_305, %c63_306] : memref<32x400xf32, #tpu.memory_space<vmem>>, vector<32x320xf32>
    %cst_307 = arith.constant dense<0.000000e+00> : vector<32x320xf32>
    %272 = tpu.matmul %270, %271, %cst_307 {dimension_numbers = #tpu.dot_dimension_numbers<[1], [0], [0], [1], [0, 0, 1, 1], [], []>} : vector<32x32xf32>, vector<32x320xf32>, vector<32x320xf32> -> vector<32x320xf32>
    %273 = arith.addf %268, %272 : vector<32x320xf32>
    %c2_308 = arith.constant 2 : index
    %c0_309 = arith.constant 0 : index
    %c0_310 = arith.constant 0 : index
    %274 = vector.load %arg6[%c2_308, %c0_309, %c0_310] : memref<3x32x1xf32, #tpu.memory_space<vmem>>, vector<1x32x1xf32>
    %275 = vector.shape_cast %274 : vector<1x32x1xf32> to vector<32x1xf32>
    %276 = vector.broadcast %275 : vector<32x1xf32> to vector<32x320xf32>
    %277 = arith.addf %273, %276 : vector<32x320xf32>
    %278 = arith.negf %277 : vector<32x320xf32>
    %279 = math.exp %278 : vector<32x320xf32>
    %cst_311 = arith.constant 1.000000e+00 : f32
    %280 = vector.broadcast %cst_311 : f32 to vector<32x320xf32>
    %281 = arith.addf %280, %279 : vector<32x320xf32>
    %282 = arith.divf %280, %281 : vector<32x320xf32>
    %283 = arith.mulf %277, %282 : vector<32x320xf32>
    %c0_312 = arith.constant 0 : index
    %c0_313 = arith.constant 0 : index
    %284 = vector.load %arg13[%c0_312, %c0_313] : memref<32x32xf32, #tpu.memory_space<vmem>>, vector<32x32xf32>
    %c0_314 = arith.constant 0 : index
    %c0_315 = arith.constant 0 : index
    %c0_316 = arith.constant 0 : index
    %285 = vector.load %arg3[%c0_314, %c0_315, %c0_316] : memref<1x32x1xf32, #tpu.memory_space<vmem>>, vector<1x32x1xf32>
    %286 = vector.shape_cast %285 : vector<1x32x1xf32> to vector<32x1xf32>
    %c0_317 = arith.constant 0 : index
    %c0_318 = arith.constant 0 : index
    %c0_319 = arith.constant 0 : index
    %287 = vector.load %arg4[%c0_317, %c0_318, %c0_319] : memref<1x1x1xf32, #tpu.memory_space<vmem>>, vector<1x1x1xf32>
    %288 = vector.shape_cast %287 : vector<1x1x1xf32> to vector<1x1xf32>
    %c0_320 = arith.constant 0 : index
    %c0_321 = arith.constant 0 : index
    %c0_322 = arith.constant 0 : index
    %289 = vector.load %arg2[%c0_320, %c0_321, %c0_322] : memref<1x8x6xf32, #tpu.memory_space<vmem>>, vector<1x8x6xf32>
    %290 = vector.shape_cast %289 : vector<1x8x6xf32> to vector<8x6xf32>
    %c0_323 = arith.constant 0 : index
    %c0_324 = arith.constant 0 : index
    %291 = vector.load %arg8[%c0_323, %c0_324] : memref<6x32xf32, #tpu.memory_space<vmem>>, vector<6x32xf32>
    %cst_325 = arith.constant dense<0.000000e+00> : vector<8x32xf32>
    %292 = tpu.matmul %290, %291, %cst_325 {dimension_numbers = #tpu.dot_dimension_numbers<[1], [0], [0], [1], [0, 0, 1, 1], [], []>} : vector<8x6xf32>, vector<6x32xf32>, vector<8x32xf32> -> vector<8x32xf32>
    %c0_326 = arith.constant 0 : index
    %c0_327 = arith.constant 0 : index
    %293 = vector.load %arg9[%c0_326, %c0_327] : memref<1x32xf32, #tpu.memory_space<vmem>>, vector<1x32xf32>
    %294 = vector.broadcast %293 : vector<1x32xf32> to vector<8x32xf32>
    %295 = arith.addf %292, %294 : vector<8x32xf32>
    %c0_328 = arith.constant 0 : index
    %c0_329 = arith.constant 0 : index
    %c0_330 = arith.constant 0 : index
    %c0_331 = arith.constant 0 : index
    %296 = vector.load %arg10[%c0_328, %c0_329, %c0_330, %c0_331] : memref<3x4x32x32xf32, #tpu.memory_space<vmem>>, vector<1x1x32x32xf32>
    %297 = vector.shape_cast %296 : vector<1x1x32x32xf32> to vector<32x32xf32>
    %c0_332 = arith.constant 0 : index
    %c1_333 = arith.constant 1 : index
    %c0_334 = arith.constant 0 : index
    %c0_335 = arith.constant 0 : index
    %298 = vector.load %arg10[%c0_332, %c1_333, %c0_334, %c0_335] : memref<3x4x32x32xf32, #tpu.memory_space<vmem>>, vector<1x1x32x32xf32>
    %299 = vector.shape_cast %298 : vector<1x1x32x32xf32> to vector<32x32xf32>
    %c0_336 = arith.constant 0 : index
    %c2_337 = arith.constant 2 : index
    %c0_338 = arith.constant 0 : index
    %c0_339 = arith.constant 0 : index
    %300 = vector.load %arg10[%c0_336, %c2_337, %c0_338, %c0_339] : memref<3x4x32x32xf32, #tpu.memory_space<vmem>>, vector<1x1x32x32xf32>
    %301 = vector.shape_cast %300 : vector<1x1x32x32xf32> to vector<32x32xf32>
    %c0_340 = arith.constant 0 : index
    %c3_341 = arith.constant 3 : index
    %c0_342 = arith.constant 0 : index
    %c0_343 = arith.constant 0 : index
    %302 = vector.load %arg10[%c0_340, %c3_341, %c0_342, %c0_343] : memref<3x4x32x32xf32, #tpu.memory_space<vmem>>, vector<1x1x32x32xf32>
    %303 = vector.shape_cast %302 : vector<1x1x32x32xf32> to vector<32x32xf32>
    %c0_344 = arith.constant 0 : index
    %c0_345 = arith.constant 0 : index
    %c0_346 = arith.constant 0 : index
    %c0_347 = arith.constant 0 : index
    %304 = vector.load %arg11[%c0_344, %c0_345, %c0_346, %c0_347] : memref<3x3x32x1xf32, #tpu.memory_space<vmem>>, vector<1x1x32x1xf32>
    %305 = vector.shape_cast %304 : vector<1x1x32x1xf32> to vector<32x1xf32>
    %c0_348 = arith.constant 0 : index
    %c1_349 = arith.constant 1 : index
    %c0_350 = arith.constant 0 : index
    %c0_351 = arith.constant 0 : index
    %306 = vector.load %arg11[%c0_348, %c1_349, %c0_350, %c0_351] : memref<3x3x32x1xf32, #tpu.memory_space<vmem>>, vector<1x1x32x1xf32>
    %307 = vector.shape_cast %306 : vector<1x1x32x1xf32> to vector<32x1xf32>
    %c0_352 = arith.constant 0 : index
    %c2_353 = arith.constant 2 : index
    %c0_354 = arith.constant 0 : index
    %c0_355 = arith.constant 0 : index
    %308 = vector.load %arg11[%c0_352, %c2_353, %c0_354, %c0_355] : memref<3x3x32x1xf32, #tpu.memory_space<vmem>>, vector<1x1x32x1xf32>
    %309 = vector.shape_cast %308 : vector<1x1x32x1xf32> to vector<32x1xf32>
    %c0_356 = arith.constant 0 : index
    %c0_357 = arith.constant 0 : index
    %c0_358 = arith.constant 0 : index
    %310 = vector.load %arg12[%c0_356, %c0_357, %c0_358] : memref<3x1x32xf32, #tpu.memory_space<vmem>>, vector<1x1x32xf32>
    %311 = vector.shape_cast %310 : vector<1x1x32xf32> to vector<1x32xf32>
    %cst_359 = arith.constant dense<0.000000e+00> : vector<32x320xf32>
    %312 = tpu.matmul %297, %283, %cst_359 {dimension_numbers = #tpu.dot_dimension_numbers<[1], [0], [0], [1], [0, 0, 1, 1], [], []>} : vector<32x32xf32>, vector<32x320xf32>, vector<32x320xf32> -> vector<32x320xf32>
    %313 = vector.broadcast %305 : vector<32x1xf32> to vector<32x320xf32>
    %314 = arith.addf %312, %313 : vector<32x320xf32>
    %cst_360 = arith.constant dense<0.000000e+00> : vector<8x32xf32>
    %315 = tpu.matmul %295, %299, %cst_360 {dimension_numbers = #tpu.dot_dimension_numbers<[1], [0], [0], [1], [0, 0, 1, 1], [], []>} : vector<8x32xf32>, vector<32x32xf32>, vector<8x32xf32> -> vector<8x32xf32>
    %316 = vector.broadcast %311 : vector<1x32xf32> to vector<8x32xf32>
    %317 = arith.addf %315, %316 : vector<8x32xf32>
    %cst_361 = arith.constant dense<0.000000e+00> : vector<32x8xf32>
    %318 = tpu.matmul %301, %295, %cst_361 {dimension_numbers = #tpu.dot_dimension_numbers<[1], [1], [0], [0], [0, 0, 1, 0], [], []>} : vector<32x32xf32>, vector<8x32xf32>, vector<32x8xf32> -> vector<32x8xf32>
    %319 = vector.broadcast %307 : vector<32x1xf32> to vector<32x8xf32>
    %320 = arith.addf %318, %319 : vector<32x8xf32>
    %321 = tpu.concatenate %317, %317, %317, %317 in 0 : vector<8x32xf32>, vector<8x32xf32>, vector<8x32xf32>, vector<8x32xf32> -> vector<32x32xf32>
    %322 = arith.mulf %321, %284 : vector<32x32xf32>
    %323 = tpu.concatenate %320, %320, %320, %320 in 1 : vector<32x8xf32>, vector<32x8xf32>, vector<32x8xf32>, vector<32x8xf32> -> vector<32x32xf32>
    %324 = arith.mulf %323, %284 : vector<32x32xf32>
    %cst_362 = arith.constant dense<0.000000e+00> : vector<32x320xf32>
    %325 = tpu.matmul %322, %314, %cst_362 {dimension_numbers = #tpu.dot_dimension_numbers<[1], [0], [0], [1], [0, 0, 1, 1], [], []>} : vector<32x32xf32>, vector<32x320xf32>, vector<32x320xf32> -> vector<32x320xf32>
    %cst_363 = arith.constant 0.353553385 : f32
    %326 = vector.broadcast %cst_363 : f32 to vector<32x320xf32>
    %327 = arith.mulf %325, %326 : vector<32x320xf32>
    %328 = vector.broadcast %286 : vector<32x1xf32> to vector<32x320xf32>
    %329 = arith.addf %327, %328 : vector<32x320xf32>
    %cst_364 = arith.constant dense<0xFF800000> : vector<320xf32>
    %330 = vector.multi_reduction <maximumf>, %329, %cst_364 [0] : vector<32x320xf32> to vector<320xf32>
    %331 = vector.shape_cast %330 : vector<320xf32> to vector<1x320xf32>
    %332 = vector.broadcast %331 : vector<1x320xf32> to vector<32x320xf32>
    %333 = arith.subf %329, %332 : vector<32x320xf32>
    %334 = math.exp %333 : vector<32x320xf32>
    %cst_365 = arith.constant dense<0.000000e+00> : vector<32x320xf32>
    %335 = tpu.matmul %284, %334, %cst_365 {dimension_numbers = #tpu.dot_dimension_numbers<[1], [0], [0], [1], [0, 0, 1, 1], [], []>} : vector<32x32xf32>, vector<32x320xf32>, vector<32x320xf32> -> vector<32x320xf32>
    %336 = tpu.reciprocal %335 {approx = true} : vector<32x320xf32> -> vector<32x320xf32>
    %337 = arith.mulf %334, %336 : vector<32x320xf32>
    %cst_366 = arith.constant dense<0.000000e+00> : vector<32x320xf32>
    %338 = tpu.matmul %324, %337, %cst_366 {dimension_numbers = #tpu.dot_dimension_numbers<[1], [0], [0], [1], [0, 0, 1, 1], [], []>} : vector<32x32xf32>, vector<32x320xf32>, vector<32x320xf32> -> vector<32x320xf32>
    %cst_367 = arith.constant dense<0.000000e+00> : vector<32x320xf32>
    %339 = tpu.matmul %303, %338, %cst_367 {dimension_numbers = #tpu.dot_dimension_numbers<[1], [0], [0], [1], [0, 0, 1, 1], [], []>} : vector<32x32xf32>, vector<32x320xf32>, vector<32x320xf32> -> vector<32x320xf32>
    %340 = vector.broadcast %309 : vector<32x1xf32> to vector<32x320xf32>
    %341 = arith.addf %339, %340 : vector<32x320xf32>
    %342 = vector.broadcast %288 : vector<1x1xf32> to vector<32x320xf32>
    %343 = arith.mulf %341, %342 : vector<32x320xf32>
    %344 = arith.negf %343 : vector<32x320xf32>
    %345 = math.exp %344 : vector<32x320xf32>
    %cst_368 = arith.constant 1.000000e+00 : f32
    %346 = vector.broadcast %cst_368 : f32 to vector<32x320xf32>
    %347 = arith.addf %346, %345 : vector<32x320xf32>
    %348 = arith.divf %346, %347 : vector<32x320xf32>
    %349 = arith.mulf %343, %348 : vector<32x320xf32>
    %350 = arith.addf %283, %349 : vector<32x320xf32>
    %c1_369 = arith.constant 1 : index
    %c0_370 = arith.constant 0 : index
    %c0_371 = arith.constant 0 : index
    %c0_372 = arith.constant 0 : index
    %351 = vector.load %arg10[%c1_369, %c0_370, %c0_371, %c0_372] : memref<3x4x32x32xf32, #tpu.memory_space<vmem>>, vector<1x1x32x32xf32>
    %352 = vector.shape_cast %351 : vector<1x1x32x32xf32> to vector<32x32xf32>
    %c1_373 = arith.constant 1 : index
    %c1_374 = arith.constant 1 : index
    %c0_375 = arith.constant 0 : index
    %c0_376 = arith.constant 0 : index
    %353 = vector.load %arg10[%c1_373, %c1_374, %c0_375, %c0_376] : memref<3x4x32x32xf32, #tpu.memory_space<vmem>>, vector<1x1x32x32xf32>
    %354 = vector.shape_cast %353 : vector<1x1x32x32xf32> to vector<32x32xf32>
    %c1_377 = arith.constant 1 : index
    %c2_378 = arith.constant 2 : index
    %c0_379 = arith.constant 0 : index
    %c0_380 = arith.constant 0 : index
    %355 = vector.load %arg10[%c1_377, %c2_378, %c0_379, %c0_380] : memref<3x4x32x32xf32, #tpu.memory_space<vmem>>, vector<1x1x32x32xf32>
    %356 = vector.shape_cast %355 : vector<1x1x32x32xf32> to vector<32x32xf32>
    %c1_381 = arith.constant 1 : index
    %c3_382 = arith.constant 3 : index
    %c0_383 = arith.constant 0 : index
    %c0_384 = arith.constant 0 : index
    %357 = vector.load %arg10[%c1_381, %c3_382, %c0_383, %c0_384] : memref<3x4x32x32xf32, #tpu.memory_space<vmem>>, vector<1x1x32x32xf32>
    %358 = vector.shape_cast %357 : vector<1x1x32x32xf32> to vector<32x32xf32>
    %c1_385 = arith.constant 1 : index
    %c0_386 = arith.constant 0 : index
    %c0_387 = arith.constant 0 : index
    %c0_388 = arith.constant 0 : index
    %359 = vector.load %arg11[%c1_385, %c0_386, %c0_387, %c0_388] : memref<3x3x32x1xf32, #tpu.memory_space<vmem>>, vector<1x1x32x1xf32>
    %360 = vector.shape_cast %359 : vector<1x1x32x1xf32> to vector<32x1xf32>
    %c1_389 = arith.constant 1 : index
    %c1_390 = arith.constant 1 : index
    %c0_391 = arith.constant 0 : index
    %c0_392 = arith.constant 0 : index
    %361 = vector.load %arg11[%c1_389, %c1_390, %c0_391, %c0_392] : memref<3x3x32x1xf32, #tpu.memory_space<vmem>>, vector<1x1x32x1xf32>
    %362 = vector.shape_cast %361 : vector<1x1x32x1xf32> to vector<32x1xf32>
    %c1_393 = arith.constant 1 : index
    %c2_394 = arith.constant 2 : index
    %c0_395 = arith.constant 0 : index
    %c0_396 = arith.constant 0 : index
    %363 = vector.load %arg11[%c1_393, %c2_394, %c0_395, %c0_396] : memref<3x3x32x1xf32, #tpu.memory_space<vmem>>, vector<1x1x32x1xf32>
    %364 = vector.shape_cast %363 : vector<1x1x32x1xf32> to vector<32x1xf32>
    %c1_397 = arith.constant 1 : index
    %c0_398 = arith.constant 0 : index
    %c0_399 = arith.constant 0 : index
    %365 = vector.load %arg12[%c1_397, %c0_398, %c0_399] : memref<3x1x32xf32, #tpu.memory_space<vmem>>, vector<1x1x32xf32>
    %366 = vector.shape_cast %365 : vector<1x1x32xf32> to vector<1x32xf32>
    %cst_400 = arith.constant dense<0.000000e+00> : vector<32x320xf32>
    %367 = tpu.matmul %352, %350, %cst_400 {dimension_numbers = #tpu.dot_dimension_numbers<[1], [0], [0], [1], [0, 0, 1, 1], [], []>} : vector<32x32xf32>, vector<32x320xf32>, vector<32x320xf32> -> vector<32x320xf32>
    %368 = vector.broadcast %360 : vector<32x1xf32> to vector<32x320xf32>
    %369 = arith.addf %367, %368 : vector<32x320xf32>
    %cst_401 = arith.constant dense<0.000000e+00> : vector<8x32xf32>
    %370 = tpu.matmul %295, %354, %cst_401 {dimension_numbers = #tpu.dot_dimension_numbers<[1], [0], [0], [1], [0, 0, 1, 1], [], []>} : vector<8x32xf32>, vector<32x32xf32>, vector<8x32xf32> -> vector<8x32xf32>
    %371 = vector.broadcast %366 : vector<1x32xf32> to vector<8x32xf32>
    %372 = arith.addf %370, %371 : vector<8x32xf32>
    %cst_402 = arith.constant dense<0.000000e+00> : vector<32x8xf32>
    %373 = tpu.matmul %356, %295, %cst_402 {dimension_numbers = #tpu.dot_dimension_numbers<[1], [1], [0], [0], [0, 0, 1, 0], [], []>} : vector<32x32xf32>, vector<8x32xf32>, vector<32x8xf32> -> vector<32x8xf32>
    %374 = vector.broadcast %362 : vector<32x1xf32> to vector<32x8xf32>
    %375 = arith.addf %373, %374 : vector<32x8xf32>
    %376 = tpu.concatenate %372, %372, %372, %372 in 0 : vector<8x32xf32>, vector<8x32xf32>, vector<8x32xf32>, vector<8x32xf32> -> vector<32x32xf32>
    %377 = arith.mulf %376, %284 : vector<32x32xf32>
    %378 = tpu.concatenate %375, %375, %375, %375 in 1 : vector<32x8xf32>, vector<32x8xf32>, vector<32x8xf32>, vector<32x8xf32> -> vector<32x32xf32>
    %379 = arith.mulf %378, %284 : vector<32x32xf32>
    %cst_403 = arith.constant dense<0.000000e+00> : vector<32x320xf32>
    %380 = tpu.matmul %377, %369, %cst_403 {dimension_numbers = #tpu.dot_dimension_numbers<[1], [0], [0], [1], [0, 0, 1, 1], [], []>} : vector<32x32xf32>, vector<32x320xf32>, vector<32x320xf32> -> vector<32x320xf32>
    %cst_404 = arith.constant 0.353553385 : f32
    %381 = vector.broadcast %cst_404 : f32 to vector<32x320xf32>
    %382 = arith.mulf %380, %381 : vector<32x320xf32>
    %383 = vector.broadcast %286 : vector<32x1xf32> to vector<32x320xf32>
    %384 = arith.addf %382, %383 : vector<32x320xf32>
    %cst_405 = arith.constant dense<0xFF800000> : vector<320xf32>
    %385 = vector.multi_reduction <maximumf>, %384, %cst_405 [0] : vector<32x320xf32> to vector<320xf32>
    %386 = vector.shape_cast %385 : vector<320xf32> to vector<1x320xf32>
    %387 = vector.broadcast %386 : vector<1x320xf32> to vector<32x320xf32>
    %388 = arith.subf %384, %387 : vector<32x320xf32>
    %389 = math.exp %388 : vector<32x320xf32>
    %cst_406 = arith.constant dense<0.000000e+00> : vector<32x320xf32>
    %390 = tpu.matmul %284, %389, %cst_406 {dimension_numbers = #tpu.dot_dimension_numbers<[1], [0], [0], [1], [0, 0, 1, 1], [], []>} : vector<32x32xf32>, vector<32x320xf32>, vector<32x320xf32> -> vector<32x320xf32>
    %391 = tpu.reciprocal %390 {approx = true} : vector<32x320xf32> -> vector<32x320xf32>
    %392 = arith.mulf %389, %391 : vector<32x320xf32>
    %cst_407 = arith.constant dense<0.000000e+00> : vector<32x320xf32>
    %393 = tpu.matmul %379, %392, %cst_407 {dimension_numbers = #tpu.dot_dimension_numbers<[1], [0], [0], [1], [0, 0, 1, 1], [], []>} : vector<32x32xf32>, vector<32x320xf32>, vector<32x320xf32> -> vector<32x320xf32>
    %cst_408 = arith.constant dense<0.000000e+00> : vector<32x320xf32>
    %394 = tpu.matmul %358, %393, %cst_408 {dimension_numbers = #tpu.dot_dimension_numbers<[1], [0], [0], [1], [0, 0, 1, 1], [], []>} : vector<32x32xf32>, vector<32x320xf32>, vector<32x320xf32> -> vector<32x320xf32>
    %395 = vector.broadcast %364 : vector<32x1xf32> to vector<32x320xf32>
    %396 = arith.addf %394, %395 : vector<32x320xf32>
    %397 = vector.broadcast %288 : vector<1x1xf32> to vector<32x320xf32>
    %398 = arith.mulf %396, %397 : vector<32x320xf32>
    %399 = arith.negf %398 : vector<32x320xf32>
    %400 = math.exp %399 : vector<32x320xf32>
    %cst_409 = arith.constant 1.000000e+00 : f32
    %401 = vector.broadcast %cst_409 : f32 to vector<32x320xf32>
    %402 = arith.addf %401, %400 : vector<32x320xf32>
    %403 = arith.divf %401, %402 : vector<32x320xf32>
    %404 = arith.mulf %398, %403 : vector<32x320xf32>
    %405 = arith.addf %350, %404 : vector<32x320xf32>
    %c2_410 = arith.constant 2 : index
    %c0_411 = arith.constant 0 : index
    %c0_412 = arith.constant 0 : index
    %c0_413 = arith.constant 0 : index
    %406 = vector.load %arg10[%c2_410, %c0_411, %c0_412, %c0_413] : memref<3x4x32x32xf32, #tpu.memory_space<vmem>>, vector<1x1x32x32xf32>
    %407 = vector.shape_cast %406 : vector<1x1x32x32xf32> to vector<32x32xf32>
    %c2_414 = arith.constant 2 : index
    %c1_415 = arith.constant 1 : index
    %c0_416 = arith.constant 0 : index
    %c0_417 = arith.constant 0 : index
    %408 = vector.load %arg10[%c2_414, %c1_415, %c0_416, %c0_417] : memref<3x4x32x32xf32, #tpu.memory_space<vmem>>, vector<1x1x32x32xf32>
    %409 = vector.shape_cast %408 : vector<1x1x32x32xf32> to vector<32x32xf32>
    %c2_418 = arith.constant 2 : index
    %c2_419 = arith.constant 2 : index
    %c0_420 = arith.constant 0 : index
    %c0_421 = arith.constant 0 : index
    %410 = vector.load %arg10[%c2_418, %c2_419, %c0_420, %c0_421] : memref<3x4x32x32xf32, #tpu.memory_space<vmem>>, vector<1x1x32x32xf32>
    %411 = vector.shape_cast %410 : vector<1x1x32x32xf32> to vector<32x32xf32>
    %c2_422 = arith.constant 2 : index
    %c3_423 = arith.constant 3 : index
    %c0_424 = arith.constant 0 : index
    %c0_425 = arith.constant 0 : index
    %412 = vector.load %arg10[%c2_422, %c3_423, %c0_424, %c0_425] : memref<3x4x32x32xf32, #tpu.memory_space<vmem>>, vector<1x1x32x32xf32>
    %413 = vector.shape_cast %412 : vector<1x1x32x32xf32> to vector<32x32xf32>
    %c2_426 = arith.constant 2 : index
    %c0_427 = arith.constant 0 : index
    %c0_428 = arith.constant 0 : index
    %c0_429 = arith.constant 0 : index
    %414 = vector.load %arg11[%c2_426, %c0_427, %c0_428, %c0_429] : memref<3x3x32x1xf32, #tpu.memory_space<vmem>>, vector<1x1x32x1xf32>
    %415 = vector.shape_cast %414 : vector<1x1x32x1xf32> to vector<32x1xf32>
    %c2_430 = arith.constant 2 : index
    %c1_431 = arith.constant 1 : index
    %c0_432 = arith.constant 0 : index
    %c0_433 = arith.constant 0 : index
    %416 = vector.load %arg11[%c2_430, %c1_431, %c0_432, %c0_433] : memref<3x3x32x1xf32, #tpu.memory_space<vmem>>, vector<1x1x32x1xf32>
    %417 = vector.shape_cast %416 : vector<1x1x32x1xf32> to vector<32x1xf32>
    %c2_434 = arith.constant 2 : index
    %c2_435 = arith.constant 2 : index
    %c0_436 = arith.constant 0 : index
    %c0_437 = arith.constant 0 : index
    %418 = vector.load %arg11[%c2_434, %c2_435, %c0_436, %c0_437] : memref<3x3x32x1xf32, #tpu.memory_space<vmem>>, vector<1x1x32x1xf32>
    %419 = vector.shape_cast %418 : vector<1x1x32x1xf32> to vector<32x1xf32>
    %c2_438 = arith.constant 2 : index
    %c0_439 = arith.constant 0 : index
    %c0_440 = arith.constant 0 : index
    %420 = vector.load %arg12[%c2_438, %c0_439, %c0_440] : memref<3x1x32xf32, #tpu.memory_space<vmem>>, vector<1x1x32xf32>
    %421 = vector.shape_cast %420 : vector<1x1x32xf32> to vector<1x32xf32>
    %cst_441 = arith.constant dense<0.000000e+00> : vector<32x320xf32>
    %422 = tpu.matmul %407, %405, %cst_441 {dimension_numbers = #tpu.dot_dimension_numbers<[1], [0], [0], [1], [0, 0, 1, 1], [], []>} : vector<32x32xf32>, vector<32x320xf32>, vector<32x320xf32> -> vector<32x320xf32>
    %423 = vector.broadcast %415 : vector<32x1xf32> to vector<32x320xf32>
    %424 = arith.addf %422, %423 : vector<32x320xf32>
    %cst_442 = arith.constant dense<0.000000e+00> : vector<8x32xf32>
    %425 = tpu.matmul %295, %409, %cst_442 {dimension_numbers = #tpu.dot_dimension_numbers<[1], [0], [0], [1], [0, 0, 1, 1], [], []>} : vector<8x32xf32>, vector<32x32xf32>, vector<8x32xf32> -> vector<8x32xf32>
    %426 = vector.broadcast %421 : vector<1x32xf32> to vector<8x32xf32>
    %427 = arith.addf %425, %426 : vector<8x32xf32>
    %cst_443 = arith.constant dense<0.000000e+00> : vector<32x8xf32>
    %428 = tpu.matmul %411, %295, %cst_443 {dimension_numbers = #tpu.dot_dimension_numbers<[1], [1], [0], [0], [0, 0, 1, 0], [], []>} : vector<32x32xf32>, vector<8x32xf32>, vector<32x8xf32> -> vector<32x8xf32>
    %429 = vector.broadcast %417 : vector<32x1xf32> to vector<32x8xf32>
    %430 = arith.addf %428, %429 : vector<32x8xf32>
    %431 = tpu.concatenate %427, %427, %427, %427 in 0 : vector<8x32xf32>, vector<8x32xf32>, vector<8x32xf32>, vector<8x32xf32> -> vector<32x32xf32>
    %432 = arith.mulf %431, %284 : vector<32x32xf32>
    %433 = tpu.concatenate %430, %430, %430, %430 in 1 : vector<32x8xf32>, vector<32x8xf32>, vector<32x8xf32>, vector<32x8xf32> -> vector<32x32xf32>
    %434 = arith.mulf %433, %284 : vector<32x32xf32>
    %cst_444 = arith.constant dense<0.000000e+00> : vector<32x320xf32>
    %435 = tpu.matmul %432, %424, %cst_444 {dimension_numbers = #tpu.dot_dimension_numbers<[1], [0], [0], [1], [0, 0, 1, 1], [], []>} : vector<32x32xf32>, vector<32x320xf32>, vector<32x320xf32> -> vector<32x320xf32>
    %cst_445 = arith.constant 0.353553385 : f32
    %436 = vector.broadcast %cst_445 : f32 to vector<32x320xf32>
    %437 = arith.mulf %435, %436 : vector<32x320xf32>
    %438 = vector.broadcast %286 : vector<32x1xf32> to vector<32x320xf32>
    %439 = arith.addf %437, %438 : vector<32x320xf32>
    %cst_446 = arith.constant dense<0xFF800000> : vector<320xf32>
    %440 = vector.multi_reduction <maximumf>, %439, %cst_446 [0] : vector<32x320xf32> to vector<320xf32>
    %441 = vector.shape_cast %440 : vector<320xf32> to vector<1x320xf32>
    %442 = vector.broadcast %441 : vector<1x320xf32> to vector<32x320xf32>
    %443 = arith.subf %439, %442 : vector<32x320xf32>
    %444 = math.exp %443 : vector<32x320xf32>
    %cst_447 = arith.constant dense<0.000000e+00> : vector<32x320xf32>
    %445 = tpu.matmul %284, %444, %cst_447 {dimension_numbers = #tpu.dot_dimension_numbers<[1], [0], [0], [1], [0, 0, 1, 1], [], []>} : vector<32x32xf32>, vector<32x320xf32>, vector<32x320xf32> -> vector<32x320xf32>
    %446 = tpu.reciprocal %445 {approx = true} : vector<32x320xf32> -> vector<32x320xf32>
    %447 = arith.mulf %444, %446 : vector<32x320xf32>
    %cst_448 = arith.constant dense<0.000000e+00> : vector<32x320xf32>
    %448 = tpu.matmul %434, %447, %cst_448 {dimension_numbers = #tpu.dot_dimension_numbers<[1], [0], [0], [1], [0, 0, 1, 1], [], []>} : vector<32x32xf32>, vector<32x320xf32>, vector<32x320xf32> -> vector<32x320xf32>
    %cst_449 = arith.constant dense<0.000000e+00> : vector<32x320xf32>
    %449 = tpu.matmul %413, %448, %cst_449 {dimension_numbers = #tpu.dot_dimension_numbers<[1], [0], [0], [1], [0, 0, 1, 1], [], []>} : vector<32x32xf32>, vector<32x320xf32>, vector<32x320xf32> -> vector<32x320xf32>
    %450 = vector.broadcast %419 : vector<32x1xf32> to vector<32x320xf32>
    %451 = arith.addf %449, %450 : vector<32x320xf32>
    %452 = vector.broadcast %288 : vector<1x1xf32> to vector<32x320xf32>
    %453 = arith.mulf %451, %452 : vector<32x320xf32>
    %454 = arith.negf %453 : vector<32x320xf32>
    %455 = math.exp %454 : vector<32x320xf32>
    %cst_450 = arith.constant 1.000000e+00 : f32
    %456 = vector.broadcast %cst_450 : f32 to vector<32x320xf32>
    %457 = arith.addf %456, %455 : vector<32x320xf32>
    %458 = arith.divf %456, %457 : vector<32x320xf32>
    %459 = arith.mulf %453, %458 : vector<32x320xf32>
    %460 = arith.addf %405, %459 : vector<32x320xf32>
    %c0_451 = arith.constant 0 : index
    %c0_452 = arith.constant 0 : index
    %c0_453 = arith.constant 0 : index
    %461 = vector.load %arg14[%c0_451, %c0_452, %c0_453] : memref<1x32x320xf32, #tpu.memory_space<vmem>>, vector<1x32x320xf32>
    %462 = vector.shape_cast %461 : vector<1x32x320xf32> to vector<32x320xf32>
    %463 = vector.shape_cast %460 : vector<32x320xf32> to vector<1x32x320xf32>
    tpu.vector_store %arg14[%c0_451, %c0_452, %c0_453], %463 {strides = array<i32>} : memref<1x32x320xf32, #tpu.memory_space<vmem>>, vector<1x32x320xf32>,
    return
  }
  func.func @transform_0(%arg0: i32) -> (i32, i32, i32) {
    %c0_i32 = arith.constant 0 : i32
    %c0_i32_0 = arith.constant 0 : i32
    %c0_i32_1 = arith.constant 0 : i32
    return %arg0, %c0_i32, %c0_i32_0 : i32, i32, i32
  }
  func.func @transform_1(%arg0: i32) -> (i32, i32, i32) {
    %c0_i32 = arith.constant 0 : i32
    %c0_i32_0 = arith.constant 0 : i32
    %c0_i32_1 = arith.constant 0 : i32
    return %arg0, %c0_i32, %c0_i32_0 : i32, i32, i32
  }
  func.func @transform_2(%arg0: i32) -> (i32, i32, i32) {
    %c0_i32 = arith.constant 0 : i32
    %c0_i32_0 = arith.constant 0 : i32
    %c0_i32_1 = arith.constant 0 : i32
    return %arg0, %c0_i32, %c0_i32_0 : i32, i32, i32
  }
  func.func @transform_3(%arg0: i32) -> (i32, i32, i32) {
    %c0_i32 = arith.constant 0 : i32
    %c0_i32_0 = arith.constant 0 : i32
    %c0_i32_1 = arith.constant 0 : i32
    return %arg0, %c0_i32, %c0_i32_0 : i32, i32, i32
  }
  func.func @transform_4(%arg0: i32) -> (i32, i32, i32, i32) {
    %c0_i32 = arith.constant 0 : i32
    %c0_i32_0 = arith.constant 0 : i32
    %c0_i32_1 = arith.constant 0 : i32
    %c0_i32_2 = arith.constant 0 : i32
    %c0_i32_3 = arith.constant 0 : i32
    return %c0_i32, %c0_i32_0, %c0_i32_1, %c0_i32_2 : i32, i32, i32, i32
  }
  func.func @transform_5(%arg0: i32) -> (i32, i32, i32) {
    %c0_i32 = arith.constant 0 : i32
    %c0_i32_0 = arith.constant 0 : i32
    %c0_i32_1 = arith.constant 0 : i32
    %c0_i32_2 = arith.constant 0 : i32
    return %c0_i32, %c0_i32_0, %c0_i32_1 : i32, i32, i32
  }
  func.func @transform_6(%arg0: i32) -> (i32, i32) {
    %c0_i32 = arith.constant 0 : i32
    %c0_i32_0 = arith.constant 0 : i32
    %c0_i32_1 = arith.constant 0 : i32
    return %c0_i32, %c0_i32_0 : i32, i32
  }
  func.func @transform_7(%arg0: i32) -> (i32, i32) {
    %c0_i32 = arith.constant 0 : i32
    %c0_i32_0 = arith.constant 0 : i32
    %c0_i32_1 = arith.constant 0 : i32
    return %c0_i32, %c0_i32_0 : i32, i32
  }
  func.func @transform_8(%arg0: i32) -> (i32, i32) {
    %c0_i32 = arith.constant 0 : i32
    %c0_i32_0 = arith.constant 0 : i32
    %c0_i32_1 = arith.constant 0 : i32
    return %c0_i32, %c0_i32_0 : i32, i32
  }
  func.func @transform_9(%arg0: i32) -> (i32, i32, i32, i32) {
    %c0_i32 = arith.constant 0 : i32
    %c0_i32_0 = arith.constant 0 : i32
    %c0_i32_1 = arith.constant 0 : i32
    %c0_i32_2 = arith.constant 0 : i32
    %c0_i32_3 = arith.constant 0 : i32
    return %c0_i32, %c0_i32_0, %c0_i32_1, %c0_i32_2 : i32, i32, i32, i32
  }
  func.func @transform_10(%arg0: i32) -> (i32, i32, i32, i32) {
    %c0_i32 = arith.constant 0 : i32
    %c0_i32_0 = arith.constant 0 : i32
    %c0_i32_1 = arith.constant 0 : i32
    %c0_i32_2 = arith.constant 0 : i32
    %c0_i32_3 = arith.constant 0 : i32
    return %c0_i32, %c0_i32_0, %c0_i32_1, %c0_i32_2 : i32, i32, i32, i32
  }
  func.func @transform_11(%arg0: i32) -> (i32, i32, i32) {
    %c0_i32 = arith.constant 0 : i32
    %c0_i32_0 = arith.constant 0 : i32
    %c0_i32_1 = arith.constant 0 : i32
    %c0_i32_2 = arith.constant 0 : i32
    return %c0_i32, %c0_i32_0, %c0_i32_1 : i32, i32, i32
  }
  func.func @transform_12(%arg0: i32) -> (i32, i32) {
    %c0_i32 = arith.constant 0 : i32
    %c0_i32_0 = arith.constant 0 : i32
    %c0_i32_1 = arith.constant 0 : i32
    return %c0_i32, %c0_i32_0 : i32, i32
  }
  func.func @transform_13(%arg0: i32) -> (i32, i32, i32) {
    %c0_i32 = arith.constant 0 : i32
    %c0_i32_0 = arith.constant 0 : i32
    %c0_i32_1 = arith.constant 0 : i32
    return %arg0, %c0_i32, %c0_i32_0 : i32, i32, i32
  }
}

</mosaic_0001>

<bundles_post_ra>
// kernel: _lambda_.1
= control target key start
LH: loop header
LB: loop body
LE: loop exit
PB: predicated region body
PF: predicated region fallthrough
CT: control target
= control target key end

     0   :  { %s19239_s25 = smov 0   ;;  %s25618_s0 = inlined_call_operand.vmem [shape: f32[2,32,400], index: 0, kind: input, shape index: {}]   ;;  %s25619_s1 = inlined_call_operand.vmem [shape: f32[2,8,6], index: 1, kind: input, shape index: {}]   ;;  %s25620_s2 = inlined_call_operand.vmem [shape: f32[2,32,1], index: 2, kind: input, shape index: {}]   ;;  %s25621_s3 = inlined_call_operand.vmem [shape: f32[2,1,1], index: 3, kind: input, shape index: {}]   ;;  %s25622_s4 = inlined_call_operand.vmem [shape: f32[3,25,32,32], index: 4, kind: input, shape index: {}]   ;;  %s25623_s5 = inlined_call_operand.vmem [shape: f32[3,32,1], index: 5, kind: input, shape index: {}]   ;;  %s25624_s6 = inlined_call_operand.vmem [shape: f32[1,400], index: 6, kind: input, shape index: {}]   ;;  %s25625_s7 = inlined_call_operand.vmem [shape: f32[6,32], index: 7, kind: input, shape index: {}]   ;;  %s25626_s8 = inlined_call_operand.vmem [shape: f32[1,32], index: 8, kind: input, shape index: {}]   ;;  %s25627_s9 = inlined_call_operand.vmem [shape: f32[3,4,32,32], index: 9, kind: input, shape index: {}]   ;;  %s25628_s10 = inlined_call_operand.vmem [shape: f32[3,3,32,1], index: 10, kind: input, shape index: {}]   ;;  %s25629_s11 = inlined_call_operand.vmem [shape: f32[3,1,32], index: 11, kind: input, shape index: {}]   ;;  %s25630_s12 = inlined_call_operand.vmem [shape: f32[32,32], index: 12, kind: input, shape index: {}]   ;;  %s25631_s13 = inlined_call_operand.vmem [shape: f32[2,32,320], index: 13, kind: output, shape index: {}]  }
   0x1 LB: > { %s16420_s26 = sadd.s32 4294967295, %s19136_s25   ;;  %p16424_p0 = scmp.ge.s32.totalorder %s19136_s25, 1  ;;  %s19136_s25 = sphi %s19239_s25, %s23_s25  }
   0x2   : > { %p414_p1 = scmp.lt.s32.totalorder %s19136_s25, 3 }
   0x4   : > { %p415_p2 = pnand %p16424_p0, %p414_p1 }
   0x6   : > { %418 = sbr.rel (%p415_p2) target bundleno = 5937 (0x1731), region = 72 }
   0xb   : > { %p470_p3 = scmp.lt.s32.totalorder %s16420_s26, 1  ;;  %s19138_s14 = smov 127   ;;  %v19294_v8 = vld [vmem:[%s25622_s4 + $0x20] sm:$0xff]  ;;  %vm571_vm0 = vcmask 261120   ;;  %v19139_v9 = vmov 0.0   ;;  %vm550_vm1 = vcmask 1039360  }
   0xc   : > { %648 = vmatprep.mubr.f32.mxu0 %v19139_v9  ;;  %6860 = vst [vmem:[#allocation2] sm:$0xff] %v19139_v9  ;;  %6862 = vst [vmem:[#allocation2 + $0x10] sm:$0xff] %v19139_v9  ;;  %17754 = vmatprep.mubr.msk.f32.mxu1 %vm571_vm0, %v19294_v8  ;;  %s19140_s17 = smov 126   ;;  %s19141_s18 = smov 125   ;;  %v16432_v34 = vld [vmem:[%s25622_s4 + $0x28] sm:$0xff]  ;;  %v16433_v37 = vld [vmem:[%s25622_s4 + $0x30] sm:$0xff] }
   0xd   : > { %s25936_s26 = smov (!%p470_p3, %s16420_s26), 1  ;;  %6865 = vst [vmem:[#allocation2 + $0x20] sm:$0xff] %v19139_v9  ;;  %6867 = vst [vmem:[#allocation2 + $0x30] sm:$0xff] %v19139_v9  ;;  %s19142_s19 = smov 124   ;;  %v16434_v40 = vld [vmem:[%s25622_s4 + $0x38] sm:$0xff]  ;;  %vm973_vm2 = vcmask 1031168  }
   0xe   : > { %s17248_s27 = sshll.u32 %s25936_s26, 7  ;;  %6869 = vst [vmem:[#allocation2 + $0x40] sm:$0xff] %v19139_v9  ;;  %6871 = vst [vmem:[#allocation2 + $0x50] sm:$0xff] %v19139_v9  ;;  %s19143_s20 = smov 108   ;;  %v493_v45 = vld [vmem:[%s25622_s4] sm:$0xff]  ;;  %v494_v49 = vld [vmem:[%s25622_s4 + $0x8] sm:$0xff] }
   0xf   : > { %s19253_s30 = scalar_lea.vmem %s25618_s0, %s17248_s27  ;;  %6873 = vst [vmem:[#allocation2 + $0x60] sm:$0xff] %v19139_v9  ;;  %6875 = vst [vmem:[#allocation2 + $0x70] sm:$0xff] %v19139_v9  ;;  %s19144_s21 = smov 107   ;;  %v495_v54 = vld [vmem:[%s25622_s4 + $0x10] sm:$0xff]  ;;  %v496_v60 = vld [vmem:[%s25622_s4 + $0x18] sm:$0xff]  ;;  %vm1221_vm3 = vcmask 1022976  }
  0x10   : > { %v19256_v0 = vld [vmem:[%s19253_s30 + $0x68] sm:$0xff]  ;;  %v19259_v1 = vld [vmem:[%s19253_s30 + $0x60] sm:$0xff]  ;;  %v19266_v2 = vld [vmem:[%s19253_s30 + $0x70] sm:$0xff]  ;;  %9328 = vst [vmem:[#allocation3] sm:$0xff] %v19139_v9  ;;  %s19146_s28 = smov 105   ;;  %vm1469_vm4 = vcmask 1014784  }
  0x11   : > { %546 = vrot.lane.b32.xlu0 %v19256_v0, %s19138_s14  ;;  %544 = vrot.lane.b32.xlu1 %v19259_v1, %s19138_s14  ;;  %v19269_v3 = vld [vmem:[%s19253_s30 + $0x48] sm:$0xff]  ;;  %v19276_v4 = vld [vmem:[%s19253_s30 + $0x50] sm:$0xff]  ;;  %9330 = vst [vmem:[#allocation3 + $0x10] sm:$0xff] %v19139_v9  ;;  %9332 = vst [vmem:[#allocation3 + $0x20] sm:$0xff] %v19139_v9  ;;  %s19147_s15 = smov 104   ;;  %vm1717_vm5 = vcmask 883712  }
  0x12   : > { %v19279_v5 = vld [vmem:[%s19253_s30 + $0x40] sm:$0xff]  ;;  %v19286_v6 = vld [vmem:[%s19253_s30 + $0x30] sm:$0xff]  ;;  %v19289_v7 = vld [vmem:[%s19253_s30 + $0x28] sm:$0xff]  ;;  %9334 = vst [vmem:[#allocation3 + $0x30] sm:$0xff] %v19139_v9  ;;  %s19148_s16 = smov 88   ;;  %vm1965_vm6 = vcmask 875520  }
  0x13   : > { %9336 = vst [vmem:[#allocation3 + $0x40] sm:$0xff] %v19139_v9  ;;  %9338 = vst [vmem:[#allocation3 + $0x50] sm:$0xff] %v19139_v9  ;;  %v19320_v10 = vld [vmem:[%s19253_s30 + $0x20] sm:$0xff]  ;;  %v19323_v11 = vld [vmem:[%s19253_s30 + $0x8] sm:$0xff]  ;;  %s19149_s27 = smov 87   ;;  %vm2213_vm7 = vcmask 867328  }
  0x14   : > { %9340 = vst [vmem:[#allocation3 + $0x60] sm:$0xff] %v19139_v9  ;;  %9342 = vst [vmem:[#allocation3 + $0x70] sm:$0xff] %v19139_v9  ;;  %v19330_v12 = vld [vmem:[%s19253_s30 + $0x10] sm:$0xff]  ;;  %v19333_v13 = vld [vmem:[%s19253_s30] sm:$0xff]  ;;  %s19150_s23 = smov 86   ;;  %vm2461_vm8 = vcmask 859136  }
  0x15   : > { %548 = vrot.lane.b32.xlu0 %v19266_v2, %s19138_s14  ;;  %540 = vrot.lane.b32.xlu1 %v19269_v3, %s19138_s14  ;;  %s19151_s22 = smov 85   ;;  %vm2709_vm9 = vcmask 850944   ;;  %vm2957_vm10 = vcmask 719872   ;;  %vm3205_vm11 = vcmask 711680   ;;  %s19154_s29 = smov 67   ;;  %vm3453_vm12 = vcmask 703488  }
  0x16   : > { %vm3701_vm13 = vcmask 695296   ;;  %vm3949_vm14 = vcmask 687104   ;;  %vm4197_vm15 = vcmask 556032   ;;  %s19158_s24 = smov 48  }
  0x19   : > { %542 = vrot.lane.b32.xlu0 %v19276_v4, %s19138_s14  ;;  %538 = vrot.lane.b32.xlu1 %v19279_v5, %s19138_s14 }
  0x1d   : > { %536 = vrot.lane.b32.xlu1 %v19286_v6, %s19138_s14  ;;  %534 = vrot.lane.b32.xlu0 %v19289_v7, %s19138_s14 }
  0x21   : > { %532 = vrot.lane.b32.xlu0 %v19320_v10, %s19138_s14  ;;  %528 = vrot.lane.b32.xlu1 %v19323_v11, %s19138_s14 }
  0x25   : > { %530 = vrot.lane.b32.xlu0 %v19330_v12, %s19138_s14  ;;  %526 = vrot.lane.b32.xlu1 %v19333_v13, %s19138_s14  ;;  %s19145_s14 = smov 106  }
  0x29   : > { %969 = vrot.lane.b32.xlu0 %v19256_v0, %s19140_s17  ;;  %971 = vrot.lane.b32.xlu1 %v19266_v2, %s19140_s17 }
  0x2d   : > { %967 = vrot.lane.b32.xlu0 %v19259_v1, %s19140_s17  ;;  %963 = vrot.lane.b32.xlu1 %v19269_v3, %s19140_s17 }
  0x31   : > { %965 = vrot.lane.b32.xlu0 %v19276_v4, %s19140_s17  ;;  %961 = vrot.lane.b32.xlu1 %v19279_v5, %s19140_s17 }
  0x35   : > { %957 = vrot.lane.b32.xlu0 %v19289_v7, %s19140_s17  ;;  %959 = vrot.lane.b32.xlu1 %v19286_v6, %s19140_s17 }
  0x39   : > { %955 = vrot.lane.b32.xlu0 %v19320_v10, %s19140_s17  ;;  %951 = vrot.lane.b32.xlu1 %v19323_v11, %s19140_s17 }
  0x3d   : > { %953 = vrot.lane.b32.xlu0 %v19330_v12, %s19140_s17  ;;  %949 = vrot.lane.b32.xlu1 %v19333_v13, %s19140_s17  ;;  %s19162_s17 = smov 44  }
  0x41   : > { %1219 = vrot.lane.b32.xlu0 %v19266_v2, %s19141_s18  ;;  %1217 = vrot.lane.b32.xlu1 %v19256_v0, %s19141_s18 }
  0x45   : > { %1213 = vrot.lane.b32.xlu0 %v19276_v4, %s19141_s18  ;;  %1215 = vrot.lane.b32.xlu1 %v19259_v1, %s19141_s18 }
  0x49   : > { %1211 = vrot.lane.b32.xlu0 %v19269_v3, %s19141_s18  ;;  %1207 = vrot.lane.b32.xlu1 %v19286_v6, %s19141_s18 }
  0x4d   : > { %1209 = vrot.lane.b32.xlu0 %v19279_v5, %s19141_s18  ;;  %1205 = vrot.lane.b32.xlu1 %v19289_v7, %s19141_s18 }
  0x51   : > { %1201 = vrot.lane.b32.xlu0 %v19330_v12, %s19141_s18  ;;  %1203 = vrot.lane.b32.xlu1 %v19320_v10, %s19141_s18 }
  0x55   : > { %1199 = vrot.lane.b32.xlu0 %v19323_v11, %s19141_s18  ;;  %1465 = vrot.lane.b32.xlu1 %v19256_v0, %s19142_s19 }
  0x59   : > { %1467 = vrot.lane.b32.xlu0 %v19266_v2, %s19142_s19  ;;  %1197 = vrot.lane.b32.xlu1 %v19333_v13, %s19141_s18  ;;  %s25632_s18 = smov 66  }
  0x5d   : > { %1463 = vrot.lane.b32.xlu0 %v19259_v1, %s19142_s19  ;;  %1459 = vrot.lane.b32.xlu1 %v19269_v3, %s19142_s19 }
  0x61   : > { %1461 = vrot.lane.b32.xlu0 %v19276_v4, %s19142_s19  ;;  %1457 = vrot.lane.b32.xlu1 %v19279_v5, %s19142_s19 }
  0x65   : > { %1453 = vrot.lane.b32.xlu0 %v19289_v7, %s19142_s19  ;;  %1455 = vrot.lane.b32.xlu1 %v19286_v6, %s19142_s19 }
  0x69   : > { %1451 = vrot.lane.b32.xlu0 %v19320_v10, %s19142_s19  ;;  %1447 = vrot.lane.b32.xlu1 %v19323_v11, %s19142_s19 }
  0x6d   : > { %1449 = vrot.lane.b32.xlu0 %v19330_v12, %s19142_s19  ;;  %1445 = vrot.lane.b32.xlu1 %v19333_v13, %s19142_s19  ;;  %s19156_s19 = smov 65  }
  0x71   : > { %1715 = vrot.lane.b32.xlu0 %v19266_v2, %s19143_s20  ;;  %1713 = vrot.lane.b32.xlu1 %v19256_v0, %s19143_s20 }
  0x75   : > { %1709 = vrot.lane.b32.xlu0 %v19276_v4, %s19143_s20  ;;  %1711 = vrot.lane.b32.xlu1 %v19259_v1, %s19143_s20 }
  0x79   : > { %1707 = vrot.lane.b32.xlu0 %v19269_v3, %s19143_s20  ;;  %1703 = vrot.lane.b32.xlu1 %v19286_v6, %s19143_s20 }
  0x7d   : > { %1705 = vrot.lane.b32.xlu0 %v19279_v5, %s19143_s20  ;;  %1701 = vrot.lane.b32.xlu1 %v19289_v7, %s19143_s20 }
  0x81   : > { %1697 = vrot.lane.b32.xlu0 %v19330_v12, %s19143_s20  ;;  %1699 = vrot.lane.b32.xlu1 %v19320_v10, %s19143_s20 }
  0x83   : > { %v547_v14 = vpop.permute.xlu0 %546  ;;  %v545_v15 = vpop.permute.xlu1 %544 }
  0x84   : > { %v557_v19 = vsel %vm550_vm1, %v545_v15, %v547_v14 }
  0x85   : > { %1695 = vrot.lane.b32.xlu0 %v19323_v11, %s19143_s20  ;;  %1961 = vrot.lane.b32.xlu1 %v19256_v0, %s19144_s21 }
  0x87   : > { %v549_v16 = vpop.permute.xlu0 %548  ;;  %v541_v17 = vpop.permute.xlu1 %540 }
  0x88   : > { %17746 = vmatprep.subr.mxu1 %v549_v16  ;;  %v558_v18 = vsel %vm550_vm1, %v547_v14, %v549_v16  ;;  %v16451_v14 = vld [vmem:[%s25622_s4 + $0x40] sm:$0xff] }
  0x89   : > { %608 = vmatprep.subr.mxu0 %v558_v18  ;;  %17747 = vmatpush3.msra.mxu1 %v549_v16  ;;  %v16452_v18 = vld [vmem:[%s25622_s4 + $0x48] sm:$0xff] }
  0x8a   : > { %1963 = vrot.lane.b32.xlu0 %v19266_v2, %s19144_s21  ;;  %1693 = vrot.lane.b32.xlu1 %v19333_v13, %s19143_s20  ;;  %s19152_s20 = smov 84  }
  0x8b   : > { %609 = vmatpush1.msra.mxu0 %v557_v19  ;;  %v543_v20 = vpop.permute.xlu0 %542  ;;  %v539_v21 = vpop.permute.xlu1 %538 }
  0x8c   : > { %17748 = vmatprep.subr.mxu1 %v543_v20  ;;  %v556_v22 = vsel %vm550_vm1, %v541_v17, %v543_v20  ;;  %v555_v23 = vsel %vm550_vm1, %v539_v21, %v541_v17 }
  0x8d   : > { %610 = vmatprep.subr.mxu0 %v556_v22  ;;  %17749 = vmatpush3.msra.mxu1 %v543_v20 }
  0x8e   : > { %1959 = vrot.lane.b32.xlu0 %v19259_v1, %s19144_s21  ;;  %1955 = vrot.lane.b32.xlu1 %v19269_v3, %s19144_s21 }
  0x8f   : > { %611 = vmatpush1.msra.mxu0 %v555_v23  ;;  %v537_v24 = vpop.permute.xlu1 %536  ;;  %v535_v25 = vpop.permute.xlu0 %534 }
  0x90   : > { %v554_v26 = vsel %vm550_vm1, %v535_v25, %v537_v24  ;;  %17750 = vmatprep.subr.mxu1 %v537_v24 }
  0x91   : > { %612 = vmatprep.subr.mxu0 %v554_v26  ;;  %17751 = vmatpush3.msra.mxu1 %v537_v24 }
  0x92   : > { %1957 = vrot.lane.b32.xlu0 %v19276_v4, %s19144_s21  ;;  %1953 = vrot.lane.b32.xlu1 %v19279_v5, %s19144_s21 }
  0x93   : > { %v533_v27 = vpop.permute.xlu0 %532  ;;  %v529_v28 = vpop.permute.xlu1 %528 }
  0x94   : > { %v553_v29 = vsel %vm550_vm1, %v533_v27, %v535_v25 }
  0x95   : > { %613 = vmatpush1.msra.mxu0 %v553_v29 }
  0x96   : > { %1949 = vrot.lane.b32.xlu0 %v19289_v7, %s19144_s21  ;;  %1951 = vrot.lane.b32.xlu1 %v19286_v6, %s19144_s21 }
  0x97   : > { %v531_v30 = vpop.permute.xlu0 %530  ;;  %v527_v31 = vpop.permute.xlu1 %526 }
  0x98   : > { %17752 = vmatprep.subr.mxu1 %v531_v30  ;;  %v552_v32 = vsel %vm550_vm1, %v529_v28, %v531_v30  ;;  %v551_v33 = vsel %vm550_vm1, %v527_v31, %v529_v28  ;;  %vm4445_vm1 = vcmask 547840  }
  0x99   : > { %17753 = vmatpush3.msra.mxu1 %v531_v30  ;;  %614 = vmatprep.subr.mxu0 %v552_v32  ;;  %v16453_v30 = vld [vmem:[%s25622_s4 + $0x50] sm:$0xff]  ;;  %v16454_v32 = vld [vmem:[%s25622_s4 + $0x58] sm:$0xff] }
  0x9a   : > { %1947 = vrot.lane.b32.xlu0 %v19320_v10, %s19144_s21  ;;  %1943 = vrot.lane.b32.xlu1 %v19323_v11, %s19144_s21 }
  0x9b   : > { %615 = vmatpush1.msra.mxu0 %v551_v33  ;;  %794 = vmatprep.subr.mxu1 %v19256_v0  ;;  %v19419_v35 = vpop.permute.xlu0 %969  ;;  %v972_v36 = vpop.permute.xlu1 %971 }
  0x9c   : > { %17755 = vmatmul.mubr.msk.f32.vlgmr.msra.gmra.mxu1 %vm571_vm0, %v16432_v34  ;;  %16435 = vmatmul.mubr.msk.f32.vlgmr.msra.gmra.mxu0 %vm571_vm0, %v19294_v8  ;;  %v981_v46 = vsel %vm973_vm2, %v19419_v35, %v972_v36 }
  0x9d   : > { %795 = vmatpush1.msra.mxu1 %v19259_v1  ;;  %17760 = vmatprep.subr.mxu0 %v19266_v2 }
  0x9e   : > { %796 = vmatprep.subr.mxu1 %v19269_v3  ;;  %17761 = vmatpush3.msra.mxu0 %v19266_v2 }
  0x9f   : > { %797 = vmatpush1.msra.mxu1 %v19279_v5  ;;  %1945 = vrot.lane.b32.xlu0 %v19330_v12, %s19144_s21  ;;  %v968_v38 = vpop.permute.xlu0 %967  ;;  %v964_v39 = vpop.permute.xlu1 %963 }
  0xa0   : > { %1941 = vrot.lane.b32.xlu1 %v19333_v13, %s19144_s21  ;;  %17762 = vmatprep.subr.mxu0 %v19276_v4  ;;  %v980_v52 = vsel %vm973_vm2, %v968_v38, %v19419_v35 }
  0xa1   : > { %654 = vmatprep.mubr.f32.mxu0 %v19139_v9  ;;  %17757 = vmatprep.mubr.msk.f32.mxu1 %vm571_vm0, %v16433_v37 }
  0xa2   : > { %798 = vmatprep.subr.mxu1 %v19289_v7  ;;  %17763 = vmatpush3.msra.mxu0 %v19276_v4 }
  0xa3   : > { %17758 = vmatmul.mubr.msk.f32.gmra.mxu1 %vm571_vm0, %v16434_v40  ;;  %16436 = vmatmul.mubr.msk.f32.gmra.mxu0 %vm571_vm0, %v16432_v34  ;;  %v966_v41 = vpop.permute.xlu0 %965  ;;  %v962_v42 = vpop.permute.xlu1 %961 }
  0xa4   : > { %799 = vmatpush1.msra.mxu1 %v19320_v10  ;;  %17764 = vmatprep.subr.mxu0 %v19286_v6  ;;  %v979_v53 = vsel %vm973_vm2, %v964_v39, %v966_v41  ;;  %v978_v57 = vsel %vm973_vm2, %v962_v42, %v964_v39  ;;  %v16463_v39 = vld [vmem:[%s25622_s4 + $0x60] sm:$0xff] }
  0xa5   : > { %800 = vmatprep.subr.mxu1 %v19323_v11  ;;  %17765 = vmatpush3.msra.mxu0 %v19286_v6 }
  0xa6   : > { %2211 = vrot.lane.b32.xlu0 %v19266_v2, %s19145_s14  ;;  %2209 = vrot.lane.b32.xlu1 %v19256_v0, %s19145_s14 }
  0xa7   : > { %801 = vmatpush1.msra.mxu1 %v19333_v13  ;;  %17766 = vmatprep.subr.mxu0 %v19330_v12  ;;  %v958_v43 = vpop.permute.xlu0 %957  ;;  %v960_v44 = vpop.permute.xlu1 %959 }
  0xa8   : > { %660 = vmatprep.mubr.f32.mxu0 %v19139_v9  ;;  %834 = vmatprep.mubr.f32.mxu1 %v19139_v9  ;;  %v977_v58 = vsel %vm973_vm2, %v958_v43, %v960_v44 }
  0xa9   : > { %17767 = vmatpush3.msra.mxu0 %v19330_v12  ;;  %17774 = vmatprep.subr.mxu1 %v972_v36 }
  0xaa   : > { %16437 = vmatmul.mubr.msk.f32.gmra.mxu0 %vm571_vm0, %v16433_v37  ;;  %1030 = vmatprep.subr.mxu0 %v981_v46 }
  0xab   : > { %16443 = vmatmul.mubr.msk.f32.vlgmr.msra.gmra.mxu1 %vm571_vm0, %v493_v45  ;;  %2205 = vrot.lane.b32.xlu0 %v19276_v4, %s19145_s14  ;;  %v956_v47 = vpop.permute.xlu0 %955  ;;  %v952_v48 = vpop.permute.xlu1 %951 }
  0xac   : > { %17775 = vmatpush3.msra.mxu1 %v972_v36  ;;  %2207 = vrot.lane.b32.xlu1 %v19259_v1, %s19145_s14  ;;  %v976_v59 = vsel %vm973_vm2, %v956_v47, %v958_v43 }
  0xad   : > { %17776 = vmatprep.subr.mxu1 %v966_v41  ;;  %666 = vmatprep.mubr.f32.mxu0 %v19139_v9 }
  0xae   : > { %17777 = vmatpush3.msra.mxu1 %v966_v41  ;;  %16438 = vmatmul.mubr.msk.f32.gmra.mxu0 %vm571_vm0, %v16434_v40  ;;  %v16464_v40 = vld [vmem:[%s25622_s4 + $0x68] sm:$0xff] }
  0xaf   : > { %2203 = vrot.lane.b32.xlu0 %v19269_v3, %s19145_s14  ;;  %17778 = vmatprep.subr.mxu1 %v960_v44  ;;  %v954_v50 = vpop.permute.xlu0 %953  ;;  %v950_v51 = vpop.permute.xlu1 %949 }
  0xb0   : > { %2199 = vrot.lane.b32.xlu1 %v19286_v6, %s19145_s14  ;;  %17768 = vmatprep.mubr.msk.f32.mxu0 %vm571_vm0, %v493_v45  ;;  %v975_v61 = vsel %vm973_vm2, %v952_v48, %v954_v50  ;;  %v974_v8 = vsel %vm973_vm2, %v950_v51, %v952_v48  ;;  %vm4693_vm2 = vcmask 539648  }
  0xb1   : > { %17779 = vmatpush3.msra.mxu1 %v960_v44  ;;  %840 = vmatprep.mubr.f32.mxu1 %v19139_v9 }
  0xb2   : > { %17769 = vmatmul.mubr.msk.f32.vlgmr.msra.gmra.mxu0 %vm571_vm0, %v494_v49  ;;  %16444 = vmatmul.mubr.msk.f32.gmra.mxu1 %vm571_vm0, %v494_v49  ;;  %v16465_v49 = vld [vmem:[%s25622_s4 + $0x70] sm:$0xff] }
  0xb3   : > { %1031 = vmatpush1.msra.mxu0 %v980_v52  ;;  %2201 = vrot.lane.b32.xlu0 %v19279_v5, %s19145_s14  ;;  %v1220_v55 = vpop.permute.xlu0 %1219  ;;  %v1218_v56 = vpop.permute.xlu1 %1217 }
  0xb4   : > { %1032 = vmatprep.subr.mxu0 %v979_v53  ;;  %2197 = vrot.lane.b32.xlu1 %v19289_v7, %s19145_s14  ;;  %v1229_v17 = vsel %vm1221_vm3, %v1218_v56, %v1220_v55 }
  0xb5   : > { %1033 = vmatpush1.msra.mxu0 %v978_v57  ;;  %846 = vmatprep.mubr.f32.mxu1 %v19139_v9 }
  0xb6   : > { %1034 = vmatprep.subr.mxu0 %v977_v58  ;;  %17771 = vmatprep.mubr.msk.f32.mxu0 %vm571_vm0, %v495_v54  ;;  %v16475_v58 = vld [vmem:[%s25622_s4 + $0x80] sm:$0xff] }
  0xb7   : > { %1035 = vmatpush1.msra.mxu0 %v976_v59  ;;  %17780 = vmatprep.subr.mxu1 %v954_v50  ;;  %v1214_v62 = vpop.permute.xlu0 %1213  ;;  %v1216_v63 = vpop.permute.xlu1 %1215 }
  0xb8   : > { %2193 = vrot.lane.b32.xlu0 %v19330_v12, %s19145_s14  ;;  %2195 = vrot.lane.b32.xlu1 %v19320_v10, %s19145_s14  ;;  %v1228_v21 = vsel %vm1221_vm3, %v1216_v63, %v1218_v56 }
  0xb9   : > { %16445 = vmatmul.mubr.msk.f32.gmra.mxu1 %vm571_vm0, %v495_v54  ;;  %17772 = vmatmul.mubr.msk.f32.gmra.mxu0 %vm571_vm0, %v496_v60 }
  0xba   : > { %1036 = vmatprep.subr.mxu0 %v975_v61  ;;  %17781 = vmatpush3.msra.mxu1 %v954_v50  ;;  %v16466_v50 = vld [vmem:[%s25622_s4 + $0x78] sm:$0xff] }
  0xbb   : > { %1037 = vmatpush1.msra.mxu0 %v974_v8  ;;  %852 = vmatprep.mubr.f32.mxu1 %v19139_v9  ;;  %v1212_v15 = vpop.permute.xlu0 %1211  ;;  %v1208_v16 = vpop.permute.xlu1 %1207 }
  0xbc   : > { %1070 = vmatprep.mubr.f32.mxu0 %v19139_v9  ;;  %17788 = vmatprep.subr.mxu0 %v1220_v55  ;;  %v1227_v22 = vsel %vm1221_vm3, %v1212_v15, %v1214_v62 }
  0xbd   : > { %2191 = vrot.lane.b32.xlu0 %v19323_v11, %s19145_s14  ;;  %2457 = vrot.lane.b32.xlu1 %v19256_v0, %s19146_s28 }
  0xbe   : > { %16446 = vmatmul.mubr.msk.f32.gmra.mxu1 %vm571_vm0, %v496_v60  ;;  %16455 = vmatmul.mubr.msk.f32.vlgmr.msra.gmra.mxu0 %vm571_vm0, %v16451_v14 }
  0xbf   : > { %1278 = vmatprep.subr.mxu1 %v1229_v17  ;;  %17789 = vmatpush3.msra.mxu0 %v1220_v55  ;;  %v1210_v19 = vpop.permute.xlu0 %1209  ;;  %v1206_v20 = vpop.permute.xlu1 %1205 }
  0xc0   : > { %17782 = vmatprep.mubr.msk.f32.mxu1 %vm571_vm0, %v16451_v14  ;;  %17790 = vmatprep.subr.mxu0 %v1214_v62  ;;  %v1226_v23 = vsel %vm1221_vm3, %v1210_v19, %v1212_v15  ;;  %v1225_v26 = vsel %vm1221_vm3, %v1206_v20, %v1208_v16  ;;  %v16477_v15 = vld [vmem:[%s25622_s4 + $0x90] sm:$0xff]  ;;  %v16478_v19 = vld [vmem:[%s25622_s4 + $0x98] sm:$0xff] }
  0xc1   : > { %2459 = vrot.lane.b32.xlu0 %v19266_v2, %s19146_s28  ;;  %2189 = vrot.lane.b32.xlu1 %v19333_v13, %s19145_s14 }
  0xc2   : > { %17783 = vmatmul.mubr.msk.f32.vlgmr.msra.gmra.mxu1 %vm571_vm0, %v16452_v18  ;;  %17791 = vmatpush3.msra.mxu0 %v1214_v62  ;;  %v16476_v62 = vld [vmem:[%s25622_s4 + $0x88] sm:$0xff] }
  0xc3   : > { %1279 = vmatpush1.msra.mxu1 %v1228_v21  ;;  %17792 = vmatprep.subr.mxu0 %v1208_v16  ;;  %v1202_v24 = vpop.permute.xlu0 %1201  ;;  %v1204_v25 = vpop.permute.xlu1 %1203 }
  0xc4   : > { %1280 = vmatprep.subr.mxu1 %v1227_v22  ;;  %17793 = vmatpush3.msra.mxu0 %v1208_v16  ;;  %v1224_v27 = vsel %vm1221_vm3, %v1204_v25, %v1206_v20  ;;  %v16487_v22 = vld [vmem:[%s25622_s4 + $0xa0] sm:$0xff] }
  0xc5   : > { %2455 = vrot.lane.b32.xlu0 %v19259_v1, %s19146_s28  ;;  %2451 = vrot.lane.b32.xlu1 %v19269_v3, %s19146_s28 }
  0xc6   : > { %1281 = vmatpush1.msra.mxu1 %v1226_v23  ;;  %1076 = vmatprep.mubr.f32.mxu0 %v19139_v9 }
  0xc7   : > { %1282 = vmatprep.subr.mxu1 %v1225_v26  ;;  %17794 = vmatprep.subr.mxu0 %v1202_v24  ;;  %v1200_v28 = vpop.permute.xlu0 %1199  ;;  %v1466_v29 = vpop.permute.xlu1 %1465 }
  0xc8   : > { %16456 = vmatmul.mubr.msk.f32.gmra.mxu0 %vm571_vm0, %v16452_v18  ;;  %1283 = vmatpush1.msra.mxu1 %v1224_v27  ;;  %v1223_v31 = vsel %vm1221_vm3, %v1200_v28, %v1202_v24 }
  0xc9   : > { %2453 = vrot.lane.b32.xlu0 %v19276_v4, %s19146_s28  ;;  %2449 = vrot.lane.b32.xlu1 %v19279_v5, %s19146_s28 }
  0xca   : > { %17795 = vmatpush3.msra.mxu0 %v1202_v24  ;;  %1082 = vmatprep.mubr.f32.mxu0 %v19139_v9 }
  0xcb   : > { %1284 = vmatprep.subr.mxu1 %v1223_v31  ;;  %17785 = vmatprep.mubr.msk.f32.mxu1 %vm571_vm0, %v16453_v30  ;;  %v1468_v33 = vpop.permute.xlu0 %1467  ;;  %v1198_v34 = vpop.permute.xlu1 %1197 }
  0xcc   : > { %16457 = vmatmul.mubr.msk.f32.gmra.mxu0 %vm571_vm0, %v16453_v30  ;;  %v1222_v35 = vsel %vm1221_vm3, %v1198_v34, %v1200_v28  ;;  %17786 = vmatmul.mubr.msk.f32.gmra.mxu1 %vm571_vm0, %v16454_v32  ;;  %v1477_v36 = vsel %vm1469_vm4, %v1466_v29, %v1468_v33  ;;  %v16488_v28 = vld [vmem:[%s25622_s4 + $0xa8] sm:$0xff]  ;;  %vm4941_vm3 = vcmask 531456  }
  0xcd   : > { %2445 = vrot.lane.b32.xlu0 %v19289_v7, %s19146_s28  ;;  %2447 = vrot.lane.b32.xlu1 %v19286_v6, %s19146_s28 }
  0xce   : > { %1088 = vmatprep.mubr.f32.mxu0 %v19139_v9  ;;  %1285 = vmatpush1.msra.mxu1 %v1222_v35 }
  0xcf   : > { %1526 = vmatprep.subr.mxu0 %v1477_v36  ;;  %1318 = vmatprep.mubr.f32.mxu1 %v19139_v9  ;;  %v1464_v37 = vpop.permute.xlu0 %1463  ;;  %v1460_v38 = vpop.permute.xlu1 %1459 }
  0xd0   : > { %16458 = vmatmul.mubr.msk.f32.gmra.mxu0 %vm571_vm0, %v16454_v32  ;;  %17802 = vmatprep.subr.mxu1 %v1468_v33  ;;  %v1476_v41 = vsel %vm1469_vm4, %v1464_v37, %v1466_v29  ;;  %v16489_v29 = vld [vmem:[%s25622_s4 + $0xb0] sm:$0xff] }
  0xd1   : > { %2443 = vrot.lane.b32.xlu0 %v19320_v10, %s19146_s28  ;;  %2439 = vrot.lane.b32.xlu1 %v19323_v11, %s19146_s28 }
  0xd2   : > { %16467 = vmatmul.mubr.msk.f32.vlgmr.msra.gmra.mxu1 %vm571_vm0, %v16463_v39  ;;  %17796 = vmatprep.mubr.msk.f32.mxu0 %vm571_vm0, %v16463_v39 }
  0xd3   : > { %17803 = vmatpush3.msra.mxu1 %v1468_v33  ;;  %v1462_v42 = vpop.permute.xlu0 %1461  ;;  %v1458_v43 = vpop.permute.xlu1 %1457  ;;  %1324 = vmatprep.mubr.f32.mxu1 %v19139_v9  ;;  %v16490_v33 = vld [vmem:[%s25622_s4 + $0xb8] sm:$0xff] }
  0xd4   : > { %17797 = vmatmul.mubr.msk.f32.vlgmr.msra.gmra.mxu0 %vm571_vm0, %v16464_v40  ;;  %17804 = vmatprep.subr.mxu1 %v1462_v42  ;;  %v1475_v44 = vsel %vm1469_vm4, %v1460_v38, %v1462_v42  ;;  %v1474_v45 = vsel %vm1469_vm4, %v1458_v43, %v1460_v38 }
  0xd5   : > { %2441 = vrot.lane.b32.xlu0 %v19330_v12, %s19146_s28  ;;  %2437 = vrot.lane.b32.xlu1 %v19333_v13, %s19146_s28 }
  0xd6   : > { %1527 = vmatpush1.msra.mxu0 %v1476_v41  ;;  %17805 = vmatpush3.msra.mxu1 %v1462_v42 }
  0xd7   : > { %1528 = vmatprep.subr.mxu0 %v1475_v44  ;;  %v1454_v46 = vpop.permute.xlu0 %1453  ;;  %v1456_v47 = vpop.permute.xlu1 %1455  ;;  %16468 = vmatmul.mubr.msk.f32.gmra.mxu1 %vm571_vm0, %v16464_v40 }
  0xd8   : > { %1529 = vmatpush1.msra.mxu0 %v1474_v45  ;;  %v1473_v48 = vsel %vm1469_vm4, %v1454_v46, %v1456_v47  ;;  %17806 = vmatprep.subr.mxu1 %v1456_v47 }
  0xd9   : > { %2707 = vrot.lane.b32.xlu0 %v19266_v2, %s19147_s15  ;;  %2705 = vrot.lane.b32.xlu1 %v19256_v0, %s19147_s15 }
  0xda   : > { %1530 = vmatprep.subr.mxu0 %v1473_v48  ;;  %17807 = vmatpush3.msra.mxu1 %v1456_v47 }
  0xdb   : > { %v1452_v51 = vpop.permute.xlu0 %1451  ;;  %v1448_v52 = vpop.permute.xlu1 %1447  ;;  %1330 = vmatprep.mubr.f32.mxu1 %v19139_v9  ;;  %17799 = vmatprep.mubr.msk.f32.mxu0 %vm571_vm0, %v16465_v49 }
  0xdc   : > { %v1472_v53 = vsel %vm1469_vm4, %v1452_v51, %v1454_v46  ;;  %16469 = vmatmul.mubr.msk.f32.gmra.mxu1 %vm571_vm0, %v16465_v49  ;;  %17800 = vmatmul.mubr.msk.f32.gmra.mxu0 %vm571_vm0, %v16466_v50 }
  0xdd   : > { %2701 = vrot.lane.b32.xlu0 %v19276_v4, %s19147_s15  ;;  %2703 = vrot.lane.b32.xlu1 %v19259_v1, %s19147_s15 }
  0xde   : > { %1531 = vmatpush1.msra.mxu0 %v1472_v53  ;;  %1336 = vmatprep.mubr.f32.mxu1 %v19139_v9 }
  0xdf   : > { %v1450_v54 = vpop.permute.xlu0 %1449  ;;  %v1446_v55 = vpop.permute.xlu1 %1445  ;;  %1566 = vmatprep.mubr.f32.mxu0 %v19139_v9 }
  0xe0   : > { %v1470_v56 = vsel %vm1469_vm4, %v1446_v55, %v1448_v52  ;;  %17808 = vmatprep.subr.mxu1 %v1450_v54  ;;  %v1471_v57 = vsel %vm1469_vm4, %v1448_v52, %v1450_v54  ;;  %16470 = vmatmul.mubr.msk.f32.gmra.mxu1 %vm571_vm0, %v16466_v50  ;;  %v19764_v55 = vld [vmem:[#allocation2] sm:$0xff]  ;;  %vm5189_vm4 = vcmask 523264  }
  0xe1   : > { %2699 = vrot.lane.b32.xlu0 %v19269_v3, %s19147_s15  ;;  %2695 = vrot.lane.b32.xlu1 %v19286_v6, %s19147_s15 }
  0xe2   : > { %1532 = vmatprep.subr.mxu0 %v1471_v57  ;;  %17809 = vmatpush3.msra.mxu1 %v1450_v54 }
  0xe3   : > { %1533 = vmatpush1.msra.mxu0 %v1470_v56  ;;  %v1716_v59 = vpop.permute.xlu0 %1715  ;;  %v1714_v60 = vpop.permute.xlu1 %1713  ;;  %17810 = vmatprep.mubr.msk.f32.mxu1 %vm571_vm0, %v16475_v58 }
  0xe4   : > { %17816 = vmatprep.subr.mxu0 %v1716_v59  ;;  %16479 = vmatmul.mubr.msk.f32.vlgmr.msra.gmra.mxu0 %vm571_vm0, %v16475_v58  ;;  %v1725_v61 = vsel %vm1717_vm5, %v1714_v60, %v1716_v59 }
  0xe5   : > { %2697 = vrot.lane.b32.xlu0 %v19279_v5, %s19147_s15  ;;  %2693 = vrot.lane.b32.xlu1 %v19289_v7, %s19147_s15 }
  0xe6   : > { %1774 = vmatprep.subr.mxu1 %v1725_v61  ;;  %17817 = vmatpush3.msra.mxu0 %v1716_v59  ;;  %v16511_v59 = vld [vmem:[%s25622_s4 + $0xe0] sm:$0xff] }
  0xe7   : > { %v1710_v63 = vpop.permute.xlu0 %1709  ;;  %v1712_v8 = vpop.permute.xlu1 %1711  ;;  %17811 = vmatmul.mubr.msk.f32.vlgmr.msra.gmra.mxu1 %vm571_vm0, %v16476_v62  ;;  %1572 = vmatprep.mubr.f32.mxu0 %v19139_v9 }
  0xe8   : > { %v1724_v14 = vsel %vm1717_vm5, %v1712_v8, %v1714_v60  ;;  %17818 = vmatprep.subr.mxu0 %v1710_v63  ;;  %16480 = vmatmul.mubr.msk.f32.gmra.mxu0 %vm571_vm0, %v16476_v62  ;;  %v19782_v60 = vld [vmem:[%s19253_s30 + $0x60] sm:$0xff] }
  0xe9   : > { %2689 = vrot.lane.b32.xlu0 %v19330_v12, %s19147_s15  ;;  %2691 = vrot.lane.b32.xlu1 %v19320_v10, %s19147_s15 }
  0xea   : > { %1775 = vmatpush1.msra.mxu1 %v1724_v14  ;;  %17819 = vmatpush3.msra.mxu0 %v1710_v63  ;;  %v19796_v14 = vld [vmem:[%s19253_s30 + $0x50] sm:$0xff] }
  0xeb   : > { %v1708_v16 = vpop.permute.xlu0 %1707  ;;  %v1704_v17 = vpop.permute.xlu1 %1703  ;;  %1578 = vmatprep.mubr.f32.mxu0 %v19139_v9  ;;  %17813 = vmatprep.mubr.msk.f32.mxu1 %vm571_vm0, %v16477_v15 }
  0xec   : > { %v1723_v18 = vsel %vm1717_vm5, %v1708_v16, %v1710_v63  ;;  %17820 = vmatprep.subr.mxu0 %v1704_v17  ;;  %16481 = vmatmul.mubr.msk.f32.gmra.mxu0 %vm571_vm0, %v16477_v15  ;;  %v19801_v15 = vld [vmem:[%s19253_s30 + $0x40] sm:$0xff] }
  0xed   : > { %2687 = vrot.lane.b32.xlu0 %v19323_v11, %s19147_s15  ;;  %2953 = vrot.lane.b32.xlu1 %v19256_v0, %s19148_s16 }
  0xee   : > { %1776 = vmatprep.subr.mxu1 %v1723_v18  ;;  %17821 = vmatpush3.msra.mxu0 %v1704_v17 }
  0xef   : > { %v1706_v20 = vpop.permute.xlu0 %1705  ;;  %v1702_v21 = vpop.permute.xlu1 %1701  ;;  %17814 = vmatmul.mubr.msk.f32.gmra.mxu1 %vm571_vm0, %v16478_v19  ;;  %1584 = vmatprep.mubr.f32.mxu0 %v19139_v9 }
  0xf0   : > { %v1722_v23 = vsel %vm1717_vm5, %v1706_v20, %v1708_v16  ;;  %v1721_v24 = vsel %vm1717_vm5, %v1702_v21, %v1704_v17  ;;  %16482 = vmatmul.mubr.msk.f32.gmra.mxu0 %vm571_vm0, %v16478_v19  ;;  %1814 = vmatprep.mubr.f32.mxu1 %v19139_v9  ;;  %v16512_v19 = vld [vmem:[%s25622_s4 + $0xe8] sm:$0xff]  ;;  %v16513_v20 = vld [vmem:[%s25622_s4 + $0xf0] sm:$0xff] }
  0xf1   : > { %2955 = vrot.lane.b32.xlu0 %v19266_v2, %s19148_s16  ;;  %2685 = vrot.lane.b32.xlu1 %v19333_v13, %s19147_s15  ;;  %s19157_s15 = smov 64  }
  0xf2   : > { %1777 = vmatpush1.msra.mxu1 %v1722_v23  ;;  %17824 = vmatprep.mubr.msk.f32.mxu0 %vm571_vm0, %v16487_v22 }
  0xf3   : > { %1778 = vmatprep.subr.mxu1 %v1721_v24  ;;  %v1698_v25 = vpop.permute.xlu0 %1697  ;;  %v1700_v26 = vpop.permute.xlu1 %1699 }
  0xf4   : > { %v1720_v27 = vsel %vm1717_vm5, %v1700_v26, %v1702_v21  ;;  %17822 = vmatprep.subr.mxu0 %v1698_v25  ;;  %v19813_v21 = vld [vmem:[%s19253_s30 + $0x28] sm:$0xff] }
  0xf5   : > { %2951 = vrot.lane.b32.xlu0 %v19259_v1, %s19148_s16  ;;  %2947 = vrot.lane.b32.xlu1 %v19269_v3, %s19148_s16 }
  0xf6   : > { %1779 = vmatpush1.msra.mxu1 %v1720_v27  ;;  %17823 = vmatpush3.msra.mxu0 %v1698_v25  ;;  %v19829_v27 = vld [vmem:[%s19253_s30 + $0x20] sm:$0xff] }
  0xf7   : > { %v1696_v30 = vpop.permute.xlu0 %1695  ;;  %v1962_v31 = vpop.permute.xlu1 %1961  ;;  %17825 = vmatmul.mubr.msk.f32.vlgmr.msra.gmra.mxu0 %vm571_vm0, %v16488_v28 }
  0xf8   : > { %v1719_v32 = vsel %vm1717_vm5, %v1696_v30, %v1698_v25  ;;  %17827 = vmatprep.mubr.msk.f32.mxu0 %vm571_vm0, %v16489_v29  ;;  %v16514_v25 = vld [vmem:[%s25622_s4 + $0xf8] sm:$0xff] }
  0xf9   : > { %2949 = vrot.lane.b32.xlu0 %v19276_v4, %s19148_s16  ;;  %2945 = vrot.lane.b32.xlu1 %v19279_v5, %s19148_s16 }
  0xfa   : > { %1780 = vmatprep.subr.mxu1 %v1719_v32 }
  0xfb   : > { %17828 = vmatmul.mubr.msk.f32.gmra.mxu0 %vm571_vm0, %v16490_v33 }
  0xfc   : > { %v1964_v34 = vpop.permute.xlu0 %1963  ;;  %v1694_v35 = vpop.permute.xlu1 %1693  ;;  %2062 = vmatprep.mubr.f32.mxu0 %v19139_v9 }
  0xfd   : > { %2941 = vrot.lane.b32.xlu0 %v19289_v7, %s19148_s16  ;;  %2943 = vrot.lane.b32.xlu1 %v19286_v6, %s19148_s16  ;;  %v1718_v36 = vsel %vm1717_vm5, %v1694_v35, %v1696_v30  ;;  %v1973_v37 = vsel %vm1965_vm6, %v1962_v31, %v1964_v34  ;;  %vm5477_vm5 = vcmask 392192  }
  0xfe   : > { %1781 = vmatpush1.msra.mxu1 %v1718_v36  ;;  %2022 = vmatprep.subr.mxu0 %v1973_v37 }
  0xff   : > { %17830 = vmatprep.subr.mxu1 %v1964_v34  ;;  %16491 = vmatmul.mubr.msk.f32.vlgmr.msra.gmra.mxu1 %vm571_vm0, %v16487_v22  ;;  %v19818_v22 = vld [vmem:[%s19253_s30 + $0x30] sm:$0xff] }
 0x100   : > { %v1960_v38 = vpop.permute.xlu0 %1959  ;;  %v1956_v39 = vpop.permute.xlu1 %1955  ;;  %17831 = vmatpush3.msra.mxu1 %v1964_v34  ;;  %1820 = vmatprep.mubr.f32.mxu1 %v19139_v9  ;;  %v19848_v34 = vld [vmem:[%s19253_s30] sm:$0xff] }
 0x101   : > { %2939 = vrot.lane.b32.xlu0 %v19320_v10, %s19148_s16  ;;  %2935 = vrot.lane.b32.xlu1 %v19323_v11, %s19148_s16  ;;  %v1972_v40 = vsel %vm1965_vm6, %v1960_v38, %v1962_v31 }
 0x102   : > { %2023 = vmatpush1.msra.mxu0 %v1972_v40 }
 0x103   : > { %16492 = vmatmul.mubr.msk.f32.gmra.mxu1 %vm571_vm0, %v16488_v28  ;;  %v19834_v28 = vld [vmem:[%s19253_s30 + $0x8] sm:$0xff] }
 0x104   : > { %v1958_v41 = vpop.permute.xlu0 %1957  ;;  %v1954_v42 = vpop.permute.xlu1 %1953  ;;  %1826 = vmatprep.mubr.f32.mxu1 %v19139_v9 }
 0x105   : > { %2937 = vrot.lane.b32.xlu0 %v19330_v12, %s19148_s16  ;;  %2933 = vrot.lane.b32.xlu1 %v19333_v13, %s19148_s16  ;;  %v1970_v43 = vsel %vm1965_vm6, %v1954_v42, %v1956_v39  ;;  %v1971_v44 = vsel %vm1965_vm6, %v1956_v39, %v1958_v41  ;;  %s19153_s16 = smov 68  }
 0x106   : > { %17832 = vmatprep.subr.mxu1 %v1958_v41  ;;  %2024 = vmatprep.subr.mxu0 %v1971_v44 }
 0x107   : > { %17833 = vmatpush3.msra.mxu1 %v1958_v41  ;;  %2025 = vmatpush1.msra.mxu0 %v1970_v43 }
 0x108   : > { %v1950_v45 = vpop.permute.xlu0 %1949  ;;  %v1952_v46 = vpop.permute.xlu1 %1951  ;;  %16493 = vmatmul.mubr.msk.f32.gmra.mxu1 %vm571_vm0, %v16489_v29 }
 0x109   : > { %3203 = vrot.lane.b32.xlu0 %v19266_v2, %s19149_s27  ;;  %3201 = vrot.lane.b32.xlu1 %v19256_v0, %s19149_s27  ;;  %v1969_v47 = vsel %vm1965_vm6, %v1950_v45, %v1952_v46  ;;  %v16499_v0 = vld [vmem:[%s25622_s4 + $0xc0] sm:$0xff] }
 0x10a   : > { %2026 = vmatprep.subr.mxu0 %v1969_v47  ;;  %17834 = vmatprep.subr.mxu1 %v1952_v46  ;;  %v16523_v47 = vld [vmem:[%s25622_s4 + $0x100] sm:$0xff] }
 0x10b   : > { %17835 = vmatpush3.msra.mxu1 %v1952_v46  ;;  %1832 = vmatprep.mubr.f32.mxu1 %v19139_v9 }
 0x10c   : > { %v1948_v48 = vpop.permute.xlu0 %1947  ;;  %v1944_v49 = vpop.permute.xlu1 %1943  ;;  %16494 = vmatmul.mubr.msk.f32.gmra.mxu1 %vm571_vm0, %v16490_v33  ;;  %v19843_v33 = vld [vmem:[%s19253_s30 + $0x10] sm:$0xff] }
 0x10d   : > { %3197 = vrot.lane.b32.xlu0 %v19276_v4, %s19149_s27  ;;  %3199 = vrot.lane.b32.xlu1 %v19259_v1, %s19149_s27  ;;  %v1968_v2 = vsel %vm1965_vm6, %v1948_v48, %v1950_v45  ;;  %v16500_v1 = vld [vmem:[%s25622_s4 + $0xc8] sm:$0xff] }
 0x10e   : > { %2027 = vmatpush1.msra.mxu0 %v1968_v2  ;;  %17838 = vmatprep.mubr.msk.f32.mxu1 %vm571_vm0, %v16499_v0 }
 0x111   : > { %3195 = vrot.lane.b32.xlu0 %v19269_v3, %s19149_s27  ;;  %3191 = vrot.lane.b32.xlu1 %v19286_v6, %s19149_s27  ;;  %v1946_v50 = vpop.permute.xlu0 %1945  ;;  %v16501_v3 = vld [vmem:[%s25622_s4 + $0xd0] sm:$0xff]  ;;  %v16502_v6 = vld [vmem:[%s25622_s4 + $0xd8] sm:$0xff] }
 0x112   : > { %v1942_v4 = vpop.permute.xlu1 %1941  ;;  %17836 = vmatprep.subr.mxu1 %v1946_v50  ;;  %v1967_v51 = vsel %vm1965_vm6, %v1944_v49, %v1946_v50 }
 0x113   : > { %v1966_v52 = vsel %vm1965_vm6, %v1942_v4, %v1944_v49  ;;  %2028 = vmatprep.subr.mxu0 %v1967_v51  ;;  %17837 = vmatpush3.msra.mxu1 %v1946_v50 }
 0x114   : > { %2029 = vmatpush1.msra.mxu0 %v1966_v52  ;;  %17839 = vmatmul.mubr.msk.f32.vlgmr.msra.gmra.mxu1 %vm571_vm0, %v16500_v1 }
 0x115   : > { %3193 = vrot.lane.b32.xlu0 %v19279_v5, %s19149_s27  ;;  %3189 = vrot.lane.b32.xlu1 %v19289_v7, %s19149_s27  ;;  %v19760_v7 = vld [vmem:[%s19253_s30 + $0x68] sm:$0xff] }
 0x116   : > { %16503 = vmatmul.mubr.msk.f32.vlgmr.msra.gmra.mxu0 %vm571_vm0, %v16499_v0  ;;  %17841 = vmatprep.mubr.msk.f32.mxu1 %vm571_vm0, %v16501_v3 }
 0x117   : > { %2068 = vmatprep.mubr.f32.mxu0 %v19139_v9 }
 0x118   : > { %v2212_v53 = vpop.permute.xlu0 %2211  ;;  %v2210_v54 = vpop.permute.xlu1 %2209  ;;  %17842 = vmatmul.mubr.msk.f32.gmra.mxu1 %vm571_vm0, %v16502_v6 }
 0x119   : > { %3185 = vrot.lane.b32.xlu0 %v19330_v12, %s19149_s27  ;;  %3187 = vrot.lane.b32.xlu1 %v19320_v10, %s19149_s27  ;;  %v2221_v5 = vsel %vm2213_vm7, %v2210_v54, %v2212_v53 }
 0x11a   : > { %17844 = vmatprep.subr.mxu0 %v2212_v53  ;;  %2270 = vmatprep.subr.mxu1 %v2221_v5  ;;  %v16526_v5 = vld [vmem:[%s25622_s4 + $0x118] sm:$0xff] }
 0x11b   : > { %17845 = vmatpush3.msra.mxu0 %v2212_v53  ;;  %2310 = vmatprep.mubr.f32.mxu1 %v19139_v9 }
 0x11c   : > { %16504 = vmatmul.mubr.msk.f32.gmra.mxu0 %vm571_vm0, %v16500_v1  ;;  %v16524_v1 = vld [vmem:[%s25622_s4 + $0x108] sm:$0xff] }
 0x11d   : > { %3183 = vrot.lane.b32.xlu0 %v19323_v11, %s19149_s27  ;;  %3449 = vrot.lane.b32.xlu1 %v19760_v7, %s19150_s23  ;;  %v2206_v10 = vpop.permute.xlu0 %2205  ;;  %v19770_v11 = vld [vmem:[%s19253_s30 + $0x70] sm:$0xff] }
 0x11e   : > { %v2208_v12 = vpop.permute.xlu1 %2207  ;;  %17846 = vmatprep.subr.mxu0 %v2206_v10  ;;  %2074 = vmatprep.mubr.f32.mxu0 %v19764_v55 }
 0x11f   : > { %v2220_v9 = vsel %vm2213_vm7, %v2208_v12, %v2210_v54  ;;  %17847 = vmatpush3.msra.mxu0 %v2206_v10 }
 0x120   : > { %2271 = vmatpush1.msra.mxu1 %v2220_v9  ;;  %16505 = vmatmul.mubr.msk.f32.gmra.mxu0 %vm571_vm0, %v16501_v3  ;;  %v16525_v3 = vld [vmem:[%s25622_s4 + $0x110] sm:$0xff] }
 0x121   : > { %3451 = vrot.lane.b32.xlu0 %v19770_v11, %s19150_s23  ;;  %3181 = vrot.lane.b32.xlu1 %v19333_v13, %s19149_s27  ;;  %v2204_v56 = vpop.permute.xlu0 %2203  ;;  %v19787_v13 = vld [vmem:[%s19253_s30 + $0x48] sm:$0xff] }
 0x122   : > { %v2200_v57 = vpop.permute.xlu1 %2199  ;;  %v2219_v58 = vsel %vm2213_vm7, %v2204_v56, %v2206_v10  ;;  %2080 = vmatprep.mubr.f32.mxu0 %v19764_v55 }
 0x123   : > { %2272 = vmatprep.subr.mxu1 %v2219_v58  ;;  %17848 = vmatprep.subr.mxu0 %v2200_v57  ;;  %v16535_v58 = vld [vmem:[%s25622_s4 + $0x120] sm:$0xff] }
 0x124   : > { %17849 = vmatpush3.msra.mxu0 %v2200_v57 }
 0x125   : > { %3447 = vrot.lane.b32.xlu0 %v19782_v60, %s19150_s23  ;;  %3443 = vrot.lane.b32.xlu1 %v19787_v13, %s19150_s23  ;;  %v2202_v61 = vpop.permute.xlu0 %2201 }
 0x126   : > { %v2218_v62 = vsel %vm2213_vm7, %v2202_v61, %v2204_v56  ;;  %v2198_v63 = vpop.permute.xlu1 %2197  ;;  %16506 = vmatmul.mubr.msk.f32.gmra.mxu0 %vm571_vm0, %v16502_v6 }
 0x127   : > { %2273 = vmatpush1.msra.mxu1 %v2218_v62  ;;  %v2217_v8 = vsel %vm2213_vm7, %v2198_v63, %v2200_v57  ;;  %17852 = vmatprep.mubr.msk.f32.mxu0 %vm571_vm0, %v16511_v59 }
 0x128   : > { %2274 = vmatprep.subr.mxu1 %v2217_v8 }
 0x129   : > { %3445 = vrot.lane.b32.xlu0 %v19796_v14, %s19150_s23  ;;  %3441 = vrot.lane.b32.xlu1 %v19801_v15, %s19150_s23 }
 0x12a   : > { %v2194_v16 = vpop.permute.xlu0 %2193  ;;  %v2196_v17 = vpop.permute.xlu1 %2195 }
 0x12b   : > { %v2216_v18 = vsel %vm2213_vm7, %v2196_v17, %v2198_v63  ;;  %17850 = vmatprep.subr.mxu0 %v2194_v16  ;;  %v16537_v17 = vld [vmem:[%s25622_s4 + $0x130] sm:$0xff] }
 0x12c   : > { %2275 = vmatpush1.msra.mxu1 %v2216_v18  ;;  %17851 = vmatpush3.msra.mxu0 %v2194_v16 }
 0x12d   : > { %3437 = vrot.lane.b32.xlu0 %v19813_v21, %s19150_s23  ;;  %3439 = vrot.lane.b32.xlu1 %v19818_v22, %s19150_s23 }
 0x12e   : > { %17853 = vmatmul.mubr.msk.f32.vlgmr.msra.gmra.mxu0 %vm571_vm0, %v16512_v19 }
 0x12f   : > { %v2192_v23 = vpop.permute.xlu0 %2191  ;;  %v2458_v24 = vpop.permute.xlu1 %2457  ;;  %17855 = vmatprep.mubr.msk.f32.mxu0 %vm571_vm0, %v16513_v20 }
 0x130   : > { %v2215_v26 = vsel %vm2213_vm7, %v2192_v23, %v2194_v16  ;;  %v16536_v16 = vld [vmem:[%s25622_s4 + $0x128] sm:$0xff] }
 0x131   : > { %3435 = vrot.lane.b32.xlu0 %v19829_v27, %s19150_s23  ;;  %3431 = vrot.lane.b32.xlu1 %v19834_v28, %s19150_s23 }
 0x132   : > { %2276 = vmatprep.subr.mxu1 %v2215_v26  ;;  %17856 = vmatmul.mubr.msk.f32.gmra.mxu0 %vm571_vm0, %v16514_v25 }
 0x133   : > { %v2460_v29 = vpop.permute.xlu0 %2459  ;;  %v2190_v30 = vpop.permute.xlu1 %2189  ;;  %2558 = vmatprep.mubr.f32.mxu0 %v19764_v55 }
 0x134   : > { %v2214_v31 = vsel %vm2213_vm7, %v2190_v30, %v2192_v23  ;;  %v2469_v32 = vsel %vm2461_vm8, %v2458_v24, %v2460_v29  ;;  %v16538_v23 = vld [vmem:[%s25622_s4 + $0x138] sm:$0xff] }
 0x135   : > { %3433 = vrot.lane.b32.xlu0 %v19843_v33, %s19150_s23  ;;  %3429 = vrot.lane.b32.xlu1 %v19848_v34, %s19150_s23 }
 0x136   : > { %2277 = vmatpush1.msra.mxu1 %v2214_v31  ;;  %2518 = vmatprep.subr.mxu0 %v2469_v32 }
 0x137   : > { %17858 = vmatprep.subr.mxu1 %v2460_v29  ;;  %v2456_v35 = vpop.permute.xlu0 %2455  ;;  %v2452_v36 = vpop.permute.xlu1 %2451  ;;  %16515 = vmatmul.mubr.msk.f32.vlgmr.msra.gmra.mxu1 %vm571_vm0, %v16511_v59 }
 0x138   : > { %v2468_v37 = vsel %vm2461_vm8, %v2456_v35, %v2458_v24  ;;  %17859 = vmatpush3.msra.mxu1 %v2460_v29  ;;  %2316 = vmatprep.mubr.f32.mxu1 %v19764_v55 }
 0x139   : > { %3699 = vrot.lane.b32.xlu0 %v19770_v11, %s19151_s22  ;;  %3697 = vrot.lane.b32.xlu1 %v19760_v7, %s19151_s22 }
 0x13a   : > { %2519 = vmatpush1.msra.mxu0 %v2468_v37 }
 0x13b   : > { %v2454_v38 = vpop.permute.xlu0 %2453  ;;  %v2450_v39 = vpop.permute.xlu1 %2449  ;;  %16516 = vmatmul.mubr.msk.f32.gmra.mxu1 %vm571_vm0, %v16512_v19 }
 0x13c   : > { %v2466_v40 = vsel %vm2461_vm8, %v2450_v39, %v2452_v36  ;;  %17860 = vmatprep.subr.mxu1 %v2454_v38  ;;  %v2467_v41 = vsel %vm2461_vm8, %v2452_v36, %v2454_v38  ;;  %2322 = vmatprep.mubr.f32.mxu1 %v19764_v55 }
 0x13d   : > { %3693 = vrot.lane.b32.xlu0 %v19796_v14, %s19151_s22  ;;  %3695 = vrot.lane.b32.xlu1 %v19782_v60, %s19151_s22 }
 0x13e   : > { %2520 = vmatprep.subr.mxu0 %v2467_v41  ;;  %17861 = vmatpush3.msra.mxu1 %v2454_v38 }
 0x13f   : > { %2521 = vmatpush1.msra.mxu0 %v2466_v40  ;;  %v2446_v42 = vpop.permute.xlu0 %2445  ;;  %v2448_v43 = vpop.permute.xlu1 %2447  ;;  %16517 = vmatmul.mubr.msk.f32.gmra.mxu1 %vm571_vm0, %v16513_v20 }
 0x140   : > { %v2465_v44 = vsel %vm2461_vm8, %v2446_v42, %v2448_v43  ;;  %17862 = vmatprep.subr.mxu1 %v2448_v43  ;;  %2328 = vmatprep.mubr.f32.mxu1 %v19764_v55 }
 0x141   : > { %3691 = vrot.lane.b32.xlu0 %v19787_v13, %s19151_s22  ;;  %3687 = vrot.lane.b32.xlu1 %v19818_v22, %s19151_s22 }
 0x142   : > { %2522 = vmatprep.subr.mxu0 %v2465_v44  ;;  %17863 = vmatpush3.msra.mxu1 %v2448_v43  ;;  %v16547_v44 = vld [vmem:[%s25622_s4 + $0x140] sm:$0xff] }
 0x143   : > { %v2444_v45 = vpop.permute.xlu0 %2443  ;;  %v2440_v46 = vpop.permute.xlu1 %2439  ;;  %16518 = vmatmul.mubr.msk.f32.gmra.mxu1 %vm571_vm0, %v16514_v25 }
 0x144   : > { %v2464_v48 = vsel %vm2461_vm8, %v2444_v45, %v2446_v42  ;;  %17866 = vmatprep.mubr.msk.f32.mxu1 %vm571_vm0, %v16523_v47 }
 0x145   : > { %3689 = vrot.lane.b32.xlu0 %v19801_v15, %s19151_s22  ;;  %3685 = vrot.lane.b32.xlu1 %v19813_v21, %s19151_s22 }
 0x146   : > { %2523 = vmatpush1.msra.mxu0 %v2464_v48 }
 0x147   : > { %v2442_v49 = vpop.permute.xlu0 %2441  ;;  %v2438_v2 = vpop.permute.xlu1 %2437 }
 0x148   : > { %v2462_v0 = vsel %vm2461_vm8, %v2438_v2, %v2440_v46  ;;  %17864 = vmatprep.subr.mxu1 %v2442_v49  ;;  %v2463_v50 = vsel %vm2461_vm8, %v2440_v46, %v2442_v49  ;;  %v16548_v2 = vld [vmem:[%s25622_s4 + $0x148] sm:$0xff] }
 0x149   : > { %3681 = vrot.lane.b32.xlu0 %v19843_v33, %s19151_s22  ;;  %3683 = vrot.lane.b32.xlu1 %v19829_v27, %s19151_s22 }
 0x14a   : > { %2524 = vmatprep.subr.mxu0 %v2463_v50  ;;  %17865 = vmatpush3.msra.mxu1 %v2442_v49 }
 0x14b   : > { %2525 = vmatpush1.msra.mxu0 %v2462_v0  ;;  %v2708_v4 = vpop.permute.xlu0 %2707  ;;  %v2706_v51 = vpop.permute.xlu1 %2705  ;;  %17867 = vmatmul.mubr.msk.f32.vlgmr.msra.gmra.mxu1 %vm571_vm0, %v16524_v1 }
 0x14c   : > { %17872 = vmatprep.subr.mxu0 %v2708_v4  ;;  %16527 = vmatmul.mubr.msk.f32.vlgmr.msra.gmra.mxu0 %vm571_vm0, %v16523_v47  ;;  %v2717_v52 = vsel %vm2709_vm9, %v2706_v51, %v2708_v4 }
 0x14d   : > { %3679 = vrot.lane.b32.xlu0 %v19834_v28, %s19151_s22  ;;  %3945 = vrot.lane.b32.xlu1 %v19760_v7, %s19152_s20 }
 0x14e   : > { %2766 = vmatprep.subr.mxu1 %v2717_v52  ;;  %17873 = vmatpush3.msra.mxu0 %v2708_v4  ;;  %v16549_v52 = vld [vmem:[%s25622_s4 + $0x150] sm:$0xff] }
 0x14f   : > { %v2702_v6 = vpop.permute.xlu0 %2701  ;;  %v2704_v53 = vpop.permute.xlu1 %2703  ;;  %2564 = vmatprep.mubr.f32.mxu0 %v19764_v55  ;;  %17869 = vmatprep.mubr.msk.f32.mxu1 %vm571_vm0, %v16525_v3 }
 0x150   : > { %v2716_v54 = vsel %vm2709_vm9, %v2704_v53, %v2706_v51  ;;  %17874 = vmatprep.subr.mxu0 %v2702_v6  ;;  %16528 = vmatmul.mubr.msk.f32.gmra.mxu0 %vm571_vm0, %v16524_v1 }
 0x151   : > { %3947 = vrot.lane.b32.xlu0 %v19770_v11, %s19152_s20  ;;  %3677 = vrot.lane.b32.xlu1 %v19848_v34, %s19151_s22 }
 0x152   : > { %2767 = vmatpush1.msra.mxu1 %v2716_v54  ;;  %17875 = vmatpush3.msra.mxu0 %v2702_v6 }
 0x153   : > { %v2700_v10 = vpop.permute.xlu0 %2699  ;;  %v2696_v12 = vpop.permute.xlu1 %2695  ;;  %2570 = vmatprep.mubr.f32.mxu0 %v19764_v55  ;;  %17870 = vmatmul.mubr.msk.f32.gmra.mxu1 %vm571_vm0, %v16526_v5 }
 0x154   : > { %v2715_v9 = vsel %vm2709_vm9, %v2700_v10, %v2702_v6  ;;  %17876 = vmatprep.subr.mxu0 %v2696_v12  ;;  %16529 = vmatmul.mubr.msk.f32.gmra.mxu0 %vm571_vm0, %v16525_v3 }
 0x155   : > { %3943 = vrot.lane.b32.xlu0 %v19782_v60, %s19152_s20  ;;  %3939 = vrot.lane.b32.xlu1 %v19787_v13, %s19152_s20 }
 0x156   : > { %2768 = vmatprep.subr.mxu1 %v2715_v9  ;;  %17877 = vmatpush3.msra.mxu0 %v2696_v12 }
 0x157   : > { %v2698_v56 = vpop.permute.xlu0 %2697  ;;  %v2694_v57 = vpop.permute.xlu1 %2693  ;;  %2576 = vmatprep.mubr.f32.mxu0 %v19764_v55  ;;  %2806 = vmatprep.mubr.f32.mxu1 %v19764_v55 }
 0x158   : > { %v2714_v59 = vsel %vm2709_vm9, %v2698_v56, %v2700_v10  ;;  %v2713_v61 = vsel %vm2709_vm9, %v2694_v57, %v2696_v12  ;;  %16530 = vmatmul.mubr.msk.f32.gmra.mxu0 %vm571_vm0, %v16526_v5  ;;  %v16550_v10 = vld [vmem:[%s25622_s4 + $0x158] sm:$0xff] }
 0x159   : > { %3941 = vrot.lane.b32.xlu0 %v19796_v14, %s19152_s20  ;;  %3937 = vrot.lane.b32.xlu1 %v19801_v15, %s19152_s20 }
 0x15a   : > { %2769 = vmatpush1.msra.mxu1 %v2714_v59  ;;  %17880 = vmatprep.mubr.msk.f32.mxu0 %vm571_vm0, %v16535_v58 }
 0x15b   : > { %2770 = vmatprep.subr.mxu1 %v2713_v61  ;;  %v2690_v62 = vpop.permute.xlu0 %2689  ;;  %v2692_v63 = vpop.permute.xlu1 %2691 }
 0x15c   : > { %v2712_v8 = vsel %vm2709_vm9, %v2692_v63, %v2694_v57  ;;  %17878 = vmatprep.subr.mxu0 %v2690_v62  ;;  %v20001_v0 = vpop.f32.mrf.mxu0  ;;  %v17756_v61 = vpop.f32.mrf.mxu1 }
 0x15d   : > { %3933 = vrot.lane.b32.xlu0 %v19813_v21, %s19152_s20  ;;  %3935 = vrot.lane.b32.xlu1 %v19818_v22, %s19152_s20 }
 0x15e   : > { %2771 = vmatpush1.msra.mxu1 %v2712_v8  ;;  %17879 = vmatpush3.msra.mxu0 %v2690_v62  ;;  %v20007_v50 = vpop.f32.mrf.mxu0  ;;  %v20050_v63 = vpop.f32.mrf.mxu1 }
 0x15f   : > { %v2688_v18 = vpop.permute.xlu0 %2687  ;;  %v2954_v19 = vpop.permute.xlu1 %2953  ;;  %17881 = vmatmul.mubr.msk.f32.vlgmr.msra.gmra.mxu0 %vm571_vm0, %v16536_v16 }
 0x160   : > { %v2711_v20 = vsel %vm2709_vm9, %v2688_v18, %v2690_v62  ;;  %17883 = vmatprep.mubr.msk.f32.mxu0 %vm571_vm0, %v16537_v17 }
 0x161   : > { %3931 = vrot.lane.b32.xlu0 %v19829_v27, %s19152_s20  ;;  %3927 = vrot.lane.b32.xlu1 %v19834_v28, %s19152_s20 }
 0x162   : > { %2772 = vmatprep.subr.mxu1 %v2711_v20 }
 0x163   : > { %v2956_v24 = vpop.permute.xlu0 %2955  ;;  %v2686_v25 = vpop.permute.xlu1 %2685  ;;  %17884 = vmatmul.mubr.msk.f32.gmra.mxu0 %vm571_vm0, %v16538_v23 }
 0x164   : > { %v2710_v26 = vsel %vm2709_vm9, %v2686_v25, %v2688_v18  ;;  %v2965_v29 = vsel %vm2957_vm10, %v2954_v19, %v2956_v24  ;;  %3054 = vmatprep.mubr.f32.mxu0 %v19764_v55  ;;  %v20015_v3 = vpop.f32.mrf.mxu0  ;;  %vm5737_vm9 = vcmask 384000  }
 0x165   : > { %3929 = vrot.lane.b32.xlu0 %v19843_v33, %s19152_s20  ;;  %3925 = vrot.lane.b32.xlu1 %v19848_v34, %s19152_s20  ;;  %s19160_s20 = smov 46  }
 0x166   : > { %2773 = vmatpush1.msra.mxu1 %v2710_v26  ;;  %3014 = vmatprep.subr.mxu0 %v2965_v29  ;;  %v20021_v6 = vpop.f32.mrf.mxu0 }
 0x167   : > { %17886 = vmatprep.subr.mxu1 %v2956_v24  ;;  %v2952_v30 = vpop.permute.xlu0 %2951  ;;  %v2948_v31 = vpop.permute.xlu1 %2947  ;;  %16539 = vmatmul.mubr.msk.f32.vlgmr.msra.gmra.mxu1 %vm571_vm0, %v16535_v58 }
 0x168   : > { %v2964_v32 = vsel %vm2957_vm10, %v2952_v30, %v2954_v19  ;;  %17887 = vmatpush3.msra.mxu1 %v2956_v24  ;;  %2812 = vmatprep.mubr.f32.mxu1 %v19764_v55 }
 0x169   : > { %4195 = vrot.lane.b32.xlu0 %v19770_v11, %s19153_s16  ;;  %4193 = vrot.lane.b32.xlu1 %v19760_v7, %s19153_s16 }
 0x16a   : > { %3015 = vmatpush1.msra.mxu0 %v2964_v32  ;;  %v20030_v12 = vpop.f32.mrf.mxu0 }
 0x16b   : > { %v2950_v35 = vpop.permute.xlu0 %2949  ;;  %v2946_v36 = vpop.permute.xlu1 %2945  ;;  %16540 = vmatmul.mubr.msk.f32.gmra.mxu1 %vm571_vm0, %v16536_v16 }
 0x16c   : > { %v2962_v37 = vsel %vm2957_vm10, %v2946_v36, %v2948_v31  ;;  %17888 = vmatprep.subr.mxu1 %v2950_v35  ;;  %v2963_v38 = vsel %vm2957_vm10, %v2948_v31, %v2950_v35  ;;  %2818 = vmatprep.mubr.f32.mxu1 %v19764_v55  ;;  %v20036_v9 = vpop.f32.mrf.mxu0  ;;  %v16560_v31 = vld [vmem:[%s25622_s4 + $0x168] sm:$0xff]  ;;  %v20085_v36 = vld [vmem:[%s25622_s4 + $0x170] sm:$0xff] }
 0x16d   : > { %4189 = vrot.lane.b32.xlu0 %v19796_v14, %s19153_s16  ;;  %4191 = vrot.lane.b32.xlu1 %v19782_v60, %s19153_s16 }
 0x16e   : > { %3016 = vmatprep.subr.mxu0 %v2963_v38  ;;  %17889 = vmatpush3.msra.mxu1 %v2950_v35  ;;  %v20042_v59 = vpop.f32.mrf.mxu0 }
 0x16f   : > { %3017 = vmatpush1.msra.mxu0 %v2962_v37  ;;  %v2942_v39 = vpop.permute.xlu0 %2941  ;;  %v2944_v40 = vpop.permute.xlu1 %2943  ;;  %16541 = vmatmul.mubr.msk.f32.gmra.mxu1 %vm571_vm0, %v16537_v17  ;;  %v20057_v17 = vld [vmem:[%s25622_s4 + $0x160] sm:$0xff] }
 0x170   : > { %v2961_v41 = vsel %vm2957_vm10, %v2942_v39, %v2944_v40  ;;  %17890 = vmatprep.subr.mxu1 %v2944_v40  ;;  %2824 = vmatprep.mubr.f32.mxu1 %v19764_v55  ;;  %v20048_v62 = vpop.f32.mrf.mxu0 }
 0x171   : > { %4187 = vrot.lane.b32.xlu0 %v19787_v13, %s19153_s16  ;;  %4183 = vrot.lane.b32.xlu1 %v19818_v22, %s19153_s16 }
 0x172   : > { %3018 = vmatprep.subr.mxu0 %v2961_v41  ;;  %17891 = vmatpush3.msra.mxu1 %v2944_v40  ;;  %v17770_v20 = vpop.f32.mrf.mxu0 }
 0x173   : > { %v2940_v42 = vpop.permute.xlu0 %2939  ;;  %v2936_v43 = vpop.permute.xlu1 %2935  ;;  %16542 = vmatmul.mubr.msk.f32.gmra.mxu1 %vm571_vm0, %v16538_v23  ;;  %v20066_v24 = vadd.f32 %v17770_v20, %v17756_v61 }
 0x174   : > { %v2960_v45 = vsel %vm2957_vm10, %v2940_v42, %v2942_v39  ;;  %17894 = vmatprep.mubr.msk.f32.mxu1 %vm571_vm0, %v16547_v44  ;;  %v17759_v23 = vpop.f32.mrf.mxu1  ;;  %v20070_v25 = vpop.f32.mrf.mxu0 }
 0x175   : > { %4185 = vrot.lane.b32.xlu0 %v19801_v15, %s19153_s16  ;;  %4181 = vrot.lane.b32.xlu1 %v19813_v21, %s19153_s16 }
 0x176   : > { %3019 = vmatpush1.msra.mxu0 %v2960_v45  ;;  %v20076_v32 = vpop.f32.mrf.mxu1 }
 0x177   : > { %v2938_v46 = vpop.permute.xlu0 %2937  ;;  %v2934_v47 = vpop.permute.xlu1 %2933 }
 0x178   : > { %v2958_v48 = vsel %vm2957_vm10, %v2934_v47, %v2936_v43  ;;  %17892 = vmatprep.subr.mxu1 %v2938_v46  ;;  %v2959_v49 = vsel %vm2957_vm10, %v2936_v43, %v2938_v46  ;;  %v836_v39 = vpop.f32.mrf.mxu1  ;;  %vm5997_vm10 = vcmask 375808  }
 0x179   : > { %4177 = vrot.lane.b32.xlu0 %v19843_v33, %s19153_s16  ;;  %4179 = vrot.lane.b32.xlu1 %v19829_v27, %s19153_s16  ;;  %v17773_v35 = vpop.f32.mrf.mxu0  ;;  %v837_v42 = vadd.f32 %v836_v39, %v20001_v0 }
 0x17a   : > { %3020 = vmatprep.subr.mxu0 %v2959_v49  ;;  %17893 = vmatpush3.msra.mxu1 %v2938_v46  ;;  %v20087_v37 = vadd.f32 %v17773_v35, %v17759_v23  ;;  %v20101_v46 = vpop.f32.mrf.mxu1 }
 0x17b   : > { %3021 = vmatpush1.msra.mxu0 %v2958_v48  ;;  %v3204_v1 = vpop.permute.xlu0 %3203  ;;  %v3202_v4 = vpop.permute.xlu1 %3201  ;;  %17895 = vmatmul.mubr.msk.f32.vlgmr.msra.gmra.mxu1 %vm571_vm0, %v16548_v2 }
 0x17c   : > { %17900 = vmatprep.subr.mxu0 %v3204_v1  ;;  %16551 = vmatmul.mubr.msk.f32.vlgmr.msra.gmra.mxu0 %vm571_vm0, %v16547_v44  ;;  %v3213_v51 = vsel %vm3205_vm11, %v3202_v4, %v3204_v1  ;;  %v20089_v38 = vpop.f32.mrf.mxu0  ;;  %v20099_v44 = vld [vmem:[%s25622_s4 + $0x178] sm:$0xff]  ;;  %v842_v49 = vpop.f32.mrf.mxu1 }
 0x17d   : > { %4175 = vrot.lane.b32.xlu0 %v19834_v28, %s19153_s16  ;;  %4441 = vrot.lane.b32.xlu1 %v19760_v7, %s19154_s29 }
 0x17e   : > { %3262 = vmatprep.subr.mxu1 %v3213_v51  ;;  %17901 = vmatpush3.msra.mxu0 %v3204_v1  ;;  %v1072_v45 = vpop.f32.mrf.mxu0  ;;  %v843_v1 = vadd.f32 %v842_v49, %v20015_v3 }
 0x17f   : > { %v3198_v53 = vpop.permute.xlu0 %3197  ;;  %v3200_v54 = vpop.permute.xlu1 %3199  ;;  %3060 = vmatprep.mubr.f32.mxu0 %v19764_v55  ;;  %17897 = vmatprep.mubr.msk.f32.mxu1 %vm571_vm0, %v16549_v52  ;;  %v20107_v47 = vadd.f32 %v1072_v45, %v837_v42 }
 0x180   : > { %v3212_v5 = vsel %vm3205_vm11, %v3200_v54, %v3202_v4  ;;  %17902 = vmatprep.subr.mxu0 %v3198_v53  ;;  %16552 = vmatmul.mubr.msk.f32.gmra.mxu0 %vm571_vm0, %v16548_v2  ;;  %v20109_v48 = vpop.f32.mrf.mxu0 }
 0x181   : > { %4443 = vrot.lane.b32.xlu0 %v19770_v11, %s19154_s29  ;;  %4173 = vrot.lane.b32.xlu1 %v19848_v34, %s19153_s16 }
 0x182   : > { %3263 = vmatpush1.msra.mxu1 %v3212_v5  ;;  %17903 = vmatpush3.msra.mxu0 %v3198_v53 }
 0x183   : > { %v3196_v56 = vpop.permute.xlu0 %3195  ;;  %v3192_v57 = vpop.permute.xlu1 %3191  ;;  %3066 = vmatprep.mubr.f32.mxu0 %v19764_v55  ;;  %17898 = vmatmul.mubr.msk.f32.gmra.mxu1 %vm571_vm0, %v16550_v10 }
 0x184   : > { %v3211_v58 = vsel %vm3205_vm11, %v3196_v56, %v3198_v53  ;;  %17904 = vmatprep.subr.mxu0 %v3192_v57  ;;  %16553 = vmatmul.mubr.msk.f32.gmra.mxu0 %vm571_vm0, %v16549_v52  ;;  %v20117_v53 = vpop.f32.mrf.mxu1 }
 0x185   : > { %4439 = vrot.lane.b32.xlu0 %v19782_v60, %s19154_s29  ;;  %4435 = vrot.lane.b32.xlu1 %v19787_v13, %s19154_s29 }
 0x186   : > { %3264 = vmatprep.subr.mxu1 %v3211_v58  ;;  %17905 = vmatpush3.msra.mxu0 %v3192_v57  ;;  %v848_v5 = vpop.f32.mrf.mxu1 }
 0x187   : > { %v3194_v8 = vpop.permute.xlu0 %3193  ;;  %v3190_v16 = vpop.permute.xlu1 %3189  ;;  %3072 = vmatprep.mubr.f32.mxu0 %v19764_v55  ;;  %3302 = vmatprep.mubr.f32.mxu1 %v19764_v55 }
 0x188   : > { %v3210_v18 = vsel %vm3205_vm11, %v3194_v8, %v3196_v56  ;;  %v3209_v19 = vsel %vm3205_vm11, %v3190_v16, %v3192_v57  ;;  %16554 = vmatmul.mubr.msk.f32.gmra.mxu0 %vm571_vm0, %v16550_v10  ;;  %v1078_v52 = vpop.f32.mrf.mxu0  ;;  %v849_v57 = vadd.f32 %v848_v5, %v20030_v12  ;;  %v20132_v8 = vpop.f32.mrf.mxu1 }
 0x189   : > { %4437 = vrot.lane.b32.xlu0 %v19796_v14, %s19154_s29  ;;  %4433 = vrot.lane.b32.xlu1 %v19801_v15, %s19154_s29  ;;  %v20123_v54 = vadd.f32 %v1078_v52, %v843_v1  ;;  %v16571_v1 = vld [vmem:[%s25622_s4 + $0x180] sm:$0xff] }
 0x18a   : > { %3265 = vmatpush1.msra.mxu1 %v3210_v18  ;;  %17908 = vmatprep.mubr.msk.f32.mxu0 %vm571_vm0, %v20057_v17  ;;  %v20125_v3 = vpop.f32.mrf.mxu0  ;;  %v854_v12 = vpop.f32.mrf.mxu1 }
 0x18b   : > { %3266 = vmatprep.subr.mxu1 %v3209_v19  ;;  %v3186_v26 = vpop.permute.xlu0 %3185  ;;  %v3188_v29 = vpop.permute.xlu1 %3187  ;;  %v855_v20 = vadd.f32 %v854_v12, %v20042_v59 }
 0x18c   : > { %v3208_v30 = vsel %vm3205_vm11, %v3188_v29, %v3190_v16  ;;  %17906 = vmatprep.subr.mxu0 %v3186_v26  ;;  %v1084_v61 = vpop.f32.mrf.mxu0 }
 0x18d   : > { %4429 = vrot.lane.b32.xlu0 %v19813_v21, %s19154_s29  ;;  %4431 = vrot.lane.b32.xlu1 %v19818_v22, %s19154_s29  ;;  %v20138_v16 = vadd.f32 %v1084_v61, %v849_v57 }
 0x18e   : > { %3267 = vmatpush1.msra.mxu1 %v3208_v30  ;;  %17907 = vmatpush3.msra.mxu0 %v3186_v26  ;;  %v20147_v30 = vpop.f32.mrf.mxu1 }
 0x18f   : > { %v3184_v40 = vpop.permute.xlu0 %3183  ;;  %v3450_v41 = vpop.permute.xlu1 %3449  ;;  %17909 = vmatmul.mubr.msk.f32.vlgmr.msra.gmra.mxu0 %vm571_vm0, %v16560_v31 }
 0x190   : > { %v3207_v43 = vsel %vm3205_vm11, %v3184_v40, %v3186_v26  ;;  %17911 = vmatprep.mubr.msk.f32.mxu0 %vm571_vm0, %v20085_v36 }
 0x191   : > { %4427 = vrot.lane.b32.xlu0 %v19829_v27, %s19154_s29  ;;  %4423 = vrot.lane.b32.xlu1 %v19834_v28, %s19154_s29 }
 0x192   : > { %3268 = vmatprep.subr.mxu1 %v3207_v43 }
 0x193   : > { %v3452_v2 = vpop.permute.xlu0 %3451  ;;  %v3182_v0 = vpop.permute.xlu1 %3181  ;;  %17912 = vmatmul.mubr.msk.f32.gmra.mxu0 %vm571_vm0, %v20099_v44 }
 0x194   : > { %v3206_v4 = vsel %vm3205_vm11, %v3182_v0, %v3184_v40  ;;  %v3461_v51 = vsel %vm3453_vm12, %v3450_v41, %v3452_v2  ;;  %3550 = vmatprep.mubr.f32.mxu0 %v19764_v55 }
 0x195   : > { %4425 = vrot.lane.b32.xlu0 %v19843_v33, %s19154_s29  ;;  %4421 = vrot.lane.b32.xlu1 %v19848_v34, %s19154_s29 }
 0x196   : > { %3269 = vmatpush1.msra.mxu1 %v3206_v4  ;;  %3510 = vmatprep.subr.mxu0 %v3461_v51 }
 0x197   : > { %17914 = vmatprep.subr.mxu1 %v3452_v2  ;;  %v3448_v10 = vpop.permute.xlu0 %3447  ;;  %v3444_v56 = vpop.permute.xlu1 %3443  ;;  %16563 = vmatmul.mubr.msk.f32.vlgmr.msra.gmra.mxu1 %vm571_vm0, %v20057_v17 }
 0x198   : > { %v3460_v58 = vsel %vm3453_vm12, %v3448_v10, %v3450_v41  ;;  %17915 = vmatpush3.msra.mxu1 %v3452_v2  ;;  %3308 = vmatprep.mubr.f32.mxu1 %v19764_v55  ;;  %v20140_v17 = vpop.f32.mrf.mxu0 }
 0x199   : > { %4691 = vrot.lane.b32.xlu0 %v19770_v11, %s25632_s18  ;;  %4689 = vrot.lane.b32.xlu1 %v19760_v7, %s25632_s18 }
 0x19a   : > { %3511 = vmatpush1.msra.mxu0 %v3460_v58  ;;  %v1090_v29 = vpop.f32.mrf.mxu0 }
 0x19b   : > { %v3446_v18 = vpop.permute.xlu0 %3445  ;;  %v3442_v19 = vpop.permute.xlu1 %3441  ;;  %16564 = vmatmul.mubr.msk.f32.gmra.mxu1 %vm571_vm0, %v16560_v31  ;;  %v20153_v35 = vadd.f32 %v1090_v29, %v855_v20 }
 0x19c   : > { %v3458_v23 = vsel %vm3453_vm12, %v3442_v19, %v3444_v56  ;;  %17916 = vmatprep.subr.mxu1 %v3446_v18  ;;  %v3459_v26 = vsel %vm3453_vm12, %v3444_v56, %v3446_v18  ;;  %3314 = vmatprep.mubr.f32.mxu1 %v19764_v55  ;;  %v20155_v59 = vpop.f32.mrf.mxu0  ;;  %v17784_v31 = vpop.f32.mrf.mxu1 }
 0x19d   : > { %4685 = vrot.lane.b32.xlu0 %v19796_v14, %s25632_s18  ;;  %4687 = vrot.lane.b32.xlu1 %v19782_v60, %s25632_s18  ;;  %v1185_v41 = vadd.f32 %v17784_v31, %v20066_v24 }
 0x19e   : > { %3512 = vmatprep.subr.mxu0 %v3459_v26  ;;  %17917 = vmatpush3.msra.mxu1 %v3446_v18  ;;  %v17798_v43 = vpop.f32.mrf.mxu0  ;;  %v20162_v45 = vpop.f32.mrf.mxu1  ;;  %v16572_v18 = vld [vmem:[%s25622_s4 + $0x188] sm:$0xff] }
 0x19f   : > { %3513 = vmatpush1.msra.mxu0 %v3458_v23  ;;  %v3438_v39 = vpop.permute.xlu0 %3437  ;;  %v3440_v40 = vpop.permute.xlu1 %3439  ;;  %16565 = vmatmul.mubr.msk.f32.gmra.mxu1 %vm571_vm0, %v20085_v36  ;;  %v20168_v49 = vadd.f32 %v17798_v43, %v1185_v41  ;;  %v16573_v41 = vld [vmem:[%s25622_s4 + $0x190] sm:$0xff] }
 0x1a0   : > { %v3457_v42 = vsel %vm3453_vm12, %v3438_v39, %v3440_v40  ;;  %17918 = vmatprep.subr.mxu1 %v3440_v40  ;;  %3320 = vmatprep.mubr.f32.mxu1 %v19764_v55  ;;  %v20170_v36 = vpop.f32.mrf.mxu0  ;;  %v17787_v24 = vpop.f32.mrf.mxu1 }
 0x1a1   : > { %4683 = vrot.lane.b32.xlu0 %v19787_v13, %s25632_s18  ;;  %4679 = vrot.lane.b32.xlu1 %v19818_v22, %s25632_s18  ;;  %v1191_v4 = vadd.f32 %v17787_v24, %v20087_v37 }
 0x1a2   : > { %3514 = vmatprep.subr.mxu0 %v3457_v42  ;;  %17919 = vmatpush3.msra.mxu1 %v3440_v40  ;;  %v17801_v52 = vpop.f32.mrf.mxu0  ;;  %v20180_v5 = vpop.f32.mrf.mxu1 }
 0x1a3   : > { %v3436_v2 = vpop.permute.xlu0 %3435  ;;  %v3432_v0 = vpop.permute.xlu1 %3431  ;;  %16566 = vmatmul.mubr.msk.f32.gmra.mxu1 %vm571_vm0, %v20099_v44  ;;  %v20186_v44 = vadd.f32 %v17801_v52, %v1191_v4 }
 0x1a4   : > { %v3456_v51 = vsel %vm3453_vm12, %v3436_v2, %v3438_v39  ;;  %17922 = vmatprep.mubr.msk.f32.mxu1 %vm571_vm0, %v16571_v1  ;;  %v20188_v10 = vpop.f32.mrf.mxu0  ;;  %v1320_v56 = vpop.f32.mrf.mxu1 }
 0x1a5   : > { %4681 = vrot.lane.b32.xlu0 %v19801_v15, %s25632_s18  ;;  %4677 = vrot.lane.b32.xlu1 %v19813_v21, %s25632_s18  ;;  %v1428_v58 = vadd.f32 %v1320_v56, %v20107_v47 }
 0x1a6   : > { %3515 = vmatpush1.msra.mxu0 %v3456_v51  ;;  %v1568_v19 = vpop.f32.mrf.mxu0  ;;  %v20196_v20 = vpop.f32.mrf.mxu1 }
 0x1a7   : > { %v3434_v37 = vpop.permute.xlu0 %3433  ;;  %v3430_v57 = vpop.permute.xlu1 %3429  ;;  %v20202_v47 = vadd.f32 %v1568_v19, %v1428_v58 }
 0x1a8   : > { %v3454_v61 = vsel %vm3453_vm12, %v3430_v57, %v3432_v0  ;;  %17920 = vmatprep.subr.mxu1 %v3434_v37  ;;  %v3455_v12 = vsel %vm3453_vm12, %v3432_v0, %v3434_v37  ;;  %v20204_v23 = vpop.f32.mrf.mxu0  ;;  %v1326_v26 = vpop.f32.mrf.mxu1 }
 0x1a9   : > { %4673 = vrot.lane.b32.xlu0 %v19843_v33, %s25632_s18  ;;  %4675 = vrot.lane.b32.xlu1 %v19829_v27, %s25632_s18  ;;  %v1431_v39 = vadd.f32 %v1326_v26, %v20123_v54 }
 0x1aa   : > { %3516 = vmatprep.subr.mxu0 %v3455_v12  ;;  %17921 = vmatpush3.msra.mxu1 %v3434_v37  ;;  %v1574_v42 = vpop.f32.mrf.mxu0  ;;  %v20213_v43 = vpop.f32.mrf.mxu1 }
 0x1ab   : > { %3517 = vmatpush1.msra.mxu0 %v3454_v61  ;;  %v3700_v29 = vpop.permute.xlu0 %3699  ;;  %v3698_v31 = vpop.permute.xlu1 %3697  ;;  %17923 = vmatmul.mubr.msk.f32.vlgmr.msra.gmra.mxu1 %vm571_vm0, %v16572_v18  ;;  %v20219_v54 = vadd.f32 %v1574_v42, %v1431_v39 }
 0x1ac   : > { %17928 = vmatprep.subr.mxu0 %v3700_v29  ;;  %16575 = vmatmul.mubr.msk.f32.vlgmr.msra.gmra.mxu0 %vm571_vm0, %v16571_v1  ;;  %v3709_v40 = vsel %vm3701_vm13, %v3698_v31, %v3700_v29  ;;  %v20221_v24 = vpop.f32.mrf.mxu0  ;;  %v1332_v2 = vpop.f32.mrf.mxu1 }
 0x1ad   : > { %4671 = vrot.lane.b32.xlu0 %v19834_v28, %s25632_s18  ;;  %4937 = vrot.lane.b32.xlu1 %v19760_v7, %s19156_s19  ;;  %25649 = vst [vmem:[#allocation4_spill] sm:$0xff] %v20221_v24  ;;  %v1434_v4 = vadd.f32 %v1332_v2, %v20138_v16  ;;  %v16574_v7 = vld [vmem:[%s25622_s4 + $0x198] sm:$0xff] }
 0x1ae   : > { %3758 = vmatprep.subr.mxu1 %v3709_v40  ;;  %17929 = vmatpush3.msra.mxu0 %v3700_v29  ;;  %v1580_v52 = vpop.f32.mrf.mxu0  ;;  %v20231_v56 = vpop.f32.mrf.mxu1 }
 0x1af   : > { %v3694_v0 = vpop.permute.xlu0 %3693  ;;  %v3696_v1 = vpop.permute.xlu1 %3695  ;;  %3556 = vmatprep.mubr.f32.mxu0 %v19764_v55  ;;  %17925 = vmatprep.mubr.msk.f32.mxu1 %vm571_vm0, %v16573_v41  ;;  %v20237_v37 = vadd.f32 %v1580_v52, %v1434_v4 }
 0x1b0   : > { %v3708_v51 = vsel %vm3701_vm13, %v3696_v1, %v3698_v31  ;;  %17930 = vmatprep.subr.mxu0 %v3694_v0  ;;  %16576 = vmatmul.mubr.msk.f32.gmra.mxu0 %vm571_vm0, %v16572_v18  ;;  %v20239_v16 = vpop.f32.mrf.mxu0  ;;  %v1338_v57 = vpop.f32.mrf.mxu1 }
 0x1b1   : > { %4939 = vrot.lane.b32.xlu0 %v19770_v11, %s19156_s19  ;;  %4669 = vrot.lane.b32.xlu1 %v19848_v34, %s25632_s18  ;;  %25650 = vst [vmem:[#allocation5_spill] sm:$0xff] %v20239_v16  ;;  %v1437_v12 = vadd.f32 %v1338_v57, %v20153_v35 }
 0x1b2   : > { %3759 = vmatpush1.msra.mxu1 %v3708_v51  ;;  %17931 = vmatpush3.msra.mxu0 %v3694_v0  ;;  %v1586_v18 = vpop.f32.mrf.mxu0  ;;  %v20246_v19 = vpop.f32.mrf.mxu1 }
 0x1b3   : > { %v3692_v58 = vpop.permute.xlu0 %3691  ;;  %v3688_v61 = vpop.permute.xlu1 %3687  ;;  %3562 = vmatprep.mubr.f32.mxu0 %v19764_v55  ;;  %17926 = vmatmul.mubr.msk.f32.gmra.mxu1 %vm571_vm0, %v16574_v7  ;;  %v20252_v26 = vadd.f32 %v1586_v18, %v1437_v12 }
 0x1b4   : > { %v3707_v11 = vsel %vm3701_vm13, %v3692_v58, %v3694_v0  ;;  %17932 = vmatprep.subr.mxu0 %v3688_v61  ;;  %16577 = vmatmul.mubr.msk.f32.gmra.mxu0 %vm571_vm0, %v16573_v41  ;;  %v20254_v29 = vpop.f32.mrf.mxu0  ;;  %v17812_v35 = vpop.f32.mrf.mxu1 }
 0x1b5   : > { %4935 = vrot.lane.b32.xlu0 %v19782_v60, %s19156_s19  ;;  %4931 = vrot.lane.b32.xlu1 %v19787_v13, %s19156_s19  ;;  %25651 = vst [vmem:[#allocation6_spill] sm:$0xff] %v20254_v29  ;;  %v16583_v60 = vld [vmem:[%s25622_s4 + $0x1a0] sm:$0xff]  ;;  %v1681_v40 = vadd.f32 %v17812_v35, %v20168_v49 }
 0x1b6   : > { %3760 = vmatprep.subr.mxu1 %v3707_v11  ;;  %17933 = vmatpush3.msra.mxu0 %v3688_v61  ;;  %v20265_v2 = vpop.f32.mrf.mxu1 }
 0x1b7   : > { %v3690_v31 = vpop.permute.xlu0 %3689  ;;  %v3686_v39 = vpop.permute.xlu1 %3685  ;;  %3568 = vmatprep.mubr.f32.mxu0 %v19764_v55  ;;  %3798 = vmatprep.mubr.f32.mxu1 %v19764_v55 }
 0x1b8   : > { %v3706_v13 = vsel %vm3701_vm13, %v3690_v31, %v3692_v58  ;;  %v3705_v41 = vsel %vm3701_vm13, %v3686_v39, %v3688_v61  ;;  %16578 = vmatmul.mubr.msk.f32.gmra.mxu0 %vm571_vm0, %v16574_v7  ;;  %v17826_v42 = vpop.f32.mrf.mxu0  ;;  %v17815_v0 = vpop.f32.mrf.mxu1 }
 0x1b9   : > { %4933 = vrot.lane.b32.xlu0 %v19796_v14, %s19156_s19  ;;  %4929 = vrot.lane.b32.xlu1 %v19801_v15, %s19156_s19  ;;  %v20271_v55 = vadd.f32 %v17826_v42, %v1681_v40  ;;  %v1687_v51 = vadd.f32 %v17815_v0, %v20186_v44  ;;  %v16584_v14 = vld [vmem:[%s25622_s4 + $0x1a8] sm:$0xff]  ;;  %v20290_v44 = vld [vmem:[%s25622_s4 + $0x1b0] sm:$0xff] }
 0x1ba   : > { %3761 = vmatpush1.msra.mxu1 %v3706_v13  ;;  %17936 = vmatprep.mubr.msk.f32.mxu0 %vm571_vm0, %v16583_v60  ;;  %v20274_v49 = vpop.f32.mrf.mxu0  ;;  %v20281_v52 = vpop.f32.mrf.mxu1 }
 0x1bb   : > { %25652 = vst [vmem:[#allocation7_spill] sm:$0xff] %v20274_v49  ;;  %3762 = vmatprep.subr.mxu1 %v3705_v41  ;;  %v3682_v1 = vpop.permute.xlu0 %3681  ;;  %v3684_v4 = vpop.permute.xlu1 %3683  ;;  %25653 = vst [vmem:[#allocation8_spill] sm:$0xff] %v20281_v52 }
 0x1bc   : > { %v3704_v7 = vsel %vm3701_vm13, %v3684_v4, %v3686_v39  ;;  %17934 = vmatprep.subr.mxu0 %v3682_v1  ;;  %v17829_v15 = vpop.f32.mrf.mxu0 }
 0x1bd   : > { %4925 = vrot.lane.b32.xlu0 %v19813_v21, %s19156_s19  ;;  %4927 = vrot.lane.b32.xlu1 %v19818_v22, %s19156_s19  ;;  %v20292_v57 = vadd.f32 %v17829_v15, %v1687_v51  ;;  %v20301_v21 = vld [vmem:[%s25622_s4 + $0x1b8] sm:$0xff] }
 0x1be   : > { %3763 = vmatpush1.msra.mxu1 %v3704_v7  ;;  %17935 = vmatpush3.msra.mxu0 %v3682_v1 }
 0x1bf   : > { %v3680_v58 = vpop.permute.xlu0 %3679  ;;  %v3946_v61 = vpop.permute.xlu1 %3945  ;;  %17937 = vmatmul.mubr.msk.f32.vlgmr.msra.gmra.mxu0 %vm571_vm0, %v16584_v14 }
 0x1c0   : > { %v3703_v12 = vsel %vm3701_vm13, %v3680_v58, %v3682_v1  ;;  %17939 = vmatprep.mubr.msk.f32.mxu0 %vm571_vm0, %v20290_v44  ;;  %v1816_v22 = vpop.f32.mrf.mxu1 }
 0x1c1   : > { %4923 = vrot.lane.b32.xlu0 %v19829_v27, %s19156_s19  ;;  %4919 = vrot.lane.b32.xlu1 %v19834_v28, %s19156_s19  ;;  %v20308_v11 = vadd.f32 %v1816_v22, %v20202_v47  ;;  %v20316_v27 = vld [vmem:[#allocation2] sm:$0xff] }
 0x1c2   : > { %3764 = vmatprep.subr.mxu1 %v3703_v12  ;;  %v20310_v18 = vpop.f32.mrf.mxu1 }
 0x1c3   : > { %25654 = vst [vmem:[#allocation9_spill] sm:$0xff] %v20310_v18  ;;  %v3948_v35 = vpop.permute.xlu0 %3947  ;;  %v3678_v31 = vpop.permute.xlu1 %3677  ;;  %17940 = vmatmul.mubr.msk.f32.gmra.mxu0 %vm571_vm0, %v20301_v21 }
 0x1c4   : > { %v3702_v39 = vsel %vm3701_vm13, %v3678_v31, %v3680_v58  ;;  %v3957_v40 = vsel %vm3949_vm14, %v3946_v61, %v3948_v35  ;;  %4046 = vmatprep.mubr.f32.mxu0 %v20316_v27  ;;  %v1822_v28 = vpop.f32.mrf.mxu1 }
 0x1c5   : > { %4921 = vrot.lane.b32.xlu0 %v19843_v33, %s19156_s19  ;;  %4917 = vrot.lane.b32.xlu1 %v19848_v34, %s19156_s19  ;;  %v20324_v47 = vadd.f32 %v1822_v28, %v20219_v54  ;;  %v19108_v34 = vld [vmem:[%s19253_s30 + $0x70] sm:$0xff]  ;;  %v19109_v54 = vld [vmem:[%s19253_s30 + $0x68] sm:$0xff] }
 0x1c6   : > { %3765 = vmatpush1.msra.mxu1 %v3702_v39  ;;  %4006 = vmatprep.subr.mxu0 %v3957_v40  ;;  %v20326_v13 = vpop.f32.mrf.mxu1  ;;  %v19112_v39 = vld [vmem:[%s19253_s30 + $0x48] sm:$0xff]  ;;  %v20361_v40 = vpop.f32.mrf.mxu0 }
 0x1c7   : > { %25655 = vst [vmem:[#allocation10_spill] sm:$0xff] %v20326_v13  ;;  %17942 = vmatprep.subr.mxu1 %v3948_v35  ;;  %v3944_v41 = vpop.permute.xlu0 %3943  ;;  %v3940_v42 = vpop.permute.xlu1 %3939  ;;  %16587 = vmatmul.mubr.msk.f32.vlgmr.msra.gmra.mxu1 %vm571_vm0, %v16583_v60  ;;  %25658 = vst [vmem:[#allocation13_spill] sm:$0xff] %v20361_v40 }
 0x1c8   : > { %v3956_v0 = vsel %vm3949_vm14, %v3944_v41, %v3946_v61  ;;  %17943 = vmatpush3.msra.mxu1 %v3948_v35  ;;  %3804 = vmatprep.mubr.f32.mxu1 %v20316_v27  ;;  %v1828_v33 = vpop.f32.mrf.mxu1  ;;  %v19110_v61 = vld [vmem:[%s19253_s30 + $0x50] sm:$0xff]  ;;  %v16595_v41 = vld [vmem:[%s25622_s4 + $0x1c0] sm:$0xff] }
 0x1c9   : > { %5187 = vrot.lane.b32.xlu0 %v19108_v34, %s19157_s15  ;;  %5185 = vrot.lane.b32.xlu1 %v19109_v54, %s19157_s15  ;;  %v20336_v1 = vadd.f32 %v1828_v33, %v20237_v37  ;;  %v19111_v37 = vld [vmem:[%s19253_s30 + $0x60] sm:$0xff]  ;;  %v19115_v34 = vld [vmem:[%s19253_s30 + $0x28] sm:$0xff] }
 0x1ca   : > { %4007 = vmatpush1.msra.mxu0 %v3956_v0  ;;  %v20338_v60 = vpop.f32.mrf.mxu1  ;;  %v19114_v33 = vld [vmem:[%s19253_s30 + $0x40] sm:$0xff] }
 0x1cb   : > { %25656 = vst [vmem:[#allocation11_spill] sm:$0xff] %v20338_v60  ;;  %v3942_v4 = vpop.permute.xlu0 %3941  ;;  %v3938_v51 = vpop.permute.xlu1 %3937  ;;  %16588 = vmatmul.mubr.msk.f32.gmra.mxu1 %vm571_vm0, %v16584_v14 }
 0x1cc   : > { %v3954_v7 = vsel %vm3949_vm14, %v3938_v51, %v3940_v42  ;;  %17944 = vmatprep.subr.mxu1 %v3942_v4  ;;  %v3955_v15 = vsel %vm3949_vm14, %v3940_v42, %v3942_v4  ;;  %3810 = vmatprep.mubr.f32.mxu1 %v20316_v27  ;;  %v1834_v58 = vpop.f32.mrf.mxu1 }
 0x1cd   : > { %5181 = vrot.lane.b32.xlu0 %v19110_v61, %s19157_s15  ;;  %5183 = vrot.lane.b32.xlu1 %v19111_v37, %s19157_s15  ;;  %v20349_v12 = vadd.f32 %v1834_v58, %v20252_v26  ;;  %v19113_v26 = vld [vmem:[%s19253_s30 + $0x30] sm:$0xff] }
 0x1ce   : > { %4008 = vmatprep.subr.mxu0 %v3955_v15  ;;  %17945 = vmatpush3.msra.mxu1 %v3942_v4  ;;  %v20355_v31 = vpop.f32.mrf.mxu1 }
 0x1cf   : > { %4009 = vmatpush1.msra.mxu0 %v3954_v7  ;;  %v3934_v14 = vpop.permute.xlu0 %3933  ;;  %v3936_v22 = vpop.permute.xlu1 %3935  ;;  %16589 = vmatmul.mubr.msk.f32.gmra.mxu1 %vm571_vm0, %v20290_v44  ;;  %25657 = vst [vmem:[#allocation12_spill] sm:$0xff] %v20355_v31 }
 0x1d0   : > { %v3953_v35 = vsel %vm3949_vm14, %v3934_v14, %v3936_v22  ;;  %17946 = vmatprep.subr.mxu1 %v3936_v22  ;;  %3816 = vmatprep.mubr.f32.mxu1 %v20316_v27 }
 0x1d1   : > { %5179 = vrot.lane.b32.xlu0 %v19112_v39, %s19157_s15  ;;  %5175 = vrot.lane.b32.xlu1 %v19113_v26, %s19157_s15  ;;  %v20397_v39 = vld [vmem:[%s19253_s30 + $0x68] sm:$0xff] }
 0x1d2   : > { %4010 = vmatprep.subr.mxu0 %v3953_v35  ;;  %17947 = vmatpush3.msra.mxu1 %v3936_v22  ;;  %v19116_v22 = vld [vmem:[%s19253_s30 + $0x10] sm:$0xff]  ;;  %v19117_v35 = vld [vmem:[%s19253_s30 + $0x20] sm:$0xff] }
 0x1d3   : > { %v3932_v44 = vpop.permute.xlu0 %3931  ;;  %v3928_v28 = vpop.permute.xlu1 %3927  ;;  %16590 = vmatmul.mubr.msk.f32.gmra.mxu1 %vm571_vm0, %v20301_v21 }
 0x1d4   : > { %v3952_v42 = vsel %vm3949_vm14, %v3932_v44, %v3934_v14  ;;  %17950 = vmatprep.mubr.msk.f32.mxu1 %vm571_vm0, %v16595_v41  ;;  %v17840_v0 = vpop.f32.mrf.mxu1 }
 0x1d5   : > { %5177 = vrot.lane.b32.xlu0 %v19114_v33, %s19157_s15  ;;  %5173 = vrot.lane.b32.xlu1 %v19115_v34, %s19157_s15  ;;  %v20375_v54 = vadd.f32 %v17840_v0, %v20271_v55  ;;  %v16596_v55 = vld [vmem:[%s25622_s4 + $0x1c8] sm:$0xff]  ;;  %v20410_v33 = vld [vmem:[%s19253_s30 + $0x70] sm:$0xff] }
 0x1d6   : > { %4011 = vmatpush1.msra.mxu0 %v3952_v42  ;;  %v2064_v21 = vpop.f32.mrf.mxu0  ;;  %v20377_v4 = vpop.f32.mrf.mxu1  ;;  %v19118_v0 = vld [vmem:[%s19253_s30 + $0x8] sm:$0xff] }
 0x1d7   : > { %25659 = vst [vmem:[#allocation14_spill] sm:$0xff] %v20377_v4  ;;  %v3930_v51 = vpop.permute.xlu0 %3929  ;;  %v3926_v7 = vpop.permute.xlu1 %3925  ;;  %v20380_v15 = vadd.f32 %v2064_v21, %v20308_v11 }
 0x1d8   : > { %v3950_v58 = vsel %vm3949_vm14, %v3926_v7, %v3928_v28  ;;  %17948 = vmatprep.subr.mxu1 %v3930_v51  ;;  %v3951_v61 = vsel %vm3949_vm14, %v3928_v28, %v3930_v51  ;;  %v20387_v37 = vpop.f32.mrf.mxu0  ;;  %v17843_v14 = vpop.f32.mrf.mxu1  ;;  %vm6257_vm14 = vcmask 367616  }
 0x1d9   : > { %25660 = vst [vmem:[#allocation15_spill] sm:$0xff] %v20387_v37  ;;  %5169 = vrot.lane.b32.xlu0 %v19116_v22, %s19157_s15  ;;  %5171 = vrot.lane.b32.xlu1 %v19117_v35, %s19157_s15  ;;  %v20394_v11 = vadd.f32 %v17843_v14, %v20292_v57  ;;  %v20429_v14 = vld [vmem:[%s19253_s30 + $0x60] sm:$0xff]  ;;  %v20432_v22 = vld [vmem:[%s19253_s30 + $0x48] sm:$0xff] }
 0x1da   : > { %4012 = vmatprep.subr.mxu0 %v3951_v61  ;;  %17949 = vmatpush3.msra.mxu1 %v3930_v51 }
 0x1db   : > { %4013 = vmatpush1.msra.mxu0 %v3950_v58  ;;  %v4196_v26 = vpop.permute.xlu0 %4195  ;;  %v4194_v44 = vpop.permute.xlu1 %4193  ;;  %17951 = vmatmul.mubr.msk.f32.vlgmr.msra.gmra.mxu1 %vm571_vm0, %v16596_v55  ;;  %v19119_v58 = vld [vmem:[%s19253_s30] sm:$0xff] }
 0x1dc   : > { %17956 = vmatprep.subr.mxu0 %v4196_v26  ;;  %16599 = vmatmul.mubr.msk.f32.vlgmr.msra.gmra.mxu0 %vm571_vm0, %v16595_v41  ;;  %v4205_v28 = vsel %vm4197_vm15, %v4194_v44, %v4196_v26  ;;  %v2070_v42 = vpop.f32.mrf.mxu0  ;;  %v16597_v41 = vld [vmem:[%s25622_s4 + $0x1d0] sm:$0xff] }
 0x1dd   : > { %5167 = vrot.lane.b32.xlu0 %v19118_v0, %s19157_s15  ;;  %5471 = vrot.lane.b32.xlu1 %v20397_v39, %s19158_s24  ;;  %v20407_v57 = vadd.f32 %v2070_v42, %v20324_v47  ;;  %v20451_v42 = vld [vmem:[%s19253_s30 + $0x40] sm:$0xff] }
 0x1de   : > { %4254 = vmatprep.subr.mxu1 %v4205_v28  ;;  %17957 = vmatpush3.msra.mxu0 %v4196_v26  ;;  %v20415_v34 = vpop.f32.mrf.mxu0  ;;  %v20448_v28 = vld [vmem:[%s19253_s30 + $0x50] sm:$0xff] }
 0x1df   : > { %25661 = vst [vmem:[#allocation16_spill] sm:$0xff] %v20415_v34  ;;  %v4190_v21 = vpop.permute.xlu0 %4189  ;;  %v4192_v51 = vpop.permute.xlu1 %4191  ;;  %4052 = vmatprep.mubr.f32.mxu0 %v20316_v27  ;;  %17953 = vmatprep.mubr.msk.f32.mxu1 %vm571_vm0, %v16597_v41 }
 0x1e0   : > { %v4204_v47 = vsel %vm4197_vm15, %v4192_v51, %v4194_v44  ;;  %17958 = vmatprep.subr.mxu0 %v4190_v21  ;;  %16600 = vmatmul.mubr.msk.f32.gmra.mxu0 %vm571_vm0, %v16596_v55  ;;  %v2076_v7 = vpop.f32.mrf.mxu0  ;;  %v16598_v55 = vld [vmem:[%s25622_s4 + $0x1d8] sm:$0xff] }
 0x1e1   : > { %5473 = vrot.lane.b32.xlu0 %v20410_v33, %s19158_s24  ;;  %5165 = vrot.lane.b32.xlu1 %v19119_v58, %s19157_s15  ;;  %v20426_v61 = vadd.f32 %v2076_v7, %v20336_v1  ;;  %s19164_s15 = smov 42  }
 0x1e2   : > { %4255 = vmatpush1.msra.mxu1 %v4204_v47  ;;  %17959 = vmatpush3.msra.mxu0 %v4190_v21  ;;  %v20437_v35 = vpop.f32.mrf.mxu0 }
 0x1e3   : > { %25662 = vst [vmem:[#allocation17_spill] sm:$0xff] %v20437_v35  ;;  %v4188_v26 = vpop.permute.xlu0 %4187  ;;  %v4184_v44 = vpop.permute.xlu1 %4183  ;;  %4058 = vmatprep.mubr.f32.mxu0 %v20316_v27  ;;  %17954 = vmatmul.mubr.msk.f32.gmra.mxu1 %vm571_vm0, %v16598_v55  ;;  %v20472_v35 = vld [vmem:[%s19253_s30 + $0x30] sm:$0xff] }
 0x1e4   : > { %v4203_v1 = vsel %vm4197_vm15, %v4188_v26, %v4190_v21  ;;  %17960 = vmatprep.subr.mxu0 %v4184_v44  ;;  %16601 = vmatmul.mubr.msk.f32.gmra.mxu0 %vm571_vm0, %v16597_v41  ;;  %v16607_v41 = vld [vmem:[%s25622_s4 + $0x1e0] sm:$0xff] }
 0x1e5   : > { %5469 = vrot.lane.b32.xlu0 %v20429_v14, %s19158_s24  ;;  %5463 = vrot.lane.b32.xlu1 %v20432_v22, %s19158_s24 }
 0x1e6   : > { %4256 = vmatprep.subr.mxu1 %v4203_v1  ;;  %17961 = vmatpush3.msra.mxu0 %v4184_v44  ;;  %v2082_v0 = vpop.f32.mrf.mxu0  ;;  %v20469_v1 = vld [vmem:[%s19253_s30 + $0x28] sm:$0xff] }
 0x1e7   : > { %v4186_v51 = vpop.permute.xlu0 %4185  ;;  %v4182_v21 = vpop.permute.xlu1 %4181  ;;  %4064 = vmatprep.mubr.f32.mxu0 %v20316_v27  ;;  %4294 = vmatprep.mubr.f32.mxu1 %v20316_v27  ;;  %v20459_v47 = vadd.f32 %v2082_v0, %v20349_v12  ;;  %v16608_v0 = vld [vmem:[%s25622_s4 + $0x1e8] sm:$0xff] }
 0x1e8   : > { %v4202_v7 = vsel %vm4197_vm15, %v4186_v51, %v4188_v26  ;;  %v4201_v58 = vsel %vm4197_vm15, %v4182_v21, %v4184_v44  ;;  %16602 = vmatmul.mubr.msk.f32.gmra.mxu0 %vm571_vm0, %v16598_v55  ;;  %v20475_v12 = vpop.f32.mrf.mxu0  ;;  %v20488_v51 = vld [vmem:[%s25622_s4 + $0x1f0] sm:$0xff] }
 0x1e9   : > { %5465 = vrot.lane.b32.xlu0 %v20448_v28, %s19158_s24  ;;  %5461 = vrot.lane.b32.xlu1 %v20451_v42, %s19158_s24  ;;  %25663 = vst [vmem:[#allocation18_spill] sm:$0xff] %v20475_v12 }
 0x1ea   : > { %4257 = vmatpush1.msra.mxu1 %v4202_v7  ;;  %17964 = vmatprep.mubr.msk.f32.mxu0 %vm571_vm0, %v16607_v41  ;;  %v20494_v7 = vld [vmem:[%s19253_s30 + $0x8] sm:$0xff] }
 0x1eb   : > { %4258 = vmatprep.subr.mxu1 %v4201_v58  ;;  %v4178_v26 = vpop.permute.xlu0 %4177  ;;  %v4180_v55 = vpop.permute.xlu1 %4179 }
 0x1ec   : > { %v4200_v44 = vsel %vm4197_vm15, %v4180_v55, %v4182_v21  ;;  %17962 = vmatprep.subr.mxu0 %v4178_v26  ;;  %v20491_v21 = vld [vmem:[%s19253_s30 + $0x20] sm:$0xff] }
 0x1ed   : > { %5455 = vrot.lane.b32.xlu0 %v20469_v1, %s19158_s24  ;;  %5457 = vrot.lane.b32.xlu1 %v20472_v35, %s19158_s24 }
 0x1ee   : > { %4259 = vmatpush1.msra.mxu1 %v4200_v44  ;;  %17963 = vmatpush3.msra.mxu0 %v4178_v26  ;;  %v17854_v58 = vpop.f32.mrf.mxu0  ;;  %v20506_v44 = vld [vmem:[%s25622_s4 + $0x1f8] sm:$0xff] }
 0x1ef   : > { %v4176_v55 = vpop.permute.xlu0 %4175  ;;  %17965 = vmatmul.mubr.msk.f32.vlgmr.msra.gmra.mxu0 %vm571_vm0, %v16608_v0  ;;  %v4442_v12 = vpop.permute.xlu1 %4441  ;;  %v20498_v34 = vadd.f32 %v17854_v58, %v20375_v54  ;;  %v20515_v54 = vld [vmem:[%s19253_s30 + $0x10] sm:$0xff] }
 0x1f0   : > { %v4199_v4 = vsel %vm4197_vm15, %v4176_v55, %v4178_v26  ;;  %17967 = vmatprep.mubr.msk.f32.mxu0 %vm571_vm0, %v20488_v51  ;;  %v20508_v31 = vpop.f32.mrf.mxu0  ;;  %v20518_v26 = vld [vmem:[%s19253_s30] sm:$0xff] }
 0x1f1   : > { %25664 = vst [vmem:[#allocation19_spill] sm:$0xff] %v20508_v31  ;;  %5453 = vrot.lane.b32.xlu0 %v20491_v21, %s19158_s24  ;;  %5447 = vrot.lane.b32.xlu1 %v20494_v7, %s19158_s24 }
 0x1f2   : > { %4260 = vmatprep.subr.mxu1 %v4199_v4  ;;  %v17857_v58 = vpop.f32.mrf.mxu0  ;;  %v20528_v4 = vpop.f32.mrf.mxu1 }
 0x1f3   : > { %v4444_v37 = vpop.permute.xlu0 %4443  ;;  %17968 = vmatmul.mubr.msk.f32.gmra.mxu0 %vm571_vm0, %v20506_v44  ;;  %v4174_v31 = vpop.permute.xlu1 %4173  ;;  %v20523_v60 = vadd.f32 %v17857_v58, %v20394_v11  ;;  %25665 = vst [vmem:[#allocation20_spill] sm:$0xff] %v20528_v4  ;;  %v20535_v11 = vld [vmem:[%s19253_s30 + $0x78] sm:$0xff] }
 0x1f4   : > { %v4198_v13 = vsel %vm4197_vm15, %v4174_v31, %v4176_v55  ;;  %v4453_v40 = vsel %vm4445_vm1, %v4442_v12, %v4444_v37  ;;  %4542 = vmatprep.mubr.f32.mxu0 %v20316_v27  ;;  %v20538_v58 = vld [vmem:[%s19253_s30 + $0x58] sm:$0xff]  ;;  %vm6517_vm15 = vcmask 359424  }
 0x1f5   : > { %5449 = vrot.lane.b32.xlu0 %v20515_v54, %s19158_s24  ;;  %5445 = vrot.lane.b32.xlu1 %v20518_v26, %s19158_s24 }
 0x1f6   : > { %4261 = vmatpush1.msra.mxu1 %v4198_v13  ;;  %4502 = vmatprep.subr.mxu0 %v4453_v40  ;;  %v20551_v40 = vld [vmem:[%s19253_s30 + $0x38] sm:$0xff] }
 0x1f7   : > { %16611 = vmatmul.mubr.msk.f32.vlgmr.msra.gmra.mxu1 %vm571_vm0, %v16607_v41  ;;  %17970 = vmatprep.subr.mxu1 %v4444_v37  ;;  %v4440_v31 = vpop.permute.xlu0 %4439  ;;  %v4436_v55 = vpop.permute.xlu1 %4435  ;;  %v20554_v41 = vld [vmem:[%s19253_s30 + $0x18] sm:$0xff]  ;;  %s19159_s30 = smov 47  }
 0x1f8   : > { %v4452_v4 = vsel %vm4445_vm1, %v4440_v31, %v4442_v12  ;;  %17971 = vmatpush3.msra.mxu1 %v4444_v37  ;;  %4300 = vmatprep.mubr.f32.mxu1 %v20316_v27  ;;  %v2312_v49 = vpop.f32.mrf.mxu1 }
 0x1f9   : > { %5475 = vrot.lane.b32.xlu0 %v20535_v11, %s19158_s24  ;;  %5467 = vrot.lane.b32.xlu1 %v20538_v58, %s19158_s24  ;;  %v20548_v13 = vadd.f32 %v2312_v49, %v20380_v15 }
 0x1fa   : > { %4503 = vmatpush1.msra.mxu0 %v4452_v4  ;;  %v20556_v18 = vpop.f32.mrf.mxu1 }
 0x1fb   : > { %25666 = vst [vmem:[#allocation21_spill] sm:$0xff] %v20556_v18  ;;  %16612 = vmatmul.mubr.msk.f32.gmra.mxu1 %vm571_vm0, %v16608_v0  ;;  %v4438_v37 = vpop.permute.xlu0 %4437  ;;  %v4434_v12 = vpop.permute.xlu1 %4433 }
 0x1fc   : > { %v4450_v31 = vsel %vm4445_vm1, %v4434_v12, %v4436_v55  ;;  %17972 = vmatprep.subr.mxu1 %v4438_v37  ;;  %4306 = vmatprep.mubr.f32.mxu1 %v20316_v27  ;;  %v4451_v29 = vsel %vm4445_vm1, %v4436_v55, %v4438_v37  ;;  %v2318_v49 = vpop.f32.mrf.mxu1 }
 0x1fd   : > { %5459 = vrot.lane.b32.xlu0 %v20551_v40, %s19158_s24  ;;  %5451 = vrot.lane.b32.xlu1 %v20554_v41, %s19158_s24  ;;  %v20567_v15 = vadd.f32 %v2318_v49, %v20407_v57  ;;  %s19161_s24 = smov 45  }
 0x1fe   : > { %4504 = vmatprep.subr.mxu0 %v4451_v29  ;;  %17973 = vmatpush3.msra.mxu1 %v4438_v37  ;;  %v20569_v0 = vpop.f32.mrf.mxu1  ;;  %v16619_v29 = vld [vmem:[%s25622_s4 + $0x200] sm:$0xff] }
 0x1ff   : > { %25667 = vst [vmem:[#allocation22_spill] sm:$0xff] %v20569_v0  ;;  %16613 = vmatmul.mubr.msk.f32.gmra.mxu1 %vm571_vm0, %v20488_v51  ;;  %4505 = vmatpush1.msra.mxu0 %v4450_v31  ;;  %v4430_v4 = vpop.permute.xlu0 %4429  ;;  %v4432_v55 = vpop.permute.xlu1 %4431 }
 0x200   : > { %4312 = vmatprep.mubr.f32.mxu1 %v20316_v27  ;;  %v4449_v12 = vsel %vm4445_vm1, %v4430_v4, %v4432_v55  ;;  %17974 = vmatprep.subr.mxu1 %v4432_v55  ;;  %v2324_v18 = vpop.f32.mrf.mxu1 }
 0x201   : > { %5733 = vrot.lane.b32.xlu0 %v20410_v33, %s19159_s30  ;;  %5735 = vrot.lane.b32.xlu1 %v20535_v11, %s19159_s30  ;;  %v20583_v57 = vadd.f32 %v2324_v18, %v20426_v61 }
 0x202   : > { %4506 = vmatprep.subr.mxu0 %v4449_v12  ;;  %17975 = vmatpush3.msra.mxu1 %v4432_v55  ;;  %v20585_v51 = vpop.f32.mrf.mxu1  ;;  %v16620_v12 = vld [vmem:[%s25622_s4 + $0x208] sm:$0xff] }
 0x203   : > { %25668 = vst [vmem:[#allocation23_spill] sm:$0xff] %v20585_v51  ;;  %16614 = vmatmul.mubr.msk.f32.gmra.mxu1 %vm571_vm0, %v20506_v44  ;;  %v4428_v37 = vpop.permute.xlu0 %4427  ;;  %v4424_v31 = vpop.permute.xlu1 %4423 }
 0x204   : > { %v4448_v49 = vsel %vm4445_vm1, %v4428_v37, %v4430_v4  ;;  %17978 = vmatprep.mubr.msk.f32.mxu1 %vm571_vm0, %v16619_v29  ;;  %v2330_v0 = vpop.f32.mrf.mxu1  ;;  %v20603_v37 = vpop.f32.mrf.mxu0 }
 0x205   : > { %5725 = vrot.lane.b32.xlu0 %v20448_v28, %s19159_s30  ;;  %5727 = vrot.lane.b32.xlu1 %v20538_v58, %s19159_s30  ;;  %v20596_v18 = vadd.f32 %v2330_v0, %v20459_v47  ;;  %25669 = vst [vmem:[#allocation24_spill] sm:$0xff] %v20603_v37 }
 0x206   : > { %4507 = vmatpush1.msra.mxu0 %v4448_v49  ;;  %v20605_v51 = vpop.f32.mrf.mxu1 }
 0x207   : > { %v4426_v61 = vpop.permute.xlu0 %4425  ;;  %v4422_v55 = vpop.permute.xlu1 %4421  ;;  %25670 = vst [vmem:[#allocation25_spill] sm:$0xff] %v20605_v51 }
 0x208   : > { %v4446_v44 = vsel %vm4445_vm1, %v4422_v55, %v4424_v31  ;;  %17976 = vmatprep.subr.mxu1 %v4426_v61  ;;  %v4447_v4 = vsel %vm4445_vm1, %v4424_v31, %v4426_v61  ;;  %v16621_v31 = vld [vmem:[%s25622_s4 + $0x210] sm:$0xff] }
 0x209   : > { %5731 = vrot.lane.b32.xlu0 %v20397_v39, %s19159_s30  ;;  %5729 = vrot.lane.b32.xlu1 %v20429_v14, %s19159_s30 }
 0x20a   : > { %4508 = vmatprep.subr.mxu0 %v4447_v4  ;;  %17977 = vmatpush3.msra.mxu1 %v4426_v61  ;;  %v16622_v61 = vld [vmem:[%s25622_s4 + $0x218] sm:$0xff] }
 0x20b   : > { %4509 = vmatpush1.msra.mxu0 %v4446_v44  ;;  %17979 = vmatmul.mubr.msk.f32.vlgmr.msra.gmra.mxu1 %vm571_vm0, %v16620_v12  ;;  %v4692_v47 = vpop.permute.xlu0 %4691  ;;  %v4690_v0 = vpop.permute.xlu1 %4689 }
 0x20c   : > { %16623 = vmatmul.mubr.msk.f32.vlgmr.msra.gmra.mxu0 %vm571_vm0, %v16619_v29  ;;  %17984 = vmatprep.subr.mxu0 %v4692_v47  ;;  %v4701_v49 = vsel %vm4693_vm2, %v4690_v0, %v4692_v47  ;;  %v2560_v55 = vpop.f32.mrf.mxu0  ;;  %v17868_v51 = vpop.f32.mrf.mxu1 }
 0x20d   : > { %5717 = vrot.lane.b32.xlu0 %v20472_v35, %s19159_s30  ;;  %5719 = vrot.lane.b32.xlu1 %v20551_v40, %s19159_s30  ;;  %v20625_v44 = vadd.f32 %v2560_v55, %v20548_v13  ;;  %v20628_v29 = vadd.f32 %v17868_v51, %v20498_v34 }
 0x20e   : > { %17981 = vmatprep.mubr.msk.f32.mxu1 %vm571_vm0, %v16621_v31  ;;  %4750 = vmatprep.subr.mxu1 %v4701_v49  ;;  %v20631_v4 = vpop.f32.mrf.mxu0  ;;  %v20637_v24 = vpop.f32.mrf.mxu1 }
 0x20f   : > { %25671 = vst [vmem:[#allocation26_spill] sm:$0xff] %v20631_v4  ;;  %17985 = vmatpush3.msra.mxu0 %v4692_v47  ;;  %4548 = vmatprep.mubr.f32.mxu0 %v20316_v27  ;;  %v4686_v37 = vpop.permute.xlu0 %4685  ;;  %v4688_v16 = vpop.permute.xlu1 %4687  ;;  %25672 = vst [vmem:[#allocation27_spill] sm:$0xff] %v20637_v24 }
 0x210   : > { %17982 = vmatmul.mubr.msk.f32.gmra.mxu1 %vm571_vm0, %v16622_v61  ;;  %16624 = vmatmul.mubr.msk.f32.gmra.mxu0 %vm571_vm0, %v16620_v12  ;;  %v4700_v13 = vsel %vm4693_vm2, %v4688_v16, %v4690_v0  ;;  %v2566_v55 = vpop.f32.mrf.mxu0 }
 0x211   : > { %17986 = vmatprep.subr.mxu0 %v4686_v37  ;;  %5723 = vrot.lane.b32.xlu0 %v20432_v22, %s19159_s30  ;;  %v20642_v34 = vadd.f32 %v2566_v55, %v20567_v15 }
 0x212   : > { %5721 = vrot.lane.b32.xlu1 %v20451_v42, %s19159_s30  ;;  %4751 = vmatpush1.msra.mxu1 %v4700_v13  ;;  %v20646_v51 = vpop.f32.mrf.mxu0 }
 0x213   : > { %25673 = vst [vmem:[#allocation28_spill] sm:$0xff] %v20646_v51  ;;  %17987 = vmatpush3.msra.mxu0 %v4686_v37  ;;  %4554 = vmatprep.mubr.f32.mxu0 %v20316_v27  ;;  %v4684_v16 = vpop.permute.xlu0 %4683  ;;  %v4680_v12 = vpop.permute.xlu1 %4679 }
 0x214   : > { %16625 = vmatmul.mubr.msk.f32.gmra.mxu0 %vm571_vm0, %v16621_v31  ;;  %v4699_v47 = vsel %vm4693_vm2, %v4684_v16, %v4686_v37  ;;  %17988 = vmatprep.subr.mxu0 %v4680_v12  ;;  %v2572_v0 = vpop.f32.mrf.mxu0  ;;  %v17871_v49 = vpop.f32.mrf.mxu1 }
 0x215   : > { %5709 = vrot.lane.b32.xlu0 %v20515_v54, %s19159_s30  ;;  %4752 = vmatprep.subr.mxu1 %v4699_v47  ;;  %v20654_v15 = vadd.f32 %v2572_v0, %v20583_v57  ;;  %v2679_v13 = vadd.f32 %v17871_v49, %v20523_v60  ;;  %v16631_v60 = vld [vmem:[%s25622_s4 + $0x220] sm:$0xff]  ;;  %v16632_v49 = vld [vmem:[%s25622_s4 + $0x228] sm:$0xff] }
 0x216   : > { %5711 = vrot.lane.b32.xlu1 %v20554_v41, %s19159_s30  ;;  %4560 = vmatprep.mubr.f32.mxu0 %v20316_v27  ;;  %v20660_v31 = vpop.f32.mrf.mxu0  ;;  %v20712_v52 = vpop.f32.mrf.mxu1 }
 0x217   : > { %25674 = vst [vmem:[#allocation29_spill] sm:$0xff] %v20660_v31  ;;  %17989 = vmatpush3.msra.mxu0 %v4680_v12  ;;  %v4682_v37 = vpop.permute.xlu0 %4681  ;;  %v4678_v55 = vpop.permute.xlu1 %4677  ;;  %4790 = vmatprep.mubr.f32.mxu1 %v20316_v27  ;;  %25677 = vst [vmem:[#allocation32_spill] sm:$0xff] %v20712_v52 }
 0x218   : > { %v4698_v51 = vsel %vm4693_vm2, %v4682_v37, %v4684_v16  ;;  %16626 = vmatmul.mubr.msk.f32.gmra.mxu0 %vm571_vm0, %v16622_v61  ;;  %v4697_v57 = vsel %vm4693_vm2, %v4678_v55, %v4680_v12  ;;  %v2578_v47 = vpop.f32.mrf.mxu0 }
 0x219   : > { %5715 = vrot.lane.b32.xlu0 %v20469_v1, %s19159_s30  ;;  %4753 = vmatpush1.msra.mxu1 %v4698_v51  ;;  %v20672_v0 = vadd.f32 %v2578_v47, %v20596_v18  ;;  %v16633_v18 = vld [vmem:[%s25622_s4 + $0x230] sm:$0xff]  ;;  %v20696_v47 = vld [vmem:[%s25622_s4 + $0x238] sm:$0xff] }
 0x21a   : > { %5713 = vrot.lane.b32.xlu1 %v20491_v21, %s19159_s30  ;;  %4754 = vmatprep.subr.mxu1 %v4697_v57  ;;  %v20681_v37 = vpop.f32.mrf.mxu0 }
 0x21b   : > { %v4674_v16 = vpop.permute.xlu0 %4673  ;;  %v4676_v61 = vpop.permute.xlu1 %4675  ;;  %17992 = vmatprep.mubr.msk.f32.mxu0 %vm571_vm0, %v16631_v60  ;;  %25675 = vst [vmem:[#allocation30_spill] sm:$0xff] %v20681_v37 }
 0x21c   : > { %v4696_v12 = vsel %vm4693_vm2, %v4676_v61, %v4678_v55  ;;  %17990 = vmatprep.subr.mxu0 %v4674_v16 }
 0x21d   : > { %5707 = vrot.lane.b32.xlu0 %v20494_v7, %s19159_s30  ;;  %4755 = vmatpush1.msra.mxu1 %v4696_v12 }
 0x21e   : > { %5991 = vrot.lane.b32.xlu1 %v20397_v39, %s19160_s20  ;;  %17991 = vmatpush3.msra.mxu0 %v4674_v16 }
 0x21f   : > { %17993 = vmatmul.mubr.msk.f32.vlgmr.msra.gmra.mxu0 %vm571_vm0, %v16632_v49  ;;  %v4672_v51 = vpop.permute.xlu0 %4671  ;;  %v4938_v55 = vpop.permute.xlu1 %4937 }
 0x220   : > { %v4695_v57 = vsel %vm4693_vm2, %v4672_v51, %v4674_v16  ;;  %17995 = vmatprep.mubr.msk.f32.mxu0 %vm571_vm0, %v16633_v18  ;;  %v17882_v61 = vpop.f32.mrf.mxu0 }
 0x221   : > { %5993 = vrot.lane.b32.xlu0 %v20410_v33, %s19160_s20  ;;  %4756 = vmatprep.subr.mxu1 %v4695_v57  ;;  %v20701_v12 = vadd.f32 %v17882_v61, %v20628_v29 }
 0x222   : > { %5705 = vrot.lane.b32.xlu1 %v20518_v26, %s19159_s30  ;;  %v20705_v16 = vpop.f32.mrf.mxu0 }
 0x223   : > { %25676 = vst [vmem:[#allocation31_spill] sm:$0xff] %v20705_v16  ;;  %17996 = vmatmul.mubr.msk.f32.gmra.mxu0 %vm571_vm0, %v20696_v47  ;;  %v4940_v37 = vpop.permute.xlu0 %4939  ;;  %v4670_v31 = vpop.permute.xlu1 %4669 }
 0x224   : > { %v4694_v24 = vsel %vm4693_vm2, %v4670_v31, %v4672_v51  ;;  %v4949_v4 = vsel %vm4941_vm3, %v4938_v55, %v4940_v37  ;;  %5038 = vmatprep.mubr.f32.mxu0 %v20316_v27  ;;  %v17885_v57 = vpop.f32.mrf.mxu0 }
 0x225   : > { %5989 = vrot.lane.b32.xlu0 %v20429_v14, %s19160_s20  ;;  %4757 = vmatpush1.msra.mxu1 %v4694_v24  ;;  %v20716_v29 = vadd.f32 %v17885_v57, %v2679_v13 }
 0x226   : > { %5983 = vrot.lane.b32.xlu1 %v20432_v22, %s19160_s20  ;;  %4998 = vmatprep.subr.mxu0 %v4949_v4 }
 0x227   : > { %16635 = vmatmul.mubr.msk.f32.vlgmr.msra.gmra.mxu1 %vm571_vm0, %v16631_v60  ;;  %17998 = vmatprep.subr.mxu1 %v4940_v37  ;;  %v4936_v31 = vpop.permute.xlu0 %4935  ;;  %v4932_v51 = vpop.permute.xlu1 %4931 }
 0x228   : > { %v4948_v61 = vsel %vm4941_vm3, %v4936_v31, %v4938_v55  ;;  %17999 = vmatpush3.msra.mxu1 %v4940_v37  ;;  %4796 = vmatprep.mubr.f32.mxu1 %v20316_v27  ;;  %v2808_v16 = vpop.f32.mrf.mxu1 }
 0x229   : > { %5985 = vrot.lane.b32.xlu0 %v20448_v28, %s19160_s20  ;;  %4999 = vmatpush1.msra.mxu0 %v4948_v61  ;;  %v20726_v24 = vadd.f32 %v2808_v16, %v20625_v44 }
 0x22a   : > { %5981 = vrot.lane.b32.xlu1 %v20451_v42, %s19160_s20  ;;  %v20730_v4 = vpop.f32.mrf.mxu1 }
 0x22b   : > { %25678 = vst [vmem:[#allocation33_spill] sm:$0xff] %v20730_v4  ;;  %16636 = vmatmul.mubr.msk.f32.gmra.mxu1 %vm571_vm0, %v16632_v49  ;;  %v4934_v13 = vpop.permute.xlu0 %4933  ;;  %v4930_v60 = vpop.permute.xlu1 %4929 }
 0x22c   : > { %v4946_v37 = vsel %vm4941_vm3, %v4930_v60, %v4932_v51  ;;  %18000 = vmatprep.subr.mxu1 %v4934_v13  ;;  %4802 = vmatprep.mubr.f32.mxu1 %v20316_v27  ;;  %v4947_v55 = vsel %vm4941_vm3, %v4932_v51, %v4934_v13  ;;  %v2814_v57 = vpop.f32.mrf.mxu1 }
 0x22d   : > { %5975 = vrot.lane.b32.xlu0 %v20469_v1, %s19160_s20  ;;  %5000 = vmatprep.subr.mxu0 %v4947_v55  ;;  %v20739_v44 = vadd.f32 %v2814_v57, %v20642_v34  ;;  %v16643_v34 = vld [vmem:[%s25622_s4 + $0x240] sm:$0xff] }
 0x22e   : > { %5977 = vrot.lane.b32.xlu1 %v20472_v35, %s19160_s20  ;;  %18001 = vmatpush3.msra.mxu1 %v4934_v13  ;;  %v20743_v49 = vpop.f32.mrf.mxu1 }
 0x22f   : > { %25679 = vst [vmem:[#allocation34_spill] sm:$0xff] %v20743_v49  ;;  %16637 = vmatmul.mubr.msk.f32.gmra.mxu1 %vm571_vm0, %v16633_v18  ;;  %5001 = vmatpush1.msra.mxu0 %v4946_v37  ;;  %v4926_v16 = vpop.permute.xlu0 %4925  ;;  %v4928_v31 = vpop.permute.xlu1 %4927 }
 0x230   : > { %4808 = vmatprep.mubr.f32.mxu1 %v20316_v27  ;;  %v4945_v51 = vsel %vm4941_vm3, %v4926_v16, %v4928_v31  ;;  %18002 = vmatprep.subr.mxu1 %v4928_v31  ;;  %v2820_v61 = vpop.f32.mrf.mxu1 }
 0x231   : > { %5973 = vrot.lane.b32.xlu0 %v20491_v21, %s19160_s20  ;;  %5002 = vmatprep.subr.mxu0 %v4945_v51  ;;  %v20754_v13 = vadd.f32 %v2820_v61, %v20654_v15  ;;  %v16644_v61 = vld [vmem:[%s25622_s4 + $0x248] sm:$0xff] }
 0x232   : > { %5967 = vrot.lane.b32.xlu1 %v20494_v7, %s19160_s20  ;;  %18003 = vmatpush3.msra.mxu1 %v4928_v31  ;;  %v20758_v18 = vpop.f32.mrf.mxu1 }
 0x233   : > { %25680 = vst [vmem:[#allocation35_spill] sm:$0xff] %v20758_v18  ;;  %16638 = vmatmul.mubr.msk.f32.gmra.mxu1 %vm571_vm0, %v20696_v47  ;;  %v4924_v60 = vpop.permute.xlu0 %4923  ;;  %v4920_v37 = vpop.permute.xlu1 %4919 }
 0x234   : > { %v4944_v55 = vsel %vm4941_vm3, %v4924_v60, %v4926_v16  ;;  %18006 = vmatprep.mubr.msk.f32.mxu1 %vm571_vm0, %v16643_v34  ;;  %v2826_v57 = vpop.f32.mrf.mxu1  ;;  %v20776_v60 = vpop.f32.mrf.mxu0 }
 0x235   : > { %5969 = vrot.lane.b32.xlu0 %v20515_v54, %s19160_s20  ;;  %5003 = vmatpush1.msra.mxu0 %v4944_v55  ;;  %v20767_v15 = vadd.f32 %v2826_v57, %v20672_v0  ;;  %25681 = vst [vmem:[#allocation36_spill] sm:$0xff] %v20776_v60  ;;  %v16645_v0 = vld [vmem:[%s25622_s4 + $0x250] sm:$0xff] }
 0x236   : > { %5965 = vrot.lane.b32.xlu1 %v20518_v26, %s19160_s20  ;;  %v20778_v55 = vpop.f32.mrf.mxu1 }
 0x237   : > { %v4922_v31 = vpop.permute.xlu0 %4921  ;;  %v4918_v51 = vpop.permute.xlu1 %4917  ;;  %25682 = vst [vmem:[#allocation37_spill] sm:$0xff] %v20778_v55 }
 0x238   : > { %v4942_v47 = vsel %vm4941_vm3, %v4918_v51, %v4920_v37  ;;  %18004 = vmatprep.subr.mxu1 %v4922_v31  ;;  %v4943_v16 = vsel %vm4941_vm3, %v4920_v37, %v4922_v31 }
 0x239   : > { %5995 = vrot.lane.b32.xlu0 %v20535_v11, %s19160_s20  ;;  %5004 = vmatprep.subr.mxu0 %v4943_v16 }
 0x23a   : > { %5987 = vrot.lane.b32.xlu1 %v20538_v58, %s19160_s20  ;;  %18005 = vmatpush3.msra.mxu1 %v4922_v31  ;;  %v16646_v31 = vld [vmem:[%s25622_s4 + $0x258] sm:$0xff] }
 0x23b   : > { %5005 = vmatpush1.msra.mxu0 %v4942_v47  ;;  %18007 = vmatmul.mubr.msk.f32.vlgmr.msra.gmra.mxu1 %vm571_vm0, %v16644_v61  ;;  %v5188_v37 = vpop.permute.xlu0 %5187  ;;  %v5186_v57 = vpop.permute.xlu1 %5185 }
 0x23c   : > { %16647 = vmatmul.mubr.msk.f32.vlgmr.msra.gmra.mxu0 %vm571_vm0, %v16643_v34  ;;  %18012 = vmatprep.subr.mxu0 %v5188_v37  ;;  %v5197_v51 = vsel %vm5189_vm4, %v5186_v57, %v5188_v37  ;;  %v3056_v16 = vpop.f32.mrf.mxu0  ;;  %v17896_v55 = vpop.f32.mrf.mxu1 }
 0x23d   : > { %5979 = vrot.lane.b32.xlu0 %v20551_v40, %s19160_s20  ;;  %18009 = vmatprep.mubr.msk.f32.mxu1 %vm571_vm0, %v16645_v0  ;;  %v20797_v47 = vadd.f32 %v3056_v16, %v20726_v24  ;;  %v20800_v18 = vadd.f32 %v17896_v55, %v20701_v12 }
 0x23e   : > { %5971 = vrot.lane.b32.xlu1 %v20554_v41, %s19160_s20  ;;  %5246 = vmatprep.subr.mxu1 %v5197_v51  ;;  %v20804_v34 = vpop.f32.mrf.mxu0  ;;  %v20810_v12 = vpop.f32.mrf.mxu1 }
 0x23f   : > { %25683 = vst [vmem:[#allocation38_spill] sm:$0xff] %v20804_v34  ;;  %18013 = vmatpush3.msra.mxu0 %v5188_v37  ;;  %5044 = vmatprep.mubr.f32.mxu0 %v20316_v27  ;;  %v5182_v49 = vpop.permute.xlu0 %5181  ;;  %v5184_v60 = vpop.permute.xlu1 %5183  ;;  %25684 = vst [vmem:[#allocation39_spill] sm:$0xff] %v20810_v12 }
 0x240   : > { %18010 = vmatmul.mubr.msk.f32.gmra.mxu1 %vm571_vm0, %v16646_v31  ;;  %16648 = vmatmul.mubr.msk.f32.gmra.mxu0 %vm571_vm0, %v16644_v61  ;;  %v5196_v24 = vsel %vm5189_vm4, %v5184_v60, %v5186_v57  ;;  %v3062_v16 = vpop.f32.mrf.mxu0 }
 0x241   : > { %18014 = vmatprep.subr.mxu0 %v5182_v49  ;;  %6253 = vrot.lane.b32.xlu0 %v20410_v33, %s19161_s24  ;;  %v20815_v55 = vadd.f32 %v3062_v16, %v20739_v44 }
 0x242   : > { %6255 = vrot.lane.b32.xlu1 %v20535_v11, %s19161_s24  ;;  %5247 = vmatpush1.msra.mxu1 %v5196_v24  ;;  %v20819_v37 = vpop.f32.mrf.mxu0 }
 0x243   : > { %25685 = vst [vmem:[#allocation40_spill] sm:$0xff] %v20819_v37  ;;  %18015 = vmatpush3.msra.mxu0 %v5182_v49  ;;  %5050 = vmatprep.mubr.f32.mxu0 %v20316_v27  ;;  %v5180_v61 = vpop.permute.xlu0 %5179  ;;  %v5176_v60 = vpop.permute.xlu1 %5175 }
 0x244   : > { %16649 = vmatmul.mubr.msk.f32.gmra.mxu0 %vm571_vm0, %v16645_v0  ;;  %v5195_v57 = vsel %vm5189_vm4, %v5180_v61, %v5182_v49  ;;  %18016 = vmatprep.subr.mxu0 %v5176_v60  ;;  %v3068_v51 = vpop.f32.mrf.mxu0  ;;  %v17899_v12 = vpop.f32.mrf.mxu1 }
 0x245   : > { %6245 = vrot.lane.b32.xlu0 %v20448_v28, %s19161_s24  ;;  %5248 = vmatprep.subr.mxu1 %v5195_v57  ;;  %v20827_v44 = vadd.f32 %v3068_v51, %v20754_v13  ;;  %v3175_v24 = vadd.f32 %v17899_v12, %v20716_v29  ;;  %v16655_v29 = vld [vmem:[%s25622_s4 + $0x260] sm:$0xff] }
 0x246   : > { %6247 = vrot.lane.b32.xlu1 %v20538_v58, %s19161_s24  ;;  %5056 = vmatprep.mubr.f32.mxu0 %v20316_v27  ;;  %v20833_v0 = vpop.f32.mrf.mxu0 }
 0x247   : > { %25686 = vst [vmem:[#allocation41_spill] sm:$0xff] %v20833_v0  ;;  %18017 = vmatpush3.msra.mxu0 %v5176_v60  ;;  %v5178_v49 = vpop.permute.xlu0 %5177  ;;  %v5174_v16 = vpop.permute.xlu1 %5173  ;;  %5286 = vmatprep.mubr.f32.mxu1 %v20316_v27 }
 0x248   : > { %v5194_v37 = vsel %vm5189_vm4, %v5178_v49, %v5180_v61  ;;  %16650 = vmatmul.mubr.msk.f32.gmra.mxu0 %vm571_vm0, %v16646_v31  ;;  %v5193_v13 = vsel %vm5189_vm4, %v5174_v16, %v5176_v60  ;;  %v3074_v12 = vpop.f32.mrf.mxu0  ;;  %v16656_v60 = vld [vmem:[%s25622_s4 + $0x268] sm:$0xff] }
 0x249   : > { %6251 = vrot.lane.b32.xlu0 %v20397_v39, %s19161_s24  ;;  %5249 = vmatpush1.msra.mxu1 %v5194_v37  ;;  %v20845_v57 = vadd.f32 %v3074_v12, %v20767_v15  ;;  %v16657_v15 = vld [vmem:[%s25622_s4 + $0x270] sm:$0xff] }
 0x24a   : > { %6249 = vrot.lane.b32.xlu1 %v20429_v14, %s19161_s24  ;;  %5250 = vmatprep.subr.mxu1 %v5193_v13  ;;  %v20854_v51 = vpop.f32.mrf.mxu0  ;;  %v16658_v13 = vld [vmem:[%s25622_s4 + $0x278] sm:$0xff] }
 0x24b   : > { %v5170_v27 = vpop.permute.xlu0 %5169  ;;  %v5172_v31 = vpop.permute.xlu1 %5171  ;;  %18020 = vmatprep.mubr.msk.f32.mxu0 %vm571_vm0, %v16655_v29  ;;  %25687 = vst [vmem:[#allocation42_spill] sm:$0xff] %v20854_v51 }
 0x24c   : > { %v5192_v61 = vsel %vm5189_vm4, %v5172_v31, %v5174_v16  ;;  %18018 = vmatprep.subr.mxu0 %v5170_v27 }
 0x24d   : > { %6237 = vrot.lane.b32.xlu0 %v20472_v35, %s19161_s24  ;;  %5251 = vmatpush1.msra.mxu1 %v5192_v61 }
 0x24e   : > { %6239 = vrot.lane.b32.xlu1 %v20551_v40, %s19161_s24  ;;  %18019 = vmatpush3.msra.mxu0 %v5170_v27 }
 0x24f   : > { %18021 = vmatmul.mubr.msk.f32.vlgmr.msra.gmra.mxu0 %vm571_vm0, %v16656_v60  ;;  %v5168_v37 = vpop.permute.xlu0 %5167  ;;  %v5472_v49 = vpop.permute.xlu1 %5471 }
 0x250   : > { %v5191_v16 = vsel %vm5189_vm4, %v5168_v37, %v5170_v27  ;;  %18023 = vmatprep.mubr.msk.f32.mxu0 %vm571_vm0, %v16657_v15  ;;  %v17910_v12 = vpop.f32.mrf.mxu0 }
 0x251   : > { %6243 = vrot.lane.b32.xlu0 %v20432_v22, %s19161_s24  ;;  %5252 = vmatprep.subr.mxu1 %v5191_v16  ;;  %v20872_v31 = vadd.f32 %v17910_v12, %v20800_v18  ;;  %v20884_v16 = vld [vmem:[#allocation2] sm:$0xff]  ;;  %v20887_v12 = vpop.f32.mrf.mxu1 }
 0x252   : > { %6241 = vrot.lane.b32.xlu1 %v20451_v42, %s19161_s24  ;;  %v20876_v61 = vpop.f32.mrf.mxu0 }
 0x253   : > { %25688 = vst [vmem:[#allocation43_spill] sm:$0xff] %v20876_v61  ;;  %18024 = vmatmul.mubr.msk.f32.gmra.mxu0 %vm571_vm0, %v16658_v13  ;;  %v20879_v27 = vpop.permute.xlu0 %5473  ;;  %v5166_v51 = vpop.permute.xlu1 %5165 }
 0x254   : > { %v5190_v0 = vsel %vm5189_vm4, %v5166_v51, %v5168_v37  ;;  %v5488_v34 = vsel %vm5477_vm5, %v5472_v49, %v20879_v27  ;;  %5578 = vmatprep.mubr.f32.mxu0 %v20884_v16  ;;  %v17913_v18 = vpop.f32.mrf.mxu0 }
 0x255   : > { %6229 = vrot.lane.b32.xlu0 %v20515_v54, %s19161_s24  ;;  %5253 = vmatpush1.msra.mxu1 %v5190_v0  ;;  %v20891_v61 = vadd.f32 %v17913_v18, %v3175_v24 }
 0x256   : > { %6231 = vrot.lane.b32.xlu1 %v20554_v41, %s19161_s24  ;;  %5538 = vmatprep.subr.mxu0 %v5488_v34 }
 0x257   : > { %16659 = vmatmul.mubr.msk.f32.vlgmr.msra.gmra.mxu1 %vm571_vm0, %v16655_v29  ;;  %v5470_v51 = vpop.permute.xlu0 %5469  ;;  %v5464_v37 = vpop.permute.xlu1 %5463 }
 0x258   : > { %v5487_v4 = vsel %vm5477_vm5, %v5470_v51, %v5472_v49  ;;  %5292 = vmatprep.mubr.f32.mxu1 %v20884_v16  ;;  %v3304_v52 = vpop.f32.mrf.mxu1 }
 0x259   : > { %6235 = vrot.lane.b32.xlu0 %v20469_v1, %s19161_s24  ;;  %5539 = vmatpush1.msra.mxu0 %v5487_v4  ;;  %v3412_v24 = vadd.f32 %v3304_v52, %v20797_v47 }
 0x25a   : > { %6233 = vrot.lane.b32.xlu1 %v20491_v21, %s19161_s24  ;;  %v20903_v0 = vpop.f32.mrf.mxu1 }
 0x25b   : > { %16660 = vmatmul.mubr.msk.f32.gmra.mxu1 %vm571_vm0, %v16656_v60  ;;  %v5466_v34 = vpop.permute.xlu0 %5465  ;;  %v5462_v29 = vpop.permute.xlu1 %5461 }
 0x25c   : > { %v5484_v49 = vsel %vm5477_vm5, %v5462_v29, %v5464_v37  ;;  %5298 = vmatprep.mubr.f32.mxu1 %v20884_v16  ;;  %v5485_v18 = vsel %vm5477_vm5, %v5464_v37, %v5466_v34  ;;  %v3310_v51 = vpop.f32.mrf.mxu1 }
 0x25d   : > { %6227 = vrot.lane.b32.xlu0 %v20494_v7, %s19161_s24  ;;  %5540 = vmatprep.subr.mxu0 %v5485_v18  ;;  %v20912_v52 = vadd.f32 %v3310_v51, %v20815_v55  ;;  %v16667_v18 = vld [vmem:[%s25622_s4 + $0x280] sm:$0xff] }
 0x25e   : > { %6511 = vrot.lane.b32.xlu1 %v20397_v39, %s19162_s17  ;;  %5541 = vmatpush1.msra.mxu0 %v5484_v49  ;;  %v20916_v4 = vpop.f32.mrf.mxu1 }
 0x25f   : > { %16661 = vmatmul.mubr.msk.f32.gmra.mxu1 %vm571_vm0, %v16657_v15  ;;  %v5456_v47 = vpop.permute.xlu0 %5455  ;;  %v5458_v60 = vpop.permute.xlu1 %5457 }
 0x260   : > { %5304 = vmatprep.mubr.f32.mxu1 %v20884_v16  ;;  %v5482_v37 = vsel %vm5477_vm5, %v5456_v47, %v5458_v60  ;;  %v3316_v29 = vpop.f32.mrf.mxu1 }
 0x261   : > { %6513 = vrot.lane.b32.xlu0 %v20410_v33, %s19162_s17  ;;  %5542 = vmatprep.subr.mxu0 %v5482_v37  ;;  %v20924_v55 = vadd.f32 %v3316_v29, %v20827_v44 }
 0x262   : > { %6225 = vrot.lane.b32.xlu1 %v20518_v26, %s19161_s24  ;;  %v20928_v39 = vpop.f32.mrf.mxu1  ;;  %s19167_s24 = smov 8  }
 0x263   : > { %25689 = vst [vmem:[#allocation44_spill] sm:$0xff] %v20928_v39  ;;  %16662 = vmatmul.mubr.msk.f32.gmra.mxu1 %vm571_vm0, %v16658_v13  ;;  %v5454_v15 = vpop.permute.xlu0 %5453  ;;  %v5448_v49 = vpop.permute.xlu1 %5447 }
 0x264   : > { %v5481_v51 = vsel %vm5477_vm5, %v5454_v15, %v5456_v47  ;;  %18034 = vmatprep.mubr.msk.f32.mxu1 %vm571_vm0, %v16667_v18  ;;  %v3322_v33 = vpop.f32.mrf.mxu1  ;;  %v20945_v47 = vpop.f32.mrf.mxu0 }
 0x265   : > { %6509 = vrot.lane.b32.xlu0 %v20429_v14, %s19162_s17  ;;  %5543 = vmatpush1.msra.mxu0 %v5481_v51  ;;  %v20939_v44 = vadd.f32 %v3322_v33, %v20845_v57 }
 0x266   : > { %6503 = vrot.lane.b32.xlu1 %v20432_v22, %s19162_s17  ;;  %v20947_v15 = vpop.f32.mrf.mxu1 }
 0x267   : > { %v5450_v13 = vpop.permute.xlu0 %5449  ;;  %v5446_v37 = vpop.permute.xlu1 %5445 }
 0x268   : > { %v5478_v29 = vsel %vm5477_vm5, %v5446_v37, %v5448_v49  ;;  %v5479_v39 = vsel %vm5477_vm5, %v5448_v49, %v5450_v13  ;;  %v16668_v49 = vld [vmem:[%s25622_s4 + $0x288] sm:$0xff] }
 0x269   : > { %6505 = vrot.lane.b32.xlu0 %v20448_v28, %s19162_s17  ;;  %5544 = vmatprep.subr.mxu0 %v5479_v39 }
 0x26a   : > { %6501 = vrot.lane.b32.xlu1 %v20451_v42, %s19162_s17  ;;  %5545 = vmatpush1.msra.mxu0 %v5478_v29 }
 0x26b   : > { %v5476_v14 = vpop.permute.xlu0 %5475  ;;  %16671 = vmatmul.mubr.msk.f32.vlgmr.msra.gmra.mxu0 %vm571_vm0, %v16667_v18  ;;  %v5468_v22 = vpop.permute.xlu1 %5467 }
 0x26c   : > { %v5489_v57 = vsel %vm5477_vm5, %v20879_v27, %v5476_v14  ;;  %5584 = vmatprep.mubr.f32.mxu0 %v20884_v16  ;;  %v3552_v51 = vpop.f32.mrf.mxu0  ;;  %v17924_v28 = vpop.f32.mrf.mxu1  ;;  %v5486_v27 = vsel %vm5477_vm5, %v5466_v34, %v5468_v22 }
 0x26d   : > { %6495 = vrot.lane.b32.xlu0 %v20469_v1, %s19162_s17  ;;  %18026 = vmatprep.subr.mxu1 %v5489_v57  ;;  %v20962_v42 = vadd.f32 %v3552_v51, %v3412_v24  ;;  %v20965_v39 = vadd.f32 %v17924_v28, %v20872_v31  ;;  %v16669_v31 = vld [vmem:[%s25622_s4 + $0x290] sm:$0xff] }
 0x26e   : > { %6497 = vrot.lane.b32.xlu1 %v20472_v35, %s19162_s17  ;;  %18027 = vmatpush3.msra.mxu1 %v5489_v57  ;;  %v20970_v18 = vpop.f32.mrf.mxu0  ;;  %v20978_v24 = vpop.f32.mrf.mxu1 }
 0x26f   : > { %v5460_v33 = vpop.permute.xlu0 %5459  ;;  %16672 = vmatmul.mubr.msk.f32.gmra.mxu0 %vm571_vm0, %v16668_v49  ;;  %v5452_v37 = vpop.permute.xlu1 %5451  ;;  %18028 = vmatprep.subr.mxu1 %v5486_v27 }
 0x270   : > { %18029 = vmatpush3.msra.mxu1 %v5486_v27  ;;  %v5483_v1 = vsel %vm5477_vm5, %v5458_v60, %v5460_v33  ;;  %5590 = vmatprep.mubr.f32.mxu0 %v20884_v16  ;;  %v3558_v35 = vpop.f32.mrf.mxu0  ;;  %v5480_v60 = vsel %vm5477_vm5, %v5450_v13, %v5452_v37  ;;  %vm6970_vm5 = vcmask 1047888  }
 0x271   : > { %6493 = vrot.lane.b32.xlu0 %v20491_v21, %s19162_s17  ;;  %18030 = vmatprep.subr.mxu1 %v5483_v1  ;;  %v20983_v34 = vadd.f32 %v3558_v35, %v20912_v52 }
 0x272   : > { %6487 = vrot.lane.b32.xlu1 %v20494_v7, %s19162_s17  ;;  %18031 = vmatpush3.msra.mxu1 %v5483_v1  ;;  %v20988_v29 = vpop.f32.mrf.mxu0  ;;  %v16670_v7 = vld [vmem:[%s25622_s4 + $0x298] sm:$0xff] }
 0x273   : > { %v5734_v14 = vpop.permute.xlu0 %5733  ;;  %16673 = vmatmul.mubr.msk.f32.gmra.mxu0 %vm571_vm0, %v16669_v31  ;;  %v5736_v22 = vpop.permute.xlu1 %5735  ;;  %18032 = vmatprep.subr.mxu1 %v5480_v60 }
 0x274   : > { %18033 = vmatpush3.msra.mxu1 %v5480_v60  ;;  %v5749_v21 = vsel %vm5737_vm9, %v5734_v14, %v5736_v22  ;;  %5596 = vmatprep.mubr.f32.mxu0 %v20884_v16  ;;  %v3564_v52 = vpop.f32.mrf.mxu0  ;;  %v17927_v57 = vpop.f32.mrf.mxu1 }
 0x275   : > { %6489 = vrot.lane.b32.xlu0 %v20515_v54, %s19162_s17  ;;  %18035 = vmatmul.mubr.msk.f32.vlgmr.msra.gmra.mxu1 %vm571_vm0, %v16668_v49  ;;  %v21000_v13 = vadd.f32 %v3564_v52, %v20924_v55  ;;  %v3671_v51 = vadd.f32 %v17927_v57, %v20891_v61  ;;  %v21013_v55 = vld [vmem:[%s25622_s4 + $0x2a0] sm:$0xff] }
 0x276   : > { %6485 = vrot.lane.b32.xlu1 %v20518_v26, %s19162_s17  ;;  %18040 = vmatprep.subr.mxu0 %v5749_v21  ;;  %v21005_v28 = vpop.f32.mrf.mxu0  ;;  %v21040_v52 = vpop.f32.mrf.mxu1 }
 0x277   : > { %18041 = vmatpush3.msra.mxu0 %v5749_v21  ;;  %v5726_v27 = vpop.permute.xlu0 %5725  ;;  %v5728_v54 = vpop.permute.xlu1 %5727  ;;  %18037 = vmatprep.mubr.msk.f32.mxu1 %vm571_vm0, %v16669_v31 }
 0x278   : > { %16674 = vmatmul.mubr.msk.f32.gmra.mxu0 %vm571_vm0, %v16670_v7  ;;  %v5746_v49 = vsel %vm5737_vm9, %v5726_v27, %v5728_v54  ;;  %v3570_v61 = vpop.f32.mrf.mxu0 }
 0x279   : > { %6515 = vrot.lane.b32.xlu0 %v20535_v11, %s19162_s17  ;;  %18038 = vmatmul.mubr.msk.f32.gmra.mxu1 %vm571_vm0, %v16670_v7  ;;  %v21019_v26 = vadd.f32 %v3570_v61, %v20939_v44 }
 0x27a   : > { %6507 = vrot.lane.b32.xlu1 %v20538_v58, %s19162_s17  ;;  %18042 = vmatprep.subr.mxu0 %v5746_v49  ;;  %v21027_v11 = vpop.f32.mrf.mxu0 }
 0x27b   : > { %18043 = vmatpush3.msra.mxu0 %v5746_v49  ;;  %v5732_v33 = vpop.permute.xlu0 %5731  ;;  %v5730_v37 = vpop.permute.xlu1 %5729  ;;  %18048 = vmatprep.mubr.msk.f32.mxu0 %vm571_vm0, %v21013_v55 }
 0x27c   : > { %v5747_v1 = vsel %vm5737_vm9, %v5730_v37, %v5732_v33  ;;  %v5748_v31 = vsel %vm5737_vm9, %v5732_v33, %v5734_v14  ;;  %5838 = vmatprep.mubr.f32.mxu1 %v20884_v16 }
 0x27d   : > { %6499 = vrot.lane.b32.xlu0 %v20551_v40, %s19162_s17  ;;  %5798 = vmatprep.subr.mxu1 %v5748_v31 }
 0x27e   : > { %6491 = vrot.lane.b32.xlu1 %v20554_v41, %s19162_s17  ;;  %5799 = vmatpush1.msra.mxu1 %v5747_v1  ;;  %v16680_v1 = vld [vmem:[%s25622_s4 + $0x2a8] sm:$0xff]  ;;  %s17249_s17 = sshll.u32 %s25936_s26, 5 }
 0x27f   : > { %v5718_v58 = vpop.permute.xlu0 %5717  ;;  %v5720_v44 = vpop.permute.xlu1 %5719 }
 0x280   : > { %v5743_v35 = vsel %vm5737_vm9, %v5718_v58, %v5720_v44  ;;  %v17938_v60 = vpop.f32.mrf.mxu0 }
 0x281   : > { %18044 = vmatprep.subr.mxu0 %v5743_v35  ;;  %v21036_v14 = vadd.f32 %v17938_v60, %v20965_v39 }
 0x282   : > { %18045 = vmatpush3.msra.mxu0 %v5743_v35  ;;  %v21038_v22 = vpop.f32.mrf.mxu0 }
 0x283   : > { %25690 = vst [vmem:[#allocation45_spill] sm:$0xff] %v21038_v22  ;;  %v5724_v21 = vpop.permute.xlu0 %5723 }
 0x284   : > { %v5722_v40 = vpop.permute.xlu1 %5721  ;;  %v5745_v57 = vsel %vm5737_vm9, %v5724_v21, %v5726_v27  ;;  %v17941_v41 = vpop.f32.mrf.mxu0 }
 0x285   : > { %v5744_v7 = vsel %vm5737_vm9, %v5722_v40, %v5724_v21  ;;  %5800 = vmatprep.subr.mxu1 %v5745_v57  ;;  %v21044_v54 = vadd.f32 %v17941_v41, %v3671_v51  ;;  %v16681_v51 = vld [vmem:[%s25622_s4 + $0x2b0] sm:$0xff]  ;;  %v16682_v40 = vld [vmem:[%s25622_s4 + $0x2b8] sm:$0xff] }
 0x286   : > { %5801 = vmatpush1.msra.mxu1 %v5744_v7 }
 0x287   : > { %v5710_v49 = vpop.permute.xlu0 %5709  ;;  %v3800_v61 = vpop.f32.mrf.mxu1 }
 0x288   : > { %v5712_v39 = vpop.permute.xlu1 %5711  ;;  %v3908_v33 = vadd.f32 %v3800_v61, %v20962_v42 }
 0x289   : > { %v5740_v37 = vsel %vm5737_vm9, %v5710_v49, %v5712_v39  ;;  %v21051_v31 = vpop.f32.mrf.mxu1 }
 0x28a   : > { %25691 = vst [vmem:[#allocation46_spill] sm:$0xff] %v21051_v31  ;;  %18046 = vmatprep.subr.mxu0 %v5740_v37 }
 0x28b   : > { %18047 = vmatpush3.msra.mxu0 %v5740_v37  ;;  %v5716_v27 = vpop.permute.xlu0 %5715  ;;  %v3806_v44 = vpop.f32.mrf.mxu1 }
 0x28c   : > { %18049 = vmatmul.mubr.msk.f32.vlgmr.msra.gmra.mxu0 %vm571_vm0, %v16680_v1  ;;  %v5714_v35 = vpop.permute.xlu1 %5713  ;;  %v5742_v42 = vsel %vm5737_vm9, %v5716_v27, %v5718_v58  ;;  %v3911_v60 = vadd.f32 %v3806_v44, %v20983_v34 }
 0x28d   : > { %v5741_v21 = vsel %vm5737_vm9, %v5714_v35, %v5716_v27  ;;  %5802 = vmatprep.subr.mxu1 %v5742_v42  ;;  %18051 = vmatprep.mubr.msk.f32.mxu0 %vm571_vm0, %v16681_v51  ;;  %v21064_v57 = vpop.f32.mrf.mxu1 }
 0x28e   : > { %25692 = vst [vmem:[#allocation47_spill] sm:$0xff] %v21064_v57  ;;  %5803 = vmatpush1.msra.mxu1 %v5741_v21 }
 0x28f   : > { %v5708_v41 = vpop.permute.xlu0 %5707  ;;  %v3812_v7 = vpop.f32.mrf.mxu1 }
 0x290   : > { %18052 = vmatmul.mubr.msk.f32.gmra.mxu0 %vm571_vm0, %v16682_v40  ;;  %v5992_v61 = vpop.permute.xlu1 %5991  ;;  %v5739_v58 = vsel %vm5737_vm9, %v5708_v41, %v5710_v49  ;;  %v3914_v34 = vadd.f32 %v3812_v7, %v21000_v13 }
 0x291   : > { %5804 = vmatprep.subr.mxu1 %v5739_v58  ;;  %v21069_v39 = vpop.f32.mrf.mxu1  ;;  %6098 = vmatprep.mubr.f32.mxu0 %v20884_v16 }
 0x292   : > { %25693 = vst [vmem:[#allocation48_spill] sm:$0xff] %v21069_v39  ;;  %v21084_v39 = vpop.f32.mrf.mxu0 }
 0x293   : > { %v21072_v37 = vpop.permute.xlu0 %5993  ;;  %v3818_v27 = vpop.f32.mrf.mxu1  ;;  %25695 = vst [vmem:[#allocation50_spill] sm:$0xff] %v21084_v39 }
 0x294   : > { %v5706_v44 = vpop.permute.xlu1 %5705  ;;  %v6008_v35 = vsel %vm5997_vm10, %v5992_v61, %v21072_v37  ;;  %v3917_v42 = vadd.f32 %v3818_v27, %v21019_v26 }
 0x295   : > { %v5738_v21 = vsel %vm5737_vm9, %v5706_v44, %v5708_v41  ;;  %6058 = vmatprep.subr.mxu0 %v6008_v35  ;;  %v21080_v49 = vpop.f32.mrf.mxu1  ;;  %vm6949_vm9 = vcmask 343040  }
 0x296   : > { %5805 = vmatpush1.msra.mxu1 %v5738_v21  ;;  %25694 = vst [vmem:[#allocation49_spill] sm:$0xff] %v21080_v49 }
 0x297   : > { %16683 = vmatmul.mubr.msk.f32.vlgmr.msra.gmra.mxu1 %vm571_vm0, %v21013_v55  ;;  %v5990_v13 = vpop.permute.xlu0 %5989 }
 0x298   : > { %v6007_v7 = vsel %vm5997_vm10, %v5990_v13, %v5992_v61  ;;  %v5984_v58 = vpop.permute.xlu1 %5983  ;;  %5844 = vmatprep.mubr.f32.mxu1 %v20884_v16 }
 0x299   : > { %6059 = vmatpush1.msra.mxu0 %v6007_v7 }
 0x29b   : > { %16684 = vmatmul.mubr.msk.f32.gmra.mxu1 %vm571_vm0, %v16680_v1  ;;  %v5986_v26 = vpop.permute.xlu0 %5985  ;;  %v17952_v41 = vpop.f32.mrf.mxu1 }
 0x29c   : > { %v5982_v27 = vpop.permute.xlu1 %5981  ;;  %5850 = vmatprep.mubr.f32.mxu1 %v20884_v16  ;;  %v6005_v55 = vsel %vm5997_vm10, %v5984_v58, %v5986_v26  ;;  %v4048_v44 = vpop.f32.mrf.mxu0  ;;  %v4161_v35 = vadd.f32 %v17952_v41, %v21036_v14 }
 0x29d   : > { %v6004_v61 = vsel %vm5997_vm10, %v5982_v27, %v5984_v58  ;;  %6060 = vmatprep.subr.mxu0 %v6005_v55  ;;  %v21091_v21 = vadd.f32 %v4048_v44, %v3908_v33  ;;  %v21096_v7 = vpop.f32.mrf.mxu1 }
 0x29e   : > { %6061 = vmatpush1.msra.mxu0 %v6004_v61  ;;  %v21093_v13 = vpop.f32.mrf.mxu0  ;;  %25697 = vst [vmem:[#allocation52_spill] sm:$0xff] %v21096_v7 }
 0x29f   : > { %25696 = vst [vmem:[#allocation51_spill] sm:$0xff] %v21093_v13  ;;  %16685 = vmatmul.mubr.msk.f32.gmra.mxu1 %vm571_vm0, %v16681_v51  ;;  %v5976_v1 = vpop.permute.xlu0 %5975  ;;  %v16691_v51 = vld [vmem:[%s25622_s4 + $0x2c0] sm:$0xff] }
 0x2a0   : > { %v5978_v49 = vpop.permute.xlu1 %5977  ;;  %5856 = vmatprep.mubr.f32.mxu1 %v20884_v16  ;;  %v4054_v57 = vpop.f32.mrf.mxu0 }
 0x2a1   : > { %v6002_v39 = vsel %vm5997_vm10, %v5976_v1, %v5978_v49  ;;  %v21100_v14 = vadd.f32 %v4054_v57, %v3911_v60 }
 0x2a2   : > { %6062 = vmatprep.subr.mxu0 %v6002_v39  ;;  %v21102_v58 = vpop.f32.mrf.mxu0 }
 0x2a3   : > { %25698 = vst [vmem:[#allocation53_spill] sm:$0xff] %v21102_v58  ;;  %16686 = vmatmul.mubr.msk.f32.gmra.mxu1 %vm571_vm0, %v16682_v40  ;;  %v5974_v33 = vpop.permute.xlu0 %5973  ;;  %v17955_v41 = vpop.f32.mrf.mxu1 }
 0x2a4   : > { %v6001_v27 = vsel %vm5997_vm10, %v5974_v33, %v5976_v1  ;;  %v5968_v55 = vpop.permute.xlu1 %5967  ;;  %v4060_v44 = vpop.f32.mrf.mxu0  ;;  %v4167_v61 = vadd.f32 %v17955_v41, %v21044_v54  ;;  %18062 = vmatprep.mubr.msk.f32.mxu1 %vm571_vm0, %v16691_v51 }
 0x2a5   : > { %6063 = vmatpush1.msra.mxu0 %v6001_v27  ;;  %v21111_v60 = vadd.f32 %v4060_v44, %v3914_v34  ;;  %v16692_v27 = vld [vmem:[%s25622_s4 + $0x2c8] sm:$0xff] }
 0x2a6   : > { %v21113_v57 = vpop.f32.mrf.mxu0 }
 0x2a7   : > { %25699 = vst [vmem:[#allocation54_spill] sm:$0xff] %v21113_v57  ;;  %v5970_v40 = vpop.permute.xlu0 %5969 }
 0x2a8   : > { %v5966_v39 = vpop.permute.xlu1 %5965  ;;  %v5999_v58 = vsel %vm5997_vm10, %v5968_v55, %v5970_v40  ;;  %v4066_v7 = vpop.f32.mrf.mxu0 }
 0x2a9   : > { %v5998_v13 = vsel %vm5997_vm10, %v5966_v39, %v5968_v55  ;;  %6064 = vmatprep.subr.mxu0 %v5999_v58  ;;  %v21117_v1 = vadd.f32 %v4066_v7, %v3917_v42  ;;  %v19163_v58 = vmov 0  }
 0x2aa   : > { %6065 = vmatpush1.msra.mxu0 %v5998_v13  ;;  %v21120_v54 = vpop.f32.mrf.mxu0  ;;  %18660 = vset.pattern.permute.xlu0 %v19163_v58  ;;  %v6743_v13 = vld [vmem:[%s25623_s5 + $0x18] sm:$0xff] }
 0x2ab   : > { %v5996_v33 = vpop.permute.xlu0 %5995  ;;  %16695 = vmatmul.mubr.msk.f32.vlgmr.msra.gmra.mxu0 %vm571_vm0, %v16691_v51  ;;  %25700 = vst [vmem:[#allocation55_spill] sm:$0xff] %v21120_v54  ;;  %18661 = vset.pattern.permute.xlu1 %v19163_v58 }
 0x2ac   : > { %v5988_v34 = vpop.permute.xlu1 %5987  ;;  %v6009_v41 = vsel %vm5997_vm10, %v21072_v37, %v5996_v33  ;;  %6104 = vmatprep.mubr.f32.mxu0 %v20884_v16  ;;  %6761 = vperm.xlu0 %18660, %v6743_v13   ;;  %v21142_v33 = vpop.f32.mrf.mxu1 }
 0x2ad   : > { %18054 = vmatprep.subr.mxu1 %v6009_v41  ;;  %v6006_v42 = vsel %vm5997_vm10, %v5986_v26, %v5988_v34  ;;  %v16693_v26 = vld [vmem:[%s25622_s4 + $0x2d0] sm:$0xff]  ;;  %25702 = vst [vmem:[#allocation57_spill] sm:$0xff] %v21142_v33 }
 0x2ae   : > { %18055 = vmatpush3.msra.mxu1 %v6009_v41 }
 0x2af   : > { %v5980_v7 = vpop.permute.xlu0 %5979  ;;  %v17966_v51 = vpop.f32.mrf.mxu0  ;;  %16696 = vmatmul.mubr.msk.f32.gmra.mxu0 %vm571_vm0, %v16692_v27  ;;  %18056 = vmatprep.subr.mxu1 %v6006_v42 }
 0x2b0   : > { %v21133_v37 = vadd.f32 %v17966_v51, %v4161_v35  ;;  %v5972_v55 = vpop.permute.xlu1 %5971  ;;  %18057 = vmatpush3.msra.mxu1 %v6006_v42  ;;  %v6003_v44 = vsel %vm5997_vm10, %v5978_v49, %v5980_v7  ;;  %6110 = vmatprep.mubr.f32.mxu0 %v20884_v16  ;;  %v6740_v49 = vld [vmem:[%s25623_s5] sm:$0xff]  ;;  %v16694_v7 = vld [vmem:[%s25622_s4 + $0x2d8] sm:$0xff] }
 0x2b1   : > { %v21140_v39 = vpop.f32.mrf.mxu0  ;;  %18058 = vmatprep.subr.mxu1 %v6003_v44  ;;  %v6000_v35 = vsel %vm5997_vm10, %v5970_v40, %v5972_v55  ;;  %v6742_v40 = vld [vmem:[%s25623_s5 + $0x10] sm:$0xff]  ;;  %6746 = vperm.xlu0 %18660, %v6740_v49   ;;  %vm6973_vm10 = vcmask 834560  }
 0x2b2   : > { %25701 = vst [vmem:[#allocation56_spill] sm:$0xff] %v21140_v39  ;;  %18059 = vmatpush3.msra.mxu1 %v6003_v44  ;;  %6756 = vperm.xlu1 %18661, %v6742_v40  }
 0x2b3   : > { %v6254_v34 = vpop.permute.xlu0 %6253  ;;  %v17969_v41 = vpop.f32.mrf.mxu0  ;;  %16697 = vmatmul.mubr.msk.f32.gmra.mxu0 %vm571_vm0, %v16693_v26  ;;  %18060 = vmatprep.subr.mxu1 %v6000_v35 }
 0x2b4   : > { %v21149_v58 = vadd.f32 %v17969_v41, %v4167_v61  ;;  %v6256_v42 = vpop.permute.xlu1 %6255  ;;  %18061 = vmatpush3.msra.mxu1 %v6000_v35  ;;  %6116 = vmatprep.mubr.f32.mxu0 %v20884_v16  ;;  %v21164_v61 = vld [vmem:[%s25622_s4 + $0x2e0] sm:$0xff]  ;;  %v6741_v35 = vld [vmem:[%s25623_s5 + $0x8] sm:$0xff] }
 0x2b5   : > { %18063 = vmatmul.mubr.msk.f32.vlgmr.msra.gmra.mxu1 %vm571_vm0, %v16692_v27  ;;  %v6269_v13 = vsel %vm6257_vm14, %v6254_v34, %v6256_v42 }
 0x2b6   : > { %18068 = vmatprep.subr.mxu0 %v6269_v13  ;;  %18065 = vmatprep.mubr.msk.f32.mxu1 %vm571_vm0, %v16693_v26 }
 0x2b7   : > { %v4296_v51 = vpop.f32.mrf.mxu1  ;;  %18069 = vmatpush3.msra.mxu0 %v6269_v13  ;;  %v6246_v55 = vpop.permute.xlu0 %6245  ;;  %6751 = vperm.xlu1 %18661, %v6741_v35  }
 0x2b8   : > { %v4404_v27 = vadd.f32 %v4296_v51, %v21091_v21  ;;  %16698 = vmatmul.mubr.msk.f32.gmra.mxu0 %vm571_vm0, %v16694_v7  ;;  %v6248_v44 = vpop.permute.xlu1 %6247 }
 0x2b9   : > { %v21171_v49 = vpop.f32.mrf.mxu1  ;;  %18066 = vmatmul.mubr.msk.f32.gmra.mxu1 %vm571_vm0, %v16694_v7  ;;  %v6266_v26 = vsel %vm6257_vm14, %v6246_v55, %v6248_v44  ;;  %18076 = vmatprep.mubr.msk.f32.mxu0 %vm571_vm0, %v21164_v61 }
 0x2ba   : > { %25703 = vst [vmem:[#allocation58_spill] sm:$0xff] %v21171_v49  ;;  %18070 = vmatprep.subr.mxu0 %v6266_v26  ;;  %6358 = vmatprep.mubr.f32.mxu1 %v20884_v16 }
 0x2bb   : > { %v4302_v21 = vpop.f32.mrf.mxu1  ;;  %18071 = vmatpush3.msra.mxu0 %v6266_v26  ;;  %v6252_v41 = vpop.permute.xlu0 %6251 }
 0x2bc   : > { %v4407_v42 = vadd.f32 %v4302_v21, %v21100_v14  ;;  %v6250_v40 = vpop.permute.xlu1 %6249  ;;  %v6268_v13 = vsel %vm6257_vm14, %v6252_v41, %v6254_v34 }
 0x2bd   : > { %v6267_v51 = vsel %vm6257_vm14, %v6250_v40, %v6252_v41  ;;  %v21181_v7 = vpop.f32.mrf.mxu1  ;;  %6318 = vmatprep.subr.mxu1 %v6268_v13 }
 0x2be   : > { %25704 = vst [vmem:[#allocation59_spill] sm:$0xff] %v21181_v7  ;;  %6319 = vmatpush1.msra.mxu1 %v6267_v51 }
 0x2bf   : > { %v4308_v44 = vpop.f32.mrf.mxu1  ;;  %v6238_v39 = vpop.permute.xlu0 %6237 }
 0x2c0   : > { %v4410_v54 = vadd.f32 %v4308_v44, %v21111_v60  ;;  %v6240_v57 = vpop.permute.xlu1 %6239 }
 0x2c1   : > { %v21184_v49 = vpop.f32.mrf.mxu1  ;;  %v6263_v35 = vsel %vm6257_vm14, %v6238_v39, %v6240_v57  ;;  %v16704_v57 = vld [vmem:[%s25622_s4 + $0x2e8] sm:$0xff] }
 0x2c2   : > { %25705 = vst [vmem:[#allocation60_spill] sm:$0xff] %v21184_v49  ;;  %18072 = vmatprep.subr.mxu0 %v6263_v35 }
 0x2c3   : > { %v4314_v14 = vpop.f32.mrf.mxu1  ;;  %18073 = vmatpush3.msra.mxu0 %v6263_v35  ;;  %v6244_v26 = vpop.permute.xlu0 %6243 }
 0x2c4   : > { %v4413_v34 = vadd.f32 %v4314_v14, %v21117_v1  ;;  %v6242_v21 = vpop.permute.xlu1 %6241  ;;  %v6265_v41 = vsel %vm6257_vm14, %v6244_v26, %v6246_v55  ;;  %v21196_v35 = vpop.f32.mrf.mxu0  ;;  %v21201_v1 = vld [vmem:[%s25622_s4 + $0x2f0] sm:$0xff] }
 0x2c5   : > { %v6264_v40 = vsel %vm6257_vm14, %v6242_v21, %v6244_v26  ;;  %6320 = vmatprep.subr.mxu1 %v6265_v41  ;;  %v21190_v51 = vpop.f32.mrf.mxu1  ;;  %25707 = vst [vmem:[#allocation62_spill] sm:$0xff] %v21196_v35 }
 0x2c6   : > { %6321 = vmatpush1.msra.mxu1 %v6264_v40  ;;  %25706 = vst [vmem:[#allocation61_spill] sm:$0xff] %v21190_v51 }
 0x2c7   : > { %v6230_v13 = vpop.permute.xlu0 %6229 }
 0x2c8   : > { %v6232_v60 = vpop.permute.xlu1 %6231 }
 0x2c9   : > { %v6260_v44 = vsel %vm6257_vm14, %v6230_v13, %v6232_v60 }
 0x2ca   : > { %18074 = vmatprep.subr.mxu0 %v6260_v44 }
 0x2cb   : > { %v17980_v55 = vpop.f32.mrf.mxu1  ;;  %18075 = vmatpush3.msra.mxu0 %v6260_v44  ;;  %v6236_v14 = vpop.permute.xlu0 %6235 }
 0x2cc   : > { %v4657_v26 = vadd.f32 %v17980_v55, %v21133_v37  ;;  %v4544_v21 = vpop.f32.mrf.mxu0  ;;  %18077 = vmatmul.mubr.msk.f32.vlgmr.msra.gmra.mxu0 %vm571_vm0, %v16704_v57  ;;  %v6234_v41 = vpop.permute.xlu1 %6233  ;;  %v6262_v40 = vsel %vm6257_vm14, %v6236_v14, %v6238_v39  ;;  %v21216_v37 = vld [vmem:[%s25622_s4 + $0x2f8] sm:$0xff] }
 0x2cd   : > { %v21206_v60 = vadd.f32 %v4544_v21, %v4404_v27  ;;  %v6261_v51 = vsel %vm6257_vm14, %v6234_v41, %v6236_v14  ;;  %v21209_v49 = vpop.f32.mrf.mxu1  ;;  %6322 = vmatprep.subr.mxu1 %v6262_v40  ;;  %18079 = vmatprep.mubr.msk.f32.mxu0 %vm571_vm0, %v21201_v1 }
 0x2ce   : > { %25708 = vst [vmem:[#allocation63_spill] sm:$0xff] %v21209_v49  ;;  %v21218_v44 = vpop.f32.mrf.mxu0  ;;  %6323 = vmatpush1.msra.mxu1 %v6261_v51 }
 0x2cf   : > { %25709 = vst [vmem:[#allocation64_spill] sm:$0xff] %v21218_v44  ;;  %v6228_v55 = vpop.permute.xlu0 %6227 }
 0x2d0   : > { %v17983_v39 = vpop.f32.mrf.mxu1  ;;  %v4550_v27 = vpop.f32.mrf.mxu0  ;;  %18080 = vmatmul.mubr.msk.f32.gmra.mxu0 %vm571_vm0, %v21216_v37  ;;  %v6259_v14 = vsel %vm6257_vm14, %v6228_v55, %v6230_v13 }
 0x2d1   : > { %v4663_v21 = vadd.f32 %v17983_v39, %v21149_v58  ;;  %v21224_v41 = vadd.f32 %v4550_v27, %v4407_v42  ;;  %v6512_v40 = vpop.permute.xlu1 %6511  ;;  %6324 = vmatprep.subr.mxu1 %v6259_v14  ;;  %6618 = vmatprep.mubr.f32.mxu0 %v20884_v16  ;;  %v6878_v39 = vlaneseq }
 0x2d2   : > { %v21227_v49 = vpop.f32.mrf.mxu0 }
 0x2d3   : > { %25710 = vst [vmem:[#allocation65_spill] sm:$0xff] %v21227_v49  ;;  %v21229_v51 = vpop.permute.xlu0 %6513  ;;  %v6879_v33 = vshrl.u32 %v6878_v39, 7 }
 0x2d4   : > { %v4556_v7 = vpop.f32.mrf.mxu0  ;;  %v6528_v35 = vsel %vm6517_vm15, %v6512_v40, %v21229_v51 }
 0x2d5   : > { %v21233_v44 = vadd.f32 %v4556_v7, %v4410_v54  ;;  %v6226_v13 = vpop.permute.xlu1 %6225  ;;  %6578 = vmatprep.subr.mxu0 %v6528_v35  ;;  %v6880_v7 = vsub.s32 0, %v6879_v33 }
 0x2d6   : > { %v6258_v58 = vsel %vm6257_vm14, %v6226_v13, %v6228_v55  ;;  %v21236_v42 = vpop.f32.mrf.mxu0  ;;  %v492_v55 = vld [vmem:[%s25624_s6] sm:$0x7] }
 0x2d7   : > { %25711 = vst [vmem:[#allocation66_spill] sm:$0xff] %v21236_v42  ;;  %6325 = vmatpush1.msra.mxu1 %v6258_v58  ;;  %v6510_v27 = vpop.permute.xlu0 %6509  ;;  %v6881_v13 = vrot.slane %v492_v55, %v6880_v7 }
 0x2d8   : > { %16707 = vmatmul.mubr.msk.f32.vlgmr.msra.gmra.mxu1 %vm571_vm0, %v21164_v61  ;;  %v6527_v14 = vsel %vm6517_vm15, %v6510_v27, %v6512_v40  ;;  %v4562_v49 = vpop.f32.mrf.mxu0  ;;  %v6884_v40 = vsub.s32 1, %v6879_v33  ;;  %v6888_v27 = vsub.s32 2, %v6879_v33 }
 0x2d9   : > { %v21241_v22 = vadd.f32 %v4562_v49, %v4413_v34  ;;  %v6504_v54 = vpop.permute.xlu1 %6503  ;;  %6364 = vmatprep.mubr.f32.mxu1 %v20884_v16  ;;  %6579 = vmatpush1.msra.mxu0 %v6527_v14 }
 0x2da   : > { %v21249_v58 = vpop.f32.mrf.mxu0  ;;  %6890 = vrot.lane.b32.xlu1 %v6881_v13, %s19150_s23  ;;  %v6885_v39 = vrot.slane %v492_v55, %v6884_v40  ;;  %v6889_v7 = vrot.slane %v492_v55, %v6888_v27  ;;  %v16715_v55 = vld [vmem:[%s25622_s4 + $0x300] sm:$0xff]  ;;  %v21272_v13 = vpop.f32.mrf.mxu1 }
 0x2db   : > { %v6506_v35 = vpop.permute.xlu0 %6505  ;;  %25712 = vst [vmem:[#allocation67_spill] sm:$0xff] %v21249_v58 }
 0x2dc   : > { %16708 = vmatmul.mubr.msk.f32.gmra.mxu1 %vm571_vm0, %v16704_v57  ;;  %v6525_v61 = vsel %vm6517_vm15, %v6504_v54, %v6506_v35  ;;  %6892 = vrot.lane.b32.xlu0 %v6885_v39, %s19150_s23 }
 0x2dd   : > { %v6502_v49 = vpop.permute.xlu1 %6501  ;;  %6370 = vmatprep.mubr.f32.mxu1 %v20884_v16  ;;  %6580 = vmatprep.subr.mxu0 %v6525_v61 }
 0x2de   : > { %v6524_v34 = vsel %vm6517_vm15, %v6502_v49, %v6504_v54  ;;  %6894 = vrot.lane.b32.xlu1 %v6889_v7, %s19150_s23 }
 0x2df   : > { %v17994_v14 = vpop.f32.mrf.mxu0  ;;  %6581 = vmatpush1.msra.mxu0 %v6524_v34  ;;  %v6496_v42 = vpop.permute.xlu0 %6495 }
 0x2e0   : > { %v21254_v57 = vadd.f32 %v17994_v14, %v4657_v26  ;;  %16709 = vmatmul.mubr.msk.f32.gmra.mxu1 %vm571_vm0, %v21201_v1 }
 0x2e1   : > { %v6498_v58 = vpop.permute.xlu1 %6497  ;;  %v21259_v31 = vpop.f32.mrf.mxu0  ;;  %6376 = vmatprep.mubr.f32.mxu1 %v20884_v16 }
 0x2e2   : > { %25713 = vst [vmem:[#allocation68_spill] sm:$0xff] %v21254_v57  ;;  %v6522_v54 = vsel %vm6517_vm15, %v6496_v42, %v6498_v58 }
 0x2e3   : > { %6582 = vmatprep.subr.mxu0 %v6522_v54  ;;  %v17997_v33 = vpop.f32.mrf.mxu0  ;;  %v6494_v61 = vpop.permute.xlu0 %6493 }
 0x2e4   : > { %v21264_v26 = vadd.f32 %v17997_v33, %v4663_v21  ;;  %16710 = vmatmul.mubr.msk.f32.gmra.mxu1 %vm571_vm0, %v21216_v37  ;;  %v6521_v1 = vsel %vm6517_vm15, %v6494_v61, %v6496_v42 }
 0x2e5   : > { %v6488_v40 = vpop.permute.xlu1 %6487  ;;  %6583 = vmatpush1.msra.mxu0 %v6521_v1  ;;  %18090 = vmatprep.mubr.msk.f32.mxu1 %vm571_vm0, %v16715_v55  ;;  %v16716_v1 = vld [vmem:[%s25622_s4 + $0x308] sm:$0xff] }
 0x2e7   : > { %v4792_v49 = vpop.f32.mrf.mxu1  ;;  %v6490_v34 = vpop.permute.xlu0 %6489 }
 0x2e8   : > { %v21276_v21 = vadd.f32 %v4792_v49, %v21206_v60  ;;  %v6519_v39 = vsel %vm6517_vm15, %v6488_v40, %v6490_v34 }
 0x2e9   : > { %v6486_v37 = vpop.permute.xlu1 %6485  ;;  %v21279_v27 = vpop.f32.mrf.mxu1  ;;  %6584 = vmatprep.subr.mxu0 %v6519_v39 }
 0x2ea   : > { %v6518_v42 = vsel %vm6517_vm15, %v6486_v37, %v6488_v40 }
 0x2eb   : > { %v4798_v14 = vpop.f32.mrf.mxu1  ;;  %6585 = vmatpush1.msra.mxu0 %v6518_v42  ;;  %v6516_v7 = vpop.permute.xlu0 %6515 }
 0x2ec   : > { %v4903_v54 = vadd.f32 %v4798_v14, %v21224_v41  ;;  %16719 = vmatmul.mubr.msk.f32.vlgmr.msra.gmra.mxu0 %vm571_vm0, %v16715_v55  ;;  %v6529_v33 = vsel %vm6517_vm15, %v21229_v51, %v6516_v7 }
 0x2ed   : > { %v6508_v60 = vpop.permute.xlu1 %6507  ;;  %v21286_v61 = vpop.f32.mrf.mxu1  ;;  %18082 = vmatprep.subr.mxu1 %v6529_v33  ;;  %6624 = vmatprep.mubr.f32.mxu0 %v20884_v16 }
 0x2ee   : > { %18083 = vmatpush3.msra.mxu1 %v6529_v33  ;;  %v6526_v40 = vsel %vm6517_vm15, %v6506_v35, %v6508_v60  ;;  %v16717_v35 = vld [vmem:[%s25622_s4 + $0x310] sm:$0xff] }
 0x2ef   : > { %v4804_v49 = vpop.f32.mrf.mxu1  ;;  %v6500_v41 = vpop.permute.xlu0 %6499  ;;  %18084 = vmatprep.subr.mxu1 %v6526_v40 }
 0x2f0   : > { %v4906_v55 = vadd.f32 %v4804_v49, %v21233_v44  ;;  %16720 = vmatmul.mubr.msk.f32.gmra.mxu0 %vm571_vm0, %v16716_v1  ;;  %18085 = vmatpush3.msra.mxu1 %v6526_v40  ;;  %v6523_v51 = vsel %vm6517_vm15, %v6498_v58, %v6500_v41  ;;  %v16718_v58 = vld [vmem:[%s25622_s4 + $0x318] sm:$0xff] }
 0x2f1   : > { %v6492_v39 = vpop.permute.xlu1 %6491  ;;  %v21296_v37 = vpop.f32.mrf.mxu1  ;;  %18086 = vmatprep.subr.mxu1 %v6523_v51  ;;  %6630 = vmatprep.mubr.f32.mxu0 %v20884_v16 }
 0x2f2   : > { %18087 = vmatpush3.msra.mxu1 %v6523_v51  ;;  %v6520_v42 = vsel %vm6517_vm15, %v6490_v34, %v6492_v39 }
 0x2f3   : > { %v4810_v14 = vpop.f32.mrf.mxu1  ;;  %18088 = vmatprep.subr.mxu1 %v6520_v42 }
 0x2f4   : > { %v4909_v44 = vadd.f32 %v4810_v14, %v21241_v22  ;;  %16721 = vmatmul.mubr.msk.f32.gmra.mxu0 %vm571_vm0, %v16717_v35  ;;  %18089 = vmatpush3.msra.mxu1 %v6520_v42  ;;  %v21315_v22 = vpop.f32.mrf.mxu0 }
 0x2f5   : > { %18091 = vmatmul.mubr.msk.f32.vlgmr.msra.gmra.mxu1 %vm571_vm0, %v16716_v1  ;;  %6636 = vmatprep.mubr.f32.mxu0 %v20884_v16  ;;  %v21312_v34 = vpop.f32.mrf.mxu1 }
 0x2f6   : > { %18093 = vmatprep.mubr.msk.f32.mxu1 %vm571_vm0, %v16717_v35 }
 0x2f8   : > { %16722 = vmatmul.mubr.msk.f32.gmra.mxu0 %vm571_vm0, %v16718_v58 }
 0x2f9   : > { %18094 = vmatmul.mubr.msk.f32.gmra.mxu1 %vm571_vm0, %v16718_v58 }
 0x2fa   : > { %7138 = vmatprep.mubr.f32.mxu1 %v20884_v16 }
 0x2fb   : > { %v21318_v7 = vpop.f32.mrf.mxu1 }
 0x2fc   : > { %25714 = vst [vmem:[#allocation69_spill] sm:$0xff] %v21318_v7  ;;  %v21320_v33 = vpop.f32.mrf.mxu0 }
 0x2fd   : > { %v21322_v60 = vpop.f32.mrf.mxu1 }
 0x2fe   : > { %25715 = vst [vmem:[#allocation70_spill] sm:$0xff] %v21322_v60  ;;  %v21324_v1 = vpop.f32.mrf.mxu0 }
 0x300   : > { %v18011_v40 = vpop.f32.mrf.mxu1  ;;  %v5046_v49 = vpop.f32.mrf.mxu0 }
 0x301   : > { %v21327_v41 = vadd.f32 %v18011_v40, %v21264_v26  ;;  %v21329_v51 = vadd.f32 %v5046_v49, %v4903_v54 }
 0x302   : > { %v21331_v39 = vpop.f32.mrf.mxu0  ;;  %v21339_v60 = vpop.f32.mrf.mxu1 }
 0x303   : > { %25716 = vst [vmem:[#allocation71_spill] sm:$0xff] %v21327_v41  ;;  %25717 = vst [vmem:[#allocation72_spill] sm:$0xff] %v21329_v51 }
 0x304   : > { %v5052_v35 = vpop.f32.mrf.mxu0 }
 0x305   : > { %v21333_v42 = vadd.f32 %v5052_v35, %v4906_v55 }
 0x306   : > { %v21335_v16 = vpop.f32.mrf.mxu0 }
 0x307   : > { %25718 = vst [vmem:[#allocation73_spill] sm:$0xff] %v21333_v42 }
 0x308   : > { %v5058_v14 = vpop.f32.mrf.mxu0 }
 0x309   : > { %v21337_v58 = vadd.f32 %v5058_v14, %v4909_v44 }
 0x30a   : > { %v21343_v57 = vpop.f32.mrf.mxu0 }
 0x30b   : > { %25719 = vst [vmem:[#allocation74_spill] sm:$0xff] %v21337_v58 }
 0x30f   : > { %v21347_v54 = vpop.f32.mrf.mxu0 }
 0x310   : > { %25720 = vst [vmem:[#allocation75_spill] sm:$0xff] %v21347_v54 }
 0x311   : > { %v21351_v49 = vpop.f32.mrf.mxu0 }
 0x312   : > { %25722 = vst [vmem:[#allocation77_spill] sm:$0xff] %v21351_v49 }
 0x313   : > { %v21355_v35 = vpop.f32.mrf.mxu0 }
 0x314   : > { %25724 = vst [vmem:[#allocation79_spill] sm:$0xff] %v21355_v35 }
 0x315   : > { %v21359_v14 = vpop.f32.mrf.mxu0 }
 0x316   : > { %25726 = vst [vmem:[#allocation81_spill] sm:$0xff] %v21359_v14 }
 0x317   : > { %v21341_v7 = vpop.f32.mrf.mxu1 }
 0x319   : > { %v21345_v26 = vpop.f32.mrf.mxu1 }
 0x31b   : > { %v21349_v40 = vpop.f32.mrf.mxu1 }
 0x31c   : > { %25721 = vst [vmem:[#allocation76_spill] sm:$0xff] %v21349_v40 }
 0x31d   : > { %v21353_v55 = vpop.f32.mrf.mxu1 }
 0x31e   : > { %25723 = vst [vmem:[#allocation78_spill] sm:$0xff] %v21353_v55 }
 0x31f   : > { %v21357_v44 = vpop.f32.mrf.mxu1 }
 0x320   : > { %25725 = vst [vmem:[#allocation80_spill] sm:$0xff] %v21357_v44 }
 0x321   : > { %v21361_v58 = vpop.f32.mrf.mxu1 }
 0x322   : > { %25727 = vst [vmem:[#allocation82_spill] sm:$0xff] %v21361_v58  ;;  %v839_v58 = vadd.f32 %v20101_v46, %v20007_v50  ;;  %v857_v50 = vadd.f32 %v20147_v30, %v20048_v62 }
 0x323   : > { %v21365_v51 = vpop.f32.mrf.mxu1 }
 0x324   : > { %25728 = vst [vmem:[#allocation83_spill] sm:$0xff] %v21365_v51  ;;  %v926_v51 = vadd.f32 %v20070_v25, %v20050_v63 }
 0x325   : > { %v21369_v54 = vpop.f32.mrf.mxu1 }
 0x326   : > { %25729 = vst [vmem:[#allocation84_spill] sm:$0xff] %v21369_v54  ;;  %v936_v54 = vadd.f32 %v20089_v38, %v20076_v32  ;;  %v1182_v63 = vadd.f32 %v20162_v45, %v926_v51 }
 0x328   : > { %v1188_v25 = vadd.f32 %v20180_v5, %v936_v54 }
 0x32a   : > { %v1436_v62 = vadd.f32 %v20188_v10, %v1188_v25  ;;  %v25738_v10 = vld [vmem:[#allocation4_spill] sm:$0xff]  ;;  %v25743_v25 = vld [vmem:[#allocation7_spill] sm:$0xff] }
 0x32b   : > { %v21363_v42 = vpop.f32.mrf.mxu0 }
 0x32d   : > { %v21367_v41 = vpop.f32.mrf.mxu0 }
 0x32f   : > { %v21371_v40 = vpop.f32.mrf.mxu0 }
 0x330   : > { %25730 = vst [vmem:[#allocation85_spill] sm:$0xff] %v21371_v40 }
 0x331   : > { %v21375_v55 = vpop.f32.mrf.mxu0 }
 0x333   : > { %v21379_v44 = vpop.f32.mrf.mxu0 }
 0x334   : > { %25733 = vst [vmem:[#allocation88_spill] sm:$0xff] %v21379_v44 }
 0x335   : > { %v21373_v49 = vpop.f32.mrf.mxu1  ;;  %v21389_v40 = vpop.f32.mrf.mxu0 }
 0x336   : > { %25731 = vst [vmem:[#allocation86_spill] sm:$0xff] %v21373_v49  ;;  %v845_v49 = vadd.f32 %v20117_v53, %v20021_v6 }
 0x337   : > { %v21377_v35 = vpop.f32.mrf.mxu1 }
 0x338   : > { %25732 = vst [vmem:[#allocation87_spill] sm:$0xff] %v21377_v35  ;;  %v851_v35 = vadd.f32 %v20132_v8, %v20036_v9  ;;  %v21402_v32 = vpop.f32.mrf.mxu0  ;;  %v1184_v6 = vadd.f32 %v20125_v3, %v845_v49  ;;  %v1190_v9 = vadd.f32 %v20155_v59, %v857_v50  ;;  %v25739_v49 = vld [vmem:[#allocation5_spill] sm:$0xff] }
 0x339   : > { %v21381_v14 = vpop.f32.mrf.mxu1  ;;  %v25742_v50 = vld [vmem:[#allocation9_spill] sm:$0xff] }
 0x33a   : > { %25734 = vst [vmem:[#allocation89_spill] sm:$0xff] %v21381_v14  ;;  %v1181_v14 = vadd.f32 %v20109_v48, %v839_v58  ;;  %v1187_v46 = vadd.f32 %v20140_v17, %v851_v35  ;;  %v1430_v48 = vadd.f32 %v20170_v36, %v1182_v63  ;;  %v21412_v8 = vpop.f32.mrf.mxu0  ;;  %v1432_v45 = vadd.f32 %v20213_v43, %v1184_v6  ;;  %v25741_v43 = vld [vmem:[#allocation6_spill] sm:$0xff]  ;;  %v25744_v6 = vld [vmem:[#allocation13_spill] sm:$0xff] }
 0x33b   : > { %v21395_v44 = vpop.f32.mrf.mxu1  ;;  %v1438_v17 = vadd.f32 %v20246_v19, %v1190_v9 }
 0x33c   : > { %25735 = vst [vmem:[#allocation90_spill] sm:$0xff] %v21395_v44  ;;  %v1429_v53 = vadd.f32 %v20196_v20, %v1181_v14  ;;  %v1435_v5 = vadd.f32 %v20231_v56, %v1187_v46  ;;  %v1678_v59 = vadd.f32 %v20265_v2, %v1430_v48  ;;  %v25737_v20 = vld [vmem:[#allocation8_spill] sm:$0xff]  ;;  %v1680_v54 = vadd.f32 %v25738_v10, %v1432_v45  ;;  %v25745_v2 = vld [vmem:[#allocation10_spill] sm:$0xff]  ;;  %v25748_v45 = vld [vmem:[#allocation15_spill] sm:$0xff] }
 0x33d   : > { %v1684_v36 = vadd.f32 %v25737_v20, %v1436_v62  ;;  %v1686_v56 = vadd.f32 %v25741_v43, %v1438_v17  ;;  %v25749_v20 = vld [vmem:[#allocation12_spill] sm:$0xff] }
 0x33e   : > { %v1677_v3 = vadd.f32 %v20204_v23, %v1429_v53  ;;  %v1683_v35 = vadd.f32 %v25739_v49, %v1435_v5  ;;  %v1926_v23 = vadd.f32 %v25743_v25, %v1678_v59  ;;  %v1928_v9 = vadd.f32 %v25745_v2, %v1680_v54  ;;  %v25746_v53 = vld [vmem:[#allocation11_spill] sm:$0xff]  ;;  %v25750_v49 = vld [vmem:[#allocation14_spill] sm:$0xff]  ;;  %v25751_v43 = vld [vmem:[#allocation20_spill] sm:$0xff] }
 0x33f   : > { %v1932_v19 = vadd.f32 %v25744_v6, %v1684_v36  ;;  %v1934_v10 = vadd.f32 %v25749_v20, %v1686_v56  ;;  %v25753_v59 = vld [vmem:[#allocation16_spill] sm:$0xff]  ;;  %v25754_v25 = vld [vmem:[#allocation17_spill] sm:$0xff]  ;;  %v25756_v54 = vld [vmem:[#allocation18_spill] sm:$0xff] }
 0x340   : > { %v1925_v63 = vadd.f32 %v25742_v50, %v1677_v3  ;;  %v1931_v48 = vadd.f32 %v25746_v53, %v1683_v35  ;;  %v2174_v17 = vadd.f32 %v25750_v49, %v1926_v23  ;;  %v2176_v36 = vadd.f32 %v25753_v59, %v1928_v9  ;;  %v25757_v2 = vld [vmem:[#allocation21_spill] sm:$0xff]  ;;  %v25763_v59 = vld [vmem:[#allocation26_spill] sm:$0xff] }
 0x341   : > { %v2180_v3 = vadd.f32 %v25751_v43, %v1932_v19  ;;  %v2182_v35 = vadd.f32 %v25756_v54, %v1934_v10  ;;  %v25761_v19 = vld [vmem:[#allocation22_spill] sm:$0xff]  ;;  %v25762_v43 = vld [vmem:[#allocation23_spill] sm:$0xff]  ;;  %v25766_v54 = vld [vmem:[#allocation32_spill] sm:$0xff] }
 0x342   : > { %v2173_v5 = vadd.f32 %v25748_v45, %v1925_v63  ;;  %v2179_v6 = vadd.f32 %v25754_v25, %v1931_v48  ;;  %v25759_v45 = vld [vmem:[#allocation24_spill] sm:$0xff]  ;;  %v2424_v49 = vadd.f32 %v25761_v19, %v2176_v36  ;;  %v25764_v25 = vld [vmem:[#allocation25_spill] sm:$0xff] }
 0x343   : > { %v2428_v56 = vadd.f32 %v25759_v45, %v2180_v3  ;;  %v25769_v45 = vld [vmem:[#allocation29_spill] sm:$0xff] }
 0x344   : > { %v2421_v53 = vadd.f32 %v25757_v2, %v2173_v5  ;;  %v2427_v9 = vadd.f32 %v25762_v43, %v2179_v6  ;;  %v25771_v19 = vld [vmem:[#allocation33_spill] sm:$0xff]  ;;  %v25772_v43 = vld [vmem:[#allocation31_spill] sm:$0xff] }
 0x345   : > { %v2676_v5 = vadd.f32 %v25766_v54, %v2428_v56  ;;  %v25776_v54 = vld [vmem:[#allocation35_spill] sm:$0xff] }
 0x346   : > { %v2669_v48 = vadd.f32 %v25763_v59, %v2421_v53  ;;  %v25773_v59 = vld [vmem:[#allocation36_spill] sm:$0xff] }
 0x348   : > { %v2917_v6 = vadd.f32 %v25771_v19, %v2669_v48 }
 0x34c   : > { %v21418_v51 = vpop.f32.mrf.mxu0 }
 0x34d   : > { %25736 = vst [vmem:[#allocation91_spill] sm:$0xff] %v21418_v51  ;;  %v25765_v51 = vld [vmem:[#allocation27_spill] sm:$0xff] }
 0x34e   : > { %v21428_v14 = vpop.f32.mrf.mxu0 }
 0x34f   : > { %25740 = vst [vmem:[#allocation8_spill] sm:$0xff] %v21428_v14 }
 0x350   : > { %v21438_v62 = vpop.f32.mrf.mxu0 }
 0x351   : > { %25747 = vst [vmem:[#allocation4_spill] sm:$0xff] %v21438_v62  ;;  %v25758_v62 = vld [vmem:[#allocation19_spill] sm:$0xff] }
 0x352   : > { %v21448_v14 = vpop.f32.mrf.mxu0  ;;  %v2422_v63 = vadd.f32 %v25758_v62, %v2174_v17  ;;  %v25768_v17 = vld [vmem:[#allocation28_spill] sm:$0xff] }
 0x353   : > { %25755 = vst [vmem:[#allocation6_spill] sm:$0xff] %v21448_v14  ;;  %v2430_v14 = vadd.f32 %v25764_v25, %v2182_v35  ;;  %v2672_v3 = vadd.f32 %v25768_v17, %v2424_v49  ;;  %v2924_v35 = vadd.f32 %v25773_v59, %v2676_v5  ;;  %v25777_v49 = vld [vmem:[#allocation38_spill] sm:$0xff]  ;;  %v25778_v17 = vld [vmem:[#allocation37_spill] sm:$0xff]  ;;  %v25780_v5 = vld [vmem:[#allocation40_spill] sm:$0xff] }
 0x354   : > { %v2670_v10 = vadd.f32 %v25765_v51, %v2422_v63  ;;  %v25775_v63 = vld [vmem:[#allocation34_spill] sm:$0xff] }
 0x355   : > { %v2920_v56 = vadd.f32 %v25775_v63, %v2672_v3  ;;  %v25782_v3 = vld [vmem:[#allocation42_spill] sm:$0xff] }
 0x356   : > { %v2918_v53 = vadd.f32 %v25772_v43, %v2670_v10  ;;  %v3172_v10 = vadd.f32 %v20887_v12, %v2924_v35  ;;  %v25781_v43 = vld [vmem:[#allocation41_spill] sm:$0xff] }
 0x357   : > { %v21404_v38 = vpop.f32.mrf.mxu1  ;;  %v3168_v19 = vadd.f32 %v25780_v5, %v2920_v56 }
 0x359   : > { %v21414_v30 = vpop.f32.mrf.mxu1  ;;  %v3416_v12 = vadd.f32 %v20916_v4, %v3168_v19  ;;  %v25787_v19 = vld [vmem:[#allocation45_spill] sm:$0xff] }
 0x35b   : > { %v21424_v58 = vpop.f32.mrf.mxu1 }
 0x35d   : > { %v21434_v46 = vpop.f32.mrf.mxu1 }
 0x35f   : > { %v21444_v50 = vpop.f32.mrf.mxu1 }
 0x360   : > { %25752 = vst [vmem:[#allocation5_spill] sm:$0xff] %v21444_v50  ;;  %v25770_v50 = vld [vmem:[#allocation30_spill] sm:$0xff] }
 0x361   : > { %v21454_v20 = vpop.f32.mrf.mxu1  ;;  %v2678_v36 = vadd.f32 %v25770_v50, %v2430_v14  ;;  %v25779_v50 = vld [vmem:[#allocation39_spill] sm:$0xff] }
 0x362   : > { %25760 = vst [vmem:[#allocation9_spill] sm:$0xff] %v21454_v20  ;;  %v2675_v20 = vadd.f32 %v25769_v45, %v2427_v9  ;;  %v3165_v9 = vadd.f32 %v25777_v49, %v2917_v6  ;;  %v3166_v48 = vadd.f32 %v25779_v50, %v2918_v53  ;;  %v25784_v53 = vld [vmem:[#allocation44_spill] sm:$0xff] }
 0x363   : > { %v21464_v2 = vpop.f32.mrf.mxu1  ;;  %v2926_v14 = vadd.f32 %v25778_v17, %v2678_v36  ;;  %v3420_v36 = vadd.f32 %v20945_v47, %v3172_v10  ;;  %v3664_v47 = vadd.f32 %v20988_v29, %v3416_v12  ;;  %v25786_v10 = vld [vmem:[#allocation46_spill] sm:$0xff] }
 0x364   : > { %25767 = vst [vmem:[#allocation7_spill] sm:$0xff] %v21464_v2  ;;  %v2923_v2 = vadd.f32 %v25776_v54, %v2675_v20  ;;  %v3413_v63 = vadd.f32 %v20903_v0, %v3165_v9  ;;  %v25783_v54 = vld [vmem:[#allocation43_spill] sm:$0xff] }
 0x365   : > { %v21474_v25 = vpop.f32.mrf.mxu1  ;;  %v3174_v20 = vadd.f32 %v25782_v3, %v2926_v14  ;;  %v3414_v6 = vadd.f32 %v25783_v54, %v3166_v48  ;;  %v3668_v0 = vadd.f32 %v21040_v52, %v3420_v36  ;;  %v25789_v52 = vld [vmem:[#allocation47_spill] sm:$0xff]  ;;  %v25792_v54 = vld [vmem:[#allocation49_spill] sm:$0xff] }
 0x366   : > { %25774 = vst [vmem:[#allocation13_spill] sm:$0xff] %v21474_v25  ;;  %v3171_v59 = vadd.f32 %v25781_v43, %v2923_v2  ;;  %v3661_v2 = vadd.f32 %v20970_v18, %v3413_v63  ;;  %v25788_v43 = vld [vmem:[#allocation50_spill] sm:$0xff]  ;;  %v3912_v3 = vadd.f32 %v25789_v52, %v3664_v47  ;;  %v25791_v63 = vld [vmem:[#allocation51_spill] sm:$0xff]  ;;  %v25799_v52 = vld [vmem:[#allocation64_spill] sm:$0xff] }
 0x367   : > { %v3422_v56 = vadd.f32 %v20947_v15, %v3174_v20  ;;  %v3662_v14 = vadd.f32 %v20978_v24, %v3414_v6  ;;  %v3916_v15 = vadd.f32 %v25788_v43, %v3668_v0  ;;  %v25790_v20 = vld [vmem:[#allocation48_spill] sm:$0xff]  ;;  %v25796_v0 = vld [vmem:[#allocation53_spill] sm:$0xff] }
 0x368   : > { %v3419_v35 = vadd.f32 %v25784_v53, %v3171_v59  ;;  %v3909_v5 = vadd.f32 %v25786_v10, %v3661_v2  ;;  %v25794_v53 = vld [vmem:[#allocation57_spill] sm:$0xff]  ;;  %v4160_v10 = vadd.f32 %v25796_v0, %v3912_v3  ;;  %v5148_v0 = vadd.f32 %v21320_v33, %v21276_v21 }
 0x369   : > { %v3670_v4 = vadd.f32 %v21027_v11, %v3422_v56  ;;  %v3910_v18 = vadd.f32 %v25787_v19, %v3662_v14  ;;  %v25793_v11 = vld [vmem:[#allocation52_spill] sm:$0xff]  ;;  %v25795_v56 = vld [vmem:[#allocation58_spill] sm:$0xff] }
 0x36a   : > { %v3667_v50 = vadd.f32 %v21005_v28, %v3419_v35  ;;  %v4157_v28 = vadd.f32 %v25791_v63, %v3909_v5  ;;  %v4164_v35 = vadd.f32 %v25794_v53, %v3916_v15  ;;  %v25797_v19 = vld [vmem:[#allocation54_spill] sm:$0xff]  ;;  %v25800_v63 = vld [vmem:[#allocation56_spill] sm:$0xff] }
 0x36b   : > { %v21456_v23 = vpop.f32.mrf.mxu0  ;;  %v3918_v6 = vadd.f32 %v25792_v54, %v3670_v4  ;;  %v4158_v12 = vadd.f32 %v25793_v11, %v3910_v18  ;;  %v25801_v54 = vld [vmem:[#allocation62_spill] sm:$0xff]  ;;  %v25802_v11 = vld [vmem:[#allocation59_spill] sm:$0xff] }
 0x36c   : > { %v3915_v29 = vadd.f32 %v25790_v20, %v3667_v50  ;;  %v4405_v14 = vadd.f32 %v25795_v56, %v4157_v28  ;;  %v25798_v50 = vld [vmem:[#allocation55_spill] sm:$0xff]  ;;  %v4412_v15 = vadd.f32 %v25801_v54, %v4164_v35  ;;  %v4408_v53 = vadd.f32 %v25802_v11, %v4160_v10  ;;  %v25804_v56 = vld [vmem:[#allocation61_spill] sm:$0xff] }
 0x36d   : > { %v21466_v62 = vpop.f32.mrf.mxu0  ;;  %v4166_v5 = vadd.f32 %v25798_v50, %v3918_v6  ;;  %v4406_v18 = vadd.f32 %v25800_v63, %v4158_v12  ;;  %v25805_v6 = vld [vmem:[#allocation63_spill] sm:$0xff]  ;;  %v25806_v50 = vld [vmem:[#allocation65_spill] sm:$0xff]  ;;  %v25807_v12 = vld [vmem:[#allocation66_spill] sm:$0xff] }
 0x36e   : > { %v4163_v47 = vadd.f32 %v25797_v19, %v3915_v29  ;;  %v4653_v4 = vadd.f32 %v25799_v52, %v4405_v14  ;;  %v4660_v14 = vadd.f32 %v21272_v13, %v4412_v15  ;;  %v4656_v52 = vadd.f32 %v25806_v50, %v4408_v53  ;;  %v25808_v10 = vld [vmem:[#allocation67_spill] sm:$0xff]  ;;  %v25810_v15 = vld [vmem:[#allocation69_spill] sm:$0xff] }
 0x36f   : > { %v21476_v51 = vpop.f32.mrf.mxu0  ;;  %v4414_v3 = vadd.f32 %v25804_v56, %v4166_v5  ;;  %v4654_v19 = vadd.f32 %v25805_v6, %v4406_v18  ;;  %v25809_v18 = vld [vmem:[#allocation68_spill] sm:$0xff]  ;;  %v25813_v6 = vld [vmem:[#allocation77_spill] sm:$0xff] }
 0x370   : > { %v4901_v29 = vadd.f32 %v21279_v27, %v4653_v4  ;;  %v4908_v33 = vadd.f32 %v21315_v22, %v4660_v14  ;;  %v4904_v13 = vadd.f32 %v21286_v61, %v4656_v52  ;;  %v5153_v11 = vadd.f32 %v25810_v15, %v25809_v18  ;;  %v25815_v14 = vld [vmem:[#allocation79_spill] sm:$0xff]  ;;  %v25816_v50 = vld [vmem:[#allocation81_spill] sm:$0xff]  ;;  %v25817_v52 = vld [vmem:[#allocation72_spill] sm:$0xff] }
 0x371   : > { %v21486_v45 = vpop.f32.mrf.mxu0  ;;  %v4662_v54 = vadd.f32 %v25808_v10, %v4414_v3  ;;  %v4902_v21 = vadd.f32 %v21259_v31, %v4654_v19  ;;  %v25812_v3 = vld [vmem:[#allocation75_spill] sm:$0xff]  ;;  %v25819_v10 = vld [vmem:[#allocation78_spill] sm:$0xff]  ;;  %v25825_v18 = vld [vmem:[#allocation84_spill] sm:$0xff] }
 0x372   : > { %v5156_v56 = vadd.f32 %v21339_v60, %v4908_v33  ;;  %v5152_v31 = vadd.f32 %v21331_v39, %v4904_v13  ;;  %v25814_v60 = vld [vmem:[#allocation71_spill] sm:$0xff]  ;;  %v25823_v13 = vld [vmem:[#allocation74_spill] sm:$0xff] }
 0x373   : > { %v21496_v49 = vpop.f32.mrf.mxu0  ;;  %v4910_v4 = vadd.f32 %v21312_v34, %v4662_v54  ;;  %v5407_v39 = vadd.f32 %v25815_v14, %v25814_v60 }
 0x374   : > { %v5400_v54 = vadd.f32 %v25819_v10, %v5152_v31  ;;  %v25832_v10 = vld [vmem:[#allocation5_spill] sm:$0xff] }
 0x375   : > { %v21480_v44 = vpop.f32.mrf.mxu1  ;;  %v21506_v9 = vpop.f32.mrf.mxu0  ;;  %v5158_v34 = vadd.f32 %v21343_v57, %v4910_v4  ;;  %v25820_v57 = vld [vmem:[#allocation73_spill] sm:$0xff] }
 0x377   : > { %v21490_v25 = vpop.f32.mrf.mxu1  ;;  %v5406_v15 = vadd.f32 %v25825_v18, %v5158_v34  ;;  %v25829_v34 = vld [vmem:[#allocation87_spill] sm:$0xff] }
 0x378   : > { %v21516_v59 = vpop.f32.mrf.mxu0 }
 0x379   : > { %v21500_v17 = vpop.f32.mrf.mxu1 }
 0x37a   : > { %v21528_v2 = vpop.f32.mrf.mxu0 }
 0x37b   : > { %v21510_v48 = vpop.f32.mrf.mxu1 }
 0x37c   : > { %25785 = vst [vmem:[#allocation10_spill] sm:$0xff] %v21510_v48  ;;  %v25803_v48 = vld [vmem:[#allocation60_spill] sm:$0xff] }
 0x37d   : > { %v4411_v28 = vadd.f32 %v25803_v48, %v4163_v47  ;;  %v5149_v48 = vadd.f32 %v21324_v1, %v4901_v29  ;;  %v5396_v47 = vadd.f32 %v21341_v7, %v5148_v0  ;;  %v25811_v7 = vld [vmem:[#allocation70_spill] sm:$0xff]  ;;  %v5401_v29 = vadd.f32 %v25812_v3, %v5153_v11  ;;  %v25826_v11 = vld [vmem:[#allocation85_spill] sm:$0xff] }
 0x37e   : > { %v25828_v3 = vld [vmem:[#allocation86_spill] sm:$0xff] }
 0x37f   : > { %v4659_v63 = vadd.f32 %v25807_v12, %v4411_v28  ;;  %v5397_v53 = vadd.f32 %v21345_v26, %v5149_v48  ;;  %v5688_v1 = vadd.f32 %v21363_v42, %v5396_v47  ;;  %v5150_v28 = vadd.f32 %v25811_v7, %v4902_v21  ;;  %v25818_v12 = vld [vmem:[#allocation76_spill] sm:$0xff]  ;;  %v25822_v21 = vld [vmem:[#allocation82_spill] sm:$0xff] }
 0x380   : > { %v25821_v48 = vld [vmem:[#allocation80_spill] sm:$0xff]  ;;  %v5692_v7 = vadd.f32 %v21375_v55, %v5400_v54 }
 0x381   : > { %v4907_v5 = vadd.f32 %v21296_v37, %v4659_v63  ;;  %v21573_v37 = vpop.permute.xlu0 %6761  ;;  %v5689_v26 = vadd.f32 %v21367_v41, %v5397_v53  ;;  %v5948_v42 = vadd.f32 %v21404_v38, %v5688_v1  ;;  %v5398_v19 = vadd.f32 %v25813_v6, %v5150_v28  ;;  %v25827_v28 = vld [vmem:[#allocation88_spill] sm:$0xff] }
 0x382   : > { %v5399_v63 = vadd.f32 %v25818_v12, %v25817_v52  ;;  %v5402_v47 = vadd.f32 %v25821_v48, %v25820_v57  ;;  %v25830_v12 = vld [vmem:[#allocation89_spill] sm:$0xff] }
 0x383   : > { %v5155_v22 = vadd.f32 %v21335_v16, %v4907_v5  ;;  %v5404_v16 = vadd.f32 %v25816_v50, %v5156_v56  ;;  %v5949_v41 = vadd.f32 %v21414_v30, %v5689_v26  ;;  %v6208_v38 = vadd.f32 %v21456_v23, %v5948_v42  ;;  %v25824_v5 = vld [vmem:[#allocation83_spill] sm:$0xff] }
 0x384   : > { %v5405_v4 = vadd.f32 %v25824_v5, %v25823_v13  ;;  %v5691_v53 = vadd.f32 %v25826_v11, %v5399_v63  ;;  %v5694_v56 = vadd.f32 %v25827_v28, %v5402_v47  ;;  %v5693_v26 = vadd.f32 %v25828_v3, %v5401_v29  ;;  %v25831_v63 = vld [vmem:[#allocation90_spill] sm:$0xff]  ;;  %v25833_v47 = vld [vmem:[#allocation91_spill] sm:$0xff] }
 0x385   : > { %v5403_v33 = vadd.f32 %v25822_v21, %v5155_v22  ;;  %v6209_v31 = vadd.f32 %v21466_v62, %v5949_v41  ;;  %v5690_v6 = vadd.f32 %v25829_v34, %v5398_v19  ;;  %v21605_v14 = vpop.permute.xlu0 %6746  ;;  %v5952_v50 = vadd.f32 %v21434_v46, %v5692_v7  ;;  %v21614_v19 = vpop.permute.xlu1 %6756  ;;  %v25834_v41 = vld [vmem:[#allocation8_spill] sm:$0xff] }
 0x386   : > { %v5697_v42 = vadd.f32 %v21402_v32, %v5405_v4  ;;  %v5951_v55 = vadd.f32 %v21424_v58, %v5691_v53  ;;  %v5696_v29 = vadd.f32 %v25831_v63, %v5404_v16  ;;  %v5954_v32 = vadd.f32 %v25832_v10, %v5694_v56  ;;  %v25836_v4 = vld [vmem:[#allocation4_spill] sm:$0xff] }
 0x387   : > { %v5695_v22 = vadd.f32 %v21389_v40, %v5403_v33  ;;  %v5699_v40 = vadd.f32 %v25830_v12, %v5407_v39  ;;  %v6212_v58 = vadd.f32 %v21486_v45, %v5952_v50  ;;  %v5950_v39 = vadd.f32 %v25834_v41, %v5690_v6  ;;  %v25839_v6 = vld [vmem:[#allocation13_spill] sm:$0xff] }
 0x388   : > { %v6211_v57 = vadd.f32 %v21476_v51, %v5951_v55  ;;  %v6214_v21 = vadd.f32 %v21496_v49, %v5954_v32 }
 0x389   : > { %v5959_v18 = vadd.f32 %v25836_v4, %v5699_v40  ;;  %v6210_v3 = vadd.f32 %v21490_v25, %v5950_v39  ;;  %v6752_v34 = vpop.permute.xlu1 %6751 }
 0x38c   : > { %v21533_v43 = vpop.f32.mrf.mxu0 }
 0x38e   : > { %v21551_v35 = vpop.f32.mrf.mxu0 }
 0x38f   : > { %v6470_v12 = vadd.f32 %v21551_v35, %v6210_v3 }
 0x390   : > { %v21571_v61 = vpop.f32.mrf.mxu0 }
 0x392   : > { %v21595_v1 = vpop.f32.mrf.mxu0 }
 0x398   : > { %v21518_v24 = vpop.f32.mrf.mxu1 }
 0x399   : > { %v6468_v30 = vadd.f32 %v21518_v24, %v6208_v38  ;;  %v5698_v24 = vadd.f32 %v21412_v8, %v5406_v15  ;;  %v5953_v8 = vadd.f32 %v25833_v47, %v5693_v26  ;;  %v25835_v38 = vld [vmem:[#allocation9_spill] sm:$0xff] }
 0x39a   : > { %v21524_v36 = vpop.f32.mrf.mxu1  ;;  %v5955_v16 = vadd.f32 %v25835_v38, %v5695_v22 }
 0x39b   : > { %v6469_v62 = vadd.f32 %v21524_v36, %v6209_v31  ;;  %v6213_v11 = vadd.f32 %v21480_v44, %v5953_v8  ;;  %v5958_v44 = vadd.f32 %v25839_v6, %v5698_v24 }
 0x39c   : > { %v21537_v20 = vpop.f32.mrf.mxu1  ;;  %v6215_v15 = vadd.f32 %v21506_v9, %v5955_v16 }
 0x39d   : > { %v6471_v13 = vadd.f32 %v21537_v20, %v6211_v57  ;;  %v6473_v26 = vadd.f32 %v21533_v43, %v6213_v11  ;;  %v6218_v25 = vadd.f32 %v21528_v2, %v5958_v44 }
 0x39e   : > { %v21556_v27 = vpop.f32.mrf.mxu1 }
 0x39f   : > { %v6472_v51 = vadd.f32 %v21556_v27, %v6212_v58  ;;  %v25837_v27 = vld [vmem:[#allocation6_spill] sm:$0xff] }
 0x3a0   : > { %v6372_v0 = vpop.f32.mrf.mxu1  ;;  %v5956_v31 = vadd.f32 %v25837_v27, %v5696_v29 }
 0x3a1   : > { %v6474_v53 = vadd.f32 %v6372_v0, %v6214_v21 }
 0x3a2   : > { %v6374_v23 = vpop.f32.mrf.mxu1 }
 0x3a3   : > { %v6475_v0 = vadd.f32 %v6374_v23, %v6215_v15  ;;  %v25840_v23 = vld [vmem:[#allocation10_spill] sm:$0xff] }
 0x3a4   : > { %v6378_v48 = vpop.f32.mrf.mxu1  ;;  %v6216_v29 = vadd.f32 %v25840_v23, %v5956_v31 }
 0x3a6   : > { %v6380_v28 = vpop.f32.mrf.mxu1 }
 0x3a7   : > { %v6478_v57 = vadd.f32 %v6380_v28, %v6218_v25 }
 0x3ac   : > { %v6620_v60 = vpop.f32.mrf.mxu0 }
 0x3ad   : > { %v6728_v52 = vadd.f32 %v6620_v60, %v6468_v30  ;;  %v25838_v30 = vld [vmem:[#allocation7_spill] sm:$0xff] }
 0x3ae   : > { %v6622_v54 = vpop.f32.mrf.mxu0  ;;  %v5957_v22 = vadd.f32 %v25838_v30, %v5697_v42 }
 0x3af   : > { %v21619_v46 = vadd.f32 %v21605_v14, %v6728_v52  ;;  %v6729_v36 = vadd.f32 %v6622_v54, %v6469_v62  ;;  %v6219_v52 = vadd.f32 %v21500_v17, %v5959_v18 }
 0x3b0   : > { %v6626_v33 = vpop.f32.mrf.mxu0  ;;  %v6217_v62 = vadd.f32 %v21516_v59, %v5957_v22 }
 0x3b1   : > { %v16727_v45 = vmul.f32 -1.442695, %v21619_v46  ;;  %v21629_v5 = vadd.f32 %v21605_v14, %v6729_v36  ;;  %v6731_v20 = vadd.f32 %v6626_v33, %v6471_v13  ;;  %v6479_v10 = vadd.f32 %v21571_v61, %v6219_v52 }
 0x3b2   : > { %v6628_v7 = vpop.f32.mrf.mxu0  ;;  %v6477_v17 = vadd.f32 %v6378_v48, %v6217_v62  ;;  %v6476_v36 = vadd.f32 %v21595_v1, %v6216_v29 }
 0x3b3   : > { %18662 = vpow2.f32 %v16727_v45  ;;  %v16728_v49 = vmul.f32 -1.442695, %v21629_v5  ;;  %v6732_v56 = vadd.f32 %v6628_v7, %v6472_v51  ;;  %v21646_v43 = vadd.f32 %v6752_v34, %v6731_v20 }
 0x3b4   : > { %v6632_v9 = vpop.f32.mrf.mxu0 }
 0x3b5   : > { %v21640_v60 = vadd.f32 %v6752_v34, %v6732_v56  ;;  %v6734_v55 = vadd.f32 %v6632_v9, %v6474_v53  ;;  %v18092_v50 = vpop.f32.mrf.mxu1  ;;  %18664 = vpow2.f32 %v16728_v49  ;;  %v16730_v39 = vmul.f32 -1.442695, %v21646_v43 }
 0x3b6   : > { %v6634_v42 = vpop.f32.mrf.mxu0  ;;  %v6733_v40 = vadd.f32 %v18092_v50, %v6473_v26 }
 0x3b7   : > { %v6735_v63 = vadd.f32 %v6634_v42, %v6475_v0  ;;  %v6709_v24 = vpop.f32.mrf.mxu1  ;;  %v16731_v35 = vmul.f32 -1.442695, %v21640_v60  ;;  %v21654_v58 = vadd.f32 %v21614_v19, %v6734_v55  ;;  %v6891_v0 = vpop.permute.xlu1 %6890 }
 0x3b8   : > { %v21650_v32 = vadd.f32 %v6752_v34, %v6733_v40  ;;  %v6638_v59 = vpop.f32.mrf.mxu0  ;;  %v6730_v54 = vadd.f32 %v6709_v24, %v6470_v12  ;;  %v6893_v34 = vpop.permute.xlu0 %6892 }
 0x3b9   : > { %v18095_v2 = vpop.f32.mrf.mxu1  ;;  %v21663_v48 = vadd.f32 %v21614_v19, %v6735_v63  ;;  %v6737_v38 = vadd.f32 %v6638_v59, %v6477_v17  ;;  %v21685_v52 = vsel %vm3453_vm12, %v6891_v0, %v6893_v34 }
 0x3ba   : > { %v16732_v47 = vmul.f32 -1.442695, %v21650_v32  ;;  %v21659_v8 = vadd.f32 %v21605_v14, %v6730_v54  ;;  %v6640_v61 = vpop.f32.mrf.mxu0  ;;  %v6739_v41 = vadd.f32 %v18095_v2, %v6479_v10  ;;  %v16733_v14 = vmul.f32 -1.442695, %v21654_v58  ;;  %25841 = vst [vmem:[#allocation11_spill] sm:$0xff] %v21685_v52 }
 0x3bb   : > { %v6738_v16 = vadd.f32 %v6640_v61, %v6478_v57  ;;  %v6719_v21 = vpop.f32.mrf.mxu1  ;;  %v16734_v15 = vmul.f32 -1.442695, %v21663_v48  ;;  %v21679_v11 = vadd.f32 %v21573_v37, %v6737_v38  ;;  %v21691_v17 = vpop.permute.xlu1 %6894 }
 0x3bc   : > { %18666 = vpow2.f32 %v16732_v47  ;;  %v16729_v33 = vmul.f32 -1.442695, %v21659_v8  ;;  %v21667_v1 = vadd.f32 %v21573_v37, %v6739_v41  ;;  %v6736_v13 = vadd.f32 %v6719_v21, %v6476_v36  ;;  %25842 = vst [vmem:[#allocation15_spill] sm:$0xff] %v21691_v17 }
 0x3bd   : > { %18668 = vpow2.f32 %v16731_v35  ;;  %v21671_v51 = vadd.f32 %v21573_v37, %v6738_v16  ;;  %v21698_v61 = vsel %vm3453_vm12, %v6893_v34, %v21691_v17 }
 0x3be   : > { %18670 = vpow2.f32 %v16729_v33  ;;  %v16738_v45 = vmul.f32 -1.442695, %v21667_v1  ;;  %v21675_v4 = vadd.f32 %v21614_v19, %v6736_v13  ;;  %v16736_v19 = vmul.f32 -1.442695, %v21679_v11  ;;  %25843 = vst [vmem:[#allocation12_spill] sm:$0xff] %v21698_v61 }
 0x3bf   : > { %18672 = vpow2.f32 %v16730_v39  ;;  %v16737_v28 = vmul.f32 -1.442695, %v21671_v51 }
 0x3c0   : > { %v18663_v18 = vpop.eup %18662  ;;  %18674 = vpow2.f32 %v16738_v45  ;;  %v16735_v53 = vmul.f32 -1.442695, %v21675_v4 }
 0x3c1   : > { %v6812_v7 = vadd.f32 1.0, %v18663_v18  ;;  %18676 = vpow2.f32 %v16733_v14 }
 0x3c2   : > { %18678 = vpow2.f32 %v16735_v53  ;;  %v18665_v49 = vpop.eup %18664 }
 0x3c3   : > { %18680 = vrcp.f32 %v6812_v7  ;;  %v6813_v20 = vadd.f32 1.0, %v18665_v49 }
 0x3c4   : > { %18682 = vpow2.f32 %v16734_v15 }
 0x3c5   : > { %18684 = vpow2.f32 %v16737_v28 }
 0x3c6   : > { %18686 = vpow2.f32 %v16736_v19 }
 0x3c7   : > { %18688 = vrcp.f32 %v6813_v20 }
 0x3c9   : > { %v18667_v56 = vpop.eup %18666 }
 0x3ca   : > { %v18669_v27 = vpop.eup %18668  ;;  %v6817_v37 = vadd.f32 1.0, %v18667_v56 }
 0x3cb   : > { %v18671_v31 = vpop.eup %18670  ;;  %v6816_v26 = vadd.f32 1.0, %v18669_v27 }
 0x3cc   : > { %v18673_v30 = vpop.eup %18672  ;;  %18690 = vrcp.f32 %v6817_v37  ;;  %v6814_v22 = vadd.f32 1.0, %v18671_v31 }
 0x3cd   : > { %v18675_v3 = vpop.eup %18674  ;;  %v6815_v50 = vadd.f32 1.0, %v18673_v30 }
 0x3ce   : > { %v18677_v9 = vpop.eup %18676  ;;  %18692 = vrcp.f32 %v6814_v22  ;;  %v6823_v6 = vadd.f32 1.0, %v18675_v3 }
 0x3cf   : > { %v18679_v44 = vpop.eup %18678  ;;  %v6818_v40 = vadd.f32 1.0, %v18677_v9 }
 0x3d0   : > { %v18681_v55 = vpop.eup %18680  ;;  %18694 = vrcp.f32 %v6823_v6  ;;  %v6820_v62 = vadd.f32 1.0, %v18679_v44 }
 0x3d1   : > { %v18683_v12 = vpop.eup %18682  ;;  %v6848_v42 = vmul.f32 %v18681_v55, %v21619_v46  ;;  %18696 = vrcp.f32 %v6816_v26 }
 0x3d2   : > { %18698 = vrcp.f32 %v6820_v62  ;;  %v18685_v25 = vpop.eup %18684  ;;  %v6819_v24 = vadd.f32 1.0, %v18683_v12 }
 0x3d3   : > { %v6901_v63 = vmul.f32 %v21685_v52, %v6848_v42  ;;  %18700 = vrcp.f32 %v6815_v50  ;;  %v18687_v23 = vpop.eup %18686  ;;  %v6822_v29 = vadd.f32 1.0, %v18685_v25 }
 0x3d4   : > { %18702 = vrcp.f32 %v6818_v40  ;;  %v18689_v10 = vpop.eup %18688  ;;  %v6821_v59 = vadd.f32 1.0, %v18687_v23 }
 0x3d5   : > { %6925 = vrot.lane.b32.xlu1 %v6901_v63, %s19164_s15  ;;  %18704 = vrcp.f32 %v6819_v24  ;;  %v6849_v35 = vmul.f32 %v18689_v10, %v21629_v5 }
 0x3d6   : > { %18706 = vrcp.f32 %v6822_v29 }
 0x3d7   : > { %18708 = vrcp.f32 %v6821_v59 }
 0x3d9   : > { %v18691_v54 = vpop.eup %18690 }
 0x3da   : > { %v6853_v46 = vmul.f32 %v18691_v54, %v21650_v32  ;;  %v21886_v54 = vld [vmem:[%s25622_s4 + $0x340] sm:$0xff] }
 0x3db   : > { %v18693_v57 = vpop.eup %18692  ;;  %18104 = vmatprep.mubr.msk.f32.mxu0 %vm571_vm0, %v21886_v54 }
 0x3dc   : > { %v6850_v2 = vmul.f32 %v18693_v57, %v21659_v8  ;;  %v6906_v36 = vmul.f32 %v21691_v17, %v6853_v46  ;;  %v6902_v8 = vmul.f32 %v21698_v61, %v6849_v35 }
 0x3dd   : > { %v18695_v47 = vpop.eup %18694 }
 0x3de   : > { %v18697_v41 = vpop.eup %18696  ;;  %6935 = vrot.lane.b32.xlu0 %v6906_v36, %s19164_s15  ;;  %v6903_v32 = vmul.f32 %v21691_v17, %v6850_v2  ;;  %v6859_v38 = vmul.f32 %v18695_v47, %v21667_v1 }
 0x3df   : > { %v18699_v39 = vpop.eup %18698  ;;  %v6852_v21 = vmul.f32 %v18697_v41, %v21640_v60 }
 0x3e0   : > { %v6856_v5 = vmul.f32 %v18699_v39, %v21675_v4  ;;  %6929 = vrot.lane.b32.xlu1 %v6903_v32, %s19164_s15  ;;  %v18701_v16 = vpop.eup %18700  ;;  %v6912_v1 = vmul.f32 %v21691_v17, %v6859_v38 }
 0x3e1   : > { %v18703_v13 = vpop.eup %18702  ;;  %v6851_v14 = vmul.f32 %v18701_v16, %v21646_v43  ;;  %v6905_v18 = vmul.f32 %v21698_v61, %v6852_v21 }
 0x3e2   : > { %6927 = vrot.lane.b32.xlu0 %v6902_v8, %s19164_s15  ;;  %v6909_v33 = vmul.f32 %v21691_v17, %v6856_v5  ;;  %v18705_v45 = vpop.eup %18704  ;;  %v6854_v4 = vmul.f32 %v18703_v13, %v21654_v58 }
 0x3e3   : > { %v18707_v15 = vpop.eup %18706  ;;  %v6855_v60 = vmul.f32 %v18705_v45, %v21663_v48  ;;  %v6904_v53 = vmul.f32 %v21685_v52, %v6851_v14 }
 0x3e4   : > { %6941 = vrot.lane.b32.xlu1 %v6909_v33, %s19164_s15  ;;  %v18709_v7 = vpop.eup %18708  ;;  %v6858_v43 = vmul.f32 %v18707_v15, %v21671_v51  ;;  %v6907_v28 = vmul.f32 %v21685_v52, %v6854_v4 }
 0x3e5   : > { %v6857_v58 = vmul.f32 %v18709_v7, %v21679_v11  ;;  %v6908_v49 = vmul.f32 %v21698_v61, %v6855_v60 }
 0x3e6   : > { %6947 = vrot.lane.b32.xlu0 %v6912_v1, %s19164_s15  ;;  %v6911_v48 = vmul.f32 %v21698_v61, %v6858_v43 }
 0x3e7   : > { %v6910_v19 = vmul.f32 %v21685_v52, %v6857_v58  ;;  %v22132_v52 = vld [vmem:[%s25622_s4 + $0x358] sm:$0xff] }
 0x3e8   : > { %6933 = vrot.lane.b32.xlu1 %v6905_v18, %s19164_s15 }
 0x3ea   : > { %6931 = vrot.lane.b32.xlu0 %v6904_v53, %s19164_s15 }
 0x3ec   : > { %6937 = vrot.lane.b32.xlu1 %v6907_v28, %s19164_s15 }
 0x3ee   : > { %6939 = vrot.lane.b32.xlu0 %v6908_v49, %s19164_s15 }
 0x3f0   : > { %6945 = vrot.lane.b32.xlu1 %v6911_v48, %s19164_s15 }
 0x3f2   : > { %6943 = vrot.lane.b32.xlu0 %v6910_v19, %s19164_s15 }
 0x447   : > { %v6926_v51 = vpop.permute.xlu1 %6925 }
 0x448   : > { %6971 = vst.msk [vmem:[#allocation2] sm:$0xff] %vm6970_vm5, %v6926_v51 }
 0x44f   : > { %v21730_v20 = vld [vmem:[#allocation2] sm:$0xff] }
 0x450   : > { %7018 = vrot.lane.b32.xlu1 %v21730_v20, %s19145_s14  ;;  %v6936_v11 = vpop.permute.xlu0 %6935 }
 0x452   : > { %v6930_v56 = vpop.permute.xlu1 %6929 }
 0x454   : > { %7248 = vrot.lane.b32.xlu1 %v21730_v20, %s19144_s21  ;;  %v6928_v27 = vpop.permute.xlu0 %6927 }
 0x455   : > { %v21737_v37 = vsel %vm6949_vm9, %v6926_v51, %v6928_v27  ;;  %v6951_v31 = vsel %vm6949_vm9, %v6928_v27, %v6930_v56 }
 0x456   : > { %6974 = vst.msk [vmem:[#allocation2 + $0x10] sm:$0xff] %vm6973_vm10, %v6951_v31  ;;  %v6942_v30 = vpop.permute.xlu1 %6941 }
 0x458   : > { %7483 = vrot.lane.b32.xlu1 %v21730_v20, %s19146_s28  ;;  %v6948_v22 = vpop.permute.xlu0 %6947 }
 0x45a   : > { %v6934_v3 = vpop.permute.xlu1 %6933 }
 0x45b   : > { %v6953_v26 = vsel %vm6949_vm9, %v6934_v3, %v6936_v11 }
 0x45c   : > { %6977 = vst.msk [vmem:[#allocation2 + $0x30] sm:$0xff] %vm6973_vm10, %v6953_v26  ;;  %7730 = vrot.lane.b32.xlu1 %v21730_v20, %s19149_s27  ;;  %v6932_v34 = vpop.permute.xlu0 %6931 }
 0x45d   : > { %v21748_v9 = vsel %vm6949_vm9, %v6932_v34, %v6934_v3  ;;  %6975 = vst.msk [vmem:[#allocation2 + $0x20] sm:$0xff] %vm6970_vm5, %v6932_v34  ;;  %v21751_v6 = vld [vmem:[#allocation2 + $0x10] sm:$0xff] }
 0x45e   : > { %7022 = vrot.lane.b32.xlu0 %v21751_v6, %s19145_s14  ;;  %v6938_v44 = vpop.permute.xlu1 %6937 }
 0x45f   : > { %6978 = vst.msk [vmem:[#allocation2 + $0x40] sm:$0xff] %vm6970_vm5, %v6938_v44 }
 0x460   : > { %7977 = vrot.lane.b32.xlu1 %v21730_v20, %s19150_s23  ;;  %v6940_v0 = vpop.permute.xlu0 %6939 }
 0x461   : > { %v21759_v55 = vsel %vm6949_vm9, %v6938_v44, %v6940_v0  ;;  %v6955_v50 = vsel %vm6949_vm9, %v6940_v0, %v6942_v30 }
 0x462   : > { %6980 = vst.msk [vmem:[#allocation2 + $0x50] sm:$0xff] %vm6973_vm10, %v6955_v50  ;;  %7252 = vrot.lane.b32.xlu0 %v21751_v6, %s19144_s21  ;;  %v6946_v62 = vpop.permute.xlu1 %6945 }
 0x463   : > { %v6957_v12 = vsel %vm6949_vm9, %v6946_v62, %v6948_v22  ;;  %v21793_v63 = vld [vmem:[#allocation2 + $0x30] sm:$0xff] }
 0x464   : > { %6983 = vst.msk [vmem:[#allocation2 + $0x70] sm:$0xff] %vm6973_vm10, %v6957_v12  ;;  %7020 = vrot.lane.b32.xlu1 %v21737_v37, %s19145_s14  ;;  %v6944_v42 = vpop.permute.xlu0 %6943  ;;  %v21783_v25 = vld [vmem:[#allocation2 + $0x20] sm:$0xff]  ;;  %v16849_v12 = vld [vmem:[%s25623_s5 + $0x30] sm:$0xff] }
 0x465   : > { %v21770_v40 = vsel %vm6949_vm9, %v6944_v42, %v6946_v62  ;;  %6981 = vst.msk [vmem:[#allocation2 + $0x60] sm:$0xff] %vm6970_vm5, %v6944_v42 }
 0x466   : > { %7250 = vrot.lane.b32.xlu0 %v21737_v37, %s19144_s21  ;;  %v21821_v24 = vld [vmem:[#allocation2 + $0x40] sm:$0xff] }
 0x468   : > { %7485 = vrot.lane.b32.xlu1 %v21737_v37, %s19146_s28 }
 0x469   : > { %v21831_v23 = vld [vmem:[#allocation2 + $0x50] sm:$0xff] }
 0x46a   : > { %7487 = vrot.lane.b32.xlu0 %v21751_v6, %s19146_s28 }
 0x46b   : > { %v21869_v10 = vld [vmem:[#allocation2 + $0x70] sm:$0xff] }
 0x46c   : > { %7979 = vrot.lane.b32.xlu1 %v21737_v37, %s19150_s23  ;;  %v21855_v29 = vld [vmem:[#allocation2 + $0x60] sm:$0xff] }
 0x46e   : > { %7734 = vrot.lane.b32.xlu0 %v21751_v6, %s19149_s27 }
 0x470   : > { %7254 = vrot.lane.b32.xlu1 %v21783_v25, %s19144_s21 }
 0x472   : > { %7732 = vrot.lane.b32.xlu0 %v21737_v37, %s19149_s27 }
 0x474   : > { %7736 = vrot.lane.b32.xlu1 %v21783_v25, %s19149_s27 }
 0x476   : > { %7981 = vrot.lane.b32.xlu0 %v21751_v6, %s19150_s23 }
 0x478   : > { %7028 = vrot.lane.b32.xlu1 %v21793_v63, %s19145_s14 }
 0x47a   : > { %7024 = vrot.lane.b32.xlu0 %v21783_v25, %s19145_s14 }
 0x47c   : > { %7258 = vrot.lane.b32.xlu1 %v21793_v63, %s19144_s21 }
 0x47e   : > { %7489 = vrot.lane.b32.xlu0 %v21783_v25, %s19146_s28 }
 0x480   : > { %7256 = vrot.lane.b32.xlu1 %v21748_v9, %s19144_s21 }
 0x482   : > { %7983 = vrot.lane.b32.xlu0 %v21783_v25, %s19150_s23 }
 0x484   : > { %7493 = vrot.lane.b32.xlu1 %v21793_v63, %s19146_s28 }
 0x486   : > { %7026 = vrot.lane.b32.xlu0 %v21748_v9, %s19145_s14 }
 0x488   : > { %7740 = vrot.lane.b32.xlu1 %v21793_v63, %s19149_s27 }
 0x48a   : > { %7491 = vrot.lane.b32.xlu0 %v21748_v9, %s19146_s28 }
 0x48c   : > { %7738 = vrot.lane.b32.xlu1 %v21748_v9, %s19149_s27 }
 0x48e   : > { %7985 = vrot.lane.b32.xlu0 %v21748_v9, %s19150_s23 }
 0x490   : > { %7987 = vrot.lane.b32.xlu1 %v21793_v63, %s19150_s23 }
 0x492   : > { %7260 = vrot.lane.b32.xlu0 %v21821_v24, %s19144_s21 }
 0x494   : > { %8234 = vrot.lane.b32.xlu1 %v21793_v63, %s19151_s22 }
 0x496   : > { %7742 = vrot.lane.b32.xlu0 %v21821_v24, %s19149_s27 }
 0x498   : > { %7030 = vrot.lane.b32.xlu1 %v21821_v24, %s19145_s14 }
 0x49a   : > { %7034 = vrot.lane.b32.xlu0 %v21831_v23, %s19145_s14 }
 0x49c   : > { %7495 = vrot.lane.b32.xlu1 %v21821_v24, %s19146_s28 }
 0x49e   : > { %7264 = vrot.lane.b32.xlu0 %v21831_v23, %s19144_s21 }
 0x4a0   : > { %7989 = vrot.lane.b32.xlu1 %v21821_v24, %s19150_s23 }
 0x4a2   : > { %7262 = vrot.lane.b32.xlu0 %v21759_v55, %s19144_s21 }
 0x4a4   : > { %7032 = vrot.lane.b32.xlu1 %v21759_v55, %s19145_s14 }
 0x4a6   : > { %7499 = vrot.lane.b32.xlu0 %v21831_v23, %s19146_s28 }
 0x4a8   : > { %7497 = vrot.lane.b32.xlu1 %v21759_v55, %s19146_s28 }
 0x4aa   : > { %7746 = vrot.lane.b32.xlu0 %v21831_v23, %s19149_s27 }
 0x4ac   : > { %7991 = vrot.lane.b32.xlu1 %v21759_v55, %s19150_s23 }
 0x4ae   : > { %7744 = vrot.lane.b32.xlu0 %v21759_v55, %s19149_s27 }
 0x4b0   : > { %7266 = vrot.lane.b32.xlu1 %v21855_v29, %s19144_s21 }
 0x4b2   : > { %7993 = vrot.lane.b32.xlu0 %v21831_v23, %s19150_s23 }
 0x4b4   : > { %7748 = vrot.lane.b32.xlu1 %v21855_v29, %s19149_s27 }
 0x4b6   : > { %8240 = vrot.lane.b32.xlu0 %v21831_v23, %s19151_s22 }
 0x4b8   : > { %8242 = vrot.lane.b32.xlu1 %v21855_v29, %s19151_s22 }
 0x4ba   : > { %8238 = vrot.lane.b32.xlu0 %v21759_v55, %s19151_s22 }
 0x4bc   : > { %7040 = vrot.lane.b32.xlu1 %v21869_v10, %s19145_s14 }
 0x4be   : > { %7036 = vrot.lane.b32.xlu0 %v21855_v29, %s19145_s14 }
 0x4c0   : > { %8232 = vrot.lane.b32.xlu1 %v21748_v9, %s19151_s22 }
 0x4c2   : > { %v21877_v59 = vpop.permute.xlu1 %7018  ;;  %7501 = vrot.lane.b32.xlu0 %v21855_v29, %s19146_s28 }
 0x4c4   : > { %7268 = vrot.lane.b32.xlu1 %v21770_v40, %s19144_s21 }
 0x4c6   : > { %v21888_v46 = vpop.permute.xlu1 %7248  ;;  %7995 = vrot.lane.b32.xlu0 %v21855_v29, %s19150_s23 }
 0x4c8   : > { %7503 = vrot.lane.b32.xlu1 %v21770_v40, %s19146_s28 }
 0x4ca   : > { %v21896_v57 = vpop.permute.xlu1 %7483  ;;  %7038 = vrot.lane.b32.xlu0 %v21770_v40, %s19145_s14 }
 0x4cc   : > { %7750 = vrot.lane.b32.xlu1 %v21770_v40, %s19149_s27 }
 0x4ce   : > { %v21902_v35 = vpop.permute.xlu1 %7730  ;;  %8236 = vrot.lane.b32.xlu0 %v21821_v24, %s19151_s22 }
 0x4d0   : > { %7997 = vrot.lane.b32.xlu1 %v21770_v40, %s19150_s23  ;;  %v21908_v2 = vpop.permute.xlu0 %7022 }
 0x4d2   : > { %v21910_v36 = vpop.permute.xlu1 %7977  ;;  %7270 = vrot.lane.b32.xlu0 %v21869_v10, %s19144_s21 }
 0x4d3   : > { %25844 = vst [vmem:[#allocation14_spill] sm:$0xff] %v21910_v36 }
 0x4d4   : > { %8244 = vrot.lane.b32.xlu1 %v21770_v40, %s19151_s22  ;;  %v21916_v47 = vpop.permute.xlu0 %7252 }
 0x4d6   : > { %v21918_v41 = vpop.permute.xlu1 %7020  ;;  %7505 = vrot.lane.b32.xlu0 %v21869_v10, %s19146_s28 }
 0x4d8   : > { %8230 = vrot.lane.b32.xlu1 %v21783_v25, %s19151_s22  ;;  %v21924_v32 = vpop.permute.xlu0 %7250 }
 0x4da   : > { %v21926_v39 = vpop.permute.xlu1 %7485  ;;  %7752 = vrot.lane.b32.xlu0 %v21869_v10, %s19149_s27 }
 0x4dc   : > { %8491 = vrot.lane.b32.xlu1 %v21770_v40, %s19154_s29  ;;  %v21932_v38 = vpop.permute.xlu0 %7487 }
 0x4de   : > { %v21934_v5 = vpop.permute.xlu1 %7979  ;;  %7999 = vrot.lane.b32.xlu0 %v21869_v10, %s19150_s23 }
 0x4e0   : > { %8224 = vrot.lane.b32.xlu1 %v21730_v20, %s19151_s22  ;;  %v21940_v8 = vpop.permute.xlu0 %7734 }
 0x4e2   : > { %v21942_v16 = vpop.permute.xlu1 %7254  ;;  %8246 = vrot.lane.b32.xlu0 %v21869_v10, %s19151_s22 }
 0x4e4   : > { %8485 = vrot.lane.b32.xlu1 %v21759_v55, %s19154_s29  ;;  %v21948_v21 = vpop.permute.xlu0 %7732 }
 0x4e6   : > { %v21950_v33 = vpop.permute.xlu1 %7736  ;;  %8228 = vrot.lane.b32.xlu0 %v21751_v6, %s19151_s22 }
 0x4e8   : > { %8483 = vrot.lane.b32.xlu1 %v21821_v24, %s19154_s29  ;;  %v21956_v13 = vpop.permute.xlu0 %7981 }
 0x4ea   : > { %v21958_v14 = vpop.permute.xlu1 %7028  ;;  %8226 = vrot.lane.b32.xlu0 %v21737_v37, %s19151_s22 }
 0x4ec   : > { %8481 = vrot.lane.b32.xlu1 %v21793_v63, %s19154_s29  ;;  %v21964_v1 = vpop.permute.xlu0 %7024 }
 0x4ee   : > { %v21966_v45 = vpop.permute.xlu1 %7258  ;;  %8493 = vrot.lane.b32.xlu0 %v21869_v10, %s19154_s29 }
 0x4f0   : > { %8473 = vrot.lane.b32.xlu1 %v21737_v37, %s19154_s29  ;;  %v21972_v4 = vpop.permute.xlu0 %7489 }
 0x4f2   : > { %v21974_v18 = vpop.permute.xlu1 %7256  ;;  %8489 = vrot.lane.b32.xlu0 %v21855_v29, %s19154_s29 }
 0x4f4   : > { %8471 = vrot.lane.b32.xlu1 %v21730_v20, %s19154_s29  ;;  %v21980_v15 = vpop.permute.xlu0 %7983 }
 0x4f6   : > { %v21982_v60 = vpop.permute.xlu1 %7493  ;;  %8487 = vrot.lane.b32.xlu0 %v21831_v23, %s19154_s29 }
 0x4f8   : > { %8738 = vrot.lane.b32.xlu1 %v21770_v40, %s25632_s18  ;;  %v21988_v53 = vpop.permute.xlu0 %7026 }
 0x4fa   : > { %v21990_v7 = vpop.permute.xlu1 %7740  ;;  %8479 = vrot.lane.b32.xlu0 %v21748_v9, %s19154_s29 }
 0x4fc   : > { %8736 = vrot.lane.b32.xlu1 %v21855_v29, %s25632_s18  ;;  %v21996_v43 = vpop.permute.xlu0 %7491 }
 0x4fe   : > { %v21998_v28 = vpop.permute.xlu1 %7738  ;;  %8477 = vrot.lane.b32.xlu0 %v21783_v25, %s19154_s29 }
 0x500   : > { %8728 = vrot.lane.b32.xlu1 %v21793_v63, %s25632_s18  ;;  %v22004_v58 = vpop.permute.xlu0 %7985 }
 0x502   : > { %v22006_v49 = vpop.permute.xlu1 %7987  ;;  %8475 = vrot.lane.b32.xlu0 %v21751_v6, %s19154_s29 }
 0x504   : > { %8726 = vrot.lane.b32.xlu1 %v21748_v9, %s25632_s18  ;;  %v22012_v48 = vpop.permute.xlu0 %7260 }
 0x506   : > { %v22014_v19 = vpop.permute.xlu1 %8234  ;;  %8740 = vrot.lane.b32.xlu0 %v21869_v10, %s25632_s18 }
 0x507   : > { %25845 = vst [vmem:[#allocation20_spill] sm:$0xff] %v22014_v19 }
 0x508   : > { %8724 = vrot.lane.b32.xlu1 %v21783_v25, %s25632_s18  ;;  %v22020_v51 = vpop.permute.xlu0 %7742 }
 0x50a   : > { %v22022_v11 = vpop.permute.xlu1 %7030  ;;  %8734 = vrot.lane.b32.xlu0 %v21831_v23, %s25632_s18 }
 0x50c   : > { %8985 = vrot.lane.b32.xlu1 %v21770_v40, %s19156_s19  ;;  %v22028_v56 = vpop.permute.xlu0 %7034  ;;  %v16847_v40 = vld [vmem:[%s25623_s5 + $0x20] sm:$0xff] }
 0x50e   : > { %v22030_v27 = vpop.permute.xlu1 %7495  ;;  %8732 = vrot.lane.b32.xlu0 %v21759_v55, %s25632_s18 }
 0x510   : > { %8718 = vrot.lane.b32.xlu1 %v21730_v20, %s25632_s18  ;;  %v22036_v31 = vpop.permute.xlu0 %7264 }
 0x512   : > { %v22038_v30 = vpop.permute.xlu1 %7989  ;;  %8730 = vrot.lane.b32.xlu0 %v21821_v24, %s25632_s18 }
 0x514   : > { %8979 = vrot.lane.b32.xlu1 %v21759_v55, %s19156_s19  ;;  %v22044_v22 = vpop.permute.xlu0 %7262 }
 0x516   : > { %v22046_v3 = vpop.permute.xlu1 %7032  ;;  %8722 = vrot.lane.b32.xlu0 %v21751_v6, %s25632_s18 }
 0x517   : > { %v7046_v36 = vsel %vm2213_vm7, %v22022_v11, %v22046_v3 }
 0x518   : > { %8977 = vrot.lane.b32.xlu1 %v21821_v24, %s19156_s19  ;;  %v22052_v26 = vpop.permute.xlu0 %7499 }
 0x51a   : > { %v22054_v34 = vpop.permute.xlu1 %7497  ;;  %8720 = vrot.lane.b32.xlu0 %v21737_v37, %s25632_s18  ;;  %s19168_s18 = smov 24  }
 0x51c   : > { %8975 = vrot.lane.b32.xlu1 %v21793_v63, %s19156_s19  ;;  %v22060_v44 = vpop.permute.xlu0 %7746 }
 0x51e   : > { %v22062_v0 = vpop.permute.xlu1 %7991  ;;  %8987 = vrot.lane.b32.xlu0 %v21869_v10, %s19156_s19  ;;  %v16744_v10 = vld [vmem:[%s25622_s4 + $0x348] sm:$0xff] }
 0x520   : > { %8967 = vrot.lane.b32.xlu1 %v21737_v37, %s19156_s19  ;;  %v22068_v55 = vpop.permute.xlu0 %7744 }
 0x522   : > { %v22070_v50 = vpop.permute.xlu1 %7266  ;;  %8983 = vrot.lane.b32.xlu0 %v21855_v29, %s19156_s19 }
 0x524   : > { %8965 = vrot.lane.b32.xlu1 %v21730_v20, %s19156_s19  ;;  %v22076_v62 = vpop.permute.xlu0 %7993 }
 0x526   : > { %v22081_v42 = vpop.permute.xlu1 %7748  ;;  %8981 = vrot.lane.b32.xlu0 %v21831_v23, %s19156_s19 }
 0x528   : > { %9224 = vperm.xlu1 %18661, %v16849_v12   ;;  %v22085_v37 = vpop.permute.xlu0 %8240 }
 0x529   : > { %25846 = vst [vmem:[#allocation16_spill] sm:$0xff] %v22085_v37 }
 0x52a   : > { %v22090_v63 = vpop.permute.xlu1 %8242  ;;  %8973 = vrot.lane.b32.xlu0 %v21748_v9, %s19156_s19  ;;  %v16850_v9 = vld [vmem:[%s25623_s5 + $0x38] sm:$0xff] }
 0x52b   : > { %25847 = vst [vmem:[#allocation17_spill] sm:$0xff] %v22090_v63 }
 0x52c   : > { %9214 = vperm.xlu1 %18661, %v16847_v40   ;;  %v22094_v20 = vpop.permute.xlu0 %8238  ;;  %v16848_v40 = vld [vmem:[%s25623_s5 + $0x28] sm:$0xff] }
 0x52d   : > { %25848 = vst [vmem:[#allocation18_spill] sm:$0xff] %v22094_v20 }
 0x52e   : > { %v7041_v24 = vpop.permute.xlu1 %7040  ;;  %8971 = vrot.lane.b32.xlu0 %v21783_v25, %s19156_s19 }
 0x52f   : > { %18096 = vmatprep.subr.mxu0 %v7041_v24 }
 0x530   : > { %18097 = vmatpush3.msra.mxu0 %v7041_v24  ;;  %v7037_v23 = vpop.permute.xlu0 %7036 }
 0x531   : > { %18098 = vmatprep.subr.mxu0 %v22028_v56 }
 0x532   : > { %18099 = vmatpush3.msra.mxu0 %v22028_v56  ;;  %v22100_v29 = vpop.permute.xlu1 %8232  ;;  %8969 = vrot.lane.b32.xlu0 %v21751_v6, %s19156_s19  ;;  %v22118_v6 = vld [vmem:[%s25622_s4 + $0x350] sm:$0xff] }
 0x533   : > { %25849 = vst [vmem:[#allocation21_spill] sm:$0xff] %v22100_v29  ;;  %18100 = vmatprep.subr.mxu0 %v21958_v14  ;;  %v22138_v29 = vld [vmem:[#allocation3] sm:$0xff] }
 0x534   : > { %18101 = vmatpush3.msra.mxu0 %v21958_v14  ;;  %v22109_v25 = vpop.permute.xlu0 %7501  ;;  %25850 = vst [vmem:[#allocation19_spill] sm:$0xff] %v22138_v29 }
 0x535   : > { %18102 = vmatprep.subr.mxu0 %v21908_v2 }
 0x536   : > { %18103 = vmatpush3.msra.mxu0 %v21908_v2  ;;  %v7269_v12 = vpop.permute.xlu1 %7268  ;;  %9229 = vperm.xlu0 %18660, %v16850_v9  }
 0x537   : > { %18105 = vmatmul.mubr.msk.f32.vlgmr.msra.gmra.mxu0 %vm571_vm0, %v16744_v10 }
 0x538   : > { %v22125_v61 = vpop.permute.xlu0 %7995  ;;  %18107 = vmatprep.mubr.msk.f32.mxu0 %vm571_vm0, %v22118_v6 }
 0x53a   : > { %v22134_v17 = vpop.permute.xlu1 %7503  ;;  %9219 = vperm.xlu0 %18660, %v16848_v40   ;;  %v7047_v40 = vsel %vm2213_vm7, %v22046_v3, %v22028_v56  ;;  %v7043_v56 = vsel %vm2213_vm7, %v21918_v41, %v21908_v2  ;;  %v7277_v2 = vsel %vm1965_vm6, %v22044_v22, %v22036_v31  ;;  %v7274_v3 = vsel %vm1965_vm6, %v21942_v16, %v21974_v18 }
 0x53b   : > { %18108 = vmatmul.mubr.msk.f32.gmra.mxu0 %vm571_vm0, %v22132_v52  ;;  %v7272_v16 = vsel %vm1965_vm6, %v21888_v46, %v21924_v32 }
 0x53c   : > { %v7039_v9 = vpop.permute.xlu0 %7038  ;;  %7368 = vmatprep.mubr.f32.mxu0 %v22138_v29 }
 0x53d   : > { %v7049_v19 = vsel %vm2213_vm7, %v7039_v9, %v7041_v24  ;;  %v7048_v20 = vsel %vm2213_vm7, %v7037_v23, %v7039_v9  ;;  %v7045_v24 = vsel %vm2213_vm7, %v21988_v53, %v21958_v14 }
 0x53e   : > { %v22143_v37 = vpop.permute.xlu1 %7750  ;;  %7098 = vmatprep.subr.mxu1 %v7049_v19  ;;  %v7044_v19 = vsel %vm2213_vm7, %v21964_v1, %v21988_v53  ;;  %v7278_v1 = vsel %vm1965_vm6, %v22070_v50, %v7269_v12  ;;  %v7275_v53 = vsel %vm1965_vm6, %v21974_v18, %v21966_v45 }
 0x53f   : > { %7099 = vmatpush1.msra.mxu1 %v7048_v20 }
 0x540   : > { %v22148_v63 = vpop.permute.xlu0 %8236  ;;  %7100 = vmatprep.subr.mxu1 %v7047_v40  ;;  %v7512_v40 = vsel %vm2461_vm8, %v22054_v34, %v22052_v26 }
 0x541   : > { %7101 = vmatpush1.msra.mxu1 %v7046_v36  ;;  %v7042_v36 = vsel %vm2213_vm7, %v21877_v59, %v21918_v41 }
 0x542   : > { %v22156_v23 = vpop.permute.xlu1 %7997  ;;  %7102 = vmatprep.subr.mxu1 %v7045_v24  ;;  %v7511_v24 = vsel %vm2461_vm8, %v22030_v27, %v22054_v34  ;;  %v16763_v27 = vld [vmem:[%s25622_s4 + $0x360] sm:$0xff]  ;;  %v7509_v34 = vsel %vm2461_vm8, %v21972_v4, %v21996_v43 }
 0x543   : > { %7103 = vmatpush1.msra.mxu1 %v7044_v19 }
 0x544   : > { %v7271_v20 = vpop.permute.xlu0 %7270  ;;  %7104 = vmatprep.subr.mxu1 %v7043_v56  ;;  %v7507_v56 = vsel %vm2461_vm8, %v21896_v57, %v21926_v39  ;;  %v7760_v57 = vsel %vm3205_vm11, %v22081_v42, %v22143_v37 }
 0x545   : > { %7105 = vmatpush1.msra.mxu1 %v7042_v36  ;;  %v7279_v14 = vsel %vm1965_vm6, %v7269_v12, %v7271_v20  ;;  %v7758_v36 = vsel %vm3205_vm11, %v22020_v51, %v22068_v55 }
 0x546   : > { %v22168_v11 = vpop.permute.xlu1 %8244  ;;  %16747 = vmatmul.mubr.msk.f32.vlgmr.msra.gmra.mxu1 %vm571_vm0, %v21886_v54  ;;  %7328 = vmatprep.subr.mxu0 %v7279_v14  ;;  %v7276_v54 = vsel %vm1965_vm6, %v22012_v48, %v22044_v22  ;;  %v16739_v22 = vld [vmem:[%s25622_s4 + $0x320] sm:$0xff]  ;;  %v16766_v14 = vld [vmem:[%s25622_s4 + $0x378] sm:$0xff] }
 0x547   : > { %18110 = vmatprep.subr.mxu1 %v7271_v20  ;;  %7329 = vmatpush1.msra.mxu0 %v7278_v1  ;;  %v7755_v1 = vsel %vm3205_vm11, %v21948_v21, %v21940_v8 }
 0x548   : > { %18111 = vmatpush3.msra.mxu1 %v7271_v20  ;;  %v7506_v59 = vpop.permute.xlu0 %7505  ;;  %7330 = vmatprep.subr.mxu0 %v7277_v2  ;;  %v16764_v20 = vld [vmem:[%s25622_s4 + $0x368] sm:$0xff]  ;;  %v7754_v2 = vsel %vm3205_vm11, %v21902_v35, %v21948_v21 }
 0x549   : > { %18112 = vmatprep.subr.mxu1 %v22036_v31  ;;  %7144 = vmatprep.mubr.f32.mxu1 %v22138_v29 }
 0x54a   : > { %7331 = vmatpush1.msra.mxu0 %v7276_v54  ;;  %18113 = vmatpush3.msra.mxu1 %v22036_v31  ;;  %v22183_v41 = vpop.permute.xlu1 %8230  ;;  %v7273_v31 = vsel %vm1965_vm6, %v21924_v32, %v21916_v47  ;;  %v16777_v54 = vld [vmem:[%s25622_s4 + $0x390] sm:$0xff] }
 0x54b   : > { %16748 = vmatmul.mubr.msk.f32.gmra.mxu1 %vm571_vm0, %v16744_v10  ;;  %7332 = vmatprep.subr.mxu0 %v7275_v53 }
 0x54c   : > { %18114 = vmatprep.subr.mxu1 %v21966_v45  ;;  %7333 = vmatpush1.msra.mxu0 %v7274_v3  ;;  %v22193_v48 = vpop.permute.xlu0 %7752 }
 0x54d   : > { %18115 = vmatpush3.msra.mxu1 %v21966_v45  ;;  %7334 = vmatprep.subr.mxu0 %v7273_v31  ;;  %v7514_v45 = vsel %vm2461_vm8, %v22134_v17, %v7506_v59  ;;  %v7761_v9 = vsel %vm3205_vm11, %v22143_v37, %v22193_v48  ;;  %v7757_v37 = vsel %vm3205_vm11, %v21998_v28, %v21990_v7 }
 0x54e   : > { %18116 = vmatprep.subr.mxu1 %v21916_v47  ;;  %7150 = vmatprep.mubr.f32.mxu1 %v22138_v29  ;;  %v22207_v18 = vpop.permute.xlu1 %8491  ;;  %v8006_v31 = vsel %vm3453_vm12, %v22062_v0, %v22076_v62 }
 0x54f   : > { %7335 = vmatpush1.msra.mxu0 %v7272_v16  ;;  %18117 = vmatpush3.msra.mxu1 %v21916_v47  ;;  %v16740_v47 = vld [vmem:[%s25622_s4 + $0x328] sm:$0xff]  ;;  %v8005_v16 = vsel %vm3453_vm12, %v22038_v30, %v22062_v0  ;;  %v8003_v30 = vsel %vm3453_vm12, %v21980_v15, %v22004_v58 }
 0x550   : > { %16749 = vmatmul.mubr.msk.f32.gmra.mxu1 %vm571_vm0, %v22118_v6  ;;  %16755 = vmatmul.mubr.msk.f32.vlgmr.msra.gmra.mxu0 %vm571_vm0, %v16739_v22  ;;  %v22215_v50 = vpop.permute.xlu0 %7999  ;;  %v16741_v6 = vld [vmem:[%s25622_s4 + $0x330] sm:$0xff]  ;;  %v16788_v0 = vld [vmem:[%s25622_s4 + $0x3a8] sm:$0xff] }
 0x551   : > { %7563 = vmatprep.subr.mxu1 %v7514_v45  ;;  %18124 = vmatprep.subr.mxu0 %v7506_v59  ;;  %v8004_v45 = vsel %vm3453_vm12, %v22004_v58, %v22006_v49 }
 0x552   : > { %18125 = vmatpush3.msra.mxu0 %v7506_v59  ;;  %7156 = vmatprep.mubr.f32.mxu1 %v22138_v29  ;;  %v22218_v46 = vpop.permute.xlu1 %8224 }
 0x553   : > { %18126 = vmatprep.subr.mxu0 %v22052_v26  ;;  %7374 = vmatprep.mubr.f32.mxu0 %v22138_v29 }
 0x554   : > { %18127 = vmatpush3.msra.mxu0 %v22052_v26  ;;  %16750 = vmatmul.mubr.msk.f32.gmra.mxu1 %vm571_vm0, %v22132_v52  ;;  %v22228_v32 = vpop.permute.xlu0 %8246  ;;  %v7513_v52 = vsel %vm2461_vm8, %v22109_v25, %v22134_v17  ;;  %v16742_v17 = vld [vmem:[%s25622_s4 + $0x338] sm:$0xff]  ;;  %v7510_v25 = vsel %vm2461_vm8, %v21996_v43, %v21982_v60 }
 0x555   : > { %16756 = vmatmul.mubr.msk.f32.gmra.mxu0 %vm571_vm0, %v16740_v47  ;;  %18128 = vmatprep.subr.mxu0 %v21982_v60  ;;  %v8255_v3 = vsel %vm3701_vm13, %v22168_v11, %v22228_v32 }
 0x556   : > { %18129 = vmatpush3.msra.mxu0 %v21982_v60  ;;  %7380 = vmatprep.mubr.f32.mxu0 %v22138_v29  ;;  %v22234_v10 = vpop.permute.xlu1 %8485  ;;  %v7508_v60 = vsel %vm2461_vm8, %v21926_v39, %v21932_v38  ;;  %v7759_v39 = vsel %vm3205_vm11, %v22068_v55, %v22060_v44 }
 0x557   : > { %18130 = vmatprep.subr.mxu0 %v21932_v38  ;;  %18118 = vmatprep.mubr.msk.f32.mxu1 %vm571_vm0, %v16739_v22  ;;  %v16778_v22 = vld [vmem:[%s25622_s4 + $0x398] sm:$0xff] }
 0x558   : > { %18131 = vmatpush3.msra.mxu0 %v21932_v38  ;;  %18119 = vmatmul.mubr.msk.f32.vlgmr.msra.gmra.mxu1 %vm571_vm0, %v16740_v47  ;;  %v22246_v12 = vpop.permute.xlu0 %8228  ;;  %v16765_v38 = vld [vmem:[%s25622_s4 + $0x370] sm:$0xff] }
 0x559   : > { %16757 = vmatmul.mubr.msk.f32.gmra.mxu0 %vm571_vm0, %v16741_v6  ;;  %7564 = vmatpush1.msra.mxu1 %v7513_v52  ;;  %v25851_v47 = vld [vmem:[#allocation14_spill] sm:$0xff]  ;;  %v25853_v52 = vld [vmem:[#allocation16_spill] sm:$0xff] }
 0x55a   : > { %7810 = vmatprep.subr.mxu0 %v7761_v9  ;;  %7565 = vmatprep.subr.mxu1 %v7512_v40  ;;  %v22265_v19 = vpop.permute.xlu1 %8483  ;;  %v8001_v15 = vsel %vm3453_vm12, %v25851_v47, %v21934_v5  ;;  %v25854_v9 = vld [vmem:[#allocation18_spill] sm:$0xff] }
 0x55b   : > { %7566 = vmatpush1.msra.mxu1 %v7511_v24  ;;  %7386 = vmatprep.mubr.f32.mxu0 %v22138_v29  ;;  %v16789_v40 = vld [vmem:[%s25622_s4 + $0x3b0] sm:$0xff] }
 0x55c   : > { %18121 = vmatprep.mubr.msk.f32.mxu1 %vm571_vm0, %v16741_v6  ;;  %7567 = vmatprep.subr.mxu1 %v7510_v25  ;;  %v22268_v26 = vpop.permute.xlu0 %8226  ;;  %v25856_v25 = vld [vmem:[#allocation21_spill] sm:$0xff] }
 0x55d   : > { %16758 = vmatmul.mubr.msk.f32.gmra.mxu0 %vm571_vm0, %v16742_v17  ;;  %18122 = vmatmul.mubr.msk.f32.gmra.mxu1 %vm571_vm0, %v16742_v17  ;;  %v8252_v17 = vsel %vm3701_vm13, %v22148_v63, %v25854_v9 }
 0x55e   : > { %7568 = vmatpush1.msra.mxu1 %v7509_v34  ;;  %7603 = vmatprep.mubr.f32.mxu1 %v22138_v29  ;;  %v22292_v43 = vpop.permute.xlu1 %8481  ;;  %v8250_v34 = vsel %vm3701_vm13, %v22183_v41, %v25856_v25  ;;  %v8248_v41 = vsel %vm3701_vm13, %v22218_v46, %v22268_v26 }
 0x55f   : > { %7569 = vmatprep.subr.mxu1 %v7508_v60  ;;  %18132 = vmatprep.mubr.msk.f32.mxu0 %vm571_vm0, %v16763_v27 }
 0x560   : > { %7570 = vmatpush1.msra.mxu1 %v7507_v56  ;;  %v22289_v4 = vpop.permute.xlu0 %8493  ;;  %v8249_v56 = vsel %vm3701_vm13, %v22268_v26, %v22246_v12  ;;  %v16800_v26 = vld [vmem:[%s25622_s4 + $0x3c8] sm:$0xff] }
 0x561   : > { %18138 = vmatprep.subr.mxu1 %v22193_v48  ;;  %16767 = vmatmul.mubr.msk.f32.vlgmr.msra.gmra.mxu1 %vm571_vm0, %v16763_v27 }
 0x562   : > { %18133 = vmatmul.mubr.msk.f32.vlgmr.msra.gmra.mxu0 %vm571_vm0, %v16764_v20  ;;  %18139 = vmatpush3.msra.mxu1 %v22193_v48  ;;  %v22322_v51 = vpop.permute.xlu1 %8473  ;;  %v8007_v48 = vsel %vm3453_vm12, %v22125_v61, %v22156_v23  ;;  %v16787_v61 = vld [vmem:[%s25622_s4 + $0x3a0] sm:$0xff] }
 0x563   : > { %7811 = vmatpush1.msra.mxu0 %v7760_v57  ;;  %18140 = vmatprep.subr.mxu1 %v22060_v44 }
 0x564   : > { %7812 = vmatprep.subr.mxu0 %v7759_v39  ;;  %18141 = vmatpush3.msra.mxu1 %v22060_v44  ;;  %v22311_v42 = vpop.permute.xlu0 %8489  ;;  %v7756_v44 = vsel %vm3205_vm11, %v21950_v33, %v21998_v28  ;;  %v8008_v33 = vsel %vm3453_vm12, %v22156_v23, %v22215_v50  ;;  %v8502_v39 = vsel %vm4445_vm1, %v22207_v18, %v22289_v4 }
 0x565   : > { %7813 = vmatpush1.msra.mxu0 %v7758_v36  ;;  %7609 = vmatprep.mubr.f32.mxu1 %v22138_v29  ;;  %v16801_v36 = vld [vmem:[%s25622_s4 + $0x3d0] sm:$0xff] }
 0x566   : > { %18135 = vmatprep.mubr.msk.f32.mxu0 %vm571_vm0, %v16765_v38  ;;  %7814 = vmatprep.subr.mxu0 %v7757_v37  ;;  %v22351_v35 = vpop.permute.xlu1 %8471 }
 0x567   : > { %18142 = vmatprep.subr.mxu1 %v21990_v7  ;;  %16768 = vmatmul.mubr.msk.f32.gmra.mxu1 %vm571_vm0, %v16764_v20  ;;  %v16799_v20 = vld [vmem:[%s25622_s4 + $0x3c0] sm:$0xff] }
 0x568   : > { %18136 = vmatmul.mubr.msk.f32.gmra.mxu0 %vm571_vm0, %v16766_v14  ;;  %18143 = vmatpush3.msra.mxu1 %v21990_v7  ;;  %v22330_v55 = vpop.permute.xlu0 %8487  ;;  %v16775_v7 = vld [vmem:[%s25622_s4 + $0x380] sm:$0xff] }
 0x569   : > { %7815 = vmatpush1.msra.mxu0 %v7756_v44  ;;  %18144 = vmatprep.subr.mxu1 %v21940_v8  ;;  %v8500_v44 = vsel %vm4445_vm1, %v22234_v10, %v22330_v55 }
 0x56a   : > { %7816 = vmatprep.subr.mxu0 %v7755_v1  ;;  %18145 = vmatpush3.msra.mxu1 %v21940_v8  ;;  %v16776_v8 = vld [vmem:[%s25622_s4 + $0x388] sm:$0xff]  ;;  %v22368_v59 = vpop.permute.xlu1 %8738  ;;  %v16802_v1 = vld [vmem:[%s25622_s4 + $0x3d8] sm:$0xff] }
 0x56b   : > { %7817 = vmatpush1.msra.mxu0 %v7754_v2  ;;  %7615 = vmatprep.mubr.f32.mxu1 %v22138_v29 }
 0x56c   : > { %7850 = vmatprep.mubr.f32.mxu0 %v22138_v29  ;;  %8057 = vmatprep.subr.mxu1 %v8008_v33  ;;  %v22348_v28 = vpop.permute.xlu0 %8479 }
 0x56d   : > { %18152 = vmatprep.subr.mxu0 %v22215_v50  ;;  %16769 = vmatmul.mubr.msk.f32.gmra.mxu1 %vm571_vm0, %v16765_v38  ;;  %v8498_v33 = vsel %vm4445_vm1, %v22348_v28, %v22292_v43 }
 0x56e   : > { %16779 = vmatmul.mubr.msk.f32.vlgmr.msra.gmra.mxu0 %vm571_vm0, %v16775_v7  ;;  %7621 = vmatprep.mubr.f32.mxu1 %v22138_v29 }
 0x56f   : > { %18153 = vmatpush3.msra.mxu0 %v22215_v50  ;;  %7856 = vmatprep.mubr.f32.mxu0 %v22138_v29 }
 0x570   : > { %18154 = vmatprep.subr.mxu0 %v22076_v62  ;;  %v22362_v21 = vpop.permute.xlu0 %8477 }
 0x571   : > { %18155 = vmatpush3.msra.mxu0 %v22076_v62  ;;  %16770 = vmatmul.mubr.msk.f32.gmra.mxu1 %vm571_vm0, %v16766_v14  ;;  %v22404_v62 = vpop.permute.xlu1 %8736  ;;  %v8501_v14 = vsel %vm4445_vm1, %v22311_v42, %v22207_v18  ;;  %v8499_v18 = vsel %vm4445_vm1, %v22265_v19, %v22234_v10  ;;  %v16811_v42 = vld [vmem:[%s25622_s4 + $0x3e0] sm:$0xff]  ;;  %v8497_v10 = vsel %vm4445_vm1, %v22362_v21, %v22348_v28  ;;  %v16812_v19 = vld [vmem:[%s25622_s4 + $0x3e8] sm:$0xff] }
 0x572   : > { %18156 = vmatprep.subr.mxu0 %v22006_v49  ;;  %16780 = vmatmul.mubr.msk.f32.gmra.mxu0 %vm571_vm0, %v16776_v8 }
 0x573   : > { %18157 = vmatpush3.msra.mxu0 %v22006_v49  ;;  %7862 = vmatprep.mubr.f32.mxu0 %v22138_v29  ;;  %v8002_v49 = vsel %vm3453_vm12, %v21934_v5, %v21956_v13  ;;  %v8253_v5 = vsel %vm3701_vm13, %v25854_v9, %v25853_v52 }
 0x574   : > { %18158 = vmatprep.subr.mxu0 %v21956_v13  ;;  %18146 = vmatprep.mubr.msk.f32.mxu1 %vm571_vm0, %v16775_v7  ;;  %v22377_v53 = vpop.permute.xlu0 %8475  ;;  %v8495_v7 = vsel %vm4445_vm1, %v22351_v35, %v22322_v51  ;;  %v16813_v35 = vld [vmem:[%s25622_s4 + $0x3f0] sm:$0xff] }
 0x575   : > { %18159 = vmatpush3.msra.mxu0 %v21956_v13  ;;  %18147 = vmatmul.mubr.msk.f32.vlgmr.msra.gmra.mxu1 %vm571_vm0, %v16776_v8  ;;  %v22428_v58 = vpop.permute.xlu1 %8728  ;;  %v25852_v13 = vld [vmem:[#allocation17_spill] sm:$0xff]  ;;  %v8748_v8 = vsel %vm4693_vm2, %v22404_v62, %v22368_v59 }
 0x576   : > { %8304 = vmatprep.subr.mxu0 %v8255_v3  ;;  %16781 = vmatmul.mubr.msk.f32.gmra.mxu0 %vm571_vm0, %v16777_v54  ;;  %v8254_v6 = vsel %vm3701_vm13, %v25852_v13, %v22168_v11  ;;  %v16790_v11 = vld [vmem:[%s25622_s4 + $0x3b8] sm:$0xff] }
 0x577   : > { %8058 = vmatpush1.msra.mxu1 %v8007_v48  ;;  %7868 = vmatprep.mubr.f32.mxu0 %v22138_v29 }
 0x578   : > { %8059 = vmatprep.subr.mxu1 %v8006_v31  ;;  %18149 = vmatprep.mubr.msk.f32.mxu1 %vm571_vm0, %v16777_v54  ;;  %v22402_v23 = vpop.permute.xlu0 %8740  ;;  %v16814_v54 = vld [vmem:[%s25622_s4 + $0x3f8] sm:$0xff] }
 0x579   : > { %8060 = vmatpush1.msra.mxu1 %v8005_v16  ;;  %v22463_v60 = vpop.permute.xlu1 %8726  ;;  %v8749_v37 = vsel %vm4693_vm2, %v22368_v59, %v22402_v23 }
 0x57a   : > { %8061 = vmatprep.subr.mxu1 %v8004_v45  ;;  %16782 = vmatmul.mubr.msk.f32.gmra.mxu0 %vm571_vm0, %v16778_v22 }
 0x57b   : > { %18150 = vmatmul.mubr.msk.f32.gmra.mxu1 %vm571_vm0, %v16778_v22  ;;  %18160 = vmatprep.mubr.msk.f32.mxu0 %vm571_vm0, %v16787_v61 }
 0x57c   : > { %8062 = vmatpush1.msra.mxu1 %v8003_v30  ;;  %8097 = vmatprep.mubr.f32.mxu1 %v22138_v29  ;;  %v22422_v50 = vpop.permute.xlu0 %8734  ;;  %v16824_v30 = vld [vmem:[%s25622_s4 + $0x408] sm:$0xff] }
 0x57d   : > { %8063 = vmatprep.subr.mxu1 %v8002_v49  ;;  %v22487_v46 = vpop.permute.xlu1 %8724  ;;  %v16825_v49 = vld [vmem:[%s25622_s4 + $0x410] sm:$0xff] }
 0x57e   : > { %8064 = vmatpush1.msra.mxu1 %v8001_v15  ;;  %18161 = vmatmul.mubr.msk.f32.vlgmr.msra.gmra.mxu0 %vm571_vm0, %v16788_v0  ;;  %v8744_v48 = vsel %vm4693_vm2, %v22487_v46, %v22463_v60 }
 0x57f   : > { %18166 = vmatprep.subr.mxu1 %v22228_v32  ;;  %16791 = vmatmul.mubr.msk.f32.vlgmr.msra.gmra.mxu1 %vm571_vm0, %v16787_v61  ;;  %v16823_v61 = vld [vmem:[%s25622_s4 + $0x400] sm:$0xff] }
 0x580   : > { %8305 = vmatpush1.msra.mxu0 %v8254_v6  ;;  %18167 = vmatpush3.msra.mxu1 %v22228_v32  ;;  %v22442_v24 = vpop.permute.xlu0 %8732  ;;  %v25855_v32 = vld [vmem:[#allocation20_spill] sm:$0xff] }
 0x581   : > { %8306 = vmatprep.subr.mxu0 %v8253_v5  ;;  %18168 = vmatprep.subr.mxu1 %v25853_v52  ;;  %v8251_v27 = vsel %vm3701_vm13, %v25856_v25, %v25855_v32  ;;  %v22507_v38 = vpop.permute.xlu1 %8985  ;;  %v16835_v6 = vld [vmem:[%s25622_s4 + $0x420] sm:$0xff] }
 0x582   : > { %8307 = vmatpush1.msra.mxu0 %v8252_v17  ;;  %18169 = vmatpush3.msra.mxu1 %v25853_v52  ;;  %v16837_v17 = vld [vmem:[%s25622_s4 + $0x430] sm:$0xff] }
 0x583   : > { %8103 = vmatprep.mubr.f32.mxu1 %v22138_v29  ;;  %18163 = vmatprep.mubr.msk.f32.mxu0 %vm571_vm0, %v16789_v40 }
 0x584   : > { %8308 = vmatprep.subr.mxu0 %v8251_v27  ;;  %18170 = vmatprep.subr.mxu1 %v25855_v32  ;;  %v22458_v63 = vpop.permute.xlu0 %8730 }
 0x585   : > { %16792 = vmatmul.mubr.msk.f32.gmra.mxu1 %vm571_vm0, %v16788_v0  ;;  %18164 = vmatmul.mubr.msk.f32.gmra.mxu0 %vm571_vm0, %v16790_v11  ;;  %v8746_v59 = vsel %vm4693_vm2, %v22458_v63, %v22442_v24 }
 0x586   : > { %8309 = vmatpush1.msra.mxu0 %v8250_v34  ;;  %18171 = vmatpush3.msra.mxu1 %v25855_v32  ;;  %v16838_v32 = vld [vmem:[%s25622_s4 + $0x438] sm:$0xff] }
 0x587   : > { %8310 = vmatprep.subr.mxu0 %v8249_v56  ;;  %18172 = vmatprep.subr.mxu1 %v22246_v12 }
 0x588   : > { %8311 = vmatpush1.msra.mxu0 %v8248_v41  ;;  %18173 = vmatpush3.msra.mxu1 %v22246_v12  ;;  %v22479_v57 = vpop.permute.xlu0 %8722 }
 0x589   : > { %8109 = vmatprep.mubr.f32.mxu1 %v22138_v29  ;;  %8344 = vmatprep.mubr.f32.mxu0 %v22138_v29 }
 0x58a   : > { %8551 = vmatprep.subr.mxu1 %v8502_v39  ;;  %18180 = vmatprep.subr.mxu0 %v22289_v4 }
 0x58b   : > { %16793 = vmatmul.mubr.msk.f32.gmra.mxu1 %vm571_vm0, %v16789_v40  ;;  %16803 = vmatmul.mubr.msk.f32.vlgmr.msra.gmra.mxu0 %vm571_vm0, %v16799_v20 }
 0x58c   : > { %18181 = vmatpush3.msra.mxu0 %v22289_v4  ;;  %8115 = vmatprep.mubr.f32.mxu1 %v22138_v29  ;;  %v22493_v12 = vpop.permute.xlu0 %8720 }
 0x58d   : > { %18182 = vmatprep.subr.mxu0 %v22330_v55  ;;  %8350 = vmatprep.mubr.f32.mxu0 %v22138_v29  ;;  %v8743_v22 = vsel %vm4693_vm2, %v22493_v12, %v22479_v57 }
 0x58e   : > { %18183 = vmatpush3.msra.mxu0 %v22330_v55  ;;  %v8719_v55 = vpop.permute.xlu1 %8718 }
 0x58f   : > { %18184 = vmatprep.subr.mxu0 %v22292_v43  ;;  %16794 = vmatmul.mubr.msk.f32.gmra.mxu1 %vm571_vm0, %v16790_v11  ;;  %v8742_v16 = vsel %vm4693_vm2, %v8719_v55, %v22493_v12 }
 0x590   : > { %16804 = vmatmul.mubr.msk.f32.gmra.mxu0 %vm571_vm0, %v16800_v26  ;;  %18174 = vmatprep.mubr.msk.f32.mxu1 %vm571_vm0, %v16799_v20  ;;  %v22505_v4 = vpop.permute.xlu0 %8987 }
 0x591   : > { %18185 = vmatpush3.msra.mxu0 %v22292_v43  ;;  %8356 = vmatprep.mubr.f32.mxu0 %v22138_v29  ;;  %v8496_v43 = vsel %vm4445_vm1, %v22322_v51, %v22377_v53  ;;  %v8747_v51 = vsel %vm4693_vm2, %v22442_v24, %v22422_v50  ;;  %v16836_v24 = vld [vmem:[%s25622_s4 + $0x428] sm:$0xff] }
 0x592   : > { %18186 = vmatprep.subr.mxu0 %v22377_v53  ;;  %v22565_v21 = vpop.permute.xlu1 %8979 }
 0x593   : > { %18187 = vmatpush3.msra.mxu0 %v22377_v53  ;;  %18175 = vmatmul.mubr.msk.f32.vlgmr.msra.gmra.mxu1 %vm571_vm0, %v16800_v26  ;;  %v8745_v53 = vsel %vm4693_vm2, %v22463_v60, %v22428_v58 }
 0x594   : > { %8798 = vmatprep.subr.mxu0 %v8749_v37  ;;  %16805 = vmatmul.mubr.msk.f32.gmra.mxu0 %vm571_vm0, %v16801_v36  ;;  %v22531_v2 = vpop.permute.xlu0 %8983 }
 0x595   : > { %8552 = vmatpush1.msra.mxu1 %v8501_v14  ;;  %8362 = vmatprep.mubr.f32.mxu0 %v22138_v29  ;;  %v8995_v47 = vsel %vm4941_vm3, %v22531_v2, %v22507_v38 }
 0x596   : > { %8553 = vmatprep.subr.mxu1 %v8500_v44  ;;  %18177 = vmatprep.mubr.msk.f32.mxu1 %vm571_vm0, %v16801_v36  ;;  %v8978_v31 = vpop.permute.xlu1 %8977 }
 0x597   : > { %8554 = vmatpush1.msra.mxu1 %v8499_v18  ;;  %v8993_v13 = vsel %vm4941_vm3, %v8978_v31, %v22565_v21 }
 0x598   : > { %8555 = vmatprep.subr.mxu1 %v8498_v33  ;;  %16806 = vmatmul.mubr.msk.f32.gmra.mxu0 %vm571_vm0, %v16802_v1  ;;  %v22559_v28 = vpop.permute.xlu0 %8981 }
 0x599   : > { %18178 = vmatmul.mubr.msk.f32.gmra.mxu1 %vm571_vm0, %v16802_v1  ;;  %18188 = vmatprep.mubr.msk.f32.mxu0 %vm571_vm0, %v16811_v42  ;;  %v8994_v15 = vsel %vm4941_vm3, %v22565_v21, %v22559_v28 }
 0x59a   : > { %8556 = vmatpush1.msra.mxu1 %v8497_v10  ;;  %8591 = vmatprep.mubr.f32.mxu1 %v22138_v29  ;;  %v8976_v45 = vpop.permute.xlu1 %8975 }
 0x59b   : > { %8557 = vmatprep.subr.mxu1 %v8496_v43 }
 0x59c   : > { %8558 = vmatpush1.msra.mxu1 %v8495_v7  ;;  %18189 = vmatmul.mubr.msk.f32.vlgmr.msra.gmra.mxu0 %vm571_vm0, %v16812_v19  ;;  %v8974_v3 = vpop.permute.xlu0 %8973 }
 0x59d   : > { %18194 = vmatprep.subr.mxu1 %v22402_v23  ;;  %16815 = vmatmul.mubr.msk.f32.vlgmr.msra.gmra.mxu1 %vm571_vm0, %v16811_v42  ;;  %v8992_v9 = vsel %vm4941_vm3, %v8974_v3, %v8976_v45 }
 0x59e   : > { %8799 = vmatpush1.msra.mxu0 %v8748_v8  ;;  %18195 = vmatpush3.msra.mxu1 %v22402_v23  ;;  %v8996_v23 = vsel %vm4941_vm3, %v22507_v38, %v22505_v4 }
 0x59f   : > { %8800 = vmatprep.subr.mxu0 %v8747_v51  ;;  %18196 = vmatprep.subr.mxu1 %v22422_v50 }
 0x5a0   : > { %8801 = vmatpush1.msra.mxu0 %v8746_v59  ;;  %18197 = vmatpush3.msra.mxu1 %v22422_v50  ;;  %v8972_v62 = vpop.permute.xlu0 %8971  ;;  %v8968_v50 = vpop.permute.xlu1 %8967 }
 0x5a1   : > { %8597 = vmatprep.mubr.f32.mxu1 %v22138_v29  ;;  %18191 = vmatprep.mubr.msk.f32.mxu0 %vm571_vm0, %v16813_v35  ;;  %v8991_v52 = vsel %vm4941_vm3, %v8972_v62, %v8974_v3 }
 0x5a2   : > { %8802 = vmatprep.subr.mxu0 %v8745_v53  ;;  %18198 = vmatprep.subr.mxu1 %v22428_v58 }
 0x5a3   : > { %16816 = vmatmul.mubr.msk.f32.gmra.mxu1 %vm571_vm0, %v16812_v19  ;;  %18192 = vmatmul.mubr.msk.f32.gmra.mxu0 %vm571_vm0, %v16814_v54 }
 0x5a4   : > { %8803 = vmatpush1.msra.mxu0 %v8744_v48  ;;  %18199 = vmatpush3.msra.mxu1 %v22428_v58  ;;  %v8970_v0 = vpop.permute.xlu0 %8969  ;;  %v16826_v58 = vld [vmem:[%s25622_s4 + $0x418] sm:$0xff]  ;;  %v8966_v5 = vpop.permute.xlu1 %8965 }
 0x5a5   : > { %8804 = vmatprep.subr.mxu0 %v8743_v22  ;;  %18200 = vmatprep.subr.mxu1 %v22479_v57  ;;  %v8990_v40 = vsel %vm4941_vm3, %v8968_v50, %v8970_v0  ;;  %v8989_v11 = vsel %vm4941_vm3, %v8966_v5, %v8968_v50 }
 0x5a6   : > { %8805 = vmatpush1.msra.mxu0 %v8742_v16  ;;  %18201 = vmatpush3.msra.mxu1 %v22479_v57 }
 0x5a7   : > { %8603 = vmatprep.mubr.f32.mxu1 %v22138_v29  ;;  %8838 = vmatprep.mubr.f32.mxu0 %v22138_v29 }
 0x5a8   : > { %9045 = vmatprep.subr.mxu1 %v8996_v23  ;;  %18208 = vmatprep.subr.mxu0 %v22505_v4 }
 0x5a9   : > { %16817 = vmatmul.mubr.msk.f32.gmra.mxu1 %vm571_vm0, %v16813_v35  ;;  %16827 = vmatmul.mubr.msk.f32.vlgmr.msra.gmra.mxu0 %vm571_vm0, %v16823_v61 }
 0x5aa   : > { %18209 = vmatpush3.msra.mxu0 %v22505_v4  ;;  %8609 = vmatprep.mubr.f32.mxu1 %v22138_v29 }
 0x5ab   : > { %8844 = vmatprep.mubr.f32.mxu0 %v22138_v29  ;;  %18210 = vmatprep.subr.mxu0 %v22559_v28 }
 0x5ac   : > { %18211 = vmatpush3.msra.mxu0 %v22559_v28 }
 0x5ad   : > { %16818 = vmatmul.mubr.msk.f32.gmra.mxu1 %vm571_vm0, %v16814_v54  ;;  %16828 = vmatmul.mubr.msk.f32.gmra.mxu0 %vm571_vm0, %v16824_v30 }
 0x5ae   : > { %18212 = vmatprep.subr.mxu0 %v8976_v45  ;;  %8850 = vmatprep.mubr.f32.mxu0 %v22138_v29 }
 0x5af   : > { %18213 = vmatpush3.msra.mxu0 %v8976_v45  ;;  %18202 = vmatprep.mubr.msk.f32.mxu1 %vm571_vm0, %v16823_v61 }
 0x5b0   : > { %18214 = vmatprep.subr.mxu0 %v8970_v0 }
 0x5b1   : > { %16829 = vmatmul.mubr.msk.f32.gmra.mxu0 %vm571_vm0, %v16825_v49  ;;  %18203 = vmatmul.mubr.msk.f32.vlgmr.msra.gmra.mxu1 %vm571_vm0, %v16824_v30 }
 0x5b2   : > { %9046 = vmatpush1.msra.mxu1 %v8995_v47  ;;  %8856 = vmatprep.mubr.f32.mxu0 %v22138_v29 }
 0x5b3   : > { %9047 = vmatprep.subr.mxu1 %v8994_v15  ;;  %18205 = vmatprep.mubr.msk.f32.mxu1 %vm571_vm0, %v16825_v49 }
 0x5b4   : > { %9048 = vmatpush1.msra.mxu1 %v8993_v13  ;;  %18215 = vmatpush3.msra.mxu0 %v8970_v0 }
 0x5b5   : > { %9049 = vmatprep.subr.mxu1 %v8992_v9  ;;  %16830 = vmatmul.mubr.msk.f32.gmra.mxu0 %vm571_vm0, %v16826_v58 }
 0x5b6   : > { %18206 = vmatmul.mubr.msk.f32.gmra.mxu1 %vm571_vm0, %v16826_v58  ;;  %18216 = vmatprep.mubr.msk.f32.mxu0 %vm571_vm0, %v16835_v6 }
 0x5b7   : > { %9050 = vmatpush1.msra.mxu1 %v8991_v52  ;;  %9085 = vmatprep.mubr.f32.mxu1 %v22138_v29 }
 0x5b8   : > { %9051 = vmatprep.subr.mxu1 %v8990_v40 }
 0x5b9   : > { %9052 = vmatpush1.msra.mxu1 %v8989_v11  ;;  %18217 = vmatmul.mubr.msk.f32.vlgmr.msra.gmra.mxu0 %vm571_vm0, %v16836_v24 }
 0x5ba   : > { %16839 = vmatmul.mubr.msk.f32.vlgmr.msra.gmra.mxu1 %vm571_vm0, %v16835_v6  ;;  %18219 = vmatprep.mubr.msk.f32.mxu0 %vm571_vm0, %v16837_v17 }
 0x5bb   : > { %9091 = vmatprep.mubr.f32.mxu1 %v22138_v29 }
 0x5bd   : > { %18220 = vmatmul.mubr.msk.f32.gmra.mxu0 %vm571_vm0, %v16838_v32 }
 0x5be   : > { %16840 = vmatmul.mubr.msk.f32.gmra.mxu1 %vm571_vm0, %v16836_v24  ;;  %9578 = vmatprep.mubr.f32.mxu0 %v22138_v29 }
 0x5bf   : > { %9097 = vmatprep.mubr.f32.mxu1 %v22138_v29 }
 0x5c2   : > { %16841 = vmatmul.mubr.msk.f32.gmra.mxu1 %vm571_vm0, %v16837_v17 }
 0x5c3   : > { %9103 = vmatprep.mubr.f32.mxu1 %v22138_v29 }
 0x5c6   : > { %16842 = vmatmul.mubr.msk.f32.gmra.mxu1 %vm571_vm0, %v16838_v32 }
 0x5f7   : > { %v18106_v25 = vpop.f32.mrf.mxu0 }
 0x5f9   : > { %v22675_v27 = vpop.f32.mrf.mxu0 }
 0x5fb   : > { %v18109_v60 = vpop.f32.mrf.mxu0 }
 0x5fd   : > { %v22679_v41 = vpop.f32.mrf.mxu0 }
 0x606   : > { %v7140_v63 = vpop.f32.mrf.mxu1 }
 0x608   : > { %v22677_v34 = vpop.f32.mrf.mxu1 }
 0x60b   : > { %v7146_v56 = vpop.f32.mrf.mxu1 }
 0x60d   : > { %v22681_v20 = vpop.f32.mrf.mxu1 }
 0x610   : > { %v7152_v57 = vpop.f32.mrf.mxu1  ;;  %v7370_v39 = vpop.f32.mrf.mxu0 }
 0x611   : > { %v22683_v46 = vadd.f32 %v7370_v39, %v7140_v63 }
 0x612   : > { %v22685_v12 = vpop.f32.mrf.mxu1  ;;  %v22687_v26 = vpop.f32.mrf.mxu0 }
 0x614   : > { %v7158_v4 = vpop.f32.mrf.mxu1 }
 0x615   : > { %v7376_v38 = vpop.f32.mrf.mxu0 }
 0x616   : > { %v7377_v36 = vadd.f32 %v7376_v38, %v7146_v56  ;;  %v22689_v37 = vpop.f32.mrf.mxu1 }
 0x617   : > { %v22691_v14 = vpop.f32.mrf.mxu0 }
 0x618   : > { %v18120_v44 = vpop.f32.mrf.mxu1 }
 0x619   : > { %v7382_v1 = vpop.f32.mrf.mxu0  ;;  %v22693_v2 = vadd.f32 %v18120_v44, %v18106_v25 }
 0x61a   : > { %v7383_v18 = vadd.f32 %v7382_v1, %v7152_v57  ;;  %v22695_v42 = vpop.f32.mrf.mxu1 }
 0x61b   : > { %v22697_v55 = vpop.f32.mrf.mxu0 }
 0x61d   : > { %v7388_v33 = vpop.f32.mrf.mxu0  ;;  %v18123_v10 = vpop.f32.mrf.mxu1 }
 0x61e   : > { %v7389_v19 = vadd.f32 %v7388_v33, %v7158_v4  ;;  %v7475_v43 = vadd.f32 %v18123_v10, %v18109_v60 }
 0x61f   : > { %v22699_v7 = vpop.f32.mrf.mxu0  ;;  %v22701_v28 = vpop.f32.mrf.mxu1 }
 0x621   : > { %v22703_v8 = vpop.f32.mrf.mxu1 }
 0x622   : > { %v22705_v21 = vpop.f32.mrf.mxu0 }
 0x623   : > { %v22707_v51 = vpop.f32.mrf.mxu1 }
 0x624   : > { %v22709_v35 = vpop.f32.mrf.mxu0 }
 0x627   : > { %v7611_v59 = vpop.f32.mrf.mxu1 }
 0x628   : > { %v22711_v54 = vadd.f32 %v7611_v59, %v7377_v36  ;;  %v18137_v53 = vpop.f32.mrf.mxu0 }
 0x629   : > { %v22713_v3 = vadd.f32 %v18137_v53, %v7475_v43  ;;  %v22715_v48 = vpop.f32.mrf.mxu1 }
 0x62a   : > { %v22717_v31 = vpop.f32.mrf.mxu0 }
 0x62d   : > { %v7617_v22 = vpop.f32.mrf.mxu1 }
 0x62e   : > { %v22719_v16 = vadd.f32 %v7617_v22, %v7383_v18  ;;  %v22721_v61 = vpop.f32.mrf.mxu0 }
 0x62f   : > { %v22723_v23 = vpop.f32.mrf.mxu1 }
 0x630   : > { %v22725_v62 = vpop.f32.mrf.mxu0 }
 0x631   : > { %v7623_v45 = vpop.f32.mrf.mxu1 }
 0x632   : > { %v22727_v30 = vadd.f32 %v7623_v45, %v7389_v19  ;;  %v22729_v0 = vpop.f32.mrf.mxu0 }
 0x633   : > { %v22731_v49 = vpop.f32.mrf.mxu1 }
 0x634   : > { %v22733_v50 = vpop.f32.mrf.mxu0 }
 0x635   : > { %v22735_v47 = vpop.f32.mrf.mxu1 }
 0x636   : > { %v22737_v15 = vpop.f32.mrf.mxu0 }
 0x637   : > { %v22739_v58 = vpop.f32.mrf.mxu1 }
 0x638   : > { %v22741_v13 = vpop.f32.mrf.mxu0 }
 0x63a   : > { %v22743_v6 = vpop.f32.mrf.mxu0 }
 0x63b   : > { %v22745_v52 = vpop.f32.mrf.mxu1 }
 0x63c   : > { %v22747_v9 = vpop.f32.mrf.mxu0 }
 0x63d   : > { %v22749_v5 = vpop.f32.mrf.mxu1 }
 0x63e   : > { %v22751_v40 = vpop.f32.mrf.mxu0 }
 0x63f   : > { %v22753_v24 = vpop.f32.mrf.mxu1 }
 0x640   : > { %v22757_v11 = vpop.f32.mrf.mxu0 }
 0x641   : > { %v22755_v17 = vpop.f32.mrf.mxu1 }
 0x645   : > { %v22759_v32 = vpop.f32.mrf.mxu1  ;;  %v22761_v25 = vpop.f32.mrf.mxu0 }
 0x647   : > { %v22763_v63 = vpop.f32.mrf.mxu1  ;;  %v22765_v60 = vpop.f32.mrf.mxu0 }
 0x64b   : > { %v22767_v56 = vpop.f32.mrf.mxu1  ;;  %v22769_v57 = vpop.f32.mrf.mxu0 }
 0x64d   : > { %v22771_v39 = vpop.f32.mrf.mxu1  ;;  %v22773_v4 = vpop.f32.mrf.mxu0 }
 0x64f   : > { %v22775_v38 = vpop.f32.mrf.mxu1 }
 0x650   : > { %v22777_v36 = vpop.f32.mrf.mxu0 }
 0x651   : > { %v22779_v44 = vpop.f32.mrf.mxu1 }
 0x652   : > { %25857 = vst [vmem:[#allocation24_spill] sm:$0xff] %v22779_v44  ;;  %v22781_v1 = vpop.f32.mrf.mxu0 }
 0x653   : > { %25858 = vst [vmem:[#allocation22_spill] sm:$0xff] %v22781_v1  ;;  %v22783_v18 = vpop.f32.mrf.mxu1 }
 0x654   : > { %v22785_v33 = vpop.f32.mrf.mxu0 }
 0x655   : > { %25859 = vst [vmem:[#allocation23_spill] sm:$0xff] %v22785_v33  ;;  %v22787_v10 = vpop.f32.mrf.mxu1 }
 0x656   : > { %25860 = vst [vmem:[#allocation26_spill] sm:$0xff] %v22787_v10  ;;  %v22789_v19 = vpop.f32.mrf.mxu0 }
 0x657   : > { %25861 = vst [vmem:[#allocation25_spill] sm:$0xff] %v22789_v19 }
 0x658   : > { %v22791_v43 = vpop.f32.mrf.mxu0 }
 0x659   : > { %25862 = vst [vmem:[#allocation27_spill] sm:$0xff] %v22791_v43  ;;  %v22793_v59 = vpop.f32.mrf.mxu1 }
 0x65a   : > { %25863 = vst [vmem:[#allocation32_spill] sm:$0xff] %v22793_v59  ;;  %v22795_v53 = vpop.f32.mrf.mxu0 }
 0x65b   : > { %25864 = vst [vmem:[#allocation28_spill] sm:$0xff] %v22795_v53  ;;  %v22797_v22 = vpop.f32.mrf.mxu1 }
 0x65c   : > { %25865 = vst [vmem:[#allocation29_spill] sm:$0xff] %v22797_v22  ;;  %v22799_v45 = vpop.f32.mrf.mxu0  ;;  %v7373_v22 = vadd.f32 %v22687_v26, %v22677_v34  ;;  %v7391_v34 = vadd.f32 %v22699_v7, %v22689_v37 }
 0x65d   : > { %v22801_v29 = vpop.f32.mrf.mxu1 }
 0x65e   : > { %25866 = vst [vmem:[#allocation30_spill] sm:$0xff] %v22801_v29  ;;  %v22805_v44 = vpop.f32.mrf.mxu0  ;;  %v7714_v26 = vadd.f32 %v22707_v51, %v7373_v22  ;;  %v7723_v7 = vadd.f32 %v22731_v49, %v7391_v34  ;;  %v7966_v51 = vadd.f32 %v22737_v15, %v22719_v16 }
 0x65f   : > { %v22803_v1 = vpop.f32.mrf.mxu1  ;;  %25868 = vst [vmem:[#allocation31_spill] sm:$0xff] %v22805_v44 }
 0x660   : > { %25867 = vst [vmem:[#allocation33_spill] sm:$0xff] %v22803_v1  ;;  %v7379_v1 = vadd.f32 %v22691_v14, %v22681_v20  ;;  %v7718_v20 = vadd.f32 %v22705_v21, %v22693_v2  ;;  %v7961_v37 = vadd.f32 %v22725_v62, %v7714_v26  ;;  %v7963_v2 = vadd.f32 %v22729_v0, %v22711_v54 }
 0x661   : > { %v7969_v54 = vadd.f32 %v22743_v6, %v22727_v30 }
 0x662   : > { %v7717_v14 = vadd.f32 %v22715_v48, %v7379_v1  ;;  %v8210_v30 = vadd.f32 %v22759_v32, %v7963_v2 }
 0x663   : > { %v22807_v33 = vpop.f32.mrf.mxu1  ;;  %v22809_v10 = vpop.f32.mrf.mxu0  ;;  %v8216_v32 = vadd.f32 %v22775_v38, %v7969_v54  ;;  %v25878_v38 = vld [vmem:[#allocation27_spill] sm:$0xff] }
 0x664   : > { %25869 = vst [vmem:[#allocation36_spill] sm:$0xff] %v22809_v10  ;;  %v7385_v10 = vadd.f32 %v22697_v55, %v22685_v12 }
 0x665   : > { %v22811_v19 = vpop.f32.mrf.mxu1  ;;  %v22813_v43 = vpop.f32.mrf.mxu0 }
 0x666   : > { %25870 = vst [vmem:[#allocation34_spill] sm:$0xff] %v22811_v19  ;;  %25871 = vst [vmem:[#allocation35_spill] sm:$0xff] %v22813_v43  ;;  %v7460_v43 = vadd.f32 %v22695_v42, %v22675_v27  ;;  %v7713_v19 = vadd.f32 %v22703_v8, %v22683_v46  ;;  %v7720_v42 = vadd.f32 %v22723_v23, %v7385_v10  ;;  %v22893_v10 = vpop.permute.xlu1 %9224 }
 0x667   : > { %v7970_v23 = vadd.f32 %v22747_v9, %v7723_v7  ;;  %v8213_v9 = vadd.f32 %v22767_v56, %v7966_v51  ;;  %v25874_v56 = vld [vmem:[#allocation22_spill] sm:$0xff]  ;;  %v25883_v7 = vld [vmem:[#allocation31_spill] sm:$0xff] }
 0x668   : > { %v7715_v27 = vadd.f32 %v22709_v35, %v7460_v43  ;;  %v7960_v46 = vadd.f32 %v22721_v61, %v7713_v19  ;;  %v7965_v35 = vadd.f32 %v22735_v47, %v7718_v20  ;;  %v7967_v48 = vadd.f32 %v22741_v13, %v7720_v42  ;;  %v25875_v19 = vld [vmem:[#allocation23_spill] sm:$0xff]  ;;  %v25876_v43 = vld [vmem:[#allocation26_spill] sm:$0xff] }
 0x669   : > { %v22815_v59 = vpop.f32.mrf.mxu1  ;;  %v22817_v53 = vpop.f32.mrf.mxu0  ;;  %v7971_v61 = vadd.f32 %v22745_v52, %v22713_v3  ;;  %v8208_v47 = vadd.f32 %v22755_v17, %v7961_v37  ;;  %v8463_v20 = vadd.f32 %v25878_v38, %v8216_v32  ;;  %v25882_v37 = vld [vmem:[#allocation29_spill] sm:$0xff] }
 0x66a   : > { %25872 = vst [vmem:[#allocation38_spill] sm:$0xff] %v22815_v59  ;;  %v7470_v59 = vadd.f32 %v22701_v28, %v22679_v41  ;;  %v7964_v28 = vadd.f32 %v22733_v50, %v7717_v14  ;;  %v8207_v16 = vadd.f32 %v22753_v24, %v7960_v46  ;;  %v8212_v50 = vadd.f32 %v22751_v40, %v7965_v35  ;;  %v22885_v17 = vpop.permute.xlu0 %9229  ;;  %v25880_v14 = vld [vmem:[#allocation30_spill] sm:$0xff]  ;;  %v25881_v46 = vld [vmem:[#allocation28_spill] sm:$0xff] }
 0x66b   : > { %v22823_v29 = vpop.f32.mrf.mxu1  ;;  %v22825_v44 = vpop.f32.mrf.mxu0  ;;  %v8214_v40 = vadd.f32 %v22771_v39, %v7967_v48  ;;  %v8460_v39 = vadd.f32 %v25875_v19, %v8213_v9  ;;  %v25885_v54 = vld [vmem:[#allocation36_spill] sm:$0xff] }
 0x66c   : > { %v7721_v41 = vadd.f32 %v22717_v31, %v7470_v59  ;;  %v7962_v31 = vadd.f32 %v22739_v58, %v7715_v27  ;;  %v8218_v58 = vadd.f32 %v22761_v25, %v7971_v61  ;;  %v8211_v3 = vadd.f32 %v22763_v63, %v7964_v28  ;;  %v25873_v63 = vld [vmem:[#allocation24_spill] sm:$0xff] }
 0x66d   : > { %v22841_v12 = vpop.f32.mrf.mxu1  ;;  %v22843_v55 = vpop.f32.mrf.mxu0  ;;  %v8459_v24 = vadd.f32 %v22783_v18, %v8212_v50  ;;  %v8457_v25 = vadd.f32 %v22777_v36, %v8210_v30  ;;  %v25879_v36 = vld [vmem:[#allocation32_spill] sm:$0xff] }
 0x66e   : > { %v7968_v62 = vadd.f32 %v22749_v5, %v7721_v41  ;;  %v8209_v15 = vadd.f32 %v22757_v11, %v7962_v31  ;;  %v8454_v5 = vadd.f32 %v22769_v57, %v8207_v16  ;;  %v8455_v11 = vadd.f32 %v22773_v4, %v8208_v47  ;;  %v25877_v4 = vld [vmem:[#allocation25_spill] sm:$0xff]  ;;  %v25886_v16 = vld [vmem:[#allocation34_spill] sm:$0xff]  ;;  %v25887_v47 = vld [vmem:[#allocation35_spill] sm:$0xff] }
 0x66f   : > { %v22854_v8 = vpop.f32.mrf.mxu1  ;;  %v22856_v21 = vpop.f32.mrf.mxu0  ;;  %v8458_v57 = vadd.f32 %v25874_v56, %v8211_v3  ;;  %v8706_v59 = vadd.f32 %v22799_v45, %v8459_v24  ;;  %v8461_v34 = vadd.f32 %v25877_v4, %v8214_v40  ;;  %v8465_v26 = vadd.f32 %v25879_v36, %v8218_v58  ;;  %v25884_v45 = vld [vmem:[#allocation33_spill] sm:$0xff] }
 0x670   : > { %v8215_v13 = vadd.f32 %v22765_v60, %v7968_v62  ;;  %v8217_v60 = vadd.f32 %v25873_v63, %v7970_v23  ;;  %v8456_v18 = vadd.f32 %v25876_v43, %v8209_v15  ;;  %v8701_v27 = vadd.f32 %v25880_v14, %v8454_v5 }
 0x671   : > { %v22869_v0 = vpop.f32.mrf.mxu0  ;;  %v18204_v49 = vpop.f32.mrf.mxu1  ;;  %v8702_v48 = vadd.f32 %v25884_v45, %v8455_v11  ;;  %v8704_v31 = vadd.f32 %v22807_v33, %v8457_v25  ;;  %v8712_v61 = vadd.f32 %v25885_v54, %v8465_v26  ;;  %v8705_v50 = vadd.f32 %v25886_v16, %v8458_v57  ;;  %v25888_v9 = vld [vmem:[#allocation38_spill] sm:$0xff] }
 0x672   : > { %v8464_v42 = vadd.f32 %v25881_v46, %v8217_v60  ;;  %v8462_v2 = vadd.f32 %v25882_v37, %v8215_v13  ;;  %v8703_v28 = vadd.f32 %v25883_v7, %v8456_v18  ;;  %v8953_v51 = vadd.f32 %v18204_v49, %v8706_v59  ;;  %v9220_v13 = vpop.permute.xlu0 %9219  ;;  %v9215_v11 = vpop.permute.xlu1 %9214 }
 0x673   : > { %v22879_v6 = vpop.f32.mrf.mxu0  ;;  %v8929_v52 = vpop.f32.mrf.mxu1  ;;  %v8948_v23 = vadd.f32 %v22817_v53, %v8701_v27  ;;  %v8707_v49 = vadd.f32 %v25888_v9, %v8460_v39  ;;  %v8708_v5 = vadd.f32 %v22823_v29, %v8461_v34  ;;  %v8949_v40 = vadd.f32 %v22825_v44, %v8702_v48 }
 0x674   : > { %v8709_v15 = vadd.f32 %v25887_v47, %v8462_v2  ;;  %v8950_v30 = vadd.f32 %v8929_v52, %v8703_v28  ;;  %v8710_v53 = vadd.f32 %v22841_v12, %v8463_v20  ;;  %v8951_v52 = vadd.f32 %v22843_v55, %v8704_v31 }
 0x675   : > { %v22891_v1 = vpop.f32.mrf.mxu0  ;;  %v8952_v56 = vadd.f32 %v22856_v21, %v8705_v50  ;;  %v8954_v59 = vadd.f32 %v22869_v0, %v8707_v49  ;;  %v8955_v27 = vadd.f32 %v22879_v6, %v8708_v5 }
 0x676   : > { %v18207_v22 = vpop.f32.mrf.mxu1  ;;  %v8957_v45 = vadd.f32 %v22891_v1, %v8710_v53 }
 0x677   : > { %v22903_v41 = vpop.f32.mrf.mxu0  ;;  %v8959_v32 = vadd.f32 %v18207_v22, %v8712_v61 }
 0x678   : > { %v8939_v35 = vpop.f32.mrf.mxu1 }
 0x679   : > { %v18218_v62 = vpop.f32.mrf.mxu0  ;;  %v8956_v39 = vadd.f32 %v8939_v35, %v8709_v15  ;;  %v8711_v35 = vadd.f32 %v22854_v8, %v8464_v42 }
 0x67a   : > { %v9200_v58 = vadd.f32 %v18218_v62, %v8953_v51  ;;  %v9087_v3 = vpop.f32.mrf.mxu1 }
 0x67b   : > { %v9195_v33 = vadd.f32 %v9087_v3, %v8948_v23  ;;  %v9176_v24 = vpop.f32.mrf.mxu0  ;;  %v8958_v23 = vadd.f32 %v22903_v41, %v8711_v35 }
 0x67c   : > { %v22918_v25 = vadd.f32 %v9220_v13, %v9200_v58  ;;  %v9197_v63 = vadd.f32 %v9176_v24, %v8950_v30  ;;  %v9089_v60 = vpop.f32.mrf.mxu1 }
 0x67d   : > { %v22922_v57 = vadd.f32 %v9215_v11, %v9195_v33  ;;  %v9196_v19 = vadd.f32 %v9089_v60, %v8949_v40  ;;  %v18221_v29 = vpop.f32.mrf.mxu0 }
 0x67e   : > { %v16856_v44 = vmul.f32 -1.442695, %v22918_v25  ;;  %v22925_v43 = vadd.f32 %v9215_v11, %v9197_v63  ;;  %v9206_v18 = vadd.f32 %v18221_v29, %v8959_v32  ;;  %v9093_v12 = vpop.f32.mrf.mxu1 }
 0x67f   : > { %v16851_v22 = vmul.f32 -1.442695, %v22922_v57  ;;  %v22929_v4 = vadd.f32 %v9215_v11, %v9196_v19  ;;  %v9198_v55 = vadd.f32 %v9093_v12, %v8951_v52  ;;  %v9186_v34 = vpop.f32.mrf.mxu0 }
 0x680   : > { %18710 = vpow2.f32 %v16856_v44  ;;  %v16853_v21 = vmul.f32 -1.442695, %v22925_v43  ;;  %v22933_v38 = vadd.f32 %v22885_v17, %v9206_v18  ;;  %v9203_v20 = vadd.f32 %v9186_v34, %v8956_v39  ;;  %v9095_v36 = vpop.f32.mrf.mxu1 }
 0x681   : > { %18712 = vpow2.f32 %v16851_v22  ;;  %v16852_v26 = vmul.f32 -1.442695, %v22929_v4  ;;  %v22936_v14 = vadd.f32 %v9220_v13, %v9198_v55  ;;  %v9199_v0 = vadd.f32 %v9095_v36, %v8952_v56 }
 0x682   : > { %18714 = vpow2.f32 %v16853_v21  ;;  %v16862_v46 = vmul.f32 -1.442695, %v22933_v38  ;;  %v22941_v37 = vadd.f32 %v22893_v10, %v9203_v20  ;;  %v9099_v2 = vpop.f32.mrf.mxu1 }
 0x683   : > { %18716 = vpow2.f32 %v16852_v26  ;;  %v16854_v7 = vmul.f32 -1.442695, %v22936_v14  ;;  %v22944_v28 = vadd.f32 %v9220_v13, %v9199_v0  ;;  %v9201_v51 = vadd.f32 %v9099_v2, %v8954_v59  ;;  %v25889_v26 = vld [vmem:[#allocation15_spill] sm:$0xff] }
 0x684   : > { %18718 = vpow2.f32 %v16862_v46  ;;  %v16859_v6 = vmul.f32 -1.442695, %v22941_v37  ;;  %v9101_v48 = vpop.f32.mrf.mxu1  ;;  %v25890_v46 = vld [vmem:[#allocation11_spill] sm:$0xff] }
 0x685   : > { %18720 = vpow2.f32 %v16854_v7  ;;  %v16855_v31 = vmul.f32 -1.442695, %v22944_v28  ;;  %v22951_v54 = vadd.f32 %v22893_v10, %v9201_v51  ;;  %v9202_v61 = vadd.f32 %v9101_v48, %v8955_v27 }
 0x686   : > { %18722 = vpow2.f32 %v16859_v6  ;;  %v9105_v62 = vpop.f32.mrf.mxu1 }
 0x687   : > { %18724 = vpow2.f32 %v16855_v31  ;;  %v16857_v8 = vmul.f32 -1.442695, %v22951_v54  ;;  %v22956_v1 = vadd.f32 %v22893_v10, %v9202_v61  ;;  %v9204_v42 = vadd.f32 %v9105_v62, %v8957_v45 }
 0x688   : > { %v9107_v16 = vpop.f32.mrf.mxu1 }
 0x689   : > { %18726 = vpow2.f32 %v16857_v8  ;;  %v16858_v50 = vmul.f32 -1.442695, %v22956_v1  ;;  %v22960_v47 = vadd.f32 %v22885_v17, %v9204_v42  ;;  %v9205_v15 = vadd.f32 %v9107_v16, %v8958_v23 }
 0x68b   : > { %18728 = vpow2.f32 %v16858_v50  ;;  %v16860_v41 = vmul.f32 -1.442695, %v22960_v47  ;;  %v22964_v30 = vadd.f32 %v22885_v17, %v9205_v15 }
 0x68d   : > { %v18711_v58 = vpop.eup %18710  ;;  %18730 = vpow2.f32 %v16860_v41  ;;  %v16861_v10 = vmul.f32 -1.442695, %v22964_v30 }
 0x68e   : > { %v18713_v3 = vpop.eup %18712  ;;  %v9285_v13 = vadd.f32 1.0, %v18711_v58 }
 0x68f   : > { %v18715_v9 = vpop.eup %18714  ;;  %v9280_v49 = vadd.f32 1.0, %v18713_v3  ;;  %18732 = vpow2.f32 %v16861_v10 }
 0x690   : > { %v18717_v5 = vpop.eup %18716  ;;  %18734 = vrcp.f32 %v9285_v13  ;;  %v9282_v40 = vadd.f32 1.0, %v18715_v9 }
 0x691   : > { %v18719_v33 = vpop.eup %18718  ;;  %18736 = vrcp.f32 %v9280_v49  ;;  %v9281_v24 = vadd.f32 1.0, %v18717_v5 }
 0x692   : > { %v18721_v11 = vpop.eup %18720  ;;  %18738 = vrcp.f32 %v9282_v40  ;;  %v9291_v53 = vadd.f32 1.0, %v18719_v33 }
 0x693   : > { %v18723_v17 = vpop.eup %18722  ;;  %18740 = vrcp.f32 %v9281_v24  ;;  %v9283_v63 = vadd.f32 1.0, %v18721_v11 }
 0x694   : > { %v18725_v32 = vpop.eup %18724  ;;  %18742 = vrcp.f32 %v9291_v53  ;;  %v9288_v60 = vadd.f32 1.0, %v18723_v17 }
 0x695   : > { %v9284_v52 = vadd.f32 1.0, %v18725_v32 }
 0x696   : > { %v18727_v56 = vpop.eup %18726  ;;  %18744 = vrcp.f32 %v9288_v60 }
 0x697   : > { %18746 = vrcp.f32 %v9283_v63  ;;  %v9286_v29 = vadd.f32 1.0, %v18727_v56 }
 0x698   : > { %v18729_v19 = vpop.eup %18728  ;;  %18748 = vrcp.f32 %v9284_v52 }
 0x699   : > { %v9287_v39 = vadd.f32 1.0, %v18729_v19 }
 0x69a   : > { %v18731_v44 = vpop.eup %18730 }
 0x69b   : > { %18750 = vrcp.f32 %v9287_v39  ;;  %v9289_v12 = vadd.f32 1.0, %v18731_v44 }
 0x69c   : > { %v18733_v18 = vpop.eup %18732  ;;  %18752 = vrcp.f32 %v9286_v29 }
 0x69d   : > { %v18735_v59 = vpop.eup %18734  ;;  %v9290_v22 = vadd.f32 1.0, %v18733_v18  ;;  %18754 = vrcp.f32 %v9289_v12 }
 0x69e   : > { %v18737_v55 = vpop.eup %18736  ;;  %v9321_v34 = vmul.f32 %v18735_v59, %v22918_v25  ;;  %v25891_v25 = vld [vmem:[#allocation12_spill] sm:$0xff] }
 0x69f   : > { %v18739_v21 = vpop.eup %18738  ;;  %v9316_v20 = vmul.f32 %v18737_v55, %v22922_v57  ;;  %18756 = vrcp.f32 %v9290_v22 }
 0x6a0   : > { %v18741_v36 = vpop.eup %18740  ;;  %v9349_v0 = vmul.f32 %v9321_v34, %v25889_v26  ;;  %v9318_v7 = vmul.f32 %v18739_v21, %v22925_v43  ;;  %v23156_v21 = vld [vmem:[%s25622_s4 + $0x660] sm:$0xff] }
 0x6a1   : > { %v18743_v27 = vpop.eup %18742  ;;  %v9344_v2 = vmul.f32 %v9316_v20, %v25890_v46  ;;  %v9317_v51 = vmul.f32 %v18741_v36, %v22929_v4  ;;  %18230 = vmatprep.mubr.msk.f32.mxu1 %vm571_vm0, %v23156_v21 }
 0x6a2   : > { %9378 = vrot.lane.b32.xlu0 %v9349_v0, %s19164_s15  ;;  %v9327_v57 = vmul.f32 %v18743_v27, %v22933_v38  ;;  %v9346_v31 = vmul.f32 %v9318_v7, %v25889_v26 }
 0x6a3   : > { %v18745_v35 = vpop.eup %18744  ;;  %9368 = vrot.lane.b32.xlu1 %v9344_v2, %s19164_s15  ;;  %v9345_v45 = vmul.f32 %v9317_v51, %v25891_v25 }
 0x6a4   : > { %v18747_v6 = vpop.eup %18746  ;;  %v9324_v48 = vmul.f32 %v18745_v35, %v22941_v37  ;;  %v9355_v43 = vmul.f32 %v9327_v57, %v25889_v26 }
 0x6a5   : > { %v18749_v61 = vpop.eup %18748  ;;  %v9319_v4 = vmul.f32 %v18747_v6, %v22936_v14 }
 0x6a6   : > { %9370 = vrot.lane.b32.xlu0 %v9345_v45, %s19164_s15  ;;  %v9320_v62 = vmul.f32 %v18749_v61, %v22944_v28  ;;  %v9352_v8 = vmul.f32 %v9324_v48, %v25889_v26 }
 0x6a7   : > { %9372 = vrot.lane.b32.xlu1 %v9346_v31, %s19164_s15  ;;  %v9347_v37 = vmul.f32 %v9319_v4, %v25890_v46 }
 0x6a8   : > { %v18751_v23 = vpop.eup %18750  ;;  %v9348_v15 = vmul.f32 %v9320_v62, %v25891_v25 }
 0x6a9   : > { %v18753_v38 = vpop.eup %18752  ;;  %v9323_v42 = vmul.f32 %v18751_v23, %v22956_v1 }
 0x6aa   : > { %9390 = vrot.lane.b32.xlu0 %v9355_v43, %s19164_s15  ;;  %v18755_v16 = vpop.eup %18754  ;;  %v9322_v50 = vmul.f32 %v18753_v38, %v22951_v54 }
 0x6ab   : > { %9384 = vrot.lane.b32.xlu1 %v9352_v8, %s19164_s15  ;;  %v9325_v28 = vmul.f32 %v18755_v16, %v22960_v47  ;;  %v9351_v41 = vmul.f32 %v9323_v42, %v25891_v25 }
 0x6ac   : > { %v18757_v14 = vpop.eup %18756  ;;  %v9350_v58 = vmul.f32 %v9322_v50, %v25890_v46 }
 0x6ad   : > { %v9326_v10 = vmul.f32 %v18757_v14, %v22964_v30  ;;  %v9353_v54 = vmul.f32 %v9325_v28, %v25890_v46 }
 0x6ae   : > { %9374 = vrot.lane.b32.xlu0 %v9347_v37, %s19164_s15 }
 0x6af   : > { %9376 = vrot.lane.b32.xlu1 %v9348_v15, %s19164_s15  ;;  %v9354_v1 = vmul.f32 %v9326_v10, %v25891_v25 }
 0x6b2   : > { %9382 = vrot.lane.b32.xlu0 %v9351_v41, %s19164_s15 }
 0x6b3   : > { %9380 = vrot.lane.b32.xlu1 %v9350_v58, %s19164_s15 }
 0x6b6   : > { %9386 = vrot.lane.b32.xlu0 %v9353_v54, %s19164_s15 }
 0x6b7   : > { %9388 = vrot.lane.b32.xlu1 %v9354_v1, %s19164_s15  ;;  %s18620_s15 = smul.u32 96, %s25936_s26 }
 0x714   : > { %v9379_v3 = vpop.permute.xlu0 %9378 }
 0x715   : > { %v9369_v47 = vpop.permute.xlu1 %9368 }
 0x716   : > { %9412 = vst.msk [vmem:[#allocation3] sm:$0xff] %vm6970_vm5, %v9369_v47 }
 0x718   : > { %v9371_v13 = vpop.permute.xlu0 %9370 }
 0x719   : > { %v23005_v9 = vsel %vm6949_vm9, %v9369_v47, %v9371_v13  ;;  %v9373_v30 = vpop.permute.xlu1 %9372 }
 0x71a   : > { %v9393_v49 = vsel %vm6949_vm9, %v9371_v13, %v9373_v30 }
 0x71b   : > { %9414 = vst.msk [vmem:[#allocation3 + $0x10] sm:$0xff] %vm6973_vm10, %v9393_v49 }
 0x71c   : > { %v9391_v5 = vpop.permute.xlu0 %9390 }
 0x71d   : > { %v9385_v40 = vpop.permute.xlu1 %9384  ;;  %v23009_v33 = vld [vmem:[#allocation3] sm:$0xff] }
 0x71e   : > { %9458 = vrot.lane.b32.xlu1 %v23009_v33, %s19145_s14 }
 0x720   : > { %v9375_v24 = vpop.permute.xlu0 %9374 }
 0x721   : > { %9415 = vst.msk [vmem:[#allocation3 + $0x20] sm:$0xff] %vm6970_vm5, %v9375_v24  ;;  %v9377_v11 = vpop.permute.xlu1 %9376 }
 0x722   : > { %v23015_v53 = vsel %vm6949_vm9, %v9375_v24, %v9377_v11  ;;  %v9395_v17 = vsel %vm6949_vm9, %v9377_v11, %v9379_v3  ;;  %9688 = vrot.lane.b32.xlu1 %v23009_v33, %s19144_s21  ;;  %v23020_v32 = vld [vmem:[#allocation3 + $0x10] sm:$0xff] }
 0x723   : > { %9417 = vst.msk [vmem:[#allocation3 + $0x30] sm:$0xff] %vm6973_vm10, %v9395_v17  ;;  %9462 = vrot.lane.b32.xlu0 %v23020_v32, %s19145_s14 }
 0x724   : > { %v9383_v63 = vpop.permute.xlu0 %9382 }
 0x725   : > { %v9397_v60 = vsel %vm6949_vm9, %v9383_v63, %v9385_v40  ;;  %v9381_v52 = vpop.permute.xlu1 %9380 }
 0x726   : > { %9420 = vst.msk [vmem:[#allocation3 + $0x50] sm:$0xff] %vm6973_vm10, %v9397_v60  ;;  %v23028_v56 = vsel %vm6949_vm9, %v9381_v52, %v9383_v63  ;;  %9923 = vrot.lane.b32.xlu1 %v23009_v33, %s19146_s28 }
 0x727   : > { %9418 = vst.msk [vmem:[#allocation3 + $0x40] sm:$0xff] %vm6970_vm5, %v9381_v52  ;;  %9692 = vrot.lane.b32.xlu0 %v23020_v32, %s19144_s21 }
 0x728   : > { %v9387_v19 = vpop.permute.xlu0 %9386  ;;  %v23069_v12 = vld [vmem:[#allocation3 + $0x20] sm:$0xff] }
 0x729   : > { %9421 = vst.msk [vmem:[#allocation3 + $0x60] sm:$0xff] %vm6970_vm5, %v9387_v19  ;;  %v9389_v29 = vpop.permute.xlu1 %9388 }
 0x72a   : > { %v23037_v39 = vsel %vm6949_vm9, %v9387_v19, %v9389_v29  ;;  %v9399_v44 = vsel %vm6949_vm9, %v9389_v29, %v9391_v5  ;;  %10170 = vrot.lane.b32.xlu1 %v23009_v33, %s19149_s27  ;;  %v23061_v18 = vld [vmem:[#allocation3 + $0x30] sm:$0xff]  ;;  %v16971_v29 = vld [vmem:[%s25623_s5 + $0x40] sm:$0xff] }
 0x72b   : > { %9423 = vst.msk [vmem:[#allocation3 + $0x70] sm:$0xff] %vm6973_vm10, %v9399_v44  ;;  %9690 = vrot.lane.b32.xlu0 %v23005_v9, %s19144_s21 }
 0x72d   : > { %v23111_v22 = vld [vmem:[#allocation3 + $0x50] sm:$0xff] }
 0x72e   : > { %10417 = vrot.lane.b32.xlu1 %v23009_v33, %s19150_s23  ;;  %v23085_v59 = vld [vmem:[#allocation3 + $0x40] sm:$0xff] }
 0x72f   : > { %9927 = vrot.lane.b32.xlu0 %v23020_v32, %s19146_s28 }
 0x730   : > { %v23133_v55 = vld [vmem:[#allocation3 + $0x60] sm:$0xff] }
 0x732   : > { %9460 = vrot.lane.b32.xlu1 %v23005_v9, %s19145_s14  ;;  %v23147_v34 = vld [vmem:[#allocation3 + $0x70] sm:$0xff] }
 0x733   : > { %10174 = vrot.lane.b32.xlu0 %v23020_v32, %s19149_s27 }
 0x736   : > { %9925 = vrot.lane.b32.xlu1 %v23005_v9, %s19146_s28 }
 0x737   : > { %10172 = vrot.lane.b32.xlu0 %v23005_v9, %s19149_s27 }
 0x73a   : > { %10419 = vrot.lane.b32.xlu1 %v23005_v9, %s19150_s23 }
 0x73b   : > { %10421 = vrot.lane.b32.xlu0 %v23020_v32, %s19150_s23 }
 0x73e   : > { %9468 = vrot.lane.b32.xlu1 %v23061_v18, %s19145_s14 }
 0x73f   : > { %10668 = vrot.lane.b32.xlu0 %v23020_v32, %s19151_s22 }
 0x742   : > { %9696 = vrot.lane.b32.xlu1 %v23015_v53, %s19144_s21 }
 0x743   : > { %9464 = vrot.lane.b32.xlu0 %v23069_v12, %s19145_s14 }
 0x746   : > { %9931 = vrot.lane.b32.xlu1 %v23015_v53, %s19146_s28 }
 0x747   : > { %9694 = vrot.lane.b32.xlu0 %v23069_v12, %s19144_s21 }
 0x74a   : > { %10178 = vrot.lane.b32.xlu1 %v23015_v53, %s19149_s27 }
 0x74b   : > { %9929 = vrot.lane.b32.xlu0 %v23069_v12, %s19146_s28 }
 0x74e   : > { %10425 = vrot.lane.b32.xlu1 %v23015_v53, %s19150_s23 }
 0x74f   : > { %10176 = vrot.lane.b32.xlu0 %v23069_v12, %s19149_s27 }
 0x752   : > { %9470 = vrot.lane.b32.xlu1 %v23085_v59, %s19145_s14 }
 0x753   : > { %10423 = vrot.lane.b32.xlu0 %v23069_v12, %s19150_s23 }
 0x756   : > { %9700 = vrot.lane.b32.xlu1 %v23085_v59, %s19144_s21 }
 0x757   : > { %9466 = vrot.lane.b32.xlu0 %v23015_v53, %s19145_s14 }
 0x75a   : > { %9935 = vrot.lane.b32.xlu1 %v23085_v59, %s19146_s28 }
 0x75b   : > { %9698 = vrot.lane.b32.xlu0 %v23061_v18, %s19144_s21 }
 0x75e   : > { %10182 = vrot.lane.b32.xlu1 %v23085_v59, %s19149_s27 }
 0x75f   : > { %9933 = vrot.lane.b32.xlu0 %v23061_v18, %s19146_s28 }
 0x762   : > { %10429 = vrot.lane.b32.xlu1 %v23085_v59, %s19150_s23 }
 0x763   : > { %10180 = vrot.lane.b32.xlu0 %v23061_v18, %s19149_s27 }
 0x766   : > { %9472 = vrot.lane.b32.xlu1 %v23028_v56, %s19145_s14 }
 0x767   : > { %10427 = vrot.lane.b32.xlu0 %v23061_v18, %s19150_s23 }
 0x76a   : > { %9704 = vrot.lane.b32.xlu1 %v23111_v22, %s19144_s21 }
 0x76b   : > { %10674 = vrot.lane.b32.xlu0 %v23061_v18, %s19151_s22 }
 0x76e   : > { %9939 = vrot.lane.b32.xlu1 %v23111_v22, %s19146_s28 }
 0x76f   : > { %9474 = vrot.lane.b32.xlu0 %v23111_v22, %s19145_s14 }
 0x772   : > { %10186 = vrot.lane.b32.xlu1 %v23111_v22, %s19149_s27 }
 0x773   : > { %9702 = vrot.lane.b32.xlu0 %v23028_v56, %s19144_s21 }
 0x776   : > { %10433 = vrot.lane.b32.xlu1 %v23111_v22, %s19150_s23 }
 0x777   : > { %9937 = vrot.lane.b32.xlu0 %v23028_v56, %s19146_s28 }
 0x77a   : > { %10680 = vrot.lane.b32.xlu1 %v23111_v22, %s19151_s22 }
 0x77b   : > { %10184 = vrot.lane.b32.xlu0 %v23028_v56, %s19149_s27 }
 0x77e   : > { %9706 = vrot.lane.b32.xlu1 %v23133_v55, %s19144_s21 }
 0x77f   : > { %10431 = vrot.lane.b32.xlu0 %v23028_v56, %s19150_s23 }
 0x782   : > { %10188 = vrot.lane.b32.xlu1 %v23133_v55, %s19149_s27 }
 0x783   : > { %9476 = vrot.lane.b32.xlu0 %v23133_v55, %s19145_s14 }
 0x786   : > { %10682 = vrot.lane.b32.xlu1 %v23133_v55, %s19151_s22 }
 0x787   : > { %9941 = vrot.lane.b32.xlu0 %v23133_v55, %s19146_s28 }
 0x78a   : > { %9480 = vrot.lane.b32.xlu1 %v23147_v34, %s19145_s14 }
 0x78b   : > { %10435 = vrot.lane.b32.xlu0 %v23133_v55, %s19150_s23 }
 0x78e   : > { %10676 = vrot.lane.b32.xlu1 %v23085_v59, %s19151_s22 }
 0x78f   : > { %9478 = vrot.lane.b32.xlu0 %v23037_v39, %s19145_s14 }
 0x790   : > { %v23164_v20 = vpop.permute.xlu1 %9458 }
 0x792   : > { %10672 = vrot.lane.b32.xlu1 %v23015_v53, %s19151_s22 }
 0x793   : > { %10678 = vrot.lane.b32.xlu0 %v23028_v56, %s19151_s22 }
 0x794   : > { %v23170_v36 = vpop.permute.xlu1 %9688 }
 0x795   : > { %v23172_v26 = vpop.permute.xlu0 %9462 }
 0x796   : > { %10927 = vrot.lane.b32.xlu1 %v23111_v22, %s19154_s29 }
 0x797   : > { %10929 = vrot.lane.b32.xlu0 %v23133_v55, %s19154_s29 }
 0x798   : > { %v23178_v0 = vpop.permute.xlu1 %9923 }
 0x799   : > { %v23180_v27 = vpop.permute.xlu0 %9692 }
 0x79a   : > { %10923 = vrot.lane.b32.xlu1 %v23085_v59, %s19154_s29 }
 0x79b   : > { %10925 = vrot.lane.b32.xlu0 %v23028_v56, %s19154_s29 }
 0x79c   : > { %v23186_v46 = vpop.permute.xlu1 %10170 }
 0x79d   : > { %v23188_v2 = vpop.permute.xlu0 %9690 }
 0x79e   : > { %9708 = vrot.lane.b32.xlu1 %v23037_v39, %s19144_s21 }
 0x79f   : > { %9710 = vrot.lane.b32.xlu0 %v23147_v34, %s19144_s21  ;;  %s25893_s21 = smov 66  }
 0x7a0   : > { %v23194_v7 = vpop.permute.xlu1 %10417 }
 0x7a1   : > { %v23196_v51 = vpop.permute.xlu0 %9927 }
 0x7a2   : > { %9943 = vrot.lane.b32.xlu1 %v23037_v39, %s19146_s28 }
 0x7a3   : > { %10670 = vrot.lane.b32.xlu0 %v23069_v12, %s19151_s22 }
 0x7a4   : > { %v23202_v35 = vpop.permute.xlu1 %9460 }
 0x7a5   : > { %v23204_v25 = vpop.permute.xlu0 %10174 }
 0x7a6   : > { %10919 = vrot.lane.b32.xlu1 %v23015_v53, %s19154_s29 }
 0x7a7   : > { %9945 = vrot.lane.b32.xlu0 %v23147_v34, %s19146_s28 }
 0x7a8   : > { %v23210_v45 = vpop.permute.xlu1 %9925 }
 0x7a9   : > { %v23212_v57 = vpop.permute.xlu0 %10172 }
 0x7aa   : > { %10664 = vrot.lane.b32.xlu1 %v23009_v33, %s19151_s22 }
 0x7ab   : > { %10666 = vrot.lane.b32.xlu0 %v23005_v9, %s19151_s22 }
 0x7ac   : > { %v23218_v6 = vpop.permute.xlu1 %10419 }
 0x7ad   : > { %v23220_v48 = vpop.permute.xlu0 %10421 }
 0x7ae   : > { %10913 = vrot.lane.b32.xlu1 %v23005_v9, %s19154_s29 }
 0x7af   : > { %10921 = vrot.lane.b32.xlu0 %v23061_v18, %s19154_s29 }
 0x7b0   : > { %v23226_v31 = vpop.permute.xlu1 %9468 }
 0x7b1   : > { %v23228_v61 = vpop.permute.xlu0 %10668 }
 0x7b2   : > { %25892 = vst [vmem:[#allocation37_spill] sm:$0xff] %v23228_v61  ;;  %10911 = vrot.lane.b32.xlu1 %v23009_v33, %s19154_s29 }
 0x7b3   : > { %10917 = vrot.lane.b32.xlu0 %v23069_v12, %s19154_s29 }
 0x7b4   : > { %v23234_v43 = vpop.permute.xlu1 %9696 }
 0x7b5   : > { %v23236_v4 = vpop.permute.xlu0 %9464 }
 0x7b6   : > { %10190 = vrot.lane.b32.xlu1 %v23037_v39, %s19149_s27 }
 0x7b7   : > { %10192 = vrot.lane.b32.xlu0 %v23147_v34, %s19149_s27  ;;  %s23397_s27 = scalar_lea.vmem %s25620_s2, %s17249_s17 }
 0x7b8   : > { %v23242_v23 = vpop.permute.xlu1 %9931 }
 0x7b9   : > { %v23244_v62 = vpop.permute.xlu0 %9694 }
 0x7ba   : > { %10437 = vrot.lane.b32.xlu1 %v23037_v39, %s19150_s23 }
 0x7bb   : > { %10915 = vrot.lane.b32.xlu0 %v23020_v32, %s19154_s29 }
 0x7bc   : > { %v23250_v8 = vpop.permute.xlu1 %10178 }
 0x7bd   : > { %v23252_v38 = vpop.permute.xlu0 %9929 }
 0x7be   : > { %11174 = vrot.lane.b32.xlu1 %v23111_v22, %s25893_s21 }
 0x7bf   : > { %10439 = vrot.lane.b32.xlu0 %v23147_v34, %s19150_s23 }
 0x7c0   : > { %v23258_v37 = vpop.permute.xlu1 %10425 }
 0x7c1   : > { %v23260_v42 = vpop.permute.xlu0 %10176 }
 0x7c2   : > { %11176 = vrot.lane.b32.xlu1 %v23133_v55, %s25893_s21 }
 0x7c3   : > { %11168 = vrot.lane.b32.xlu0 %v23061_v18, %s25893_s21 }
 0x7c4   : > { %v23266_v16 = vpop.permute.xlu1 %9470 }
 0x7c5   : > { %v23268_v50 = vpop.permute.xlu0 %10423 }
 0x7c6   : > { %11170 = vrot.lane.b32.xlu1 %v23085_v59, %s25893_s21 }
 0x7c7   : > { %11162 = vrot.lane.b32.xlu0 %v23020_v32, %s25893_s21 }
 0x7c8   : > { %v23274_v15 = vpop.permute.xlu1 %9700 }
 0x7c9   : > { %v23276_v14 = vpop.permute.xlu0 %9466 }
 0x7ca   : > { %11166 = vrot.lane.b32.xlu1 %v23015_v53, %s25893_s21 }
 0x7cb   : > { %11172 = vrot.lane.b32.xlu0 %v23028_v56, %s25893_s21 }
 0x7cc   : > { %v23282_v28 = vpop.permute.xlu1 %9935 }
 0x7cd   : > { %v23284_v41 = vpop.permute.xlu0 %9698 }
 0x7ce   : > { %10684 = vrot.lane.b32.xlu1 %v23037_v39, %s19151_s22 }
 0x7cf   : > { %10686 = vrot.lane.b32.xlu0 %v23147_v34, %s19151_s22 }
 0x7d0   : > { %v23290_v58 = vpop.permute.xlu1 %10182 }
 0x7d1   : > { %v23292_v10 = vpop.permute.xlu0 %9933 }
 0x7d2   : > { %10931 = vrot.lane.b32.xlu1 %v23037_v39, %s19154_s29 }
 0x7d3   : > { %11423 = vrot.lane.b32.xlu0 %v23133_v55, %s19156_s19 }
 0x7d4   : > { %v23298_v54 = vpop.permute.xlu1 %10429 }
 0x7d5   : > { %v23300_v1 = vpop.permute.xlu0 %10180 }
 0x7d6   : > { %11421 = vrot.lane.b32.xlu1 %v23111_v22, %s19156_s19  ;;  %v11883_v22 = vld [vmem:[%s25628_s10] sm:$0xff] }
 0x7d7   : > { %10933 = vrot.lane.b32.xlu0 %v23147_v34, %s19154_s29  ;;  %s19166_s29 = smov 16  }
 0x7d8   : > { %v23306_v3 = vpop.permute.xlu1 %9472 }
 0x7d9   : > { %v23308_v47 = vpop.permute.xlu0 %10427 }
 0x7da   : > { %11417 = vrot.lane.b32.xlu1 %v23085_v59, %s19156_s19 }
 0x7db   : > { %11419 = vrot.lane.b32.xlu0 %v23028_v56, %s19156_s19  ;;  %v16973_v56 = vld [vmem:[%s25623_s5 + $0x50] sm:$0xff] }
 0x7dc   : > { %v23314_v13 = vpop.permute.xlu1 %9704 }
 0x7dd   : > { %v23316_v30 = vpop.permute.xlu0 %10674 }
 0x7de   : > { %11413 = vrot.lane.b32.xlu1 %v23015_v53, %s19156_s19 }
 0x7df   : > { %11164 = vrot.lane.b32.xlu0 %v23069_v12, %s25893_s21 }
 0x7e0   : > { %v23322_v49 = vpop.permute.xlu1 %9939 }
 0x7e1   : > { %v9475_v5 = vpop.permute.xlu0 %9474 }
 0x7e2   : > { %11158 = vrot.lane.b32.xlu1 %v23009_v33, %s25893_s21  ;;  %v9487_v61 = vsel %vm2213_vm7, %v23306_v3, %v9475_v5 }
 0x7e3   : > { %11160 = vrot.lane.b32.xlu0 %v23005_v9, %s25893_s21 }
 0x7e4   : > { %v23328_v40 = vpop.permute.xlu1 %10186 }
 0x7e5   : > { %v23330_v24 = vpop.permute.xlu0 %9702 }
 0x7e6   : > { %11178 = vrot.lane.b32.xlu1 %v23037_v39, %s25893_s21 }
 0x7e7   : > { %11180 = vrot.lane.b32.xlu0 %v23147_v34, %s25893_s21  ;;  %s486_s21 = scalar_lea.vmem %s25621_s3, %s25936_s26 }
 0x7e8   : > { %v23336_v11 = vpop.permute.xlu1 %10433 }
 0x7e9   : > { %v23338_v53 = vpop.permute.xlu0 %9937 }
 0x7ea   : > { %11425 = vrot.lane.b32.xlu1 %v23037_v39, %s19156_s19  ;;  %v16974_v39 = vld [vmem:[%s25623_s5 + $0x58] sm:$0xff] }
 0x7eb   : > { %11415 = vrot.lane.b32.xlu0 %v23061_v18, %s19156_s19  ;;  %v11885_v18 = vld [vmem:[%s25628_s10 + $0x10] sm:$0xff] }
 0x7ec   : > { %v23344_v17 = vpop.permute.xlu1 %10680 }
 0x7ed   : > { %v23346_v63 = vpop.permute.xlu0 %10184 }
 0x7ee   : > { %11407 = vrot.lane.b32.xlu1 %v23005_v9, %s19156_s19 }
 0x7ef   : > { %11427 = vrot.lane.b32.xlu0 %v23147_v34, %s19156_s19  ;;  %v11886_v34 = vld [vmem:[%s25628_s10 + $0x18] sm:$0xff] }
 0x7f0   : > { %v23352_v60 = vpop.permute.xlu1 %9706 }
 0x7f1   : > { %v23354_v52 = vpop.permute.xlu0 %10431 }
 0x7f2   : > { %11405 = vrot.lane.b32.xlu1 %v23009_v33, %s19156_s19 }
 0x7f3   : > { %11411 = vrot.lane.b32.xlu0 %v23069_v12, %s19156_s19 }
 0x7f4   : > { %v23363_v19 = vpop.permute.xlu1 %10188 }
 0x7f5   : > { %v9477_v9 = vpop.permute.xlu0 %9476 }
 0x7f6   : > { %11664 = vperm.xlu1 %18661, %v16973_v56  }
 0x7f7   : > { %11409 = vrot.lane.b32.xlu0 %v23020_v32, %s19156_s19  ;;  %v16972_v32 = vld [vmem:[%s25623_s5 + $0x48] sm:$0xff]  ;;  %s16427_s19 = sshll.u32 %s25936_s26, 3 }
 0x7f8   : > { %v23370_v33 = vpop.permute.xlu1 %10682  ;;  %s478_s20 = scalar_lea.vmem %s25619_s1, %s16427_s19 }
 0x7f9   : > { %v23375_v44 = vpop.permute.xlu0 %9941 }
 0x7fa   : > { %11654 = vperm.xlu1 %18661, %v16971_v29  }
 0x7fb   : > { %11669 = vperm.xlu0 %18660, %v16974_v39  }
 0x7fc   : > { %v9481_v12 = vpop.permute.xlu1 %9480 }
 0x7fd   : > { %v23383_v59 = vpop.permute.xlu0 %10435  ;;  %18222 = vmatprep.subr.mxu1 %v9481_v12 }
 0x7fe   : > { %11910 = vperm.xlu1 %18661, %v11885_v18   ;;  %18223 = vmatpush3.msra.mxu1 %v9481_v12  ;;  %v11773_v18 = vld [vmem:[%s23397_s27 + $0x8] sm:$0xff] }
 0x7ff   : > { %11659 = vperm.xlu0 %18660, %v16972_v32   ;;  %18224 = vmatprep.subr.mxu1 %v9475_v5 }
 0x800   : > { %18225 = vmatpush3.msra.mxu1 %v9475_v5  ;;  %v23389_v55 = vpop.permute.xlu1 %10676  ;;  %v9485_v5 = vsel %vm2213_vm7, %v23276_v14, %v23226_v31 }
 0x801   : > { %v9479_v56 = vpop.permute.xlu0 %9478  ;;  %18226 = vmatprep.subr.mxu1 %v23226_v31 }
 0x802   : > { %11900 = vperm.xlu1 %18661, %v11883_v22   ;;  %18227 = vmatpush3.msra.mxu1 %v23226_v31  ;;  %v9489_v29 = vsel %vm2213_vm7, %v9479_v56, %v9481_v12  ;;  %v9488_v39 = vsel %vm2213_vm7, %v9477_v9, %v9479_v56  ;;  %v11884_v22 = vld [vmem:[%s25628_s10 + $0x8] sm:$0xff]  ;;  %v9486_v12 = vsel %vm2213_vm7, %v23266_v16, %v23306_v3  ;;  %v11775_v56 = vld [vmem:[%s23397_s27 + $0x18] sm:$0xff]  ;;  %v11772_v31 = vld [vmem:[%s23397_s27] sm:$0xff] }
 0x803   : > { %11915 = vperm.xlu0 %18660, %v11886_v34   ;;  %9538 = vmatprep.subr.mxu0 %v9489_v29  ;;  %v9484_v34 = vsel %vm2213_vm7, %v23236_v4, %v23276_v14  ;;  %v9483_v16 = vsel %vm2213_vm7, %v23202_v35, %v23172_v26  ;;  %v16869_v3 = vld [vmem:[%s25622_s4 + $0x670] sm:$0xff]  ;;  %v9482_v14 = vsel %vm2213_vm7, %v23164_v20, %v23202_v35  ;;  %vm19165_vm7 = vmmov 0  }
 0x804   : > { %18228 = vmatprep.subr.mxu1 %v23172_v26  ;;  %9539 = vmatpush1.msra.mxu0 %v9488_v39  ;;  %v23405_v32 = vpop.permute.xlu1 %10672  ;;  %v17003_v39 = vld [vmem:[%s25628_s10 + $0x28] sm:$0xff]  ;;  %v11774_v20 = vld [vmem:[%s23397_s27 + $0x10] sm:$0xff] }
 0x805   : > { %18229 = vmatpush3.msra.mxu1 %v23172_v26  ;;  %v23413_v9 = vpop.permute.xlu0 %10678  ;;  %9540 = vmatprep.subr.mxu0 %v9487_v61  ;;  %v16868_v61 = vld [vmem:[%s25622_s4 + $0x668] sm:$0xff]  ;;  %v16870_v26 = vld [vmem:[%s25622_s4 + $0x678] sm:$0xff] }
 0x806   : > { %12567 = vperm.xlu1 %18661, %v11773_v18   ;;  %9541 = vmatpush1.msra.mxu0 %v9486_v12 }
 0x807   : > { %11905 = vperm.xlu0 %18660, %v11884_v22   ;;  %9542 = vmatprep.subr.mxu0 %v9485_v5  ;;  %v25894_v22 = vld [vmem:[#allocation19_spill] sm:$0xff]  ;;  %v17002_v5 = vld [vmem:[%s25628_s10 + $0x20] sm:$0xff] }
 0x808   : > { %9543 = vmatpush1.msra.mxu0 %v9484_v34  ;;  %v23428_v29 = vpop.permute.xlu1 %10927  ;;  %18231 = vmatmul.mubr.msk.f32.vlgmr.msra.gmra.mxu1 %vm571_vm0, %v16868_v61 }
 0x809   : > { %v23438_v4 = vpop.permute.xlu0 %10929  ;;  %9544 = vmatprep.subr.mxu0 %v9483_v16  ;;  %18233 = vmatprep.mubr.msk.f32.mxu1 %vm571_vm0, %v16869_v3 }
 0x80a   : > { %12577 = vperm.xlu1 %18661, %v11775_v56   ;;  %9545 = vmatpush1.msra.mxu0 %v9482_v14  ;;  %v9717_v14 = vsel %vm1965_vm6, %v23330_v24, %v23314_v13 }
 0x80b   : > { %12562 = vperm.xlu0 %18660, %v11772_v31   ;;  %16871 = vmatmul.mubr.msk.f32.vlgmr.msra.gmra.mxu0 %vm571_vm0, %v23156_v21  ;;  %v17005_v21 = vld [vmem:[%s25628_s10 + $0x38] sm:$0xff] }
 0x80c   : > { %v23452_v18 = vpop.permute.xlu1 %10923  ;;  %9584 = vmatprep.mubr.f32.mxu0 %v25894_v22  ;;  %18234 = vmatmul.mubr.msk.f32.gmra.mxu1 %vm571_vm0, %v16870_v26 }
 0x80d   : > { %v23457_v35 = vpop.permute.xlu0 %10925  ;;  %9808 = vmatprep.mubr.f32.mxu1 %v25894_v22 }
 0x80e   : > { %12190 = vperm.xlu1 %18661, %v17003_v39   ;;  %v17004_v39 = vld [vmem:[%s25628_s10 + $0x30] sm:$0xff] }
 0x80f   : > { %12572 = vperm.xlu0 %18660, %v11774_v20   ;;  %16872 = vmatmul.mubr.msk.f32.gmra.mxu0 %vm571_vm0, %v16868_v61 }
 0x810   : > { %v9709_v12 = vpop.permute.xlu1 %9708  ;;  %9590 = vmatprep.mubr.f32.mxu0 %v25894_v22 }
 0x811   : > { %v9711_v34 = vpop.permute.xlu0 %9710  ;;  %v9718_v61 = vsel %vm1965_vm6, %v23352_v60, %v9709_v12  ;;  %v9716_v60 = vsel %vm1965_vm6, %v23274_v15, %v23330_v24  ;;  %v9713_v24 = vsel %vm1965_vm6, %v23188_v2, %v23180_v27 }
 0x812   : > { %12200 = vperm.xlu1 %18661, %v17005_v21   ;;  %18236 = vmatprep.subr.mxu0 %v9711_v34  ;;  %v9719_v56 = vsel %vm1965_vm6, %v9709_v12, %v9711_v34  ;;  %v16863_v21 = vld [vmem:[%s25622_s4 + $0x640] sm:$0xff] }
 0x813   : > { %12185 = vperm.xlu0 %18660, %v17002_v5   ;;  %16873 = vmatmul.mubr.msk.f32.gmra.mxu0 %vm571_vm0, %v16869_v3  ;;  %v9715_v3 = vsel %vm1965_vm6, %v23234_v43, %v23284_v41  ;;  %v16866_v5 = vld [vmem:[%s25622_s4 + $0x658] sm:$0xff] }
 0x814   : > { %9768 = vmatprep.subr.mxu1 %v9719_v56  ;;  %18237 = vmatpush3.msra.mxu0 %v9711_v34  ;;  %v9944_v16 = vpop.permute.xlu1 %9943 }
 0x815   : > { %9769 = vmatpush1.msra.mxu1 %v9718_v61  ;;  %18238 = vmatprep.subr.mxu0 %v23314_v13  ;;  %v23473_v31 = vpop.permute.xlu0 %10670  ;;  %v9950_v61 = vsel %vm2461_vm8, %v23242_v23, %v23292_v10 }
 0x816   : > { %9770 = vmatprep.subr.mxu1 %v9717_v14  ;;  %18239 = vmatpush3.msra.mxu0 %v23314_v13  ;;  %v9714_v13 = vsel %vm1965_vm6, %v23244_v62, %v23234_v43  ;;  %v9712_v43 = vsel %vm1965_vm6, %v23170_v36, %v23188_v2  ;;  %v16864_v62 = vld [vmem:[%s25622_s4 + $0x648] sm:$0xff]  ;;  %v9953_v36 = vsel %vm2461_vm8, %v23375_v44, %v9944_v16  ;;  %v16865_v2 = vld [vmem:[%s25622_s4 + $0x650] sm:$0xff]  ;;  %vm11790_vm6 = vcmask 1045504  }
 0x817   : > { %9596 = vmatprep.mubr.f32.mxu0 %v25894_v22  ;;  %9771 = vmatpush1.msra.mxu1 %v9716_v60  ;;  %v9951_v44 = vsel %vm2461_vm8, %v23282_v28, %v23338_v53 }
 0x818   : > { %18240 = vmatprep.subr.mxu0 %v23284_v41  ;;  %12195 = vperm.xlu0 %18660, %v17004_v39   ;;  %v23490_v20 = vpop.permute.xlu1 %10919  ;;  %v16888_v39 = vld [vmem:[%s25622_s4 + $0x688] sm:$0xff] }
 0x819   : > { %16874 = vmatmul.mubr.msk.f32.gmra.mxu0 %vm571_vm0, %v16870_v26  ;;  %9772 = vmatprep.subr.mxu1 %v9715_v3  ;;  %v9946_v15 = vpop.permute.xlu0 %9945 }
 0x81a   : > { %18241 = vmatpush3.msra.mxu0 %v23284_v41  ;;  %9773 = vmatpush1.msra.mxu1 %v9714_v13  ;;  %v9954_v41 = vsel %vm2461_vm8, %v9944_v16, %v9946_v15  ;;  %v9949_v16 = vsel %vm2461_vm8, %v23252_v38, %v23242_v23  ;;  %v16887_v23 = vld [vmem:[%s25622_s4 + $0x680] sm:$0xff]  ;;  %v9947_v38 = vsel %vm2461_vm8, %v23178_v0, %v23210_v45 }
 0x81b   : > { %18242 = vmatprep.subr.mxu0 %v23180_v27  ;;  %9774 = vmatprep.subr.mxu1 %v9713_v24  ;;  %v16890_v24 = vld [vmem:[%s25622_s4 + $0x698] sm:$0xff] }
 0x81c   : > { %18243 = vmatpush3.msra.mxu0 %v23180_v27  ;;  %9775 = vmatpush1.msra.mxu1 %v9712_v43  ;;  %v23512_v26 = vpop.permute.xlu1 %10664  ;;  %v9952_v27 = vsel %vm2461_vm8, %v23338_v53, %v23322_v49  ;;  %v10198_v43 = vsel %vm3205_vm11, %v23290_v58, %v23346_v63  ;;  %v10195_v58 = vsel %vm3205_vm11, %v23212_v57, %v23204_v25 }
 0x81d   : > { %18244 = vmatprep.mubr.msk.f32.mxu0 %vm571_vm0, %v16863_v21  ;;  %16879 = vmatmul.mubr.msk.f32.vlgmr.msra.gmra.mxu1 %vm571_vm0, %v16863_v21  ;;  %v23516_v12 = vpop.permute.xlu0 %10666  ;;  %v10199_v21 = vsel %vm3205_vm11, %v23346_v63, %v23328_v40 }
 0x81e   : > { %18245 = vmatmul.mubr.msk.f32.vlgmr.msra.gmra.mxu0 %vm571_vm0, %v16864_v62  ;;  %10003 = vmatprep.subr.mxu0 %v9954_v41 }
 0x81f   : > { %18250 = vmatprep.subr.mxu1 %v9946_v15  ;;  %10004 = vmatpush1.msra.mxu0 %v9953_v36 }
 0x820   : > { %18251 = vmatpush3.msra.mxu1 %v9946_v15  ;;  %10005 = vmatprep.subr.mxu0 %v9952_v27  ;;  %v23530_v34 = vpop.permute.xlu1 %10913 }
 0x821   : > { %18252 = vmatprep.subr.mxu1 %v23322_v49  ;;  %9814 = vmatprep.mubr.f32.mxu1 %v25894_v22  ;;  %v23537_v56 = vpop.permute.xlu0 %10921 }
 0x822   : > { %18247 = vmatprep.mubr.msk.f32.mxu0 %vm571_vm0, %v16865_v2  ;;  %10006 = vmatpush1.msra.mxu0 %v9951_v44 }
 0x823   : > { %18253 = vmatpush3.msra.mxu1 %v23322_v49  ;;  %18248 = vmatmul.mubr.msk.f32.gmra.mxu0 %vm571_vm0, %v16866_v5  ;;  %v9948_v49 = vsel %vm2461_vm8, %v23210_v45, %v23196_v51  ;;  %v16889_v45 = vld [vmem:[%s25622_s4 + $0x690] sm:$0xff]  ;;  %vm11786_vm8 = vcmask 48128  }
 0x824   : > { %16880 = vmatmul.mubr.msk.f32.gmra.mxu1 %vm571_vm0, %v16864_v62  ;;  %10007 = vmatprep.subr.mxu0 %v9950_v61  ;;  %v23549_v28 = vpop.permute.xlu1 %10911  ;;  %v10197_v62 = vsel %vm3205_vm11, %v23250_v8, %v23300_v1  ;;  %v10444_v61 = vsel %vm3453_vm12, %v23258_v37, %v23308_v47 }
 0x825   : > { %18254 = vmatprep.subr.mxu1 %v23292_v10  ;;  %10008 = vmatpush1.msra.mxu0 %v9949_v16  ;;  %v23555_v53 = vpop.permute.xlu0 %10917 }
 0x826   : > { %18255 = vmatpush3.msra.mxu1 %v23292_v10  ;;  %10009 = vmatprep.subr.mxu0 %v9948_v49  ;;  %v10443_v49 = vsel %vm3453_vm12, %v23268_v50, %v23258_v37  ;;  %v10441_v37 = vsel %vm3453_vm12, %v23194_v7, %v23218_v6  ;;  %v16912_v7 = vld [vmem:[%s25622_s4 + $0x6c8] sm:$0xff] }
 0x827   : > { %18256 = vmatprep.subr.mxu1 %v23196_v51  ;;  %9820 = vmatprep.mubr.f32.mxu1 %v25894_v22 }
 0x828   : > { %10010 = vmatpush1.msra.mxu0 %v9947_v38  ;;  %10043 = vmatprep.mubr.f32.mxu0 %v25894_v22  ;;  %v10191_v14 = vpop.permute.xlu1 %10190  ;;  %v16913_v38 = vld [vmem:[%s25622_s4 + $0x6d0] sm:$0xff] }
 0x829   : > { %18257 = vmatpush3.msra.mxu1 %v23196_v51  ;;  %16891 = vmatmul.mubr.msk.f32.vlgmr.msra.gmra.mxu0 %vm571_vm0, %v16887_v23  ;;  %v10193_v10 = vpop.permute.xlu0 %10192  ;;  %v10200_v15 = vsel %vm3205_vm11, %v23363_v19, %v10191_v14 }
 0x82a   : > { %16881 = vmatmul.mubr.msk.f32.gmra.mxu1 %vm571_vm0, %v16865_v2  ;;  %10049 = vmatprep.mubr.f32.mxu0 %v25894_v22  ;;  %v10201_v60 = vsel %vm3205_vm11, %v10191_v14, %v10193_v10 }
 0x82b   : > { %9826 = vmatprep.mubr.f32.mxu1 %v25894_v22  ;;  %18264 = vmatprep.subr.mxu0 %v10193_v10 }
 0x82c   : > { %10250 = vmatprep.subr.mxu1 %v10201_v60  ;;  %18265 = vmatpush3.msra.mxu0 %v10193_v10  ;;  %v10438_v0 = vpop.permute.xlu1 %10437  ;;  %v16914_v60 = vld [vmem:[%s25622_s4 + $0x6d8] sm:$0xff] }
 0x82d   : > { %16892 = vmatmul.mubr.msk.f32.gmra.mxu0 %vm571_vm0, %v16888_v39  ;;  %18266 = vmatprep.subr.mxu0 %v23328_v40  ;;  %v23578_v51 = vpop.permute.xlu0 %10915 }
 0x82e   : > { %16882 = vmatmul.mubr.msk.f32.gmra.mxu1 %vm571_vm0, %v16866_v5  ;;  %10055 = vmatprep.mubr.f32.mxu0 %v25894_v22  ;;  %v16902_v5 = vld [vmem:[%s25622_s4 + $0x6b8] sm:$0xff] }
 0x82f   : > { %18258 = vmatprep.mubr.msk.f32.mxu1 %vm571_vm0, %v16887_v23  ;;  %18267 = vmatpush3.msra.mxu0 %v23328_v40  ;;  %v10196_v40 = vsel %vm3205_vm11, %v23260_v42, %v23250_v8  ;;  %v10194_v8 = vsel %vm3205_vm11, %v23186_v46, %v23212_v57  ;;  %v16900_v42 = vld [vmem:[%s25622_s4 + $0x6a8] sm:$0xff]  ;;  %v10447_v46 = vsel %vm3453_vm12, %v23383_v59, %v10438_v0  ;;  %v16901_v57 = vld [vmem:[%s25622_s4 + $0x6b0] sm:$0xff]  ;;  %vm6863_vm11 = vcmask 130048  }
 0x830   : > { %18268 = vmatprep.subr.mxu0 %v23300_v1  ;;  %v23588_v3 = vpop.permute.xlu1 %11174  ;;  %v10445_v59 = vsel %vm3453_vm12, %v23298_v54, %v23354_v52 }
 0x831   : > { %16893 = vmatmul.mubr.msk.f32.gmra.mxu0 %vm571_vm0, %v16889_v45  ;;  %v10440_v13 = vpop.permute.xlu0 %10439 }
 0x832   : > { %18259 = vmatmul.mubr.msk.f32.vlgmr.msra.gmra.mxu1 %vm571_vm0, %v16888_v39  ;;  %10061 = vmatprep.mubr.f32.mxu0 %v25894_v22  ;;  %v10448_v63 = vsel %vm3453_vm12, %v10438_v0, %v10440_v13  ;;  %v10693_v0 = vsel %vm3701_vm13, %v23413_v9, %v23344_v17 }
 0x833   : > { %10251 = vmatpush1.msra.mxu1 %v10200_v15  ;;  %18261 = vmatprep.mubr.msk.f32.mxu1 %vm571_vm0, %v16889_v45  ;;  %v10692_v45 = vsel %vm3701_vm13, %v23389_v55, %v23413_v9  ;;  %v16923_v9 = vld [vmem:[%s25622_s4 + $0x6e0] sm:$0xff] }
 0x834   : > { %10252 = vmatprep.subr.mxu1 %v10199_v21  ;;  %18269 = vmatpush3.msra.mxu0 %v23300_v1  ;;  %v23606_v19 = vpop.permute.xlu1 %11176  ;;  %v16899_v1 = vld [vmem:[%s25622_s4 + $0x6a0] sm:$0xff] }
 0x835   : > { %10253 = vmatpush1.msra.mxu1 %v10198_v43  ;;  %16894 = vmatmul.mubr.msk.f32.gmra.mxu0 %vm571_vm0, %v16890_v24  ;;  %v23612_v41 = vpop.permute.xlu0 %11168  ;;  %v16926_v43 = vld [vmem:[%s25622_s4 + $0x6f8] sm:$0xff] }
 0x836   : > { %18262 = vmatmul.mubr.msk.f32.gmra.mxu1 %vm571_vm0, %v16890_v24  ;;  %10254 = vmatprep.subr.mxu1 %v10197_v62 }
 0x837   : > { %10255 = vmatpush1.msra.mxu1 %v10196_v40  ;;  %18270 = vmatprep.subr.mxu0 %v23204_v25  ;;  %v10939_v40 = vsel %vm4445_vm1, %v23452_v18, %v23457_v35  ;;  %v16935_v18 = vld [vmem:[%s25622_s4 + $0x700] sm:$0xff] }
 0x838   : > { %10256 = vmatprep.subr.mxu1 %v10195_v58  ;;  %18271 = vmatpush3.msra.mxu0 %v23204_v25  ;;  %v23633_v36 = vpop.permute.xlu1 %11170  ;;  %v10446_v25 = vsel %vm3453_vm12, %v23354_v52, %v23336_v11  ;;  %v16911_v52 = vld [vmem:[%s25622_s4 + $0x6c0] sm:$0xff]  ;;  %v10938_v58 = vsel %vm4445_vm1, %v23490_v20, %v23537_v56 }
 0x839   : > { %10257 = vmatpush1.msra.mxu1 %v10194_v8  ;;  %10290 = vmatprep.mubr.f32.mxu1 %v25894_v22  ;;  %v23636_v27 = vpop.permute.xlu0 %11162 }
 0x83a   : > { %18272 = vmatprep.mubr.msk.f32.mxu0 %vm571_vm0, %v16899_v1  ;;  %16903 = vmatmul.mubr.msk.f32.vlgmr.msra.gmra.mxu1 %vm571_vm0, %v16899_v1  ;;  %v10937_v1 = vsel %vm4445_vm1, %v23555_v53, %v23490_v20  ;;  %v10935_v20 = vsel %vm4445_vm1, %v23549_v28, %v23530_v34  ;;  %v16937_v53 = vld [vmem:[%s25622_s4 + $0x710] sm:$0xff] }
 0x83b   : > { %18273 = vmatmul.mubr.msk.f32.vlgmr.msra.gmra.mxu0 %vm571_vm0, %v16900_v42  ;;  %10497 = vmatprep.subr.mxu0 %v10448_v63 }
 0x83c   : > { %18278 = vmatprep.subr.mxu1 %v10440_v13  ;;  %10498 = vmatpush1.msra.mxu0 %v10447_v46  ;;  %v23649_v2 = vpop.permute.xlu1 %11166 }
 0x83d   : > { %18279 = vmatpush3.msra.mxu1 %v10440_v13  ;;  %10499 = vmatprep.subr.mxu0 %v10446_v25  ;;  %v23654_v44 = vpop.permute.xlu0 %11172  ;;  %v25895_v13 = vld [vmem:[#allocation37_spill] sm:$0xff] }
 0x83e   : > { %18280 = vmatprep.subr.mxu1 %v23336_v11  ;;  %10296 = vmatprep.mubr.f32.mxu1 %v25894_v22  ;;  %v10689_v55 = vsel %vm3701_vm13, %v23516_v12, %v25895_v13  ;;  %v11187_v46 = vsel %vm4693_vm2, %v23654_v44, %v23588_v3 }
 0x83f   : > { %18275 = vmatprep.mubr.msk.f32.mxu0 %vm571_vm0, %v16901_v57  ;;  %10500 = vmatpush1.msra.mxu0 %v10445_v59 }
 0x840   : > { %18281 = vmatpush3.msra.mxu1 %v23336_v11  ;;  %18276 = vmatmul.mubr.msk.f32.gmra.mxu0 %vm571_vm0, %v16902_v5  ;;  %v10685_v16 = vpop.permute.xlu1 %10684  ;;  %v10442_v11 = vsel %vm3453_vm12, %v23218_v6, %v23220_v48  ;;  %vm12344_vm12 = vcmask 64512  }
 0x841   : > { %16904 = vmatmul.mubr.msk.f32.gmra.mxu1 %vm571_vm0, %v16900_v42  ;;  %10501 = vmatprep.subr.mxu0 %v10444_v61  ;;  %v10687_v54 = vpop.permute.xlu0 %10686  ;;  %v10694_v39 = vsel %vm3701_vm13, %v23370_v33, %v10685_v16  ;;  %v10691_v33 = vsel %vm3701_vm13, %v23405_v32, %v23316_v30  ;;  %v16938_v42 = vld [vmem:[%s25622_s4 + $0x718] sm:$0xff] }
 0x842   : > { %18282 = vmatprep.subr.mxu1 %v23308_v47  ;;  %10502 = vmatpush1.msra.mxu0 %v10443_v49  ;;  %v16949_v49 = vld [vmem:[%s25622_s4 + $0x730] sm:$0xff] }
 0x843   : > { %18283 = vmatpush3.msra.mxu1 %v23308_v47  ;;  %10503 = vmatprep.subr.mxu0 %v10442_v11  ;;  %v10695_v47 = vsel %vm3701_vm13, %v10685_v16, %v10687_v54 }
 0x844   : > { %18284 = vmatprep.subr.mxu1 %v23220_v48  ;;  %10302 = vmatprep.mubr.f32.mxu1 %v25894_v22  ;;  %v10932_v50 = vpop.permute.xlu1 %10931 }
 0x845   : > { %10504 = vmatpush1.msra.mxu0 %v10441_v37  ;;  %10537 = vmatprep.mubr.f32.mxu0 %v25894_v22  ;;  %v23685_v23 = vpop.permute.xlu0 %11423  ;;  %v10941_v21 = vsel %vm4445_vm1, %v23438_v4, %v10932_v50 }
 0x846   : > { %18285 = vmatpush3.msra.mxu1 %v23220_v48  ;;  %16915 = vmatmul.mubr.msk.f32.vlgmr.msra.gmra.mxu0 %vm571_vm0, %v16911_v52 }
 0x847   : > { %16905 = vmatmul.mubr.msk.f32.gmra.mxu1 %vm571_vm0, %v16901_v57  ;;  %10543 = vmatprep.mubr.f32.mxu0 %v25894_v22  ;;  %v11185_v57 = vsel %vm4693_vm2, %v23649_v2, %v23612_v41 }
 0x848   : > { %10308 = vmatprep.mubr.f32.mxu1 %v25894_v22  ;;  %18292 = vmatprep.subr.mxu0 %v10687_v54  ;;  %v23696_v6 = vpop.permute.xlu1 %11421 }
 0x849   : > { %10744 = vmatprep.subr.mxu1 %v10695_v47  ;;  %18293 = vmatpush3.msra.mxu0 %v10687_v54  ;;  %v10934_v48 = vpop.permute.xlu0 %10933  ;;  %v16950_v54 = vld [vmem:[%s25622_s4 + $0x738] sm:$0xff] }
 0x84a   : > { %16916 = vmatmul.mubr.msk.f32.gmra.mxu0 %vm571_vm0, %v16912_v7  ;;  %18294 = vmatprep.subr.mxu0 %v23344_v17  ;;  %v10942_v24 = vsel %vm4445_vm1, %v10932_v50, %v10934_v48 }
 0x84b   : > { %16906 = vmatmul.mubr.msk.f32.gmra.mxu1 %vm571_vm0, %v16902_v5  ;;  %10549 = vmatprep.mubr.f32.mxu0 %v25894_v22  ;;  %v16947_v5 = vld [vmem:[%s25622_s4 + $0x720] sm:$0xff] }
 0x84c   : > { %18286 = vmatprep.mubr.msk.f32.mxu1 %vm571_vm0, %v16911_v52  ;;  %18295 = vmatpush3.msra.mxu0 %v23344_v17  ;;  %v23709_v14 = vpop.permute.xlu1 %11417  ;;  %v10690_v17 = vsel %vm3701_vm13, %v23473_v31, %v23405_v32  ;;  %v10688_v32 = vsel %vm3701_vm13, %v23512_v26, %v23516_v12  ;;  %v16924_v31 = vld [vmem:[%s25622_s4 + $0x6e8] sm:$0xff]  ;;  %v10940_v26 = vsel %vm4445_vm1, %v23457_v35, %v23428_v29  ;;  %v16925_v12 = vld [vmem:[%s25622_s4 + $0x6f0] sm:$0xff]  ;;  %vm12353_vm13 = vcmask 195584  }
 0x84d   : > { %18296 = vmatprep.subr.mxu0 %v23316_v30  ;;  %v23711_v10 = vpop.permute.xlu0 %11419 }
 0x84e   : > { %16917 = vmatmul.mubr.msk.f32.gmra.mxu0 %vm571_vm0, %v16913_v38  ;;  %v11433_v11 = vsel %vm4941_vm3, %v23709_v14, %v23711_v10  ;;  %v11778_v14 = vld [vmem:[%s25625_s7] sm:$0x3f] }
 0x84f   : > { %18287 = vmatmul.mubr.msk.f32.vlgmr.msra.gmra.mxu1 %vm571_vm0, %v16912_v7  ;;  %10555 = vmatprep.mubr.f32.mxu0 %v25894_v22 }
 0x850   : > { %10745 = vmatpush1.msra.mxu1 %v10694_v39  ;;  %18289 = vmatprep.mubr.msk.f32.mxu1 %vm571_vm0, %v16913_v38  ;;  %v23743_v15 = vpop.permute.xlu1 %11413  ;;  %v16961_v38 = vld [vmem:[%s25622_s4 + $0x750] sm:$0xff]  ;;  %v11777_v39 = vld [vmem:[%s478_s20] sm:$0xff] }
 0x851   : > { %10746 = vmatprep.subr.mxu1 %v10693_v0  ;;  %18297 = vmatpush3.msra.mxu0 %v23316_v30  ;;  %v23745_v30 = vpop.permute.xlu0 %11164 }
 0x852   : > { %10747 = vmatpush1.msra.mxu1 %v10692_v45  ;;  %16918 = vmatmul.mubr.msk.f32.gmra.mxu0 %vm571_vm0, %v16914_v60 }
 0x853   : > { %18290 = vmatmul.mubr.msk.f32.gmra.mxu1 %vm571_vm0, %v16914_v60  ;;  %10748 = vmatprep.subr.mxu1 %v10691_v33 }
 0x854   : > { %10749 = vmatpush1.msra.mxu1 %v10690_v17  ;;  %18298 = vmatprep.subr.mxu0 %v25895_v13  ;;  %v23770_v4 = vpop.permute.xlu1 %11158 }
 0x855   : > { %10750 = vmatprep.subr.mxu1 %v10689_v55  ;;  %18299 = vmatpush3.msra.mxu0 %v25895_v13  ;;  %v23772_v62 = vpop.permute.xlu0 %11160 }
 0x856   : > { %10751 = vmatpush1.msra.mxu1 %v10688_v32  ;;  %10784 = vmatprep.mubr.f32.mxu1 %v25894_v22 }
 0x857   : > { %18300 = vmatprep.mubr.msk.f32.mxu0 %vm571_vm0, %v16923_v9  ;;  %16927 = vmatmul.mubr.msk.f32.vlgmr.msra.gmra.mxu1 %vm571_vm0, %v16923_v9 }
 0x858   : > { %18301 = vmatmul.mubr.msk.f32.vlgmr.msra.gmra.mxu0 %vm571_vm0, %v16924_v31  ;;  %10991 = vmatprep.subr.mxu0 %v10942_v24  ;;  %v11179_v35 = vpop.permute.xlu1 %11178 }
 0x859   : > { %18306 = vmatprep.subr.mxu1 %v10934_v48  ;;  %10992 = vmatpush1.msra.mxu0 %v10941_v21  ;;  %v11181_v8 = vpop.permute.xlu0 %11180 }
 0x85a   : > { %18307 = vmatpush3.msra.mxu1 %v10934_v48  ;;  %10993 = vmatprep.subr.mxu0 %v10940_v26  ;;  %v16960_v48 = vld [vmem:[%s25622_s4 + $0x748] sm:$0xff] }
 0x85b   : > { %18308 = vmatprep.subr.mxu1 %v23428_v29  ;;  %10790 = vmatprep.mubr.f32.mxu1 %v25894_v22 }
 0x85c   : > { %18303 = vmatprep.mubr.msk.f32.mxu0 %vm571_vm0, %v16925_v12  ;;  %10994 = vmatpush1.msra.mxu0 %v10939_v40  ;;  %v11426_v25 = vpop.permute.xlu1 %11425 }
 0x85d   : > { %18309 = vmatpush3.msra.mxu1 %v23428_v29  ;;  %18304 = vmatmul.mubr.msk.f32.gmra.mxu0 %vm571_vm0, %v16926_v43  ;;  %v10936_v29 = vsel %vm4445_vm1, %v23530_v34, %v23578_v51  ;;  %v16936_v34 = vld [vmem:[%s25622_s4 + $0x708] sm:$0xff]  ;;  %v23812_v28 = vpop.permute.xlu0 %11415  ;;  %v11435_v61 = vsel %vm4941_vm3, %v23685_v23, %v11426_v25 }
 0x85e   : > { %16928 = vmatmul.mubr.msk.f32.gmra.mxu1 %vm571_vm0, %v16924_v31  ;;  %10995 = vmatprep.subr.mxu0 %v10938_v58  ;;  %v11432_v50 = vsel %vm4941_vm3, %v23743_v15, %v23812_v28 }
 0x85f   : > { %18310 = vmatprep.subr.mxu1 %v23537_v56  ;;  %10996 = vmatpush1.msra.mxu0 %v10937_v1 }
 0x860   : > { %18311 = vmatpush3.msra.mxu1 %v23537_v56  ;;  %10997 = vmatprep.subr.mxu0 %v10936_v29  ;;  %v11189_v56 = vsel %vm4693_vm2, %v11179_v35, %v11181_v8  ;;  %v11408_v16 = vpop.permute.xlu1 %11407 }
 0x861   : > { %18312 = vmatprep.subr.mxu1 %v23578_v51  ;;  %10796 = vmatprep.mubr.f32.mxu1 %v25894_v22  ;;  %v11428_v63 = vpop.permute.xlu0 %11427 }
 0x862   : > { %10998 = vmatpush1.msra.mxu0 %v10935_v20  ;;  %11031 = vmatprep.mubr.f32.mxu0 %v25894_v22 }
 0x863   : > { %18313 = vmatpush3.msra.mxu1 %v23578_v51  ;;  %16939 = vmatmul.mubr.msk.f32.vlgmr.msra.gmra.mxu0 %vm571_vm0, %v16935_v18  ;;  %v11188_v51 = vsel %vm4693_vm2, %v23606_v19, %v11179_v35  ;;  %v11186_v19 = vsel %vm4693_vm2, %v23633_v36, %v23654_v44  ;;  %v11183_v36 = vsel %vm4693_vm2, %v23772_v62, %v23636_v27 }
 0x864   : > { %16929 = vmatmul.mubr.msk.f32.gmra.mxu1 %vm571_vm0, %v16925_v12  ;;  %11037 = vmatprep.mubr.f32.mxu0 %v25894_v22  ;;  %v11436_v44 = vsel %vm4941_vm3, %v11426_v25, %v11428_v63  ;;  %v11406_v23 = vpop.permute.xlu1 %11405 }
 0x865   : > { %10802 = vmatprep.mubr.f32.mxu1 %v25894_v22  ;;  %18320 = vmatprep.subr.mxu0 %v11181_v8  ;;  %v11412_v59 = vpop.permute.xlu0 %11411  ;;  %v11429_v7 = vsel %vm4941_vm3, %v11406_v23, %v11408_v16 }
 0x866   : > { %11238 = vmatprep.subr.mxu1 %v11189_v56  ;;  %18321 = vmatpush3.msra.mxu0 %v11181_v8  ;;  %v11431_v37 = vsel %vm4941_vm3, %v11412_v59, %v23743_v15 }
 0x867   : > { %16940 = vmatmul.mubr.msk.f32.gmra.mxu0 %vm571_vm0, %v16936_v34  ;;  %18322 = vmatprep.subr.mxu0 %v23588_v3 }
 0x868   : > { %16930 = vmatmul.mubr.msk.f32.gmra.mxu1 %vm571_vm0, %v16926_v43  ;;  %11043 = vmatprep.mubr.f32.mxu0 %v25894_v22 }
 0x869   : > { %18314 = vmatprep.mubr.msk.f32.mxu1 %vm571_vm0, %v16935_v18  ;;  %18323 = vmatpush3.msra.mxu0 %v23588_v3  ;;  %v11184_v3 = vsel %vm4693_vm2, %v23745_v30, %v23649_v2  ;;  %v16948_v2 = vld [vmem:[%s25622_s4 + $0x728] sm:$0xff]  ;;  %v11410_v52 = vpop.permute.xlu0 %11409 }
 0x86a   : > { %18324 = vmatprep.subr.mxu0 %v23612_v41  ;;  %v11430_v47 = vsel %vm4941_vm3, %v11408_v16, %v11410_v52  ;;  %v23986_v16 = vld [vmem:[%s25627_s9] sm:$0xff] }
 0x86b   : > { %16941 = vmatmul.mubr.msk.f32.gmra.mxu0 %vm571_vm0, %v16937_v53  ;;  %25896 = vst [vmem:[#allocation39_spill] sm:$0xff] %v23986_v16 }
 0x86c   : > { %18315 = vmatmul.mubr.msk.f32.vlgmr.msra.gmra.mxu1 %vm571_vm0, %v16936_v34  ;;  %11049 = vmatprep.mubr.f32.mxu0 %v25894_v22 }
 0x86d   : > { %11239 = vmatpush1.msra.mxu1 %v11188_v51  ;;  %18317 = vmatprep.mubr.msk.f32.mxu1 %vm571_vm0, %v16937_v53 }
 0x86e   : > { %11240 = vmatprep.subr.mxu1 %v11187_v46  ;;  %18325 = vmatpush3.msra.mxu0 %v23612_v41  ;;  %v11182_v41 = vsel %vm4693_vm2, %v23770_v4, %v23772_v62 }
 0x86f   : > { %11241 = vmatpush1.msra.mxu1 %v11186_v19  ;;  %16942 = vmatmul.mubr.msk.f32.gmra.mxu0 %vm571_vm0, %v16938_v42 }
 0x870   : > { %18318 = vmatmul.mubr.msk.f32.gmra.mxu1 %vm571_vm0, %v16938_v42  ;;  %11242 = vmatprep.subr.mxu1 %v11185_v57 }
 0x871   : > { %11243 = vmatpush1.msra.mxu1 %v11184_v3  ;;  %18326 = vmatprep.subr.mxu0 %v23636_v27 }
 0x872   : > { %11244 = vmatprep.subr.mxu1 %v11183_v36  ;;  %18327 = vmatpush3.msra.mxu0 %v23636_v27  ;;  %v11434_v27 = vsel %vm4941_vm3, %v23711_v10, %v23696_v6  ;;  %v16962_v10 = vld [vmem:[%s25622_s4 + $0x758] sm:$0xff] }
 0x873   : > { %11245 = vmatpush1.msra.mxu1 %v11182_v41  ;;  %11278 = vmatprep.mubr.f32.mxu1 %v25894_v22 }
 0x874   : > { %18328 = vmatprep.mubr.msk.f32.mxu0 %vm571_vm0, %v16947_v5  ;;  %16951 = vmatmul.mubr.msk.f32.vlgmr.msra.gmra.mxu1 %vm571_vm0, %v16947_v5 }
 0x875   : > { %18329 = vmatmul.mubr.msk.f32.vlgmr.msra.gmra.mxu0 %vm571_vm0, %v16948_v2  ;;  %11485 = vmatprep.subr.mxu0 %v11436_v44 }
 0x876   : > { %18334 = vmatprep.subr.mxu1 %v11428_v63  ;;  %11486 = vmatpush1.msra.mxu0 %v11435_v61 }
 0x877   : > { %18335 = vmatpush3.msra.mxu1 %v11428_v63  ;;  %11487 = vmatprep.subr.mxu0 %v11434_v27 }
 0x878   : > { %18336 = vmatprep.subr.mxu1 %v23696_v6  ;;  %11284 = vmatprep.mubr.f32.mxu1 %v25894_v22 }
 0x879   : > { %18331 = vmatprep.mubr.msk.f32.mxu0 %vm571_vm0, %v16949_v49  ;;  %11488 = vmatpush1.msra.mxu0 %v11433_v11 }
 0x87a   : > { %18337 = vmatpush3.msra.mxu1 %v23696_v6  ;;  %18332 = vmatmul.mubr.msk.f32.gmra.mxu0 %vm571_vm0, %v16950_v54  ;;  %v16959_v6 = vld [vmem:[%s25622_s4 + $0x740] sm:$0xff] }
 0x87b   : > { %16952 = vmatmul.mubr.msk.f32.gmra.mxu1 %vm571_vm0, %v16948_v2  ;;  %11489 = vmatprep.subr.mxu0 %v11432_v50 }
 0x87c   : > { %18338 = vmatprep.subr.mxu1 %v23812_v28  ;;  %11490 = vmatpush1.msra.mxu0 %v11431_v37 }
 0x87d   : > { %18339 = vmatpush3.msra.mxu1 %v23812_v28  ;;  %11290 = vmatprep.mubr.f32.mxu1 %v25894_v22 }
 0x87e   : > { %18340 = vmatprep.subr.mxu1 %v11410_v52  ;;  %11491 = vmatprep.subr.mxu0 %v11430_v47 }
 0x87f   : > { %16953 = vmatmul.mubr.msk.f32.gmra.mxu1 %vm571_vm0, %v16949_v49  ;;  %11492 = vmatpush1.msra.mxu0 %v11429_v7 }
 0x880   : > { %18341 = vmatpush3.msra.mxu1 %v11410_v52  ;;  %11525 = vmatprep.mubr.f32.mxu0 %v25894_v22 }
 0x881   : > { %16963 = vmatmul.mubr.msk.f32.vlgmr.msra.gmra.mxu0 %vm571_vm0, %v16959_v6  ;;  %11296 = vmatprep.mubr.f32.mxu1 %v25894_v22 }
 0x882   : > { %11531 = vmatprep.mubr.f32.mxu0 %v25894_v22  ;;  %18348 = vmatprep.subr.mxu1 %v25894_v22 }
 0x883   : > { %16954 = vmatmul.mubr.msk.f32.gmra.mxu1 %vm571_vm0, %v16950_v54 }
 0x884   : > { %18342 = vmatprep.mubr.msk.f32.mxu1 %vm571_vm0, %v16959_v6 }
 0x885   : > { %16964 = vmatmul.mubr.msk.f32.gmra.mxu0 %vm571_vm0, %v16960_v48 }
 0x886   : > { %11537 = vmatprep.mubr.f32.mxu0 %v25894_v22 }
 0x887   : > { %18343 = vmatmul.mubr.msk.f32.vlgmr.msra.gmra.mxu1 %vm571_vm0, %v16960_v48 }
 0x888   : > { %18345 = vmatprep.mubr.msk.f32.mxu1 %vm571_vm0, %v16961_v38  ;;  %18349 = vmatpush3.msk.msra.mxu1 %vm11790_vm6, %v11778_v14 }
 0x889   : > { %16965 = vmatmul.mubr.msk.f32.gmra.mxu0 %vm571_vm0, %v16961_v38 }
 0x88a   : > { %11543 = vmatprep.mubr.f32.mxu0 %v25894_v22 }
 0x88b   : > { %18346 = vmatmul.mubr.msk.f32.gmra.mxu1 %vm571_vm0, %v16962_v10 }
 0x88c   : > { %18350 = vmatprep.mubr.msk.f32.mxu1 %vm19165_vm7, %v25894_v22 }
 0x88d   : > { %16966 = vmatmul.mubr.msk.f32.gmra.mxu0 %vm571_vm0, %v16962_v10 }
 0x88e   : > { %11994 = vmatprep.mubr.f32.mxu0 %v25894_v22 }
 0x88f   : > { %18351 = vmatmul.mubr.msk.f32.vlgmr.msra.gmra.mxu1 %vm11786_vm8, %v11777_v39 }
 0x890   : > { %18361 = vmatprep.mubr.msk.f32.mxu1 %vm571_vm0, %v23986_v16 }
 0x8c8   : > { %v18232_v45 = vpop.f32.mrf.mxu1 }
 0x8ca   : > { %v23939_v13 = vpop.f32.mrf.mxu1 }
 0x8cb   : > { %v9580_v60 = vpop.f32.mrf.mxu0 }
 0x8cc   : > { %v18235_v15 = vpop.f32.mrf.mxu1 }
 0x8cd   : > { %v23935_v0 = vpop.f32.mrf.mxu0 }
 0x8ce   : > { %v23943_v32 = vpop.f32.mrf.mxu1 }
 0x8cf   : > { %v9586_v33 = vpop.f32.mrf.mxu0 }
 0x8d1   : > { %v23937_v17 = vpop.f32.mrf.mxu0 }
 0x8d3   : > { %v9592_v55 = vpop.f32.mrf.mxu0 }
 0x8d5   : > { %v23941_v9 = vpop.f32.mrf.mxu0 }
 0x8d9   : > { %v9598_v30 = vpop.f32.mrf.mxu0 }
 0x8db   : > { %v23945_v31 = vpop.f32.mrf.mxu0 }
 0x8dd   : > { %v9810_v24 = vpop.f32.mrf.mxu1 }
 0x8de   : > { %v9811_v21 = vadd.f32 %v9810_v24, %v9580_v60  ;;  %v18246_v26 = vpop.f32.mrf.mxu0 }
 0x8df   : > { %v9905_v12 = vadd.f32 %v18246_v26, %v18232_v45  ;;  %v23947_v43 = vpop.f32.mrf.mxu1 }
 0x8e0   : > { %v23949_v4 = vpop.f32.mrf.mxu0 }
 0x8e3   : > { %v18249_v62 = vpop.f32.mrf.mxu0 }
 0x8e4   : > { %v9816_v40 = vpop.f32.mrf.mxu1  ;;  %v23951_v58 = vadd.f32 %v18249_v62, %v18235_v15 }
 0x8e5   : > { %v9817_v1 = vadd.f32 %v9816_v40, %v9586_v33  ;;  %v23953_v29 = vpop.f32.mrf.mxu0 }
 0x8e6   : > { %v23955_v18 = vpop.f32.mrf.mxu1 }
 0x8e9   : > { %v10045_v35 = vpop.f32.mrf.mxu0 }
 0x8ea   : > { %v9822_v8 = vpop.f32.mrf.mxu1  ;;  %v10153_v20 = vadd.f32 %v10045_v35, %v9811_v21 }
 0x8eb   : > { %v9823_v56 = vadd.f32 %v9822_v8, %v9592_v55  ;;  %v23957_v34 = vpop.f32.mrf.mxu0 }
 0x8ec   : > { %v23959_v28 = vpop.f32.mrf.mxu1 }
 0x8ed   : > { %v10051_v53 = vpop.f32.mrf.mxu0 }
 0x8ee   : > { %v9828_v51 = vpop.f32.mrf.mxu1  ;;  %v10156_v42 = vadd.f32 %v10051_v53, %v9817_v1 }
 0x8ef   : > { %v23961_v63 = vadd.f32 %v9828_v51, %v9598_v30  ;;  %v23963_v46 = vpop.f32.mrf.mxu0 }
 0x8f0   : > { %v23965_v19 = vpop.f32.mrf.mxu1 }
 0x8f1   : > { %v10057_v25 = vpop.f32.mrf.mxu0 }
 0x8f2   : > { %v23967_v57 = vadd.f32 %v10057_v25, %v9823_v56  ;;  %v18260_v3 = vpop.f32.mrf.mxu1 }
 0x8f3   : > { %v23969_v36 = vadd.f32 %v18260_v3, %v9905_v12  ;;  %v23971_v5 = vpop.f32.mrf.mxu0 }
 0x8f4   : > { %v23973_v41 = vpop.f32.mrf.mxu1 }
 0x8f5   : > { %v23975_v2 = vpop.f32.mrf.mxu0 }
 0x8f6   : > { %v23977_v44 = vpop.f32.mrf.mxu1 }
 0x8f7   : > { %v23979_v59 = vpop.f32.mrf.mxu0 }
 0x8f8   : > { %v23981_v61 = vpop.f32.mrf.mxu1 }
 0x8fa   : > { %v10292_v27 = vpop.f32.mrf.mxu1 }
 0x8fb   : > { %v23990_v49 = vadd.f32 %v10292_v27, %v10153_v20  ;;  %v23992_v54 = vpop.f32.mrf.mxu0 }
 0x8fc   : > { %v23994_v11 = vpop.f32.mrf.mxu1 }
 0x8fd   : > { %v23996_v52 = vpop.f32.mrf.mxu0 }
 0x900   : > { %v23998_v37 = vpop.f32.mrf.mxu0 }
 0x901   : > { %v10298_v50 = vpop.f32.mrf.mxu1 }
 0x902   : > { %v24000_v23 = vadd.f32 %v10298_v50, %v10156_v42  ;;  %v24002_v47 = vpop.f32.mrf.mxu0 }
 0x903   : > { %v24004_v7 = vpop.f32.mrf.mxu1 }
 0x906   : > { %v24006_v6 = vpop.f32.mrf.mxu0 }
 0x907   : > { %v24008_v48 = vpop.f32.mrf.mxu1 }
 0x908   : > { %v24010_v38 = vpop.f32.mrf.mxu0 }
 0x909   : > { %v24012_v14 = vpop.f32.mrf.mxu1 }
 0x90a   : > { %v24014_v10 = vpop.f32.mrf.mxu0 }
 0x90b   : > { %v24016_v39 = vpop.f32.mrf.mxu1 }
 0x90c   : > { %v24018_v60 = vpop.f32.mrf.mxu0 }
 0x90d   : > { %v24020_v45 = vpop.f32.mrf.mxu1 }
 0x90e   : > { %v24022_v33 = vpop.f32.mrf.mxu0 }
 0x90f   : > { %v24024_v55 = vpop.f32.mrf.mxu1 }
 0x910   : > { %v24026_v15 = vpop.f32.mrf.mxu0 }
 0x911   : > { %v24028_v30 = vpop.f32.mrf.mxu1 }
 0x912   : > { %v24030_v24 = vpop.f32.mrf.mxu0 }
 0x913   : > { %v24032_v21 = vpop.f32.mrf.mxu1 }
 0x914   : > { %v24034_v26 = vpop.f32.mrf.mxu0 }
 0x915   : > { %v24036_v12 = vpop.f32.mrf.mxu1 }
 0x917   : > { %v24038_v62 = vpop.f32.mrf.mxu1 }
 0x918   : > { %v24040_v40 = vpop.f32.mrf.mxu0 }
 0x919   : > { %v24042_v1 = vpop.f32.mrf.mxu1 }
 0x91a   : > { %v24044_v35 = vpop.f32.mrf.mxu0 }
 0x91d   : > { %v24046_v8 = vpop.f32.mrf.mxu0 }
 0x91e   : > { %25897 = vst [vmem:[#allocation40_spill] sm:$0xff] %v24046_v8  ;;  %v24048_v20 = vpop.f32.mrf.mxu1 }
 0x91f   : > { %v24050_v56 = vpop.f32.mrf.mxu0 }
 0x920   : > { %25898 = vst [vmem:[#allocation41_spill] sm:$0xff] %v24050_v56  ;;  %v24052_v53 = vpop.f32.mrf.mxu1 }
 0x921   : > { %25899 = vst [vmem:[#allocation42_spill] sm:$0xff] %v24052_v53 }
 0x923   : > { %v24054_v51 = vpop.f32.mrf.mxu0 }
 0x924   : > { %25900 = vst [vmem:[#allocation43_spill] sm:$0xff] %v24054_v51  ;;  %v24056_v42 = vpop.f32.mrf.mxu1 }
 0x925   : > { %25901 = vst [vmem:[#allocation44_spill] sm:$0xff] %v24056_v42  ;;  %v24058_v25 = vpop.f32.mrf.mxu0 }
 0x926   : > { %25902 = vst [vmem:[#allocation46_spill] sm:$0xff] %v24058_v25  ;;  %v24060_v3 = vpop.f32.mrf.mxu1 }
 0x927   : > { %25903 = vst [vmem:[#allocation45_spill] sm:$0xff] %v24060_v3  ;;  %v24062_v27 = vpop.f32.mrf.mxu0 }
 0x928   : > { %25904 = vst [vmem:[#allocation50_spill] sm:$0xff] %v24062_v27  ;;  %v24064_v50 = vpop.f32.mrf.mxu1 }
 0x929   : > { %25905 = vst [vmem:[#allocation47_spill] sm:$0xff] %v24064_v50  ;;  %v24066_v16 = vpop.f32.mrf.mxu0 }
 0x92a   : > { %25906 = vst [vmem:[#allocation48_spill] sm:$0xff] %v24066_v16  ;;  %v24068_v22 = vpop.f32.mrf.mxu1 }
 0x92b   : > { %v24070_v8 = vpop.f32.mrf.mxu0 }
 0x92c   : > { %25907 = vst [vmem:[#allocation51_spill] sm:$0xff] %v24070_v8  ;;  %v24072_v56 = vpop.f32.mrf.mxu1  ;;  %v9813_v8 = vadd.f32 %v23947_v43, %v23935_v0  ;;  %v9831_v0 = vadd.f32 %v23965_v19, %v23945_v31 }
 0x92d   : > { %v24074_v53 = vpop.f32.mrf.mxu0 }
 0x92e   : > { %25908 = vst [vmem:[#allocation49_spill] sm:$0xff] %v24074_v53  ;;  %v24076_v51 = vpop.f32.mrf.mxu1  ;;  %v9819_v53 = vadd.f32 %v23955_v18, %v23937_v17  ;;  %v10405_v18 = vadd.f32 %v23992_v54, %v23969_v36 }
 0x92f   : > { %25909 = vst [vmem:[#allocation52_spill] sm:$0xff] %v24076_v51  ;;  %v24078_v42 = vpop.f32.mrf.mxu0  ;;  %v9900_v51 = vadd.f32 %v23949_v4, %v23939_v13  ;;  %v10162_v4 = vadd.f32 %v23975_v2, %v23961_v63  ;;  %v10406_v63 = vadd.f32 %v24008_v48, %v23967_v57 }
 0x930   : > { %25910 = vst [vmem:[#allocation57_spill] sm:$0xff] %v24078_v42  ;;  %v24080_v25 = vpop.f32.mrf.mxu1  ;;  %v10157_v17 = vadd.f32 %v23963_v46, %v9819_v53  ;;  %v10652_v57 = vadd.f32 %v24024_v55, %v10405_v18  ;;  %v25918_v53 = vld [vmem:[#allocation44_spill] sm:$0xff] }
 0x931   : > { %25911 = vst [vmem:[#allocation58_spill] sm:$0xff] %v24080_v25  ;;  %v24082_v3 = vpop.f32.mrf.mxu0  ;;  %v9910_v25 = vadd.f32 %v23953_v29, %v23943_v32  ;;  %v10155_v13 = vadd.f32 %v23973_v41, %v9900_v51  ;;  %v10164_v32 = vadd.f32 %v23977_v44, %v23951_v58  ;;  %v10163_v29 = vadd.f32 %v23979_v59, %v9831_v0  ;;  %v25919_v51 = vld [vmem:[#allocation43_spill] sm:$0xff]  ;;  %v25922_v0 = vld [vmem:[#allocation45_spill] sm:$0xff] }
 0x932   : > { %25912 = vst [vmem:[#allocation53_spill] sm:$0xff] %v24082_v3  ;;  %v24084_v27 = vpop.f32.mrf.mxu1  ;;  %v9825_v3 = vadd.f32 %v23959_v28, %v23941_v9  ;;  %v10404_v46 = vadd.f32 %v24004_v7, %v10157_v17  ;;  %v10647_v41 = vadd.f32 %v24006_v6, %v23990_v49  ;;  %v10409_v44 = vadd.f32 %v24016_v39, %v10162_v4  ;;  %v25923_v17 = vld [vmem:[#allocation47_spill] sm:$0xff] }
 0x933   : > { %25913 = vst [vmem:[#allocation54_spill] sm:$0xff] %v24084_v27  ;;  %v10161_v9 = vadd.f32 %v23981_v61, %v9910_v25  ;;  %v10411_v28 = vadd.f32 %v23998_v37, %v10164_v32  ;;  %v10650_v59 = vadd.f32 %v24014_v10, %v24000_v23  ;;  %v10410_v61 = vadd.f32 %v24020_v45, %v10163_v29  ;;  %v25920_v25 = vld [vmem:[#allocation46_spill] sm:$0xff]  ;;  %v25924_v32 = vld [vmem:[#allocation48_spill] sm:$0xff]  ;;  %v25925_v18 = vld [vmem:[#allocation51_spill] sm:$0xff] }
 0x934   : > { %v24086_v50 = vpop.f32.mrf.mxu1  ;;  %v10160_v43 = vadd.f32 %v23971_v5, %v9825_v3  ;;  %v10656_v37 = vadd.f32 %v24030_v24, %v10409_v44  ;;  %v10899_v10 = vadd.f32 %v24040_v40, %v10652_v57  ;;  %v25917_v24 = vld [vmem:[#allocation41_spill] sm:$0xff]  ;;  %v25921_v3 = vld [vmem:[#allocation50_spill] sm:$0xff] }
 0x935   : > { %v24088_v16 = vpop.f32.mrf.mxu0  ;;  %v10408_v58 = vadd.f32 %v24002_v47, %v10161_v9  ;;  %v10658_v47 = vadd.f32 %v24032_v21, %v10411_v28  ;;  %v10657_v7 = vadd.f32 %v24034_v26, %v10410_v61 }
 0x936   : > { %25914 = vst [vmem:[#allocation55_spill] sm:$0xff] %v24088_v16  ;;  %v24100_v27 = vpop.f32.mrf.mxu1  ;;  %v10154_v16 = vadd.f32 %v23957_v34, %v9813_v8  ;;  %v10402_v34 = vadd.f32 %v23996_v52, %v10155_v13  ;;  %v10407_v36 = vadd.f32 %v24012_v14, %v10160_v43  ;;  %v10894_v14 = vadd.f32 %v24038_v62, %v10647_v41  ;;  %v24154_v8 = vpop.permute.xlu1 %11664  ;;  %v25927_v41 = vld [vmem:[#allocation52_spill] sm:$0xff] }
 0x937   : > { %v24102_v42 = vpop.f32.mrf.mxu0  ;;  %v10655_v23 = vadd.f32 %v24036_v12, %v10408_v58  ;;  %v10903_v43 = vadd.f32 %v25923_v17, %v10656_v37  ;;  %v10904_v13 = vadd.f32 %v24068_v22, %v10657_v7  ;;  %v25926_v58 = vld [vmem:[#allocation49_spill] sm:$0xff] }
 0x938   : > { %v10401_v31 = vadd.f32 %v23994_v11, %v10154_v16  ;;  %v10651_v16 = vadd.f32 %v24018_v60, %v10404_v46  ;;  %v10653_v11 = vadd.f32 %v24022_v33, %v10406_v63  ;;  %v10654_v49 = vadd.f32 %v24026_v15, %v10407_v36  ;;  %v25915_v33 = vld [vmem:[#allocation40_spill] sm:$0xff]  ;;  %v25916_v15 = vld [vmem:[#allocation42_spill] sm:$0xff] }
 0x939   : > { %v10649_v52 = vadd.f32 %v24028_v30, %v10402_v34  ;;  %v10897_v60 = vadd.f32 %v24048_v20, %v10650_v59  ;;  %v10905_v55 = vadd.f32 %v25915_v33, %v10658_v47  ;;  %v10902_v21 = vadd.f32 %v25917_v24, %v10655_v23 }
 0x93a   : > { %v24123_v5 = vpop.f32.mrf.mxu0  ;;  %v10648_v2 = vadd.f32 %v24010_v38, %v10401_v31  ;;  %v24144_v38 = vpop.permute.xlu0 %11669  ;;  %v10898_v30 = vadd.f32 %v25916_v15, %v10651_v16  ;;  %v10900_v62 = vadd.f32 %v25918_v53, %v10653_v11  ;;  %v11141_v40 = vadd.f32 %v25919_v51, %v10894_v14  ;;  %v25929_v11 = vld [vmem:[#allocation58_spill] sm:$0xff] }
 0x93b   : > { %v11286_v19 = vpop.f32.mrf.mxu1  ;;  %v10896_v45 = vadd.f32 %v24044_v35, %v10649_v52  ;;  %v11144_v20 = vadd.f32 %v25921_v3, %v10897_v60  ;;  %v10901_v35 = vadd.f32 %v25922_v0, %v10654_v49  ;;  %v11146_v34 = vadd.f32 %v24072_v56, %v10899_v10  ;;  %v25930_v56 = vld [vmem:[#allocation53_spill] sm:$0xff]  ;;  %v11655_v60 = vpop.permute.xlu1 %11654 }
 0x93c   : > { %v11379_v6 = vpop.f32.mrf.mxu0  ;;  %v10895_v39 = vadd.f32 %v24042_v1, %v10648_v2  ;;  %v11145_v9 = vadd.f32 %v25924_v32, %v10898_v30  ;;  %v11147_v31 = vadd.f32 %v25925_v18, %v10900_v62  ;;  %v11388_v28 = vadd.f32 %v24086_v50, %v11141_v40  ;;  %v25928_v2 = vld [vmem:[#allocation57_spill] sm:$0xff]  ;;  %v25931_v50 = vld [vmem:[#allocation54_spill] sm:$0xff] }
 0x93d   : > { %v11288_v54 = vpop.f32.mrf.mxu1  ;;  %v11391_v46 = vadd.f32 %v11286_v19, %v11144_v20  ;;  %v11148_v63 = vadd.f32 %v25926_v58, %v10901_v35  ;;  %v11143_v36 = vadd.f32 %v25927_v41, %v10896_v45  ;;  %v11150_v44 = vadd.f32 %v25928_v2, %v10903_v43  ;;  %v25932_v7 = vld [vmem:[#allocation55_spill] sm:$0xff] }
 0x93e   : > { %v11142_v1 = vadd.f32 %v25920_v25, %v10895_v39  ;;  %v11660_v16 = vpop.permute.xlu0 %11659  ;;  %v11152_v57 = vadd.f32 %v25929_v11, %v10905_v55  ;;  %v11392_v49 = vadd.f32 %v11288_v54, %v11145_v9  ;;  %v11151_v47 = vadd.f32 %v25930_v56, %v10904_v13 }
 0x93f   : > { %v11292_v48 = vpop.f32.mrf.mxu1  ;;  %v11149_v19 = vadd.f32 %v25931_v50, %v10902_v21  ;;  %v11393_v23 = vadd.f32 %v25932_v7, %v11146_v34 }
 0x940   : > { %v11389_v59 = vadd.f32 %v24100_v27, %v11142_v1  ;;  %v11390_v27 = vadd.f32 %v24102_v42, %v11143_v36  ;;  %v11394_v45 = vadd.f32 %v11292_v48, %v11147_v31  ;;  %v11399_v54 = vadd.f32 %v24123_v5, %v11152_v57 }
 0x941   : > { %v11294_v26 = vpop.f32.mrf.mxu1  ;;  %v11527_v12 = vpop.f32.mrf.mxu0  ;;  %v11396_v55 = vadd.f32 %v11379_v6, %v11149_v19 }
 0x942   : > { %v11635_v52 = vadd.f32 %v11527_v12, %v11388_v28  ;;  %v11395_v30 = vadd.f32 %v11294_v26, %v11148_v63 }
 0x943   : > { %v11298_v4 = vpop.f32.mrf.mxu1  ;;  %v11529_v29 = vpop.f32.mrf.mxu0 }
 0x944   : > { %v11636_v14 = vadd.f32 %v11529_v29, %v11389_v59  ;;  %v24179_v21 = vadd.f32 %v11655_v60, %v11635_v52  ;;  %v11397_v25 = vadd.f32 %v11298_v4, %v11150_v44 }
 0x945   : > { %v11300_v22 = vpop.f32.mrf.mxu1  ;;  %v11533_v61 = vpop.f32.mrf.mxu0 }
 0x946   : > { %v11638_v37 = vadd.f32 %v11533_v61, %v11391_v46  ;;  %v24184_v42 = vadd.f32 %v11655_v60, %v11636_v14  ;;  %v11398_v6 = vadd.f32 %v11300_v22, %v11151_v47  ;;  %v16975_v11 = vmul.f32 -1.442695, %v24179_v21 }
 0x947   : > { %v11535_v10 = vpop.f32.mrf.mxu0  ;;  %v18344_v39 = vpop.f32.mrf.mxu1 }
 0x948   : > { %v24176_v33 = vadd.f32 %v11660_v16, %v11638_v37  ;;  %v11639_v15 = vadd.f32 %v11535_v10, %v11392_v49  ;;  %v11640_v24 = vadd.f32 %v18344_v39, %v11393_v23  ;;  %v16976_v61 = vmul.f32 -1.442695, %v24184_v42 }
 0x949   : > { %v11539_v12 = vpop.f32.mrf.mxu0  ;;  %v11616_v53 = vpop.f32.mrf.mxu1 }
 0x94a   : > { %v16978_v62 = vmul.f32 -1.442695, %v24176_v33  ;;  %v24182_v51 = vadd.f32 %v11660_v16, %v11639_v15  ;;  %v11641_v40 = vadd.f32 %v11539_v12, %v11394_v45  ;;  %v24186_v48 = vadd.f32 %v11660_v16, %v11640_v24 }
 0x94b   : > { %v11637_v1 = vadd.f32 %v11616_v53, %v11390_v27  ;;  %v11541_v3 = vpop.f32.mrf.mxu0  ;;  %v18347_v5 = vpop.f32.mrf.mxu1 }
 0x94c   : > { %v16979_v26 = vmul.f32 -1.442695, %v24182_v51  ;;  %v24190_v20 = vadd.f32 %v24154_v8, %v11641_v40  ;;  %v11642_v0 = vadd.f32 %v11541_v3, %v11395_v30  ;;  %18758 = vpow2.f32 %v16978_v62 }
 0x94d   : > { %v16980_v35 = vmul.f32 -1.442695, %v24186_v48  ;;  %v24193_v17 = vadd.f32 %v11655_v60, %v11637_v1  ;;  %v11646_v43 = vadd.f32 %v18347_v5, %v11399_v54  ;;  %v11545_v13 = vpop.f32.mrf.mxu0  ;;  %v11626_v32 = vpop.f32.mrf.mxu1 }
 0x94e   : > { %18760 = vpow2.f32 %v16979_v26  ;;  %v16981_v9 = vmul.f32 -1.442695, %v24190_v20  ;;  %v24197_v4 = vadd.f32 %v24154_v8, %v11642_v0  ;;  %v11644_v29 = vadd.f32 %v11545_v13, %v11397_v25 }
 0x94f   : > { %18762 = vpow2.f32 %v16980_v35  ;;  %v16977_v18 = vmul.f32 -1.442695, %v24193_v17  ;;  %v24201_v31 = vadd.f32 %v24144_v38, %v11646_v43  ;;  %v11643_v34 = vadd.f32 %v11626_v32, %v11396_v55  ;;  %v11547_v28 = vpop.f32.mrf.mxu0  ;;  %v24203_v46 = vpop.f32.mrf.mxu1 }
 0x950   : > { %18764 = vpow2.f32 %v16981_v9  ;;  %v16982_v58 = vmul.f32 -1.442695, %v24197_v4  ;;  %v24207_v63 = vadd.f32 %v24144_v38, %v11644_v29  ;;  %v11645_v41 = vadd.f32 %v11547_v28, %v11398_v6 }
 0x951   : > { %18766 = vpow2.f32 %v16977_v18  ;;  %v16986_v36 = vmul.f32 -1.442695, %v24201_v31  ;;  %v11680_v2 = vadd.f32 %v24154_v8, %v11643_v34  ;;  %v18352_v44 = vpop.f32.mrf.mxu1 }
 0x952   : > { %18768 = vpow2.f32 %v16982_v58  ;;  %v16984_v59 = vmul.f32 -1.442695, %v24207_v63  ;;  %v11682_v22 = vadd.f32 %v24144_v38, %v11645_v41  ;;  %v11866_v41 = vld [vmem:[%s25627_s9 + $0x10] sm:$0xff]  ;;  %v25934_v44 = vld [vmem:[#allocation39_spill] sm:$0xff] }
 0x953   : > { %18770 = vpow2.f32 %v16986_v36  ;;  %v16983_v16 = vmul.f32 -1.442695, %v11680_v2 }
 0x954   : > { %18772 = vpow2.f32 %v16984_v59  ;;  %v16985_v57 = vmul.f32 -1.442695, %v11682_v22 }
 0x955   : > { %18774 = vpow2.f32 %v16983_v16  ;;  %v16996_v16 = vld [vmem:[%s25627_s9 + $0x50] sm:$0xff] }
 0x956   : > { %18776 = vpow2.f32 %v16985_v57  ;;  %v24332_v57 = vpop.permute.xlu1 %11910 }
 0x957   : > { %18778 = vpow2.f32 %v16976_v61  ;;  %v16995_v61 = vld [vmem:[%s25627_s9 + $0x48] sm:$0xff] }
 0x958   : > { %18780 = vpow2.f32 %v16975_v11  ;;  %v16997_v11 = vld [vmem:[%s25627_s9 + $0x58] sm:$0xff] }
 0x959   : > { %v18759_v49 = vpop.eup %18758 }
 0x95a   : > { %v11723_v24 = vadd.f32 1.0, %v18759_v49  ;;  %v11916_v49 = vpop.permute.xlu0 %11915 }
 0x95b   : > { %v18761_v8 = vpop.eup %18760 }
 0x95c   : > { %v18763_v52 = vpop.eup %18762  ;;  %v11724_v54 = vadd.f32 1.0, %v18761_v8  ;;  %v24334_v8 = vpop.permute.xlu1 %11900 }
 0x95d   : > { %v18765_v37 = vpop.eup %18764  ;;  %v11725_v56 = vadd.f32 1.0, %v18763_v52 }
 0x95e   : > { %v18767_v47 = vpop.eup %18766  ;;  %v11726_v50 = vadd.f32 1.0, %v18765_v37  ;;  %v24336_v52 = vpop.permute.xlu0 %11905 }
 0x95f   : > { %v18769_v38 = vpop.eup %18768  ;;  %18782 = vrcp.f32 %v11725_v56  ;;  %v11722_v27 = vadd.f32 1.0, %v18767_v47 }
 0x960   : > { %v18771_v19 = vpop.eup %18770  ;;  %v11727_v7 = vadd.f32 1.0, %v18769_v38  ;;  %18784 = vrcp.f32 %v11726_v50  ;;  %v24338_v56 = vpop.permute.xlu1 %12567 }
 0x961   : > { %v18773_v23 = vpop.eup %18772  ;;  %v11731_v14 = vadd.f32 1.0, %v18771_v19 }
 0x962   : > { %v18775_v10 = vpop.eup %18774  ;;  %18786 = vrcp.f32 %v11727_v7  ;;  %v11729_v39 = vadd.f32 1.0, %v18773_v23  ;;  %v24342_v38 = vpop.permute.xlu0 %12562 }
 0x963   : > { %v18777_v60 = vpop.eup %18776  ;;  %18788 = vrcp.f32 %v11731_v14  ;;  %v11728_v45 = vadd.f32 1.0, %v18775_v10 }
 0x964   : > { %v18779_v15 = vpop.eup %18778  ;;  %18790 = vrcp.f32 %v11729_v39  ;;  %v11730_v55 = vadd.f32 1.0, %v18777_v60  ;;  %v24346_v14 = vpop.permute.xlu1 %12577  ;;  %v17018_v39 = vld [vmem:[%s25629_s11] ss:$0 sm:$0xff] }
 0x965   : > { %v18781_v30 = vpop.eup %18780  ;;  %18792 = vrcp.f32 %v11728_v45  ;;  %v11721_v12 = vadd.f32 1.0, %v18779_v15  ;;  %v24355_v45 = vld [vmem:[%s25630_s12 + $0x8] sm:$0xff] }
 0x966   : > { %18794 = vrcp.f32 %v11730_v55  ;;  %v11720_v53 = vadd.f32 1.0, %v18781_v30 }
 0x967   : > { %18796 = vrcp.f32 %v11722_v27 }
 0x968   : > { %18798 = vrcp.f32 %v11724_v54  ;;  %v24360_v54 = vld [vmem:[%s25630_s12] sm:$0xff] }
 0x969   : > { %18800 = vrcp.f32 %v11723_v24 }
 0x96a   : > { %18802 = vrcp.f32 %v11721_v12  ;;  %v24366_v12 = vld [vmem:[%s25630_s12 + $0x10] sm:$0xff] }
 0x96b   : > { %18804 = vrcp.f32 %v11720_v53  ;;  %v24368_v53 = vpop.permute.xlu0 %12572 }
 0x96c   : > { %v18783_v62 = vpop.eup %18782 }
 0x96d   : > { %v18785_v40 = vpop.eup %18784  ;;  %v24229_v9 = vmul.f32 %v18783_v62, %v24186_v48 }
 0x96f   : > { %v18787_v25 = vpop.eup %18786 }
 0x970   : > { %v18789_v1 = vpop.eup %18788  ;;  %v24234_v29 = vmul.f32 %v18787_v25, %v24197_v4 }
 0x971   : > { %v18791_v3 = vpop.eup %18790  ;;  %v24216_v5 = vmul.f32 %v18789_v1, %v24201_v31  ;;  %v24237_v31 = vmul.f32 %v18785_v40, %v24190_v20  ;;  %v11865_v20 = vld [vmem:[%s25627_s9 + $0x8] sm:$0xff] }
 0x972   : > { %v18793_v6 = vpop.eup %18792  ;;  %v24225_v32 = vmul.f32 %v18791_v3, %v24207_v63 }
 0x973   : > { %v18795_v26 = vpop.eup %18794  ;;  %18353 = vmatprep.subr.mxu1 %v24216_v5  ;;  %v24219_v0 = vmul.f32 %v18793_v6, %v11680_v2  ;;  %v16991_v2 = vld [vmem:[%s25627_s9 + $0x28] sm:$0xff]  ;;  %v12191_v6 = vpop.permute.xlu1 %12190 }
 0x974   : > { %v18797_v35 = vpop.eup %18796  ;;  %18354 = vmatpush3.msra.mxu1 %v24216_v5  ;;  %v24222_v43 = vmul.f32 %v18795_v26, %v11682_v22  ;;  %v16990_v22 = vld [vmem:[%s25627_s9 + $0x20] sm:$0xff]  ;;  %v24376_v26 = vld [vmem:[%s25630_s12 + $0x18] sm:$0xff] }
 0x975   : > { %v18799_v13 = vpop.eup %18798  ;;  %18355 = vmatprep.subr.mxu1 %v24219_v0  ;;  %v24242_v34 = vmul.f32 %v18797_v35, %v24193_v17  ;;  %v16993_v17 = vld [vmem:[%s25627_s9 + $0x38] sm:$0xff] }
 0x976   : > { %18356 = vmatpush3.msra.mxu1 %v24219_v0  ;;  %11954 = vmatprep.subr.mxu0 %v24222_v43  ;;  %v18801_v18 = vpop.eup %18800  ;;  %v24247_v28 = vmul.f32 %v18799_v13, %v24182_v51  ;;  %v25933_v51 = vld [vmem:[#allocation19_spill] sm:$0xff] }
 0x977   : > { %18357 = vmatprep.subr.mxu1 %v24229_v9  ;;  %11955 = vmatpush1.msra.mxu0 %v24225_v32  ;;  %v18803_v48 = vpop.eup %18802  ;;  %v24258_v58 = vmul.f32 %v18801_v18, %v24176_v33  ;;  %v16992_v33 = vld [vmem:[%s25627_s9 + $0x30] sm:$0xff] }
 0x978   : > { %18358 = vmatpush3.msra.mxu1 %v24229_v9  ;;  %11956 = vmatprep.subr.mxu0 %v24234_v29  ;;  %v18805_v4 = vpop.eup %18804  ;;  %v24265_v63 = vmul.f32 %v18803_v48, %v24184_v42  ;;  %v11867_v42 = vld [vmem:[%s25627_s9 + $0x18] sm:$0xff] }
 0x979   : > { %18359 = vmatprep.subr.mxu1 %v24242_v34  ;;  %11957 = vmatpush1.msra.mxu0 %v24237_v31  ;;  %v24271_v36 = vmul.f32 %v18805_v4, %v24179_v21  ;;  %v16987_v21 = vld [vmem:[%s25626_s8] ss:$0 sm:$0xff] }
 0x97a   : > { %18360 = vmatpush3.msra.mxu1 %v24242_v34  ;;  %11958 = vmatprep.subr.mxu0 %v24247_v28  ;;  %v24295_v59 = vadd.f32 %v16987_v21, %v24203_v46  ;;  %v16994_v46 = vld [vmem:[%s25627_s9 + $0x40] sm:$0xff] }
 0x97b   : > { %18362 = vmatmul.mubr.msk.f32.vlgmr.msra.gmra.mxu1 %vm571_vm0, %v11865_v20  ;;  %18367 = vmatprep.subr.mxu1 %v25933_v51 }
 0x97c   : > { %11959 = vmatpush1.msra.mxu0 %v24258_v58  ;;  %18368 = vmatpush3.msra.mxu1 %v16993_v17 }
 0x97d   : > { %11960 = vmatprep.subr.mxu0 %v24265_v63  ;;  %18369 = vmatprep.subr.mxu1 %v25933_v51 }
 0x97e   : > { %11961 = vmatpush1.msra.mxu0 %v24271_v36  ;;  %18364 = vmatprep.mubr.msk.f32.mxu1 %vm571_vm0, %v11866_v41 }
 0x97f   : > { %18370 = vmatpush3.msra.mxu1 %v16992_v33  ;;  %17010 = vmatmul.mubr.msk.f32.vlgmr.msra.gmra.mxu0 %vm571_vm0, %v25934_v44 }
 0x980   : > { %18365 = vmatmul.mubr.msk.f32.gmra.mxu1 %vm571_vm0, %v11867_v42  ;;  %18371 = vmatprep.subr.mxu1 %v25933_v51 }
 0x981   : > { %18372 = vmatpush3.msra.mxu1 %v16991_v2  ;;  %12000 = vmatprep.mubr.f32.mxu0 %v25933_v51 }
 0x982   : > { %18373 = vmatprep.subr.mxu1 %v25933_v51  ;;  %18375 = vmatprep.mubr.msk.f32.mxu1 %vm19165_vm7, %v25933_v51 }
 0x983   : > { %18374 = vmatpush3.msra.mxu1 %v16990_v22  ;;  %17011 = vmatmul.mubr.msk.f32.gmra.mxu0 %vm571_vm0, %v11865_v20 }
 0x984   : > { %18376 = vmatmul.mubr.msk.f32.vlgmr.msra.gmra.mxu1 %vm571_vm0, %v24295_v59  ;;  %18378 = vmatprep.subr.msk.mxu1 %vm571_vm0, %v24295_v59 }
 0x985   : > { %18379 = vmatpush3.xpose.msk.msra.mxu1 %vm571_vm0, %v24295_v59  ;;  %12006 = vmatprep.mubr.f32.mxu0 %v25933_v51 }
 0x986   : > { %18380 = vmatprep.mubr.msk.f32.mxu1 %vm571_vm0, %v16994_v46 }
 0x987   : > { %17012 = vmatmul.mubr.msk.f32.gmra.mxu0 %vm571_vm0, %v11866_v41  ;;  %v12186_v41 = vpop.permute.xlu0 %12185 }
 0x988   : > { %18381 = vmatmul.mubr.msk.f32.vlgmr.msra.gmra.mxu1 %vm571_vm0, %v16995_v61  ;;  %12012 = vmatprep.mubr.f32.mxu0 %v25933_v51 }
 0x989   : > { %18383 = vmatprep.mubr.msk.f32.mxu1 %vm571_vm0, %v16996_v16 }
 0x98b   : > { %17013 = vmatmul.mubr.msk.f32.gmra.mxu0 %vm571_vm0, %v11867_v42 }
 0x98c   : > { %18384 = vmatmul.mubr.msk.f32.gmra.mxu1 %vm571_vm0, %v16997_v11  ;;  %12438 = vmatprep.mubr.f32.mxu0 %v25933_v51 }
 0xa3b   : > { %v18363_v37 = vpop.f32.mrf.mxu1 }
 0xa3c   : > { %v12091_v55 = vadd.f32 %v18363_v37, %v24336_v52 }
 0xa3d   : > { %v12085_v47 = vpop.f32.mrf.mxu1 }
 0xa3e   : > { %v12086_v40 = vadd.f32 %v12085_v47, %v24334_v8 }
 0xa3f   : > { %v24340_v50 = vpop.f32.mrf.mxu0 }
 0xa40   : > { %v18366_v19 = vpop.f32.mrf.mxu1 }
 0xa41   : > { %v12101_v7 = vadd.f32 %v18366_v19, %v11916_v49  ;;  %v24344_v23 = vpop.f32.mrf.mxu0 }
 0xa42   : > { %v12095_v10 = vpop.f32.mrf.mxu1  ;;  %v11999_v37 = vadd.f32 %v24344_v23, %v24334_v8  ;;  %v17007_v23 = vld [vmem:[%s25628_s10 + $0x48] sm:$0xff] }
 0xa43   : > { %v12096_v60 = vadd.f32 %v12095_v10, %v24332_v57  ;;  %18386 = vmatprep.subr.mxu1 %v12101_v7  ;;  %v12002_v27 = vpop.f32.mrf.mxu0  ;;  %v17006_v10 = vld [vmem:[%s25628_s10 + $0x40] sm:$0xff] }
 0xa44   : > { %v12179_v15 = vpop.f32.mrf.mxu1  ;;  %18387 = vmatpush3.msra.mxu1 %v12101_v7  ;;  %v12003_v11 = vadd.f32 %v12002_v27, %v24336_v52  ;;  %v17057_v7 = vld [vmem:[%s486_s21] ss:$0 sm:$0xff]  ;;  %v17087_v27 = vld [vmem:[%s25628_s10 + $0x68] sm:$0xff] }
 0xa45   : > { %v12180_v30 = vadd.f32 %v17018_v39, %v12179_v15  ;;  %18388 = vmatprep.subr.mxu1 %v12096_v60  ;;  %v12004_v24 = vpop.f32.mrf.mxu0  ;;  %v17089_v39 = vld [vmem:[%s25628_s10 + $0x78] sm:$0xff]  ;;  %v17086_v15 = vld [vmem:[%s25628_s10 + $0x60] sm:$0xff] }
 0xa46   : > { %v18377_v62 = vpop.f32.mrf.mxu1  ;;  %18389 = vmatpush3.msra.mxu1 %v12096_v60  ;;  %v12005_v61 = vadd.f32 %v12004_v24, %v24336_v52  ;;  %v12201_v52 = vpop.permute.xlu1 %12200  ;;  %v17088_v60 = vld [vmem:[%s25628_s10 + $0x70] sm:$0xff] }
 0xa47   : > { %v12301_v25 = vmul.f32 %v12180_v30, %v24355_v45  ;;  %18390 = vmatprep.subr.mxu1 %v12091_v55  ;;  %v12008_v1 = vpop.f32.mrf.mxu0  ;;  %v12300_v3 = vmul.f32 %v12180_v30, %v24360_v54  ;;  %v12302_v13 = vmul.f32 %v12180_v30, %v24366_v12  ;;  %v12303_v4 = vmul.f32 %v12180_v30, %v24376_v26  ;;  %v17091_v30 = vld [vmem:[%s25628_s10 + $0x88] sm:$0xff]  ;;  %v17092_v24 = vld [vmem:[%s25628_s10 + $0x90] sm:$0xff]  ;;  %v17093_v62 = vld [vmem:[%s25628_s10 + $0x98] sm:$0xff] }
 0xa48   : > { %v18382_v35 = vpop.f32.mrf.mxu1  ;;  %18391 = vmatpush3.msra.mxu1 %v12091_v55  ;;  %v12009_v46 = vadd.f32 %v12008_v1, %v24332_v57  ;;  %v17090_v55 = vld [vmem:[%s25628_s10 + $0x80] sm:$0xff] }
 0xa49   : > { %v24379_v18 = vadd.f32 %v18382_v35, %v12191_v6  ;;  %18392 = vmatprep.subr.mxu1 %v12086_v40  ;;  %v12010_v48 = vpop.f32.mrf.mxu0  ;;  %18394 = vmatprep.mubr.msk.f32.mxu1 %vm571_vm0, %v12300_v3 }
 0xa4a   : > { %v12281_v20 = vpop.f32.mrf.mxu1  ;;  %18393 = vmatpush3.msra.mxu1 %v12086_v40  ;;  %v12011_v22 = vadd.f32 %v12010_v48, %v24332_v57  ;;  %v11997_v57 = vadd.f32 %v24340_v50, %v24334_v8  ;;  %v17009_v8 = vld [vmem:[%s25628_s10 + $0x58] sm:$0xff]  ;;  %v17008_v50 = vld [vmem:[%s25628_s10 + $0x50] sm:$0xff] }
 0xa4b   : > { %18395 = vmatmul.mubr.msk.f32.vlgmr.msra.gmra.mxu1 %vm571_vm0, %v12301_v25  ;;  %12322 = vrot.lane.b32.xlu0 %v24379_v18, %s19166_s29  ;;  %v12014_v17 = vpop.f32.mrf.mxu0  ;;  %v24389_v33 = vadd.f32 %v12281_v20, %v12186_v41 }
 0xa4c   : > { %12310 = vrot.lane.b32.xlu1 %v24379_v18, %s19167_s24  ;;  %18397 = vmatprep.mubr.msk.f32.mxu1 %vm571_vm0, %v12302_v13  ;;  %v18385_v21 = vpop.f32.mrf.mxu1  ;;  %v12015_v44 = vadd.f32 %v12014_v17, %v11916_v49 }
 0xa4d   : > { %v12016_v42 = vpop.f32.mrf.mxu0  ;;  %v24417_v19 = vadd.f32 %v18385_v21, %v12201_v52 }
 0xa4e   : > { %v12017_v2 = vadd.f32 %v12016_v42, %v11916_v49  ;;  %v12291_v16 = vpop.f32.mrf.mxu1  ;;  %v12196_v49 = vpop.permute.xlu0 %12195 }
 0xa4f   : > { %18398 = vmatmul.mubr.msk.f32.gmra.mxu1 %vm571_vm0, %v12303_v4  ;;  %12308 = vrot.lane.b32.xlu0 %v24389_v33, %s19167_s24  ;;  %v24409_v47 = vadd.f32 %v12291_v16, %v12196_v49 }
 0xa50   : > { %12320 = vrot.lane.b32.xlu1 %v24389_v33, %s19166_s29  ;;  %12398 = vmatprep.subr.mxu0 %v12017_v2 }
 0xa51   : > { %12399 = vmatpush1.msra.mxu0 %v12015_v44  ;;  %12735 = vmatprep.mubr.f32.mxu1 %v25933_v51 }
 0xa52   : > { %12400 = vmatprep.subr.mxu0 %v12011_v22 }
 0xa53   : > { %12332 = vrot.lane.b32.xlu0 %v24389_v33, %s19168_s18  ;;  %12401 = vmatpush1.msra.mxu0 %v12009_v46 }
 0xa54   : > { %12334 = vrot.lane.b32.xlu1 %v24379_v18, %s19168_s18  ;;  %12402 = vmatprep.subr.mxu0 %v12005_v61 }
 0xa55   : > { %12403 = vmatpush1.msra.mxu0 %v12003_v11 }
 0xa56   : > { %12404 = vmatprep.subr.mxu0 %v11999_v37 }
 0xa57   : > { %12312 = vrot.lane.b32.xlu0 %v24409_v47, %s19167_s24  ;;  %12405 = vmatpush1.msra.mxu0 %v11997_v57 }
 0xa58   : > { %12324 = vrot.lane.b32.xlu1 %v24409_v47, %s19166_s29  ;;  %17025 = vmatmul.mubr.msk.f32.vlgmr.msra.gmra.mxu0 %vm571_vm0, %v12300_v3 }
 0xa59   : > { %12444 = vmatprep.mubr.f32.mxu0 %v25933_v51 }
 0xa5b   : > { %12336 = vrot.lane.b32.xlu0 %v24409_v47, %s19168_s18 }
 0xa5c   : > { %12314 = vrot.lane.b32.xlu1 %v24417_v19, %s19167_s24  ;;  %17026 = vmatmul.mubr.msk.f32.gmra.mxu0 %vm571_vm0, %v12301_v25 }
 0xa5d   : > { %12450 = vmatprep.mubr.f32.mxu0 %v25933_v51 }
 0xa5f   : > { %12326 = vrot.lane.b32.xlu0 %v24417_v19, %s19166_s29 }
 0xa60   : > { %12338 = vrot.lane.b32.xlu1 %v24417_v19, %s19168_s18  ;;  %17027 = vmatmul.mubr.msk.f32.gmra.mxu0 %vm571_vm0, %v12302_v13 }
 0xa61   : > { %12456 = vmatprep.mubr.f32.mxu0 %v25933_v51 }
 0xa63   : > { %13072 = vperm.xlu0 %18660, %v17009_v8  }
 0xa64   : > { %13067 = vperm.xlu1 %18661, %v17008_v50   ;;  %17028 = vmatmul.mubr.msk.f32.gmra.mxu0 %vm571_vm0, %v12303_v4 }
 0xa65   : > { %18408 = vmatprep.mubr.msk.f32.mxu0 %vm571_vm0, %v24360_v54 }
 0xa67   : > { %13267 = vperm.xlu0 %18660, %v17057_v7  }
 0xa68   : > { %13062 = vperm.xlu1 %18661, %v17007_v23  }
 0xa6b   : > { %13057 = vperm.xlu0 %18660, %v17006_v10  }
 0xa6c   : > { %13432 = vperm.xlu1 %18661, %v17089_v39  }
 0xa6f   : > { %13427 = vperm.xlu0 %18660, %v17088_v60  }
 0xa70   : > { %13422 = vperm.xlu1 %18661, %v17087_v27  }
 0xa73   : > { %13417 = vperm.xlu0 %18660, %v17086_v15  }
 0xa74   : > { %13699 = vperm.xlu1 %18661, %v17090_v55  }
 0xa77   : > { %13704 = vperm.xlu0 %18660, %v17091_v30  }
 0xa78   : > { %13709 = vperm.xlu1 %18661, %v17092_v24  }
 0xa7b   : > { %13714 = vperm.xlu0 %18660, %v17093_v62  }
 0xabd   : > { %v12323_v40 = vpop.permute.xlu0 %12322 }
 0xabe   : > { %v12311_v25 = vpop.permute.xlu1 %12310 }
 0xabf   : > { %v12346_v1 = vsel %vm12344_vm12, %v24379_v18, %v12311_v25 }
 0xac0   : > { %v24477_v3 = vsel %vm6863_vm11, %v12346_v1, %v12323_v40 }
 0xb0b   : > { %v18396_v6 = vpop.f32.mrf.mxu1 }
 0xb0c   : > { %v12553_v13 = vmul.f32 0.35355338, %v18396_v6 }
 0xb0d   : > { %v12529_v35 = vpop.f32.mrf.mxu1 }
 0xb0e   : > { %v12550_v48 = vmul.f32 0.35355338, %v12529_v35  ;;  %v12585_v41 = vadd.f32 %v24338_v56, %v12553_v13 }
 0xb0f   : > { %v18399_v20 = vpop.f32.mrf.mxu1 }
 0xb10   : > { %v12559_v4 = vmul.f32 0.35355338, %v18399_v20  ;;  %v12582_v42 = vadd.f32 %v24342_v38, %v12550_v48  ;;  %v12611_v22 = vsel %vm5189_vm4, %v12585_v41, -inf }
 0xb11   : > { %v12539_v17 = vpop.f32.mrf.mxu1 }
 0xb12   : > { %v12591_v21 = vadd.f32 %v24346_v14, %v12559_v4  ;;  %v12556_v2 = vmul.f32 0.35355338, %v12539_v17  ;;  %v12610_v46 = vsel %vm5189_vm4, %v12582_v42, -inf }
 0xb14   : > { %v12614_v44 = vsel %vm5189_vm4, %v12591_v21, -inf  ;;  %v12588_v18 = vadd.f32 %v24368_v53, %v12556_v2 }
 0xb15   : > { %v12615_v16 = vmax.f32 %v12611_v22, %v12614_v44 }
 0xb16   : > { %v12612_v61 = vsel %vm5189_vm4, %v12588_v18, -inf }
 0xb17   : > { %v12613_v11 = vmax.f32 %v12610_v46, %v12612_v61 }
 0xb18   : > { %v12440_v49 = vpop.f32.mrf.mxu0 }
 0xb19   : > { %v12616_v37 = vmax.f32 %v12613_v11, %v12615_v16  ;;  %v12548_v55 = vmul.f32 0.35355338, %v12440_v49 }
 0xb1a   : > { %v12442_v57 = vpop.f32.mrf.mxu0 }
 0xb1b   : > { %v12617_v52 = vrot.slane %v12616_v37, 4  ;;  %v12549_v24 = vmul.f32 0.35355338, %v12442_v57  ;;  %v24491_v20 = vadd.f32 %v24342_v38, %v12548_v55 }
 0xb1c   : > { %v12446_v8 = vpop.f32.mrf.mxu0 }
 0xb1d   : > { %v12618_v50 = vmax.f32 %v12616_v37, %v12617_v52  ;;  %v12551_v30 = vmul.f32 0.35355338, %v12446_v8  ;;  %v12581_v46 = vadd.f32 %v24342_v38, %v12549_v24 }
 0xb1e   : > { %v12448_v7 = vpop.f32.mrf.mxu0 }
 0xb1f   : > { %v12619_v23 = vrot.slane %v12618_v50, 2  ;;  %v12552_v1 = vmul.f32 0.35355338, %v12448_v7  ;;  %v24494_v4 = vadd.f32 %v24338_v56, %v12551_v30 }
 0xb20   : > { %v12452_v10 = vpop.f32.mrf.mxu0 }
 0xb21   : > { %v12620_v39 = vmax.f32 %v12618_v50, %v12619_v23  ;;  %v12554_v60 = vmul.f32 0.35355338, %v12452_v10  ;;  %v12584_v61 = vadd.f32 %v24338_v56, %v12552_v1 }
 0xb22   : > { %v12454_v27 = vpop.f32.mrf.mxu0 }
 0xb23   : > { %v12621_v15 = vrot.slane %v12620_v39, 1  ;;  %v12555_v62 = vmul.f32 0.35355338, %v12454_v27  ;;  %v24488_v6 = vadd.f32 %v24368_v53, %v12554_v60 }
 0xb24   : > { %v12458_v40 = vpop.f32.mrf.mxu0 }
 0xb25   : > { %v12622_v25 = vmax.f32 %v12620_v39, %v12621_v15  ;;  %v12557_v35 = vmul.f32 0.35355338, %v12458_v40  ;;  %v12587_v2 = vadd.f32 %v24368_v53, %v12555_v62  ;;  %v12592_v16 = vmax.f32 %v24491_v20, %v24488_v6 }
 0xb26   : > { %v12460_v13 = vpop.f32.mrf.mxu0 }
 0xb27   : > { %v12634_v48 = vsub.f32 %v12591_v21, %v12622_v25  ;;  %v12631_v17 = vsub.f32 %v12588_v18, %v12622_v25  ;;  %v12589_v44 = vadd.f32 %v24346_v14, %v12557_v35  ;;  %v12558_v22 = vmul.f32 0.35355338, %v12460_v13 }
 0xb28   : > { %v12628_v21 = vsub.f32 %v12585_v41, %v12622_v25  ;;  %v12625_v57 = vsub.f32 %v12582_v42, %v12622_v25  ;;  %v12601_v52 = vmax.f32 %v12581_v46, %v12587_v2 }
 0xb29   : > { %v12657_v11 = vmul.f32 1.442695, %v12634_v48  ;;  %v12593_v49 = vmax.f32 %v24494_v4, %v12589_v44  ;;  %v12590_v37 = vadd.f32 %v24346_v14, %v12558_v22  ;;  %v12651_v18 = vmul.f32 1.442695, %v12631_v17 }
 0xb2a   : > { %v12645_v7 = vmul.f32 1.442695, %v12628_v21  ;;  %v12639_v39 = vmul.f32 1.442695, %v12625_v57 }
 0xb2b   : > { %v12594_v8 = vmax.f32 %v12592_v16, %v12593_v49  ;;  %v12602_v50 = vmax.f32 %v12584_v61, %v12590_v37  ;;  %18806 = vpow2.f32 %v12657_v11 }
 0xb2c   : > { %18808 = vpow2.f32 %v12651_v18 }
 0xb2d   : > { %v12595_v23 = vrot.slane %v12594_v8, 4  ;;  %v12603_v10 = vmax.f32 %v12601_v52, %v12602_v50  ;;  %18810 = vpow2.f32 %v12645_v7 }
 0xb2e   : > { %18812 = vpow2.f32 %v12639_v39 }
 0xb2f   : > { %v12596_v60 = vmax.f32 %v12594_v8, %v12595_v23  ;;  %v12604_v27 = vrot.slane %v12603_v10, 4 }
 0xb31   : > { %v12597_v41 = vrot.slane %v12596_v60, 2  ;;  %v12605_v15 = vmax.f32 %v12603_v10, %v12604_v27  ;;  %v12309_v27 = vpop.permute.xlu0 %12308 }
 0xb33   : > { %v12598_v55 = vmax.f32 %v12596_v60, %v12597_v41  ;;  %v12606_v30 = vrot.slane %v12605_v15, 2  ;;  %v12345_v41 = vsel %vm12344_vm12, %v24389_v33, %v12309_v27 }
 0xb35   : > { %v12599_v24 = vrot.slane %v12598_v55, 1  ;;  %v12607_v42 = vmax.f32 %v12605_v15, %v12606_v30  ;;  %v12321_v15 = vpop.permute.xlu1 %12320 }
 0xb36   : > { %v12349_v30 = vsel %vm6863_vm11, %v12345_v41, %v12321_v15 }
 0xb37   : > { %v12608_v62 = vrot.slane %v12607_v42, 1  ;;  %v12600_v40 = vmax.f32 %v12598_v55, %v12599_v24  ;;  %v12333_v55 = vpop.permute.xlu0 %12332 }
 0xb38   : > { %v24504_v25 = vpop.eup %18806  ;;  %v12354_v24 = vsel %vm12353_vm13, %v12349_v30, %v12333_v55 }
 0xb39   : > { %v12609_v1 = vmax.f32 %v12607_v42, %v12608_v62  ;;  %18400 = vmatprep.subr.mxu0 %v24504_v25  ;;  %v24507_v35 = vpop.eup %18808  ;;  %v12632_v13 = vsub.f32 %v12589_v44, %v12600_v40  ;;  %v12629_v16 = vsub.f32 %v24488_v6, %v12600_v40  ;;  %v12626_v44 = vsub.f32 %v24494_v4, %v12600_v40 }
 0xb3a   : > { %18401 = vmatpush3.msra.mxu0 %v24504_v25  ;;  %v24511_v17 = vpop.eup %18810  ;;  %v24568_v42 = vmul.f32 %v12354_v24, %v24360_v54 }
 0xb3b   : > { %v12633_v48 = vsub.f32 %v12590_v37, %v12609_v1  ;;  %18402 = vmatprep.subr.mxu0 %v24507_v35  ;;  %v12630_v22 = vsub.f32 %v12587_v2, %v12609_v1  ;;  %v24516_v21 = vpop.eup %18812  ;;  %v12627_v11 = vsub.f32 %v12584_v61, %v12609_v1  ;;  %v12653_v37 = vmul.f32 1.442695, %v12632_v13  ;;  %v12335_v13 = vpop.permute.xlu1 %12334 }
 0xb3c   : > { %18403 = vmatpush3.msra.mxu0 %v24507_v35  ;;  %v12624_v57 = vsub.f32 %v12581_v46, %v12609_v1  ;;  %v12623_v2 = vsub.f32 %v24491_v20, %v12600_v40  ;;  %v12647_v6 = vmul.f32 1.442695, %v12629_v16  ;;  %v12641_v61 = vmul.f32 1.442695, %v12626_v44 }
 0xb3d   : > { %18404 = vmatprep.subr.mxu0 %v24511_v17  ;;  %v12655_v49 = vmul.f32 1.442695, %v12633_v48  ;;  %v12649_v18 = vmul.f32 1.442695, %v12630_v22  ;;  %v12643_v52 = vmul.f32 1.442695, %v12627_v11  ;;  %v12313_v48 = vpop.permute.xlu0 %12312 }
 0xb3e   : > { %18405 = vmatpush3.msra.mxu0 %v24511_v17  ;;  %v12637_v4 = vmul.f32 1.442695, %v12624_v57  ;;  %v12635_v8 = vmul.f32 1.442695, %v12623_v2  ;;  %v12347_v57 = vsel %vm12344_vm12, %v24409_v47, %v12313_v48 }
 0xb3f   : > { %18406 = vmatprep.subr.mxu0 %v24516_v21  ;;  %18814 = vpow2.f32 %v12655_v49  ;;  %v12325_v22 = vpop.permute.xlu1 %12324 }
 0xb40   : > { %18407 = vmatpush3.msra.mxu0 %v24516_v21  ;;  %18816 = vpow2.f32 %v12653_v37 }
 0xb41   : > { %18409 = vmatmul.mubr.msk.f32.vlgmr.msra.gmra.mxu0 %vm571_vm0, %v24355_v45  ;;  %18818 = vpow2.f32 %v12649_v18  ;;  %v12337_v16 = vpop.permute.xlu0 %12336 }
 0xb42   : > { %18411 = vmatprep.mubr.msk.f32.mxu0 %vm571_vm0, %v24366_v12  ;;  %18820 = vpow2.f32 %v12647_v6 }
 0xb43   : > { %18822 = vpow2.f32 %v12643_v52  ;;  %v12315_v49 = vpop.permute.xlu1 %12314 }
 0xb44   : > { %18824 = vpow2.f32 %v12641_v61 }
 0xb45   : > { %18412 = vmatmul.mubr.msk.f32.gmra.mxu0 %vm571_vm0, %v24376_v26  ;;  %18826 = vpow2.f32 %v12637_v4  ;;  %v12327_v6 = vpop.permute.xlu0 %12326  ;;  %v12355_v4 = vsel %vm12353_vm13, %v24477_v3, %v12335_v13 }
 0xb46   : > { %12945 = vmatprep.mubr.f32.mxu0 %v25933_v51  ;;  %18828 = vpow2.f32 %v12635_v8  ;;  %v12351_v8 = vsel %vm6863_vm11, %v12347_v57, %v12325_v22 }
 0xb47   : > { %v12356_v47 = vsel %vm12353_vm13, %v12351_v8, %v12337_v16  ;;  %v12339_v27 = vpop.permute.xlu1 %12338 }
 0xb48   : > { %v12360_v3 = vmul.f32 %v12356_v47, %v24366_v12 }
 0xb4c   : > { %v24530_v20 = vpop.eup %18814 }
 0xb4d   : > { %v24532_v46 = vpop.eup %18816  ;;  %12695 = vmatprep.subr.mxu1 %v24530_v20 }
 0xb4e   : > { %v24535_v50 = vpop.eup %18818  ;;  %12696 = vmatpush1.msra.mxu1 %v24532_v46 }
 0xb4f   : > { %v24538_v7 = vpop.eup %18820  ;;  %12697 = vmatprep.subr.mxu1 %v24535_v50 }
 0xb50   : > { %v24541_v23 = vpop.eup %18822  ;;  %12698 = vmatpush1.msra.mxu1 %v24538_v7 }
 0xb51   : > { %v24544_v10 = vpop.eup %18824  ;;  %12699 = vmatprep.subr.mxu1 %v24541_v23 }
 0xb52   : > { %v24547_v39 = vpop.eup %18826  ;;  %12700 = vmatpush1.msra.mxu1 %v24544_v10 }
 0xb53   : > { %v24550_v60 = vpop.eup %18828  ;;  %12701 = vmatprep.subr.mxu1 %v24547_v39 }
 0xb54   : > { %12702 = vmatpush1.msra.mxu1 %v24550_v60 }
 0xb55   : > { %17033 = vmatmul.mubr.msk.f32.vlgmr.msra.gmra.mxu1 %vm571_vm0, %v24360_v54 }
 0xb56   : > { %12741 = vmatprep.mubr.f32.mxu1 %v25933_v51 }
 0xb59   : > { %17034 = vmatmul.mubr.msk.f32.gmra.mxu1 %vm571_vm0, %v24355_v45 }
 0xb5a   : > { %12747 = vmatprep.mubr.f32.mxu1 %v25933_v51 }
 0xb5d   : > { %17035 = vmatmul.mubr.msk.f32.gmra.mxu1 %vm571_vm0, %v24366_v12 }
 0xb5e   : > { %12753 = vmatprep.mubr.f32.mxu1 %v25933_v51 }
 0xb61   : > { %17036 = vmatmul.mubr.msk.f32.gmra.mxu1 %vm571_vm0, %v24376_v26 }
 0xb62   : > { %18422 = vmatprep.mubr.msk.f32.mxu1 %vm571_vm0, %v24568_v42 }
 0xc01   : > { %v18410_v33 = vpop.f32.mrf.mxu0 }
 0xc03   : > { %v12826_v62 = vpop.f32.mrf.mxu0 }
 0xc05   : > { %v18413_v40 = vpop.f32.mrf.mxu0 }
 0xc06   : > { %18830 = vrcp.f32 %v18413_v40 }
 0xc07   : > { %18832 = vrcp.f32 %v18410_v33  ;;  %v12836_v1 = vpop.f32.mrf.mxu0 }
 0xc08   : > { %18834 = vrcp.f32 %v12836_v1 }
 0xc09   : > { %18836 = vrcp.f32 %v12826_v62 }
 0xc13   : > { %v18831_v54 = vpop.eup %18830 }
 0xc14   : > { %v18833_v11 = vpop.eup %18832  ;;  %v12868_v44 = vmul.f32 %v18831_v54, %v24504_v25  ;;  %v12348_v25 = vsel %vm12344_vm12, %v24417_v19, %v12315_v49 }
 0xc15   : > { %v18835_v37 = vpop.eup %18834  ;;  %v12737_v52 = vpop.f32.mrf.mxu1  ;;  %v12862_v61 = vmul.f32 %v18833_v11, %v24511_v17  ;;  %v12359_v17 = vmul.f32 %v12355_v4, %v24355_v45 }
 0xc16   : > { %18414 = vmatprep.subr.mxu1 %v12868_v44  ;;  %v12865_v18 = vmul.f32 %v18835_v37, %v24507_v35  ;;  %v18837_v2 = vpop.eup %18836  ;;  %v12352_v35 = vsel %vm6863_vm11, %v12348_v25, %v12327_v6 }
 0xc17   : > { %18415 = vmatpush3.msra.mxu1 %v12868_v44  ;;  %v12739_v41 = vpop.f32.mrf.mxu1  ;;  %v12859_v15 = vmul.f32 %v18837_v2, %v24516_v21  ;;  %v12357_v30 = vsel %vm12353_vm13, %v12352_v35, %v12339_v27  ;;  %v24638_v35 = vld [vmem:[%s25627_s9 + $0x80] sm:$0xff]  ;;  %v24642_v27 = vpop.permute.xlu0 %13072 }
 0xc18   : > { %18416 = vmatprep.subr.mxu1 %v12865_v18  ;;  %v12361_v24 = vmul.f32 %v12357_v30, %v24376_v26 }
 0xc19   : > { %18417 = vmatpush3.msra.mxu1 %v12865_v18  ;;  %v12743_v55 = vpop.f32.mrf.mxu1  ;;  %v17001_v18 = vld [vmem:[%s25627_s9 + $0x78] sm:$0xff] }
 0xc1a   : > { %18418 = vmatprep.subr.mxu1 %v12862_v61 }
 0xc1b   : > { %18419 = vmatpush3.msra.mxu1 %v12862_v61  ;;  %v12745_v19 = vpop.f32.mrf.mxu1 }
 0xc1c   : > { %18420 = vmatprep.subr.mxu1 %v12859_v15 }
 0xc1d   : > { %18421 = vmatpush3.msra.mxu1 %v12859_v15  ;;  %v12749_v33 = vpop.f32.mrf.mxu1  ;;  %v24646_v15 = vpop.permute.xlu0 %13267 }
 0xc1e   : > { %18423 = vmatmul.mubr.msk.f32.vlgmr.msra.gmra.mxu1 %vm571_vm0, %v12359_v17 }
 0xc1f   : > { %18425 = vmatprep.mubr.msk.f32.mxu1 %vm571_vm0, %v12360_v3  ;;  %v12751_v62 = vpop.f32.mrf.mxu1 }
 0xc20   : > { %18838 = vrcp.f32 %v12751_v62 }
 0xc21   : > { %v12755_v45 = vpop.f32.mrf.mxu1  ;;  %v13058_v30 = vpop.permute.xlu0 %13057 }
 0xc22   : > { %18426 = vmatmul.mubr.msk.f32.gmra.mxu1 %vm571_vm0, %v12361_v24  ;;  %18840 = vrcp.f32 %v12755_v45 }
 0xc23   : > { %13151 = vmatprep.mubr.f32.mxu1 %v25933_v51  ;;  %v12757_v12 = vpop.f32.mrf.mxu1 }
 0xc24   : > { %18842 = vrcp.f32 %v12757_v12 }
 0xc25   : > { %18844 = vrcp.f32 %v12749_v33 }
 0xc26   : > { %18846 = vrcp.f32 %v12745_v19 }
 0xc27   : > { %18848 = vrcp.f32 %v12743_v55 }
 0xc28   : > { %18850 = vrcp.f32 %v12739_v41  ;;  %v24644_v41 = vpop.permute.xlu1 %13067 }
 0xc29   : > { %18852 = vrcp.f32 %v12737_v52 }
 0xc2d   : > { %v18839_v21 = vpop.eup %18838 }
 0xc2e   : > { %v12864_v54 = vmul.f32 %v18839_v21, %v24535_v50  ;;  %v16998_v50 = vld [vmem:[%s25627_s9 + $0x60] sm:$0xff] }
 0xc2f   : > { %v18841_v40 = vpop.eup %18840 }
 0xc30   : > { %v12866_v22 = vmul.f32 %v18841_v40, %v24532_v46 }
 0xc31   : > { %v18843_v1 = vpop.eup %18842 }
 0xc32   : > { %v18845_v26 = vpop.eup %18844  ;;  %v12867_v13 = vmul.f32 %v18843_v1, %v24530_v20 }
 0xc33   : > { %v18847_v48 = vpop.eup %18846  ;;  %v12863_v49 = vmul.f32 %v18845_v26, %v24538_v7 }
 0xc34   : > { %v18849_v16 = vpop.eup %18848  ;;  %12905 = vmatprep.subr.mxu0 %v12867_v13  ;;  %v12861_v37 = vmul.f32 %v18847_v48, %v24541_v23 }
 0xc35   : > { %v18851_v11 = vpop.eup %18850  ;;  %12906 = vmatpush1.msra.mxu0 %v12866_v22  ;;  %v12860_v57 = vmul.f32 %v18849_v16, %v24544_v10 }
 0xc36   : > { %v18853_v44 = vpop.eup %18852  ;;  %12907 = vmatprep.subr.mxu0 %v12864_v54  ;;  %v12858_v20 = vmul.f32 %v18851_v11, %v24547_v39 }
 0xc37   : > { %12908 = vmatpush1.msra.mxu0 %v12863_v49  ;;  %v12857_v46 = vmul.f32 %v18853_v44, %v24550_v60  ;;  %v16999_v60 = vld [vmem:[%s25627_s9 + $0x68] sm:$0xff] }
 0xc38   : > { %12909 = vmatprep.subr.mxu0 %v12861_v37 }
 0xc39   : > { %12910 = vmatpush1.msra.mxu0 %v12860_v57 }
 0xc3a   : > { %12911 = vmatprep.subr.mxu0 %v12858_v20 }
 0xc3b   : > { %12912 = vmatpush1.msra.mxu0 %v12857_v46 }
 0xc3c   : > { %17041 = vmatmul.mubr.msk.f32.vlgmr.msra.gmra.mxu0 %vm571_vm0, %v24568_v42  ;;  %v17000_v42 = vld [vmem:[%s25627_s9 + $0x70] sm:$0xff] }
 0xc3d   : > { %12951 = vmatprep.mubr.f32.mxu0 %v25933_v51 }
 0xc40   : > { %17042 = vmatmul.mubr.msk.f32.gmra.mxu0 %vm571_vm0, %v12359_v17  ;;  %v13063_v17 = vpop.permute.xlu1 %13062 }
 0xc41   : > { %12957 = vmatprep.mubr.f32.mxu0 %v25933_v51 }
 0xc44   : > { %17043 = vmatmul.mubr.msk.f32.gmra.mxu0 %vm571_vm0, %v12360_v3 }
 0xc45   : > { %12963 = vmatprep.mubr.f32.mxu0 %v25933_v51 }
 0xc48   : > { %17044 = vmatmul.mubr.msk.f32.gmra.mxu0 %vm571_vm0, %v12361_v24 }
 0xc49   : > { %18436 = vmatprep.mubr.msk.f32.mxu0 %vm571_vm0, %v16998_v50 }
 0xcde   : > { %v18424_v7 = vpop.f32.mrf.mxu1 }
 0xce0   : > { %v13036_v23 = vpop.f32.mrf.mxu1 }
 0xce2   : > { %v18427_v10 = vpop.f32.mrf.mxu1 }
 0xce3   : > { %18428 = vmatprep.subr.mxu0 %v18427_v10 }
 0xce4   : > { %v13046_v39 = vpop.f32.mrf.mxu1  ;;  %18429 = vmatpush3.msra.mxu0 %v18427_v10 }
 0xce5   : > { %18430 = vmatprep.subr.mxu0 %v13046_v39 }
 0xce6   : > { %18431 = vmatpush3.msra.mxu0 %v13046_v39 }
 0xce7   : > { %18432 = vmatprep.subr.mxu0 %v18424_v7 }
 0xce8   : > { %18433 = vmatpush3.msra.mxu0 %v18424_v7 }
 0xce9   : > { %18434 = vmatprep.subr.mxu0 %v13036_v23 }
 0xcea   : > { %18435 = vmatpush3.msra.mxu0 %v13036_v23 }
 0xceb   : > { %18437 = vmatmul.mubr.msk.f32.vlgmr.msra.gmra.mxu0 %vm571_vm0, %v16999_v60 }
 0xcec   : > { %18439 = vmatprep.mubr.msk.f32.mxu0 %vm571_vm0, %v17000_v42 }
 0xcef   : > { %18440 = vmatmul.mubr.msk.f32.gmra.mxu0 %vm571_vm0, %v17001_v18 }
 0xcf0   : > { %13511 = vmatprep.mubr.f32.mxu0 %v25933_v51 }
 0xcfc   : > { %v12947_v2 = vpop.f32.mrf.mxu0 }
 0xcfe   : > { %v12949_v6 = vpop.f32.mrf.mxu0 }
 0xd00   : > { %v12953_v52 = vpop.f32.mrf.mxu0 }
 0xd02   : > { %v12955_v61 = vpop.f32.mrf.mxu0 }
 0xd04   : > { %v12959_v4 = vpop.f32.mrf.mxu0 }
 0xd06   : > { %v12961_v8 = vpop.f32.mrf.mxu0 }
 0xd08   : > { %v12965_v25 = vpop.f32.mrf.mxu0 }
 0xd0a   : > { %v12967_v47 = vpop.f32.mrf.mxu0 }
 0xd0b   : > { %13111 = vmatprep.subr.mxu1 %v12967_v47 }
 0xd0c   : > { %13112 = vmatpush1.msra.mxu1 %v12965_v25 }
 0xd0d   : > { %13113 = vmatprep.subr.mxu1 %v12961_v8 }
 0xd0e   : > { %13114 = vmatpush1.msra.mxu1 %v12959_v4 }
 0xd0f   : > { %13115 = vmatprep.subr.mxu1 %v12955_v61 }
 0xd10   : > { %13116 = vmatpush1.msra.mxu1 %v12953_v52 }
 0xd11   : > { %13117 = vmatprep.subr.mxu1 %v12949_v6 }
 0xd12   : > { %13118 = vmatpush1.msra.mxu1 %v12947_v2 }
 0xd13   : > { %17049 = vmatmul.mubr.msk.f32.vlgmr.msra.gmra.mxu1 %vm571_vm0, %v16998_v50 }
 0xd14   : > { %13157 = vmatprep.mubr.f32.mxu1 %v25933_v51 }
 0xd17   : > { %17050 = vmatmul.mubr.msk.f32.gmra.mxu1 %vm571_vm0, %v16999_v60 }
 0xd18   : > { %13163 = vmatprep.mubr.f32.mxu1 %v25933_v51 }
 0xd1b   : > { %17051 = vmatmul.mubr.msk.f32.gmra.mxu1 %vm571_vm0, %v17000_v42 }
 0xd1c   : > { %13169 = vmatprep.mubr.f32.mxu1 %v25933_v51 }
 0xd1f   : > { %17052 = vmatmul.mubr.msk.f32.gmra.mxu1 %vm571_vm0, %v17001_v18 }
 0xd20   : > { %18450 = vmatprep.mubr.msk.f32.mxu1 %vm571_vm0, %v24638_v35 }
 0xdab   : > { %v18438_v55 = vpop.f32.mrf.mxu0 }
 0xdac   : > { %v13248_v3 = vadd.f32 %v18438_v55, %v13063_v17 }
 0xdad   : > { %v13242_v19 = vpop.f32.mrf.mxu0 }
 0xdae   : > { %v13275_v24 = vmul.f32 %v24646_v15, %v13248_v3  ;;  %v13243_v33 = vadd.f32 %v13242_v19, %v13058_v30 }
 0xdaf   : > { %v18441_v62 = vpop.f32.mrf.mxu0 }
 0xdb0   : > { %v17063_v45 = vmul.f32 -1.442695, %v13275_v24  ;;  %v13272_v12 = vmul.f32 %v24646_v15, %v13243_v33  ;;  %v13258_v21 = vadd.f32 %v18441_v62, %v24642_v27  ;;  %v24687_v33 = vld [vmem:[%s25627_s9 + $0x90] sm:$0xff] }
 0xdb1   : > { %v13252_v40 = vpop.f32.mrf.mxu0 }
 0xdb2   : > { %18854 = vpow2.f32 %v17063_v45  ;;  %v17060_v1 = vmul.f32 -1.442695, %v13272_v12  ;;  %v13281_v26 = vmul.f32 %v24646_v15, %v13258_v21  ;;  %v13253_v13 = vadd.f32 %v13252_v40, %v24644_v41 }
 0xdb4   : > { %18856 = vpow2.f32 %v17060_v1  ;;  %v17069_v48 = vmul.f32 -1.442695, %v13281_v26  ;;  %v13278_v22 = vmul.f32 %v24646_v15, %v13253_v13  ;;  %v24714_v13 = vld [vmem:[%s25627_s9 + $0x98] sm:$0xff] }
 0xdb6   : > { %18858 = vpow2.f32 %v17069_v48  ;;  %v17066_v16 = vmul.f32 -1.442695, %v13278_v22 }
 0xdb8   : > { %18860 = vpow2.f32 %v17066_v16  ;;  %v17075_v16 = vld [vmem:[%s25627_s9 + $0xa8] sm:$0xff] }
 0xdbf   : > { %v18855_v54 = vpop.eup %18854 }
 0xdc0   : > { %v13323_v49 = vadd.f32 1.0, %v18855_v54 }
 0xdc1   : > { %v18857_v11 = vpop.eup %18856 }
 0xdc2   : > { %v13320_v37 = vadd.f32 1.0, %v18857_v11  ;;  %18862 = vrcp.f32 %v13323_v49 }
 0xdc3   : > { %v18859_v44 = vpop.eup %18858 }
 0xdc4   : > { %v13329_v57 = vadd.f32 1.0, %v18859_v44 }
 0xdc5   : > { %v18861_v20 = vpop.eup %18860 }
 0xdc6   : > { %18864 = vrcp.f32 %v13329_v57  ;;  %v13326_v46 = vadd.f32 1.0, %v18861_v20 }
 0xdc7   : > { %18866 = vrcp.f32 %v13320_v37  ;;  %v17074_v37 = vld [vmem:[%s25627_s9 + $0xa0] sm:$0xff] }
 0xdc8   : > { %18868 = vrcp.f32 %v13326_v46 }
 0xdcf   : > { %v18863_v50 = vpop.eup %18862 }
 0xdd0   : > { %v13359_v60 = vmul.f32 %v18863_v50, %v13275_v24 }
 0xdd2   : > { %v24664_v25 = vadd.f32 %v13359_v60, %v24229_v9  ;;  %v24678_v9 = vld [vmem:[%s25627_s9 + $0x88] sm:$0xff]  ;;  %v17080_v60 = vld [vmem:[%s25627_s9 + $0xd0] sm:$0xff] }
 0xdd3   : > { %v18865_v7 = vpop.eup %18864  ;;  %v13153_v18 = vpop.f32.mrf.mxu1 }
 0xdd4   : > { %v18867_v23 = vpop.eup %18866  ;;  %v13365_v10 = vmul.f32 %v18865_v7, %v13281_v26  ;;  %v13154_v19 = vadd.f32 %v13153_v18, %v13058_v30  ;;  %v17078_v7 = vld [vmem:[%s25627_s9 + $0xc0] sm:$0xff] }
 0xdd5   : > { %v18869_v39 = vpop.eup %18868  ;;  %v13356_v6 = vmul.f32 %v18867_v23, %v13272_v12  ;;  %v13155_v52 = vpop.f32.mrf.mxu1  ;;  %v17076_v12 = vld [vmem:[%s25627_s9 + $0xb0] sm:$0xff] }
 0xdd6   : > { %v13362_v42 = vmul.f32 %v18869_v39, %v13278_v22  ;;  %v24655_v2 = vadd.f32 %v13365_v10, %v24216_v5  ;;  %v13156_v4 = vadd.f32 %v13155_v52, %v13058_v30  ;;  %v24717_v48 = vmul.f32 %v24646_v15, %v13154_v19  ;;  %v17079_v39 = vld [vmem:[%s25627_s9 + $0xc8] sm:$0xff] }
 0xdd7   : > { %v13159_v8 = vpop.f32.mrf.mxu1  ;;  %v24669_v55 = vadd.f32 %v13356_v6, %v24242_v34  ;;  %v17077_v34 = vld [vmem:[%s25627_s9 + $0xb8] sm:$0xff] }
 0xdd8   : > { %18442 = vmatprep.subr.mxu1 %v24655_v2  ;;  %v24659_v61 = vadd.f32 %v13362_v42, %v24219_v0  ;;  %v13160_v5 = vadd.f32 %v13159_v8, %v13063_v17  ;;  %v24672_v0 = vmul.f32 %v24646_v15, %v13156_v4  ;;  %v17058_v50 = vmul.f32 -1.442695, %v24717_v48  ;;  %v17081_v42 = vld [vmem:[%s25627_s9 + $0xd8] sm:$0xff] }
 0xdd9   : > { %18443 = vmatpush3.msra.mxu1 %v24655_v2  ;;  %v13161_v47 = vpop.f32.mrf.mxu1 }
 0xdda   : > { %18444 = vmatprep.subr.mxu1 %v24659_v61  ;;  %v13162_v3 = vadd.f32 %v13161_v47, %v13063_v17  ;;  %v24695_v30 = vmul.f32 %v24646_v15, %v13160_v5  ;;  %v17059_v21 = vmul.f32 -1.442695, %v24672_v0 }
 0xddb   : > { %18445 = vmatpush3.msra.mxu1 %v24659_v61  ;;  %v13165_v24 = vpop.f32.mrf.mxu1 }
 0xddc   : > { %18446 = vmatprep.subr.mxu1 %v24664_v25  ;;  %v24690_v17 = vmul.f32 %v24646_v15, %v13162_v3  ;;  %v13166_v62 = vadd.f32 %v13165_v24, %v24644_v41  ;;  %v17061_v49 = vmul.f32 -1.442695, %v24695_v30 }
 0xddd   : > { %18447 = vmatpush3.msra.mxu1 %v24664_v25  ;;  %v13167_v45 = vpop.f32.mrf.mxu1 }
 0xdde   : > { %18448 = vmatprep.subr.mxu1 %v24669_v55  ;;  %v17062_v40 = vmul.f32 -1.442695, %v24690_v17  ;;  %v24706_v1 = vmul.f32 %v24646_v15, %v13166_v62  ;;  %v13168_v26 = vadd.f32 %v13167_v45, %v24644_v41 }
 0xddf   : > { %18449 = vmatpush3.msra.mxu1 %v24669_v55  ;;  %v13171_v22 = vpop.f32.mrf.mxu1 }
 0xde0   : > { %18451 = vmatmul.mubr.msk.f32.vlgmr.msra.gmra.mxu1 %vm571_vm0, %v24678_v9  ;;  %18456 = vmatprep.subr.mxu1 %v25933_v51  ;;  %18870 = vpow2.f32 %v17062_v40  ;;  %v17064_v41 = vmul.f32 -1.442695, %v24706_v1  ;;  %v24725_v54 = vmul.f32 %v24646_v15, %v13168_v26  ;;  %v13172_v11 = vadd.f32 %v13171_v22, %v24642_v27 }
 0xde1   : > { %18457 = vmatpush3.msra.mxu1 %v17077_v34  ;;  %18453 = vmatprep.mubr.msk.f32.mxu1 %vm571_vm0, %v24687_v33  ;;  %v13173_v44 = vpop.f32.mrf.mxu1  ;;  %18872 = vpow2.f32 %v17059_v21 }
 0xde2   : > { %18458 = vmatprep.subr.mxu1 %v25933_v51  ;;  %v17065_v57 = vmul.f32 -1.442695, %v24725_v54  ;;  %v13279_v20 = vmul.f32 %v24646_v15, %v13172_v11  ;;  %v13174_v46 = vadd.f32 %v13173_v44, %v24642_v27  ;;  %18874 = vpow2.f32 %v17064_v41 }
 0xde3   : > { %18459 = vmatpush3.msra.mxu1 %v17076_v12 }
 0xde4   : > { %18454 = vmatmul.mubr.msk.f32.gmra.mxu1 %vm571_vm0, %v24714_v13  ;;  %18460 = vmatprep.subr.mxu1 %v25933_v51  ;;  %18876 = vpow2.f32 %v17065_v57  ;;  %v17067_v23 = vmul.f32 -1.442695, %v13279_v20  ;;  %v13280_v10 = vmul.f32 %v24646_v15, %v13174_v46 }
 0xde5   : > { %18461 = vmatpush3.msra.mxu1 %v17075_v16  ;;  %18464 = vmatprep.mubr.msk.f32.mxu1 %vm19165_vm7, %v25933_v51  ;;  %18878 = vpow2.f32 %v17061_v49 }
 0xde6   : > { %18462 = vmatprep.subr.mxu1 %v25933_v51  ;;  %18880 = vpow2.f32 %v17067_v23  ;;  %v17068_v27 = vmul.f32 -1.442695, %v13280_v10 }
 0xde7   : > { %18463 = vmatpush3.msra.mxu1 %v17074_v37  ;;  %18882 = vpow2.f32 %v17058_v50 }
 0xde8   : > { %18465 = vmatmul.mubr.msk.f32.vlgmr.msra.gmra.mxu1 %vm571_vm0, %v24295_v59  ;;  %18467 = vmatprep.subr.msk.mxu1 %vm571_vm0, %v24295_v59  ;;  %18884 = vpow2.f32 %v17068_v27 }
 0xde9   : > { %18468 = vmatpush3.xpose.msk.msra.mxu1 %vm571_vm0, %v24295_v59  ;;  %18469 = vmatprep.mubr.msk.f32.mxu1 %vm571_vm0, %v17078_v7 }
 0xdec   : > { %18470 = vmatmul.mubr.msk.f32.vlgmr.msra.gmra.mxu1 %vm571_vm0, %v17079_v39 }
 0xded   : > { %18472 = vmatprep.mubr.msk.f32.mxu1 %vm571_vm0, %v17080_v60  ;;  %v18871_v18 = vpop.eup %18870 }
 0xdee   : > { %v18873_v6 = vpop.eup %18872  ;;  %v13322_v4 = vadd.f32 1.0, %v18871_v18 }
 0xdef   : > { %v18875_v52 = vpop.eup %18874  ;;  %v13319_v12 = vadd.f32 1.0, %v18873_v6 }
 0xdf0   : > { %18473 = vmatmul.mubr.msk.f32.gmra.mxu1 %vm571_vm0, %v17081_v42  ;;  %v13324_v19 = vadd.f32 1.0, %v18875_v52  ;;  %18886 = vrcp.f32 %v13322_v4  ;;  %v24833_v4 = vld [vmem:[%s25630_s12] sm:$0xff] }
 0xdf1   : > { %13950 = vmatprep.mubr.f32.mxu1 %v25933_v51  ;;  %v18877_v8 = vpop.eup %18876 }
 0xdf2   : > { %v18879_v5 = vpop.eup %18878  ;;  %v13325_v47 = vadd.f32 1.0, %v18877_v8 }
 0xdf3   : > { %v18881_v3 = vpop.eup %18880  ;;  %v13321_v45 = vadd.f32 1.0, %v18879_v5 }
 0xdf4   : > { %v18883_v24 = vpop.eup %18882  ;;  %v13327_v34 = vadd.f32 1.0, %v18881_v3  ;;  %18888 = vrcp.f32 %v13325_v47 }
 0xdf5   : > { %v18885_v62 = vpop.eup %18884  ;;  %v13318_v40 = vadd.f32 1.0, %v18883_v24 }
 0xdf6   : > { %18890 = vrcp.f32 %v13327_v34  ;;  %v13328_v21 = vadd.f32 1.0, %v18885_v62  ;;  %v24857_v62 = vld [vmem:[%s25630_s12 + $0x10] sm:$0xff] }
 0xdf7   : > { %18892 = vrcp.f32 %v13324_v19  ;;  %v24845_v19 = vld [vmem:[%s25630_s12 + $0x8] sm:$0xff] }
 0xdf8   : > { %18894 = vrcp.f32 %v13328_v21 }
 0xdf9   : > { %18896 = vrcp.f32 %v13321_v45 }
 0xdfa   : > { %18898 = vrcp.f32 %v13319_v12 }
 0xdfb   : > { %18900 = vrcp.f32 %v13318_v40  ;;  %v24871_v40 = vld [vmem:[%s25630_s12 + $0x18] sm:$0xff] }
 0xdfd   : > { %v18887_v26 = vpop.eup %18886 }
 0xdfe   : > { %v13358_v23 = vmul.f32 %v18887_v26, %v24690_v17 }
 0xe01   : > { %v18889_v22 = vpop.eup %18888 }
 0xe02   : > { %v13361_v37 = vmul.f32 %v18889_v22, %v24725_v54 }
 0xe03   : > { %v18891_v16 = vpop.eup %18890 }
 0xe04   : > { %v18893_v41 = vpop.eup %18892  ;;  %v13363_v49 = vmul.f32 %v18891_v16, %v13279_v20  ;;  %v24779_v54 = vadd.f32 %v13361_v37, %v24234_v29  ;;  %v17096_v37 = vld [vmem:[%s25628_s10 + $0xb0] sm:$0xff] }
 0xe05   : > { %v18895_v11 = vpop.eup %18894  ;;  %v13360_v50 = vmul.f32 %v18893_v41, %v24706_v1 }
 0xe06   : > { %v18897_v44 = vpop.eup %18896  ;;  %v13364_v57 = vmul.f32 %v18895_v11, %v13280_v10  ;;  %v24774_v60 = vadd.f32 %v13363_v49, %v24225_v32 }
 0xe07   : > { %v18899_v46 = vpop.eup %18898  ;;  %v13357_v39 = vmul.f32 %v18897_v44, %v24695_v30  ;;  %v24783_v10 = vadd.f32 %v13360_v50, %v24237_v31  ;;  %v17095_v50 = vld [vmem:[%s25628_s10 + $0xa8] sm:$0xff] }
 0xe08   : > { %v18901_v7 = vpop.eup %18900  ;;  %v24770_v27 = vadd.f32 %v13364_v57, %v24222_v43  ;;  %v13355_v20 = vmul.f32 %v18899_v46, %v24672_v0  ;;  %v24788_v43 = vadd.f32 %v13358_v23, %v24247_v28  ;;  %v24815_v28 = vpop.permute.xlu0 %13427  ;;  %v17097_v57 = vld [vmem:[%s25628_s10 + $0xb8] sm:$0xff]  ;;  %v17094_v46 = vld [vmem:[%s25628_s10 + $0xa0] sm:$0xff] }
 0xe09   : > { %v13354_v1 = vmul.f32 %v18901_v7, %v24717_v48  ;;  %v24791_v32 = vadd.f32 %v13357_v39, %v24258_v58  ;;  %v17176_v7 = vld [vmem:[%s25628_s10 + $0xd0] sm:$0xff]  ;;  %v17177_v23 = vld [vmem:[%s25628_s10 + $0xd8] sm:$0xff]  ;;  %v17174_v39 = vld [vmem:[%s25628_s10 + $0xc0] sm:$0xff] }
 0xe0a   : > { %13471 = vmatprep.subr.mxu0 %v24770_v27  ;;  %v24796_v29 = vadd.f32 %v13355_v20, %v24265_v63  ;;  %v24817_v63 = vpop.permute.xlu1 %13432  ;;  %v17175_v20 = vld [vmem:[%s25628_s10 + $0xc8] sm:$0xff] }
 0xe0b   : > { %13472 = vmatpush1.msra.mxu0 %v24774_v60  ;;  %v24799_v31 = vadd.f32 %v13354_v1, %v24271_v36  ;;  %v17179_v1 = vld [vmem:[%s25628_s10 + $0xe8] sm:$0xff] }
 0xe0c   : > { %13473 = vmatprep.subr.mxu0 %v24779_v54 }
 0xe0d   : > { %13474 = vmatpush1.msra.mxu0 %v24783_v10 }
 0xe0e   : > { %13475 = vmatprep.subr.mxu0 %v24788_v43 }
 0xe0f   : > { %13476 = vmatpush1.msra.mxu0 %v24791_v32 }
 0xe10   : > { %13477 = vmatprep.subr.mxu0 %v24796_v29 }
 0xe11   : > { %13478 = vmatpush1.msra.mxu0 %v24799_v31 }
 0xe12   : > { %17099 = vmatmul.mubr.msk.f32.vlgmr.msra.gmra.mxu0 %vm571_vm0, %v24638_v35 }
 0xe13   : > { %13517 = vmatprep.mubr.f32.mxu0 %v25933_v51 }
 0xe16   : > { %17100 = vmatmul.mubr.msk.f32.gmra.mxu0 %vm571_vm0, %v24678_v9  ;;  %v24820_v9 = vpop.permute.xlu0 %13417 }
 0xe17   : > { %13523 = vmatprep.mubr.f32.mxu0 %v25933_v51 }
 0xe1a   : > { %17101 = vmatmul.mubr.msk.f32.gmra.mxu0 %vm571_vm0, %v24687_v33  ;;  %v17107_v33 = vld [vmem:[%s25629_s11 + $0x1] ss:$0 sm:$0xff]  ;;  %v13705_v5 = vpop.permute.xlu0 %13704 }
 0xe1b   : > { %13529 = vmatprep.mubr.f32.mxu0 %v25933_v51 }
 0xe1e   : > { %17102 = vmatmul.mubr.msk.f32.gmra.mxu0 %vm571_vm0, %v24714_v13  ;;  %v24826_v13 = vpop.permute.xlu1 %13422  ;;  %v13715_v49 = vpop.permute.xlu0 %13714 }
 0xe22   : > { %v13700_v12 = vpop.permute.xlu1 %13699 }
 0xe26   : > { %v13710_v41 = vpop.permute.xlu1 %13709 }
 0xea0   : > { %v18452_v58 = vpop.f32.mrf.mxu1 }
 0xea1   : > { %v13608_v42 = vadd.f32 %v18452_v58, %v24826_v13  ;;  %v17178_v58 = vld [vmem:[%s25628_s10 + $0xe0] sm:$0xff] }
 0xea2   : > { %v13602_v36 = vpop.f32.mrf.mxu1 }
 0xea3   : > { %v13603_v52 = vadd.f32 %v13602_v36, %v24820_v9 }
 0xea4   : > { %v18455_v35 = vpop.f32.mrf.mxu1 }
 0xea5   : > { %v13618_v0 = vadd.f32 %v18455_v35, %v24817_v63 }
 0xea6   : > { %v13612_v17 = vpop.f32.mrf.mxu1 }
 0xea7   : > { %v13613_v30 = vadd.f32 %v13612_v17, %v24815_v28  ;;  %18475 = vmatprep.subr.mxu0 %v13618_v0  ;;  %v17180_v17 = vld [vmem:[%s25628_s10 + $0xf0] sm:$0xff] }
 0xea8   : > { %v13693_v48 = vpop.f32.mrf.mxu1  ;;  %18476 = vmatpush3.msra.mxu0 %v13618_v0  ;;  %v17181_v0 = vld [vmem:[%s25628_s10 + $0xf8] sm:$0xff] }
 0xea9   : > { %v13694_v18 = vadd.f32 %v17107_v33, %v13693_v48  ;;  %18477 = vmatprep.subr.mxu0 %v13613_v30 }
 0xeaa   : > { %v18466_v6 = vpop.f32.mrf.mxu1  ;;  %18478 = vmatpush3.msra.mxu0 %v13613_v30 }
 0xeab   : > { %18479 = vmatprep.subr.mxu0 %v13608_v42  ;;  %v24836_v8 = vmul.f32 %v24833_v4, %v13694_v18  ;;  %v24848_v24 = vmul.f32 %v24845_v19, %v13694_v18  ;;  %v24860_v45 = vmul.f32 %v24857_v62, %v13694_v18  ;;  %v24874_v26 = vmul.f32 %v24871_v40, %v13694_v18 }
 0xeac   : > { %v18471_v47 = vpop.f32.mrf.mxu1  ;;  %18480 = vmatpush3.msra.mxu0 %v13608_v42 }
 0xead   : > { %v24838_v3 = vadd.f32 %v18471_v47, %v13705_v5  ;;  %18481 = vmatprep.subr.mxu0 %v13603_v52  ;;  %18483 = vmatprep.mubr.msk.f32.mxu0 %vm571_vm0, %v24836_v8 }
 0xeae   : > { %v13795_v34 = vpop.f32.mrf.mxu1  ;;  %18482 = vmatpush3.msra.mxu0 %v13603_v52 }
 0xeaf   : > { %13836 = vrot.lane.b32.xlu1 %v24838_v3, %s19166_s29  ;;  %13824 = vrot.lane.b32.xlu0 %v24838_v3, %s19167_s24  ;;  %v24864_v21 = vadd.f32 %v13795_v34, %v13700_v12 }
 0xeb0   : > { %18484 = vmatmul.mubr.msk.f32.vlgmr.msra.gmra.mxu0 %vm571_vm0, %v24848_v24  ;;  %v18474_v22 = vpop.f32.mrf.mxu1 }
 0xeb1   : > { %18486 = vmatprep.mubr.msk.f32.mxu0 %vm571_vm0, %v24860_v45  ;;  %v24893_v44 = vadd.f32 %v18474_v22, %v13715_v49 }
 0xeb2   : > { %v13805_v16 = vpop.f32.mrf.mxu1 }
 0xeb3   : > { %13834 = vrot.lane.b32.xlu0 %v24864_v21, %s19166_s29  ;;  %13822 = vrot.lane.b32.xlu1 %v24864_v21, %s19167_s24  ;;  %v24887_v11 = vadd.f32 %v13805_v16, %v13710_v41 }
 0xeb4   : > { %18487 = vmatmul.mubr.msk.f32.gmra.mxu0 %vm571_vm0, %v24874_v26 }
 0xeb5   : > { %14215 = vmatprep.mubr.f32.mxu0 %v25933_v51 }
 0xeb7   : > { %13848 = vrot.lane.b32.xlu0 %v24838_v3, %s19168_s18  ;;  %13846 = vrot.lane.b32.xlu1 %v24864_v21, %s19168_s18 }
 0xebb   : > { %13838 = vrot.lane.b32.xlu0 %v24887_v11, %s19166_s29  ;;  %13826 = vrot.lane.b32.xlu1 %v24887_v11, %s19167_s24 }
 0xebf   : > { %13828 = vrot.lane.b32.xlu0 %v24893_v44, %s19167_s24  ;;  %13850 = vrot.lane.b32.xlu1 %v24887_v11, %s19168_s18 }
 0xec3   : > { %13852 = vrot.lane.b32.xlu0 %v24893_v44, %s19168_s18  ;;  %13840 = vrot.lane.b32.xlu1 %v24893_v44, %s19166_s29 }
 0xec7   : > { %14547 = vperm.xlu0 %18660, %v17096_v37   ;;  %14552 = vperm.xlu1 %18661, %v17097_v57  }
 0xecb   : > { %14537 = vperm.xlu0 %18660, %v17094_v46   ;;  %14542 = vperm.xlu1 %18661, %v17095_v50  }
 0xecf   : > { %14898 = vperm.xlu0 %18660, %v17176_v7   ;;  %14903 = vperm.xlu1 %18661, %v17177_v23  }
 0xed2   : > { %v13513_v36 = vpop.f32.mrf.mxu0 }
 0xed3   : > { %14888 = vperm.xlu0 %18660, %v17174_v39   ;;  %14893 = vperm.xlu1 %18661, %v17175_v20   ;;  %v13514_v41 = vadd.f32 %v13513_v36, %v24820_v9 }
 0xed4   : > { %v13515_v35 = vpop.f32.mrf.mxu0 }
 0xed5   : > { %v13516_v16 = vadd.f32 %v13515_v35, %v24820_v9 }
 0xed6   : > { %v13519_v33 = vpop.f32.mrf.mxu0 }
 0xed7   : > { %15175 = vperm.xlu0 %18660, %v17179_v1   ;;  %15170 = vperm.xlu1 %18661, %v17178_v58   ;;  %v13520_v22 = vadd.f32 %v13519_v33, %v24826_v13 }
 0xed8   : > { %v13521_v30 = vpop.f32.mrf.mxu0 }
 0xed9   : > { %v13522_v12 = vadd.f32 %v13521_v30, %v24826_v13 }
 0xeda   : > { %v13525_v48 = vpop.f32.mrf.mxu0 }
 0xedb   : > { %15185 = vperm.xlu0 %18660, %v17181_v0   ;;  %15180 = vperm.xlu1 %18661, %v17180_v17   ;;  %v13526_v34 = vadd.f32 %v13525_v48, %v24815_v28 }
 0xedc   : > { %v13527_v42 = vpop.f32.mrf.mxu0 }
 0xedd   : > { %v13528_v47 = vadd.f32 %v13527_v42, %v24815_v28 }
 0xede   : > { %v13531_v18 = vpop.f32.mrf.mxu0 }
 0xedf   : > { %v13532_v5 = vadd.f32 %v13531_v18, %v24817_v63 }
 0xee0   : > { %v13533_v6 = vpop.f32.mrf.mxu0 }
 0xee1   : > { %v13534_v52 = vadd.f32 %v13533_v6, %v24817_v63 }
 0xee3   : > { %13910 = vmatprep.subr.mxu1 %v13534_v52 }
 0xee4   : > { %13911 = vmatpush1.msra.mxu1 %v13532_v5 }
 0xee5   : > { %13912 = vmatprep.subr.mxu1 %v13528_v47 }
 0xee6   : > { %13913 = vmatpush1.msra.mxu1 %v13526_v34 }
 0xee7   : > { %13914 = vmatprep.subr.mxu1 %v13522_v12 }
 0xee8   : > { %13915 = vmatpush1.msra.mxu1 %v13520_v22 }
 0xee9   : > { %13916 = vmatprep.subr.mxu1 %v13516_v16 }
 0xeea   : > { %13917 = vmatpush1.msra.mxu1 %v13514_v41 }
 0xeeb   : > { %17114 = vmatmul.mubr.msk.f32.vlgmr.msra.gmra.mxu1 %vm571_vm0, %v24836_v8 }
 0xeec   : > { %13956 = vmatprep.mubr.f32.mxu1 %v25933_v51 }
 0xeef   : > { %17115 = vmatmul.mubr.msk.f32.gmra.mxu1 %vm571_vm0, %v24848_v24 }
 0xef0   : > { %13962 = vmatprep.mubr.f32.mxu1 %v25933_v51 }
 0xef3   : > { %17116 = vmatmul.mubr.msk.f32.gmra.mxu1 %vm571_vm0, %v24860_v45 }
 0xef4   : > { %13968 = vmatprep.mubr.f32.mxu1 %v25933_v51 }
 0xef7   : > { %17117 = vmatmul.mubr.msk.f32.gmra.mxu1 %vm571_vm0, %v24874_v26 }
 0xef8   : > { %18497 = vmatprep.mubr.msk.f32.mxu1 %vm571_vm0, %v24833_v4 }
 0xf21   : > { %v13825_v28 = vpop.permute.xlu0 %13824  ;;  %v13837_v63 = vpop.permute.xlu1 %13836 }
 0xf22   : > { %v13859_v9 = vsel %vm12344_vm12, %v24838_v3, %v13825_v28 }
 0xf23   : > { %v24963_v13 = vsel %vm6863_vm11, %v13859_v9, %v13837_v63 }
 0xf70   : > { %v18485_v8 = vpop.f32.mrf.mxu0 }
 0xf71   : > { %v14065_v49 = vmul.f32 0.35355338, %v18485_v8 }
 0xf72   : > { %v14041_v24 = vpop.f32.mrf.mxu0 }
 0xf73   : > { %v14062_v45 = vmul.f32 0.35355338, %v14041_v24  ;;  %v14077_v26 = vadd.f32 %v14065_v49, %v24338_v56 }
 0xf74   : > { %v18488_v37 = vpop.f32.mrf.mxu0 }
 0xf75   : > { %v14071_v57 = vmul.f32 0.35355338, %v18488_v37  ;;  %v14074_v50 = vadd.f32 %v14062_v45, %v24342_v38  ;;  %v14103_v20 = vsel %vm5189_vm4, %v14077_v26, -inf }
 0xf76   : > { %v14051_v46 = vpop.f32.mrf.mxu0 }
 0xf77   : > { %v14083_v7 = vadd.f32 %v14071_v57, %v24346_v14  ;;  %v14068_v23 = vmul.f32 0.35355338, %v14051_v46  ;;  %v14102_v1 = vsel %vm5189_vm4, %v14074_v50, -inf }
 0xf79   : > { %v14106_v39 = vsel %vm5189_vm4, %v14083_v7, -inf  ;;  %v14080_v3 = vadd.f32 %v14068_v23, %v24368_v53 }
 0xf7a   : > { %v14107_v36 = vmax.f32 %v14103_v20, %v14106_v39 }
 0xf7b   : > { %v14104_v58 = vsel %vm5189_vm4, %v14080_v3, -inf }
 0xf7c   : > { %v14105_v35 = vmax.f32 %v14102_v1, %v14104_v58 }
 0xf7e   : > { %v14108_v0 = vmax.f32 %v14105_v35, %v14107_v36 }
 0xf80   : > { %v14109_v17 = vrot.slane %v14108_v0, 4 }
 0xf82   : > { %v14110_v33 = vmax.f32 %v14108_v0, %v14109_v17 }
 0xf84   : > { %v14111_v30 = vrot.slane %v14110_v33, 2 }
 0xf86   : > { %v14112_v48 = vmax.f32 %v14110_v33, %v14111_v30 }
 0xf88   : > { %v14113_v42 = vrot.slane %v14112_v48, 1 }
 0xf8a   : > { %v14114_v18 = vmax.f32 %v14112_v48, %v14113_v42 }
 0xf8c   : > { %v14126_v6 = vsub.f32 %v14083_v7, %v14114_v18  ;;  %v14123_v52 = vsub.f32 %v14080_v3, %v14114_v18  ;;  %v14120_v5 = vsub.f32 %v14077_v26, %v14114_v18  ;;  %v14117_v34 = vsub.f32 %v14074_v50, %v14114_v18 }
 0xf8e   : > { %v14149_v47 = vmul.f32 1.442695, %v14126_v6  ;;  %v14143_v12 = vmul.f32 1.442695, %v14123_v52  ;;  %v14137_v22 = vmul.f32 1.442695, %v14120_v5 }
 0xf8f   : > { %v14131_v16 = vmul.f32 1.442695, %v14117_v34 }
 0xf90   : > { %18902 = vpow2.f32 %v14149_v47 }
 0xf91   : > { %18904 = vpow2.f32 %v14143_v12 }
 0xf92   : > { %18906 = vpow2.f32 %v14137_v22 }
 0xf93   : > { %18908 = vpow2.f32 %v14131_v16 }
 0xf9d   : > { %v24973_v41 = vpop.eup %18902 }
 0xf9e   : > { %18489 = vmatprep.subr.mxu1 %v24973_v41  ;;  %v24976_v28 = vpop.eup %18904 }
 0xf9f   : > { %18490 = vmatpush3.msra.mxu1 %v24973_v41  ;;  %v24980_v63 = vpop.eup %18906 }
 0xfa0   : > { %18491 = vmatprep.subr.mxu1 %v24976_v28  ;;  %v24984_v9 = vpop.eup %18908 }
 0xfa1   : > { %18492 = vmatpush3.msra.mxu1 %v24976_v28 }
 0xfa2   : > { %18493 = vmatprep.subr.mxu1 %v24980_v63 }
 0xfa3   : > { %18494 = vmatpush3.msra.mxu1 %v24980_v63 }
 0xfa4   : > { %18495 = vmatprep.subr.mxu1 %v24984_v9 }
 0xfa5   : > { %18496 = vmatpush3.msra.mxu1 %v24984_v9 }
 0xfa6   : > { %18498 = vmatmul.mubr.msk.f32.vlgmr.msra.gmra.mxu1 %vm571_vm0, %v24845_v19 }
 0xfa7   : > { %18500 = vmatprep.mubr.msk.f32.mxu1 %vm571_vm0, %v24857_v62 }
 0xfaa   : > { %18501 = vmatmul.mubr.msk.f32.gmra.mxu1 %vm571_vm0, %v24871_v40 }
 0xfab   : > { %v13952_v8 = vpop.f32.mrf.mxu1  ;;  %14425 = vmatprep.mubr.f32.mxu1 %v25933_v51 }
 0xfac   : > { %v14060_v46 = vmul.f32 0.35355338, %v13952_v8 }
 0xfad   : > { %v13954_v24 = vpop.f32.mrf.mxu1 }
 0xfae   : > { %v14061_v23 = vmul.f32 0.35355338, %v13954_v24  ;;  %v14072_v58 = vadd.f32 %v14060_v46, %v24342_v38 }
 0xfaf   : > { %v13958_v49 = vpop.f32.mrf.mxu1 }
 0xfb0   : > { %v14063_v50 = vmul.f32 0.35355338, %v13958_v49  ;;  %v14073_v30 = vadd.f32 %v14061_v23, %v24342_v38 }
 0xfb1   : > { %v13960_v45 = vpop.f32.mrf.mxu1 }
 0xfb2   : > { %v14064_v3 = vmul.f32 0.35355338, %v13960_v45  ;;  %v14075_v35 = vadd.f32 %v14063_v50, %v24338_v56 }
 0xfb3   : > { %v13964_v37 = vpop.f32.mrf.mxu1 }
 0xfb4   : > { %v14066_v57 = vmul.f32 0.35355338, %v13964_v37  ;;  %v14076_v48 = vadd.f32 %v14064_v3, %v24338_v56 }
 0xfb5   : > { %v13966_v26 = vpop.f32.mrf.mxu1 }
 0xfb6   : > { %v14067_v7 = vmul.f32 0.35355338, %v13966_v26  ;;  %v14078_v20 = vadd.f32 %v14066_v57, %v24368_v53 }
 0xfb7   : > { %v13970_v39 = vpop.f32.mrf.mxu1 }
 0xfb8   : > { %v14069_v1 = vmul.f32 0.35355338, %v13970_v39  ;;  %v14079_v0 = vadd.f32 %v14067_v7, %v24368_v53  ;;  %v14084_v42 = vmax.f32 %v14072_v58, %v14078_v20 }
 0xfb9   : > { %v13972_v36 = vpop.f32.mrf.mxu1 }
 0xfba   : > { %v14081_v17 = vadd.f32 %v14069_v1, %v24346_v14  ;;  %v14070_v33 = vmul.f32 0.35355338, %v13972_v36  ;;  %v14093_v52 = vmax.f32 %v14073_v30, %v14079_v0 }
 0xfbc   : > { %v14085_v18 = vmax.f32 %v14075_v35, %v14081_v17  ;;  %v14082_v6 = vadd.f32 %v14070_v33, %v24346_v14 }
 0xfbe   : > { %v14086_v5 = vmax.f32 %v14084_v42, %v14085_v18  ;;  %v14094_v47 = vmax.f32 %v14076_v48, %v14082_v6 }
 0xfc0   : > { %v14087_v34 = vrot.slane %v14086_v5, 4  ;;  %v14095_v12 = vmax.f32 %v14093_v52, %v14094_v47 }
 0xfc2   : > { %v14088_v22 = vmax.f32 %v14086_v5, %v14087_v34  ;;  %v14096_v16 = vrot.slane %v14095_v12, 4 }
 0xfc4   : > { %v14089_v8 = vrot.slane %v14088_v22, 2  ;;  %v14097_v24 = vmax.f32 %v14095_v12, %v14096_v16 }
 0xfc6   : > { %v14090_v49 = vmax.f32 %v14088_v22, %v14089_v8  ;;  %v14098_v45 = vrot.slane %v14097_v24, 2  ;;  %v13823_v8 = vpop.permute.xlu1 %13822 }
 0xfc8   : > { %v14091_v37 = vrot.slane %v14090_v49, 1  ;;  %v14099_v57 = vmax.f32 %v14097_v24, %v14098_v45  ;;  %v13835_v24 = vpop.permute.xlu0 %13834 }
 0xfca   : > { %v14100_v46 = vrot.slane %v14099_v57, 1  ;;  %v14092_v26 = vmax.f32 %v14090_v49, %v14091_v37  ;;  %v13858_v49 = vsel %vm12344_vm12, %v24864_v21, %v13823_v8  ;;  %v13847_v45 = vpop.permute.xlu1 %13846 }
 0xfcb   : > { %v13862_v37 = vsel %vm6863_vm11, %v13858_v49, %v13835_v24 }
 0xfcc   : > { %v14101_v50 = vmax.f32 %v14099_v57, %v14100_v46  ;;  %v14124_v7 = vsub.f32 %v14081_v17, %v14092_v26  ;;  %v14121_v3 = vsub.f32 %v14078_v20, %v14092_v26  ;;  %v14118_v33 = vsub.f32 %v14075_v35, %v14092_v26 }
 0xfcd   : > { %v14115_v5 = vsub.f32 %v14072_v58, %v14092_v26  ;;  %v13866_v57 = vsel %vm12353_vm13, %v13862_v37, %v13847_v45 }
 0xfce   : > { %v14125_v23 = vsub.f32 %v14082_v6, %v14101_v50  ;;  %v14122_v39 = vsub.f32 %v14079_v0, %v14101_v50  ;;  %v14119_v1 = vsub.f32 %v14076_v48, %v14101_v50  ;;  %v14145_v42 = vmul.f32 1.442695, %v14124_v7 }
 0xfcf   : > { %v14116_v18 = vsub.f32 %v14073_v30, %v14101_v50  ;;  %v14139_v47 = vmul.f32 1.442695, %v14121_v3  ;;  %v14133_v12 = vmul.f32 1.442695, %v14118_v33  ;;  %v14127_v16 = vmul.f32 1.442695, %v14115_v5 }
 0xfd0   : > { %v14147_v36 = vmul.f32 1.442695, %v14125_v23  ;;  %v14141_v52 = vmul.f32 1.442695, %v14122_v39  ;;  %v14135_v34 = vmul.f32 1.442695, %v14119_v1  ;;  %v25042_v46 = vmul.f32 %v24833_v4, %v13866_v57  ;;  %v13849_v23 = vpop.permute.xlu0 %13848  ;;  %v13827_v39 = vpop.permute.xlu1 %13826 }
 0xfd1   : > { %v14129_v22 = vmul.f32 1.442695, %v14116_v18 }
 0xfd2   : > { %18910 = vpow2.f32 %v14147_v36 }
 0xfd3   : > { %18912 = vpow2.f32 %v14145_v42 }
 0xfd4   : > { %18914 = vpow2.f32 %v14141_v52  ;;  %v13839_v3 = vpop.permute.xlu0 %13838  ;;  %v13851_v1 = vpop.permute.xlu1 %13850  ;;  %v13860_v52 = vsel %vm12344_vm12, %v24887_v11, %v13827_v39 }
 0xfd5   : > { %18916 = vpow2.f32 %v14139_v47 }
 0xfd6   : > { %18918 = vpow2.f32 %v14135_v34 }
 0xfd7   : > { %18920 = vpow2.f32 %v14133_v12 }
 0xfd8   : > { %18922 = vpow2.f32 %v14129_v22  ;;  %v13829_v33 = vpop.permute.xlu0 %13828  ;;  %v13841_v34 = vpop.permute.xlu1 %13840  ;;  %v13867_v22 = vsel %vm12353_vm13, %v24963_v13, %v13849_v23 }
 0xfd9   : > { %18924 = vpow2.f32 %v14127_v16  ;;  %v13861_v16 = vsel %vm12344_vm12, %v24893_v44, %v13829_v33 }
 0xfdc   : > { %v13853_v8 = vpop.permute.xlu0 %13852 }
 0xfdf   : > { %v25004_v20 = vpop.eup %18910 }
 0xfe0   : > { %v25006_v35 = vpop.eup %18912  ;;  %14175 = vmatprep.subr.mxu0 %v25004_v20 }
 0xfe1   : > { %v25009_v58 = vpop.eup %18914  ;;  %14176 = vmatpush1.msra.mxu0 %v25006_v35 }
 0xfe2   : > { %v25012_v0 = vpop.eup %18916  ;;  %14177 = vmatprep.subr.mxu0 %v25009_v58 }
 0xfe3   : > { %v25015_v17 = vpop.eup %18918  ;;  %14178 = vmatpush1.msra.mxu0 %v25012_v0 }
 0xfe4   : > { %v25018_v30 = vpop.eup %18920  ;;  %14179 = vmatprep.subr.mxu0 %v25015_v17 }
 0xfe5   : > { %v25021_v48 = vpop.eup %18922  ;;  %14180 = vmatpush1.msra.mxu0 %v25018_v30 }
 0xfe6   : > { %v25024_v6 = vpop.eup %18924  ;;  %14181 = vmatprep.subr.mxu0 %v25021_v48 }
 0xfe7   : > { %14182 = vmatpush1.msra.mxu0 %v25024_v6 }
 0xfe8   : > { %17122 = vmatmul.mubr.msk.f32.vlgmr.msra.gmra.mxu0 %vm571_vm0, %v24833_v4 }
 0xfe9   : > { %14221 = vmatprep.mubr.f32.mxu0 %v25933_v51 }
 0xfec   : > { %17123 = vmatmul.mubr.msk.f32.gmra.mxu0 %vm571_vm0, %v24845_v19 }
 0xfed   : > { %14227 = vmatprep.mubr.f32.mxu0 %v25933_v51 }
 0xff0   : > { %17124 = vmatmul.mubr.msk.f32.gmra.mxu0 %vm571_vm0, %v24857_v62 }
 0xff1   : > { %14233 = vmatprep.mubr.f32.mxu0 %v25933_v51 }
 0xff4   : > { %17125 = vmatmul.mubr.msk.f32.gmra.mxu0 %vm571_vm0, %v24871_v40 }
 0xff5   : > { %18511 = vmatprep.mubr.msk.f32.mxu0 %vm571_vm0, %v25042_v46 }
0x1066   : > { %v18499_v21 = vpop.f32.mrf.mxu1 }
0x1068   : > { %v14306_v26 = vpop.f32.mrf.mxu1 }
0x106a   : > { %v18502_v50 = vpop.f32.mrf.mxu1 }
0x106b   : > { %18926 = vrcp.f32 %v18502_v50 }
0x106c   : > { %18928 = vrcp.f32 %v18499_v21  ;;  %v14316_v7 = vpop.f32.mrf.mxu1 }
0x106d   : > { %18930 = vrcp.f32 %v14316_v7 }
0x106e   : > { %18932 = vrcp.f32 %v14306_v26 }
0x1078   : > { %v18927_v4 = vpop.eup %18926 }
0x1079   : > { %v18929_v36 = vpop.eup %18928  ;;  %v14348_v42 = vmul.f32 %v18927_v4, %v24973_v41  ;;  %v13864_v41 = vsel %vm6863_vm11, %v13860_v52, %v13839_v3 }
0x107a   : > { %v18931_v18 = vpop.eup %18930  ;;  %v14342_v12 = vmul.f32 %v18929_v36, %v24980_v63  ;;  %v13868_v11 = vsel %vm12353_vm13, %v13864_v41, %v13851_v1  ;;  %v13871_v63 = vmul.f32 %v24845_v19, %v13867_v22 }
0x107b   : > { %18503 = vmatprep.subr.mxu0 %v14348_v42  ;;  %v14345_v5 = vmul.f32 %v18931_v18, %v24976_v28  ;;  %v18933_v47 = vpop.eup %18932  ;;  %v13865_v28 = vsel %vm6863_vm11, %v13861_v16, %v13841_v34  ;;  %v13872_v13 = vmul.f32 %v24857_v62, %v13868_v11 }
0x107c   : > { %18504 = vmatpush3.msra.mxu0 %v14348_v42  ;;  %v14339_v24 = vmul.f32 %v18933_v47, %v24984_v9  ;;  %v13869_v49 = vsel %vm12353_vm13, %v13865_v28, %v13853_v8  ;;  %v17085_v47 = vld [vmem:[%s25627_s9 + $0xf8] sm:$0xff] }
0x107d   : > { %18505 = vmatprep.subr.mxu0 %v14345_v5  ;;  %v13873_v44 = vmul.f32 %v24871_v40, %v13869_v49 }
0x107e   : > { %18506 = vmatpush3.msra.mxu0 %v14345_v5 }
0x107f   : > { %18507 = vmatprep.subr.mxu0 %v14342_v12 }
0x1080   : > { %18508 = vmatpush3.msra.mxu0 %v14342_v12 }
0x1081   : > { %18509 = vmatprep.subr.mxu0 %v14339_v24 }
0x1082   : > { %18510 = vmatpush3.msra.mxu0 %v14339_v24  ;;  %v25112_v24 = vld [vmem:[%s25627_s9 + $0x100] sm:$0xff] }
0x1083   : > { %18512 = vmatmul.mubr.msk.f32.vlgmr.msra.gmra.mxu0 %vm571_vm0, %v13871_v63 }
0x1084   : > { %18514 = vmatprep.mubr.msk.f32.mxu0 %vm571_vm0, %v13872_v13 }
0x1087   : > { %18515 = vmatmul.mubr.msk.f32.gmra.mxu0 %vm571_vm0, %v13873_v44 }
0x1088   : > { %14631 = vmatprep.mubr.f32.mxu0 %v25933_v51 }
0x10a8   : > { %v14217_v9 = vpop.f32.mrf.mxu0 }
0x10aa   : > { %v14219_v45 = vpop.f32.mrf.mxu0 }
0x10ac   : > { %v14223_v37 = vpop.f32.mrf.mxu0 }
0x10ae   : > { %v14225_v19 = vpop.f32.mrf.mxu0 }
0x10b0   : > { %v14229_v57 = vpop.f32.mrf.mxu0 }
0x10b2   : > { %v14231_v21 = vpop.f32.mrf.mxu0 }
0x10b3   : > { %18934 = vrcp.f32 %v14231_v21 }
0x10b4   : > { %v14235_v62 = vpop.f32.mrf.mxu0 }
0x10b5   : > { %18936 = vrcp.f32 %v14235_v62 }
0x10b6   : > { %v14237_v26 = vpop.f32.mrf.mxu0 }
0x10b7   : > { %18938 = vrcp.f32 %v14237_v26 }
0x10b8   : > { %18940 = vrcp.f32 %v14229_v57 }
0x10b9   : > { %18942 = vrcp.f32 %v14225_v19 }
0x10ba   : > { %18944 = vrcp.f32 %v14223_v37 }
0x10bb   : > { %18946 = vrcp.f32 %v14219_v45 }
0x10bc   : > { %18948 = vrcp.f32 %v14217_v9 }
0x10c0   : > { %v18935_v40 = vpop.eup %18934 }
0x10c1   : > { %v14344_v36 = vmul.f32 %v18935_v40, %v25009_v58  ;;  %v17082_v58 = vld [vmem:[%s25627_s9 + $0xe0] sm:$0xff] }
0x10c2   : > { %v18937_v50 = vpop.eup %18936 }
0x10c3   : > { %v14346_v1 = vmul.f32 %v18937_v50, %v25006_v35 }
0x10c4   : > { %v18939_v7 = vpop.eup %18938 }
0x10c5   : > { %v18941_v23 = vpop.eup %18940  ;;  %v14347_v39 = vmul.f32 %v18939_v7, %v25004_v20 }
0x10c6   : > { %v18943_v3 = vpop.eup %18942  ;;  %v14343_v42 = vmul.f32 %v18941_v23, %v25012_v0 }
0x10c7   : > { %v18945_v4 = vpop.eup %18944  ;;  %14385 = vmatprep.subr.mxu1 %v14347_v39  ;;  %v14341_v52 = vmul.f32 %v18943_v3, %v25015_v17 }
0x10c8   : > { %v18947_v33 = vpop.eup %18946  ;;  %14386 = vmatpush1.msra.mxu1 %v14346_v1  ;;  %v14340_v5 = vmul.f32 %v18945_v4, %v25018_v30 }
0x10c9   : > { %v18949_v18 = vpop.eup %18948  ;;  %14387 = vmatprep.subr.mxu1 %v14344_v36  ;;  %v14338_v20 = vmul.f32 %v18947_v33, %v25021_v48 }
0x10ca   : > { %14388 = vmatpush1.msra.mxu1 %v14343_v42  ;;  %v14337_v35 = vmul.f32 %v18949_v18, %v25024_v6  ;;  %v17083_v6 = vld [vmem:[%s25627_s9 + $0xe8] sm:$0xff] }
0x10cb   : > { %14389 = vmatprep.subr.mxu1 %v14341_v52 }
0x10cc   : > { %14390 = vmatpush1.msra.mxu1 %v14340_v5 }
0x10cd   : > { %14391 = vmatprep.subr.mxu1 %v14338_v20 }
0x10ce   : > { %14392 = vmatpush1.msra.mxu1 %v14337_v35 }
0x10cf   : > { %17130 = vmatmul.mubr.msk.f32.vlgmr.msra.gmra.mxu1 %vm571_vm0, %v25042_v46  ;;  %v17084_v46 = vld [vmem:[%s25627_s9 + $0xf0] sm:$0xff] }
0x10d0   : > { %14431 = vmatprep.mubr.f32.mxu1 %v25933_v51 }
0x10d3   : > { %17131 = vmatmul.mubr.msk.f32.gmra.mxu1 %vm571_vm0, %v13871_v63  ;;  %v25116_v63 = vpop.permute.xlu1 %14552 }
0x10d4   : > { %14437 = vmatprep.mubr.f32.mxu1 %v25933_v51 }
0x10d7   : > { %17132 = vmatmul.mubr.msk.f32.gmra.mxu1 %vm571_vm0, %v13872_v13  ;;  %v25118_v13 = vpop.permute.xlu0 %14547  ;;  %v25120_v49 = vpop.permute.xlu1 %14542 }
0x10d8   : > { %14443 = vmatprep.mubr.f32.mxu1 %v25933_v51 }
0x10db   : > { %17133 = vmatmul.mubr.msk.f32.gmra.mxu1 %vm571_vm0, %v13873_v44  ;;  %v25123_v45 = vpop.permute.xlu0 %14537 }
0x10dc   : > { %18525 = vmatprep.mubr.msk.f32.mxu1 %vm571_vm0, %v17082_v58 }
0x1143   : > { %v18513_v0 = vpop.f32.mrf.mxu0 }
0x1145   : > { %v14516_v17 = vpop.f32.mrf.mxu0 }
0x1147   : > { %v18516_v30 = vpop.f32.mrf.mxu0 }
0x1148   : > { %18517 = vmatprep.subr.mxu1 %v18516_v30 }
0x1149   : > { %v14526_v48 = vpop.f32.mrf.mxu0  ;;  %18518 = vmatpush3.msra.mxu1 %v18516_v30 }
0x114a   : > { %18519 = vmatprep.subr.mxu1 %v14526_v48 }
0x114b   : > { %18520 = vmatpush3.msra.mxu1 %v14526_v48 }
0x114c   : > { %18521 = vmatprep.subr.mxu1 %v18513_v0 }
0x114d   : > { %18522 = vmatpush3.msra.mxu1 %v18513_v0 }
0x114e   : > { %18523 = vmatprep.subr.mxu1 %v14516_v17 }
0x114f   : > { %18524 = vmatpush3.msra.mxu1 %v14516_v17 }
0x1150   : > { %18526 = vmatmul.mubr.msk.f32.vlgmr.msra.gmra.mxu1 %vm571_vm0, %v17083_v6 }
0x1151   : > { %18528 = vmatprep.mubr.msk.f32.mxu1 %vm571_vm0, %v17084_v46 }
0x1154   : > { %18529 = vmatmul.mubr.msk.f32.gmra.mxu1 %vm571_vm0, %v17085_v47 }
0x1155   : > { %14982 = vmatprep.mubr.f32.mxu1 %v25933_v51 }
0x118f   : > { %v14427_v34 = vpop.f32.mrf.mxu1 }
0x1191   : > { %v14429_v12 = vpop.f32.mrf.mxu1 }
0x1193   : > { %v14433_v22 = vpop.f32.mrf.mxu1 }
0x1195   : > { %v14435_v16 = vpop.f32.mrf.mxu1 }
0x1197   : > { %v14439_v41 = vpop.f32.mrf.mxu1 }
0x1199   : > { %v14441_v11 = vpop.f32.mrf.mxu1 }
0x119b   : > { %v14445_v8 = vpop.f32.mrf.mxu1 }
0x119d   : > { %v14447_v28 = vpop.f32.mrf.mxu1 }
0x119e   : > { %14591 = vmatprep.subr.mxu0 %v14447_v28  ;;  %v17166_v28 = vld [vmem:[%s25627_s9 + $0x140] sm:$0xff] }
0x119f   : > { %14592 = vmatpush1.msra.mxu0 %v14445_v8  ;;  %v17162_v8 = vld [vmem:[%s25627_s9 + $0x120] sm:$0xff] }
0x11a0   : > { %14593 = vmatprep.subr.mxu0 %v14441_v11  ;;  %v17163_v11 = vld [vmem:[%s25627_s9 + $0x128] sm:$0xff] }
0x11a1   : > { %14594 = vmatpush1.msra.mxu0 %v14439_v41  ;;  %v25176_v41 = vld [vmem:[%s25627_s9 + $0x118] sm:$0xff] }
0x11a2   : > { %14595 = vmatprep.subr.mxu0 %v14435_v16  ;;  %v25162_v16 = vld [vmem:[%s25627_s9 + $0x110] sm:$0xff] }
0x11a3   : > { %14596 = vmatpush1.msra.mxu0 %v14433_v22 }
0x11a4   : > { %14597 = vmatprep.subr.mxu0 %v14429_v12 }
0x11a5   : > { %14598 = vmatpush1.msra.mxu0 %v14427_v34 }
0x11a6   : > { %17138 = vmatmul.mubr.msk.f32.vlgmr.msra.gmra.mxu0 %vm571_vm0, %v17082_v58 }
0x11a7   : > { %14637 = vmatprep.mubr.f32.mxu0 %v25933_v51 }
0x11aa   : > { %17139 = vmatmul.mubr.msk.f32.gmra.mxu0 %vm571_vm0, %v17083_v6 }
0x11ab   : > { %14643 = vmatprep.mubr.f32.mxu0 %v25933_v51 }
0x11ae   : > { %17140 = vmatmul.mubr.msk.f32.gmra.mxu0 %vm571_vm0, %v17084_v46 }
0x11af   : > { %14649 = vmatprep.mubr.f32.mxu0 %v25933_v51 }
0x11b2   : > { %17141 = vmatmul.mubr.msk.f32.gmra.mxu0 %vm571_vm0, %v17085_v47 }
0x11b3   : > { %18539 = vmatprep.mubr.msk.f32.mxu0 %vm571_vm0, %v25112_v24 }
0x1210   : > { %v18527_v44 = vpop.f32.mrf.mxu1 }
0x1211   : > { %v14728_v9 = vadd.f32 %v18527_v44, %v25120_v49  ;;  %v17167_v44 = vld [vmem:[%s25627_s9 + $0x148] sm:$0xff] }
0x1212   : > { %v14722_v37 = vpop.f32.mrf.mxu1 }
0x1213   : > { %v14746_v19 = vmul.f32 %v14728_v9, %v24646_v15  ;;  %v14723_v57 = vadd.f32 %v14722_v37, %v25123_v45  ;;  %v17168_v9 = vld [vmem:[%s25627_s9 + $0x150] sm:$0xff]  ;;  %v17169_v37 = vld [vmem:[%s25627_s9 + $0x158] sm:$0xff] }
0x1214   : > { %v18530_v21 = vpop.f32.mrf.mxu1 }
0x1215   : > { %v17151_v62 = vmul.f32 -1.442695, %v14746_v19  ;;  %v14743_v26 = vmul.f32 %v14723_v57, %v24646_v15  ;;  %v14738_v40 = vadd.f32 %v18530_v21, %v25116_v63 }
0x1216   : > { %v14732_v50 = vpop.f32.mrf.mxu1 }
0x1217   : > { %18950 = vpow2.f32 %v17151_v62  ;;  %v17148_v7 = vmul.f32 -1.442695, %v14743_v26  ;;  %v14752_v23 = vmul.f32 %v14738_v40, %v24646_v15  ;;  %v14733_v39 = vadd.f32 %v14732_v50, %v25118_v13 }
0x1219   : > { %18952 = vpow2.f32 %v17148_v7  ;;  %v17157_v3 = vmul.f32 -1.442695, %v14752_v23  ;;  %v14749_v1 = vmul.f32 %v14733_v39, %v24646_v15 }
0x121b   : > { %18954 = vpow2.f32 %v17157_v3  ;;  %v17154_v4 = vmul.f32 -1.442695, %v14749_v1 }
0x121d   : > { %18956 = vpow2.f32 %v17154_v4 }
0x1224   : > { %v18951_v36 = vpop.eup %18950 }
0x1225   : > { %v14794_v42 = vadd.f32 1.0, %v18951_v36 }
0x1226   : > { %v18953_v33 = vpop.eup %18952 }
0x1227   : > { %v14791_v52 = vadd.f32 1.0, %v18953_v33  ;;  %18958 = vrcp.f32 %v14794_v42 }
0x1228   : > { %v18955_v18 = vpop.eup %18954 }
0x1229   : > { %v14800_v5 = vadd.f32 1.0, %v18955_v18 }
0x122a   : > { %v18957_v20 = vpop.eup %18956 }
0x122b   : > { %18960 = vrcp.f32 %v14800_v5  ;;  %v14797_v35 = vadd.f32 1.0, %v18957_v20 }
0x122c   : > { %18962 = vrcp.f32 %v14791_v52 }
0x122d   : > { %18964 = vrcp.f32 %v14797_v35 }
0x1234   : > { %v18959_v58 = vpop.eup %18958 }
0x1235   : > { %v14830_v6 = vmul.f32 %v18959_v58, %v14746_v19 }
0x1237   : > { %v25142_v22 = vadd.f32 %v14830_v6, %v24664_v25  ;;  %v17165_v25 = vld [vmem:[%s25627_s9 + $0x138] sm:$0xff] }
0x1238   : > { %v18961_v0 = vpop.eup %18960 }
0x1239   : > { %v18963_v17 = vpop.eup %18962  ;;  %v14836_v30 = vmul.f32 %v18961_v0, %v14752_v23 }
0x123a   : > { %v18965_v48 = vpop.eup %18964  ;;  %v14827_v34 = vmul.f32 %v18963_v17, %v14743_v26 }
0x123b   : > { %v14833_v46 = vmul.f32 %v18965_v48, %v14749_v1  ;;  %v25133_v47 = vadd.f32 %v14836_v30, %v24655_v2 }
0x123c   : > { %v25147_v2 = vadd.f32 %v14827_v34, %v24669_v55  ;;  %v17164_v55 = vld [vmem:[%s25627_s9 + $0x130] sm:$0xff] }
0x123d   : > { %18531 = vmatprep.subr.mxu0 %v25133_v47  ;;  %v25137_v12 = vadd.f32 %v14833_v46, %v24659_v61  ;;  %v25153_v61 = vld [vmem:[%s25627_s9 + $0x108] sm:$0xff] }
0x123e   : > { %18532 = vmatpush3.msra.mxu0 %v25133_v47 }
0x123f   : > { %18533 = vmatprep.subr.mxu0 %v25137_v12 }
0x1240   : > { %18534 = vmatpush3.msra.mxu0 %v25137_v12 }
0x1241   : > { %18535 = vmatprep.subr.mxu0 %v25142_v22 }
0x1242   : > { %18536 = vmatpush3.msra.mxu0 %v25142_v22 }
0x1243   : > { %18537 = vmatprep.subr.mxu0 %v25147_v2 }
0x1244   : > { %18538 = vmatpush3.msra.mxu0 %v25147_v2 }
0x1245   : > { %18540 = vmatmul.mubr.msk.f32.vlgmr.msra.gmra.mxu0 %vm571_vm0, %v25153_v61  ;;  %18545 = vmatprep.subr.mxu0 %v25933_v51 }
0x1246   : > { %18546 = vmatpush3.msra.mxu0 %v17165_v25  ;;  %18542 = vmatprep.mubr.msk.f32.mxu0 %vm571_vm0, %v25162_v16 }
0x1247   : > { %18547 = vmatprep.subr.mxu0 %v25933_v51 }
0x1248   : > { %18548 = vmatpush3.msra.mxu0 %v17164_v55 }
0x1249   : > { %18543 = vmatmul.mubr.msk.f32.gmra.mxu0 %vm571_vm0, %v25176_v41  ;;  %18549 = vmatprep.subr.mxu0 %v25933_v51 }
0x124a   : > { %18550 = vmatpush3.msra.mxu0 %v17163_v11  ;;  %18553 = vmatprep.mubr.msk.f32.mxu0 %vm19165_vm7, %v25933_v51 }
0x124b   : > { %18551 = vmatprep.subr.mxu0 %v25933_v51 }
0x124c   : > { %18552 = vmatpush3.msra.mxu0 %v17162_v8 }
0x124d   : > { %18554 = vmatmul.mubr.msk.f32.vlgmr.msra.gmra.mxu0 %vm571_vm0, %v24295_v59  ;;  %18556 = vmatprep.subr.msk.mxu0 %vm571_vm0, %v24295_v59 }
0x124e   : > { %18557 = vmatpush3.xpose.msk.msra.mxu0 %vm571_vm0, %v24295_v59  ;;  %18558 = vmatprep.mubr.msk.f32.mxu0 %vm571_vm0, %v17166_v28 }
0x1251   : > { %18559 = vmatmul.mubr.msk.f32.vlgmr.msra.gmra.mxu0 %vm571_vm0, %v17167_v44 }
0x1252   : > { %18561 = vmatprep.mubr.msk.f32.mxu0 %vm571_vm0, %v17168_v9 }
0x1255   : > { %18562 = vmatmul.mubr.msk.f32.gmra.mxu0 %vm571_vm0, %v17169_v37 }
0x1266   : > { %v14633_v59 = vpop.f32.mrf.mxu0 }
0x1267   : > { %v14634_v7 = vadd.f32 %v14633_v59, %v25123_v45 }
0x1268   : > { %v14635_v19 = vpop.f32.mrf.mxu0 }
0x1269   : > { %v14636_v57 = vadd.f32 %v14635_v19, %v25123_v45  ;;  %v25232_v45 = vmul.f32 %v14634_v7, %v24646_v15 }
0x126a   : > { %v14639_v21 = vpop.f32.mrf.mxu0 }
0x126b   : > { %v14640_v62 = vadd.f32 %v14639_v21, %v25120_v49  ;;  %v25216_v40 = vmul.f32 %v14636_v57, %v24646_v15 }
0x126c   : > { %v14641_v26 = vpop.f32.mrf.mxu0 }
0x126d   : > { %v14642_v50 = vadd.f32 %v14641_v26, %v25120_v49  ;;  %v25225_v1 = vmul.f32 %v14640_v62, %v24646_v15  ;;  %v17147_v36 = vmul.f32 -1.442695, %v25216_v40 }
0x126e   : > { %v14645_v23 = vpop.f32.mrf.mxu0 }
0x126f   : > { %v25221_v39 = vmul.f32 %v14642_v50, %v24646_v15  ;;  %v14646_v3 = vadd.f32 %v14645_v23, %v25118_v13  ;;  %v17149_v35 = vmul.f32 -1.442695, %v25225_v1 }
0x1270   : > { %v14647_v4 = vpop.f32.mrf.mxu0 }
0x1271   : > { %v17150_v33 = vmul.f32 -1.442695, %v25221_v39  ;;  %v14747_v42 = vmul.f32 %v14646_v3, %v24646_v15  ;;  %v14648_v49 = vadd.f32 %v14647_v4, %v25118_v13  ;;  %v17146_v13 = vmul.f32 -1.442695, %v25232_v45 }
0x1272   : > { %v14651_v18 = vpop.f32.mrf.mxu0 }
0x1273   : > { %18966 = vpow2.f32 %v17150_v33  ;;  %v17152_v52 = vmul.f32 -1.442695, %v14747_v42  ;;  %v14748_v5 = vmul.f32 %v14648_v49, %v24646_v15  ;;  %v14652_v20 = vadd.f32 %v14651_v18, %v25116_v63 }
0x1274   : > { %v14653_v58 = vpop.f32.mrf.mxu0  ;;  %18968 = vpow2.f32 %v17147_v36 }
0x1275   : > { %v17153_v0 = vmul.f32 -1.442695, %v14748_v5  ;;  %v14750_v17 = vmul.f32 %v14652_v20, %v24646_v15  ;;  %v14654_v30 = vadd.f32 %v14653_v58, %v25116_v63  ;;  %18970 = vpow2.f32 %v17152_v52 }
0x1277   : > { %18972 = vpow2.f32 %v17153_v0  ;;  %v17155_v48 = vmul.f32 -1.442695, %v14750_v17  ;;  %v14751_v6 = vmul.f32 %v14654_v30, %v24646_v15 }
0x1278   : > { %18974 = vpow2.f32 %v17149_v35 }
0x1279   : > { %18976 = vpow2.f32 %v17155_v48  ;;  %v17156_v46 = vmul.f32 -1.442695, %v14751_v6 }
0x127a   : > { %18978 = vpow2.f32 %v17146_v13 }
0x127b   : > { %18980 = vpow2.f32 %v17156_v46 }
0x1280   : > { %v18967_v34 = vpop.eup %18966 }
0x1281   : > { %v18969_v25 = vpop.eup %18968  ;;  %v14793_v11 = vadd.f32 1.0, %v18967_v34 }
0x1282   : > { %v18971_v55 = vpop.eup %18970  ;;  %v14790_v21 = vadd.f32 1.0, %v18969_v25 }
0x1283   : > { %v14795_v9 = vadd.f32 1.0, %v18971_v55  ;;  %18982 = vrcp.f32 %v14793_v11  ;;  %v25307_v55 = vld [vmem:[%s25630_s12] sm:$0xff] }
0x1284   : > { %v18973_v8 = vpop.eup %18972 }
0x1285   : > { %v18975_v28 = vpop.eup %18974  ;;  %v14796_v44 = vadd.f32 1.0, %v18973_v8 }
0x1286   : > { %v18977_v63 = vpop.eup %18976  ;;  %v14792_v57 = vadd.f32 1.0, %v18975_v28 }
0x1287   : > { %v18979_v37 = vpop.eup %18978  ;;  %v14798_v59 = vadd.f32 1.0, %v18977_v63  ;;  %18984 = vrcp.f32 %v14796_v44  ;;  %v25319_v63 = vld [vmem:[%s25630_s12 + $0x8] sm:$0xff] }
0x1288   : > { %v18981_v19 = vpop.eup %18980  ;;  %v14789_v26 = vadd.f32 1.0, %v18979_v37 }
0x1289   : > { %18986 = vrcp.f32 %v14798_v59  ;;  %v14799_v62 = vadd.f32 1.0, %v18981_v19  ;;  %v25331_v59 = vld [vmem:[%s25630_s12 + $0x10] sm:$0xff] }
0x128a   : > { %18988 = vrcp.f32 %v14795_v9 }
0x128b   : > { %18990 = vrcp.f32 %v14799_v62  ;;  %v25345_v62 = vld [vmem:[%s25630_s12 + $0x18] sm:$0xff] }
0x128c   : > { %18992 = vrcp.f32 %v14792_v57 }
0x128d   : > { %18994 = vrcp.f32 %v14790_v21 }
0x128e   : > { %18996 = vrcp.f32 %v14789_v26 }
0x1290   : > { %v18983_v50 = vpop.eup %18982 }
0x1291   : > { %v14829_v58 = vmul.f32 %v18983_v50, %v25221_v39 }
0x1294   : > { %v18985_v7 = vpop.eup %18984 }
0x1295   : > { %v14832_v49 = vmul.f32 %v18985_v7, %v14748_v5 }
0x1296   : > { %v18987_v23 = vpop.eup %18986 }
0x1297   : > { %v18989_v3 = vpop.eup %18988  ;;  %v14834_v36 = vmul.f32 %v18987_v23, %v14750_v17  ;;  %v25252_v5 = vadd.f32 %v14832_v49, %v24779_v54  ;;  %v17182_v49 = vld [vmem:[%s25628_s10 + $0x100] sm:$0xff] }
0x1298   : > { %v18991_v4 = vpop.eup %18990  ;;  %v14831_v20 = vmul.f32 %v18989_v3, %v14747_v42 }
0x1299   : > { %v18993_v33 = vpop.eup %18992  ;;  %v14835_v18 = vmul.f32 %v18991_v4, %v14751_v6  ;;  %v25247_v13 = vadd.f32 %v14834_v36, %v24774_v60 }
0x129a   : > { %v18995_v52 = vpop.eup %18994  ;;  %v14828_v30 = vmul.f32 %v18993_v33, %v25225_v1  ;;  %v25256_v17 = vadd.f32 %v14831_v20, %v24783_v10  ;;  %v17183_v33 = vld [vmem:[%s25628_s10 + $0x108] sm:$0xff] }
0x129b   : > { %v18997_v35 = vpop.eup %18996  ;;  %v25243_v0 = vadd.f32 %v14835_v18, %v24770_v27  ;;  %v14826_v48 = vmul.f32 %v18995_v52, %v25216_v40  ;;  %v25261_v27 = vadd.f32 %v14829_v58, %v24788_v43  ;;  %v25289_v43 = vpop.permute.xlu0 %14898  ;;  %v17185_v18 = vld [vmem:[%s25628_s10 + $0x118] sm:$0xff]  ;;  %v17184_v52 = vld [vmem:[%s25628_s10 + $0x110] sm:$0xff] }
0x129c   : > { %v14825_v42 = vmul.f32 %v18997_v35, %v25232_v45  ;;  %v25264_v60 = vadd.f32 %v14828_v30, %v24791_v32 }
0x129d   : > { %14942 = vmatprep.subr.mxu1 %v25243_v0  ;;  %v25269_v54 = vadd.f32 %v14826_v48, %v24796_v29  ;;  %v25291_v29 = vpop.permute.xlu1 %14903 }
0x129e   : > { %14943 = vmatpush1.msra.mxu1 %v25247_v13  ;;  %v25272_v10 = vadd.f32 %v14825_v42, %v24799_v31 }
0x129f   : > { %14944 = vmatprep.subr.mxu1 %v25252_v5  ;;  %v25294_v40 = vpop.permute.xlu0 %14888 }
0x12a0   : > { %14945 = vmatpush1.msra.mxu1 %v25256_v17 }
0x12a1   : > { %14946 = vmatprep.subr.mxu1 %v25261_v27  ;;  %v25300_v1 = vpop.permute.xlu1 %14893 }
0x12a2   : > { %14947 = vmatpush1.msra.mxu1 %v25264_v60 }
0x12a3   : > { %14948 = vmatprep.subr.mxu1 %v25269_v54  ;;  %v15176_v8 = vpop.permute.xlu0 %15175 }
0x12a4   : > { %14949 = vmatpush1.msra.mxu1 %v25272_v10 }
0x12a5   : > { %17187 = vmatmul.mubr.msk.f32.vlgmr.msra.gmra.mxu1 %vm571_vm0, %v25112_v24  ;;  %v15171_v57 = vpop.permute.xlu1 %15170 }
0x12a6   : > { %14988 = vmatprep.mubr.f32.mxu1 %v25933_v51 }
0x12a7   : > { %v15186_v4 = vpop.permute.xlu0 %15185 }
0x12a9   : > { %17188 = vmatmul.mubr.msk.f32.gmra.mxu1 %vm571_vm0, %v25153_v61  ;;  %v15181_v23 = vpop.permute.xlu1 %15180 }
0x12aa   : > { %14994 = vmatprep.mubr.f32.mxu1 %v25933_v51 }
0x12ad   : > { %17189 = vmatmul.mubr.msk.f32.gmra.mxu1 %vm571_vm0, %v25162_v16  ;;  %v17195_v16 = vld [vmem:[%s25629_s11 + $0x2] ss:$0 sm:$0xff] }
0x12ae   : > { %15000 = vmatprep.mubr.f32.mxu1 %v25933_v51 }
0x12b1   : > { %17190 = vmatmul.mubr.msk.f32.gmra.mxu1 %vm571_vm0, %v25176_v41 }
0x12b2   : > { %15421 = vmatprep.mubr.f32.mxu1 %v25933_v51 }
0x1305   : > { %v18541_v32 = vpop.f32.mrf.mxu0 }
0x1306   : > { %v15079_v6 = vadd.f32 %v18541_v32, %v25300_v1 }
0x1307   : > { %v15073_v31 = vpop.f32.mrf.mxu0 }
0x1308   : > { %v15074_v25 = vadd.f32 %v15073_v31, %v25294_v40 }
0x1309   : > { %v18544_v24 = vpop.f32.mrf.mxu0 }
0x130a   : > { %v15089_v61 = vadd.f32 %v18544_v24, %v25291_v29 }
0x130b   : > { %v15083_v39 = vpop.f32.mrf.mxu0 }
0x130c   : > { %v15084_v41 = vadd.f32 %v15083_v39, %v25289_v43  ;;  %18564 = vmatprep.subr.mxu0 %v15089_v61 }
0x130d   : > { %v15164_v45 = vpop.f32.mrf.mxu0  ;;  %18565 = vmatpush3.msra.mxu0 %v15089_v61 }
0x130e   : > { %v15165_v46 = vadd.f32 %v17195_v16, %v15164_v45  ;;  %18566 = vmatprep.subr.mxu0 %v15084_v41 }
0x130f   : > { %v18555_v34 = vpop.f32.mrf.mxu0  ;;  %18567 = vmatpush3.msra.mxu0 %v15084_v41 }
0x1310   : > { %18568 = vmatprep.subr.mxu0 %v15079_v6  ;;  %v25310_v11 = vmul.f32 %v25307_v55, %v15165_v46  ;;  %v25322_v9 = vmul.f32 %v25319_v63, %v15165_v46  ;;  %v25334_v19 = vmul.f32 %v25331_v59, %v15165_v46  ;;  %v15288_v26 = vmul.f32 %v25345_v62, %v15165_v46 }
0x1311   : > { %v18560_v28 = vpop.f32.mrf.mxu0  ;;  %18569 = vmatpush3.msra.mxu0 %v15079_v6 }
0x1312   : > { %v25312_v44 = vadd.f32 %v18560_v28, %v15176_v8  ;;  %18570 = vmatprep.subr.mxu0 %v15074_v25  ;;  %18572 = vmatprep.mubr.msk.f32.mxu0 %vm571_vm0, %v25310_v11 }
0x1313   : > { %v15266_v37 = vpop.f32.mrf.mxu0  ;;  %18571 = vmatpush3.msra.mxu0 %v15074_v25 }
0x1314   : > { %15307 = vrot.lane.b32.xlu1 %v25312_v44, %s19166_s29  ;;  %15295 = vrot.lane.b32.xlu0 %v25312_v44, %s19167_s24  ;;  %v25338_v21 = vadd.f32 %v15266_v37, %v15171_v57 }
0x1315   : > { %18573 = vmatmul.mubr.msk.f32.vlgmr.msra.gmra.mxu0 %vm571_vm0, %v25322_v9  ;;  %v18563_v50 = vpop.f32.mrf.mxu0 }
0x1316   : > { %18575 = vmatprep.mubr.msk.f32.mxu0 %vm571_vm0, %v25334_v19  ;;  %v25364_v36 = vadd.f32 %v18563_v50, %v15186_v4 }
0x1317   : > { %v15276_v7 = vpop.f32.mrf.mxu0 }
0x1318   : > { %15305 = vrot.lane.b32.xlu0 %v25338_v21, %s19166_s29  ;;  %15293 = vrot.lane.b32.xlu1 %v25338_v21, %s19167_s24  ;;  %v25358_v3 = vadd.f32 %v15276_v7, %v15181_v23 }
0x1319   : > { %18576 = vmatmul.mubr.msk.f32.gmra.mxu0 %vm571_vm0, %v15288_v26 }
0x131a   : > { %15686 = vmatprep.mubr.f32.mxu0 %v25933_v51 }
0x131c   : > { %15319 = vrot.lane.b32.xlu0 %v25312_v44, %s19168_s18  ;;  %15317 = vrot.lane.b32.xlu1 %v25338_v21, %s19168_s18 }
0x1320   : > { %15309 = vrot.lane.b32.xlu0 %v25358_v3, %s19166_s29  ;;  %15297 = vrot.lane.b32.xlu1 %v25358_v3, %s19167_s24 }
0x1324   : > { %15299 = vrot.lane.b32.xlu0 %v25364_v36, %s19167_s24  ;;  %15321 = vrot.lane.b32.xlu1 %v25358_v3, %s19168_s18  ;;  %s25571_s24 = scalar_lea.vmem %s25631_s13, %s18620_s15 }
0x1328   : > { %15323 = vrot.lane.b32.xlu0 %v25364_v36, %s19168_s18  ;;  %15311 = vrot.lane.b32.xlu1 %v25364_v36, %s19166_s29 }
0x132c   : > { %16013 = vperm.xlu0 %18660, %v17183_v33   ;;  %16008 = vperm.xlu1 %18661, %v17182_v49  }
0x1330   : > { %16023 = vperm.xlu0 %18660, %v17185_v18   ;;  %16018 = vperm.xlu1 %18661, %v17184_v52  }
0x1365   : > { %v14984_v20 = vpop.f32.mrf.mxu1 }
0x1366   : > { %v14985_v46 = vadd.f32 %v14984_v20, %v25294_v40 }
0x1367   : > { %v14986_v35 = vpop.f32.mrf.mxu1 }
0x1368   : > { %v14987_v6 = vadd.f32 %v14986_v35, %v25294_v40 }
0x1369   : > { %v14990_v58 = vpop.f32.mrf.mxu1 }
0x136a   : > { %v14991_v45 = vadd.f32 %v14990_v58, %v25300_v1 }
0x136b   : > { %v14992_v30 = vpop.f32.mrf.mxu1 }
0x136c   : > { %v14993_v41 = vadd.f32 %v14992_v30, %v25300_v1 }
0x136d   : > { %v14996_v48 = vpop.f32.mrf.mxu1 }
0x136e   : > { %v14997_v16 = vadd.f32 %v14996_v48, %v25289_v43 }
0x136f   : > { %v14998_v42 = vpop.f32.mrf.mxu1 }
0x1370   : > { %v14999_v39 = vadd.f32 %v14998_v42, %v25289_v43 }
0x1371   : > { %v15002_v32 = vpop.f32.mrf.mxu1 }
0x1372   : > { %v15003_v61 = vadd.f32 %v15002_v32, %v25291_v29 }
0x1373   : > { %v15004_v31 = vpop.f32.mrf.mxu1 }
0x1374   : > { %v15005_v24 = vadd.f32 %v15004_v31, %v25291_v29 }
0x1376   : > { %15381 = vmatprep.subr.mxu1 %v15005_v24 }
0x1377   : > { %15382 = vmatpush1.msra.mxu1 %v15003_v61 }
0x1378   : > { %15383 = vmatprep.subr.mxu1 %v14999_v39 }
0x1379   : > { %15384 = vmatpush1.msra.mxu1 %v14997_v16 }
0x137a   : > { %15385 = vmatprep.subr.mxu1 %v14993_v41 }
0x137b   : > { %15386 = vmatpush1.msra.mxu1 %v14991_v45 }
0x137c   : > { %15387 = vmatprep.subr.mxu1 %v14987_v6 }
0x137d   : > { %15388 = vmatpush1.msra.mxu1 %v14985_v46 }
0x137e   : > { %17202 = vmatmul.mubr.msk.f32.vlgmr.msra.gmra.mxu1 %vm571_vm0, %v25310_v11 }
0x137f   : > { %15427 = vmatprep.mubr.f32.mxu1 %v25933_v51 }
0x1382   : > { %17203 = vmatmul.mubr.msk.f32.gmra.mxu1 %vm571_vm0, %v25322_v9 }
0x1383   : > { %15433 = vmatprep.mubr.f32.mxu1 %v25933_v51 }
0x1386   : > { %v15296_v43 = vpop.permute.xlu0 %15295  ;;  %v15308_v29 = vpop.permute.xlu1 %15307  ;;  %17204 = vmatmul.mubr.msk.f32.gmra.mxu1 %vm571_vm0, %v25334_v19 }
0x1387   : > { %v15330_v1 = vsel %vm12344_vm12, %v25312_v44, %v15296_v43  ;;  %15439 = vmatprep.mubr.f32.mxu1 %v25933_v51 }
0x1388   : > { %v25402_v34 = vsel %vm6863_vm11, %v15330_v1, %v15308_v29 }
0x138a   : > { %17205 = vmatmul.mubr.msk.f32.gmra.mxu1 %vm571_vm0, %v15288_v26 }
0x138b   : > { %18586 = vmatprep.mubr.msk.f32.mxu1 %vm571_vm0, %v25307_v55 }
0x13d5   : > { %v18574_v40 = vpop.f32.mrf.mxu0 }
0x13d6   : > { %v15536_v11 = vmul.f32 0.35355338, %v18574_v40 }
0x13d7   : > { %v15512_v25 = vpop.f32.mrf.mxu0 }
0x13d8   : > { %v15533_v8 = vmul.f32 0.35355338, %v15512_v25  ;;  %v15548_v37 = vadd.f32 %v15536_v11, %v24338_v56 }
0x13d9   : > { %v18577_v28 = vpop.f32.mrf.mxu0 }
0x13da   : > { %v15542_v44 = vmul.f32 0.35355338, %v18577_v28  ;;  %v15545_v57 = vadd.f32 %v15533_v8, %v24342_v38  ;;  %v15574_v23 = vsel %vm5189_vm4, %v15548_v37, -inf }
0x13db   : > { %v15522_v9 = vpop.f32.mrf.mxu0 }
0x13dc   : > { %v15554_v19 = vadd.f32 %v15542_v44, %v24346_v14  ;;  %v15539_v50 = vmul.f32 0.35355338, %v15522_v9  ;;  %v15573_v4 = vsel %vm5189_vm4, %v15545_v57, -inf }
0x13de   : > { %v15577_v7 = vsel %vm5189_vm4, %v15554_v19, -inf  ;;  %v15551_v26 = vadd.f32 %v15539_v50, %v24368_v53 }
0x13df   : > { %v15578_v49 = vmax.f32 %v15574_v23, %v15577_v7 }
0x13e0   : > { %v15575_v33 = vsel %vm5189_vm4, %v15551_v26, -inf }
0x13e1   : > { %v15576_v18 = vmax.f32 %v15573_v4, %v15575_v33 }
0x13e3   : > { %v15579_v52 = vmax.f32 %v15576_v18, %v15578_v49 }
0x13e5   : > { %v15580_v20 = vrot.slane %v15579_v52, 4 }
0x13e7   : > { %v15581_v35 = vmax.f32 %v15579_v52, %v15580_v20 }
0x13e9   : > { %v15582_v58 = vrot.slane %v15581_v35, 2 }
0x13eb   : > { %v15583_v30 = vmax.f32 %v15581_v35, %v15582_v58 }
0x13ed   : > { %v15584_v48 = vrot.slane %v15583_v30, 1 }
0x13ef   : > { %v15585_v42 = vmax.f32 %v15583_v30, %v15584_v48 }
0x13f1   : > { %v15597_v32 = vsub.f32 %v15554_v19, %v15585_v42  ;;  %v15594_v31 = vsub.f32 %v15551_v26, %v15585_v42  ;;  %v15591_v24 = vsub.f32 %v15548_v37, %v15585_v42  ;;  %v15588_v39 = vsub.f32 %v15545_v57, %v15585_v42 }
0x13f3   : > { %v15620_v61 = vmul.f32 1.442695, %v15597_v32  ;;  %v15614_v16 = vmul.f32 1.442695, %v15594_v31  ;;  %v15608_v41 = vmul.f32 1.442695, %v15591_v24 }
0x13f4   : > { %v15602_v45 = vmul.f32 1.442695, %v15588_v39 }
0x13f5   : > { %18998 = vpow2.f32 %v15620_v61 }
0x13f6   : > { %19000 = vpow2.f32 %v15614_v16 }
0x13f7   : > { %19002 = vpow2.f32 %v15608_v41 }
0x13f8   : > { %19004 = vpow2.f32 %v15602_v45 }
0x1402   : > { %v25419_v6 = vpop.eup %18998 }
0x1403   : > { %18578 = vmatprep.subr.mxu1 %v25419_v6  ;;  %v25422_v46 = vpop.eup %19000 }
0x1404   : > { %18579 = vmatpush3.msra.mxu1 %v25419_v6  ;;  %v25426_v43 = vpop.eup %19002 }
0x1405   : > { %18580 = vmatprep.subr.mxu1 %v25422_v46  ;;  %v25430_v29 = vpop.eup %19004 }
0x1406   : > { %18581 = vmatpush3.msra.mxu1 %v25422_v46 }
0x1407   : > { %18582 = vmatprep.subr.mxu1 %v25426_v43 }
0x1408   : > { %18583 = vmatpush3.msra.mxu1 %v25426_v43 }
0x1409   : > { %18584 = vmatprep.subr.mxu1 %v25430_v29 }
0x140a   : > { %18585 = vmatpush3.msra.mxu1 %v25430_v29 }
0x140b   : > { %18587 = vmatmul.mubr.msk.f32.vlgmr.msra.gmra.mxu1 %vm571_vm0, %v25319_v63 }
0x140c   : > { %18589 = vmatprep.mubr.msk.f32.mxu1 %vm571_vm0, %v25331_v59 }
0x140f   : > { %18590 = vmatmul.mubr.msk.f32.gmra.mxu1 %vm571_vm0, %v25345_v62 }
0x1410   : > { %15896 = vmatprep.mubr.f32.mxu1 %v25933_v51 }
0x143e   : > { %v15423_v1 = vpop.f32.mrf.mxu1 }
0x143f   : > { %v15531_v44 = vmul.f32 0.35355338, %v15423_v1 }
0x1440   : > { %v15425_v40 = vpop.f32.mrf.mxu1 }
0x1441   : > { %v15532_v19 = vmul.f32 0.35355338, %v15425_v40  ;;  %v15543_v4 = vadd.f32 %v15531_v44, %v24342_v38 }
0x1442   : > { %v15429_v25 = vpop.f32.mrf.mxu1 }
0x1443   : > { %v15534_v37 = vmul.f32 0.35355338, %v15429_v25  ;;  %v15544_v35 = vadd.f32 %v15532_v19, %v24342_v38 }
0x1444   : > { %v15431_v11 = vpop.f32.mrf.mxu1 }
0x1445   : > { %v15535_v7 = vmul.f32 0.35355338, %v15431_v11  ;;  %v15546_v49 = vadd.f32 %v15534_v37, %v24338_v56 }
0x1446   : > { %v15435_v8 = vpop.f32.mrf.mxu1 }
0x1447   : > { %v15537_v28 = vmul.f32 0.35355338, %v15435_v8  ;;  %v15547_v58 = vadd.f32 %v15535_v7, %v24338_v56 }
0x1448   : > { %v15437_v9 = vpop.f32.mrf.mxu1 }
0x1449   : > { %v15538_v57 = vmul.f32 0.35355338, %v15437_v9  ;;  %v15549_v26 = vadd.f32 %v15537_v28, %v24368_v53 }
0x144a   : > { %v15441_v50 = vpop.f32.mrf.mxu1 }
0x144b   : > { %v15540_v23 = vmul.f32 0.35355338, %v15441_v50  ;;  %v15550_v18 = vadd.f32 %v15538_v57, %v24368_v53  ;;  %v15555_v30 = vmax.f32 %v15543_v4, %v15549_v26 }
0x144c   : > { %v15443_v33 = vpop.f32.mrf.mxu1 }
0x144d   : > { %v15552_v52 = vadd.f32 %v15540_v23, %v24346_v14  ;;  %v15541_v20 = vmul.f32 0.35355338, %v15443_v33  ;;  %v15564_v32 = vmax.f32 %v15544_v35, %v15550_v18 }
0x144f   : > { %v15556_v48 = vmax.f32 %v15546_v49, %v15552_v52  ;;  %v15553_v42 = vadd.f32 %v15541_v20, %v24346_v14 }
0x1451   : > { %v15557_v31 = vmax.f32 %v15555_v30, %v15556_v48  ;;  %v15565_v24 = vmax.f32 %v15547_v58, %v15553_v42 }
0x1453   : > { %v15558_v61 = vrot.slane %v15557_v31, 4  ;;  %v15566_v39 = vmax.f32 %v15564_v32, %v15565_v24  ;;  %v15294_v24 = vpop.permute.xlu1 %15293 }
0x1455   : > { %v15559_v16 = vmax.f32 %v15557_v31, %v15558_v61  ;;  %v15567_v41 = vrot.slane %v15566_v39, 4  ;;  %v15306_v61 = vpop.permute.xlu0 %15305 }
0x1457   : > { %v15560_v45 = vrot.slane %v15559_v16, 2  ;;  %v15568_v53 = vmax.f32 %v15566_v39, %v15567_v41  ;;  %v15329_v39 = vsel %vm12344_vm12, %v25338_v21, %v15294_v24 }
0x1458   : > { %v15333_v41 = vsel %vm6863_vm11, %v15329_v39, %v15306_v61 }
0x1459   : > { %v15561_v1 = vmax.f32 %v15559_v16, %v15560_v45  ;;  %v15569_v40 = vrot.slane %v15568_v53, 2  ;;  %v15318_v16 = vpop.permute.xlu1 %15317 }
0x145a   : > { %v15337_v45 = vsel %vm12353_vm13, %v15333_v41, %v15318_v16 }
0x145b   : > { %v15562_v25 = vrot.slane %v15561_v1, 1  ;;  %v15570_v11 = vmax.f32 %v15568_v53, %v15569_v40  ;;  %v25488_v53 = vmul.f32 %v25307_v55, %v15337_v45 }
0x145d   : > { %v15571_v38 = vrot.slane %v15570_v11, 1  ;;  %v15563_v8 = vmax.f32 %v15561_v1, %v15562_v25 }
0x145f   : > { %v15572_v56 = vmax.f32 %v15570_v11, %v15571_v38  ;;  %v15595_v28 = vsub.f32 %v15552_v52, %v15563_v8  ;;  %v15592_v14 = vsub.f32 %v15549_v26, %v15563_v8  ;;  %v15589_v19 = vsub.f32 %v15546_v49, %v15563_v8  ;;  %v15320_v11 = vpop.permute.xlu0 %15319  ;;  %v15298_v38 = vpop.permute.xlu1 %15297 }
0x1460   : > { %v15586_v33 = vsub.f32 %v15543_v4, %v15563_v8 }
0x1461   : > { %v15596_v44 = vsub.f32 %v15553_v42, %v15572_v56  ;;  %v15593_v9 = vsub.f32 %v15550_v18, %v15572_v56  ;;  %v15590_v37 = vsub.f32 %v15547_v58, %v15572_v56  ;;  %v15616_v50 = vmul.f32 1.442695, %v15595_v28 }
0x1462   : > { %v15587_v7 = vsub.f32 %v15544_v35, %v15572_v56  ;;  %v15610_v20 = vmul.f32 1.442695, %v15592_v14  ;;  %v15604_v48 = vmul.f32 1.442695, %v15589_v19  ;;  %v15598_v31 = vmul.f32 1.442695, %v15586_v33 }
0x1463   : > { %v15618_v57 = vmul.f32 1.442695, %v15596_v44  ;;  %v15612_v23 = vmul.f32 1.442695, %v15593_v9  ;;  %v15606_v30 = vmul.f32 1.442695, %v15590_v37  ;;  %v15310_v8 = vpop.permute.xlu0 %15309  ;;  %v15322_v56 = vpop.permute.xlu1 %15321  ;;  %v15331_v37 = vsel %vm12344_vm12, %v25358_v3, %v15298_v38 }
0x1464   : > { %v15600_v32 = vmul.f32 1.442695, %v15587_v7 }
0x1465   : > { %19006 = vpow2.f32 %v15618_v57 }
0x1466   : > { %19008 = vpow2.f32 %v15616_v50 }
0x1467   : > { %19010 = vpow2.f32 %v15612_v23  ;;  %v15300_v44 = vpop.permute.xlu0 %15299  ;;  %v15312_v50 = vpop.permute.xlu1 %15311  ;;  %v15338_v23 = vsel %vm12353_vm13, %v25402_v34, %v15320_v11 }
0x1468   : > { %19012 = vpow2.f32 %v15610_v20  ;;  %v15332_v33 = vsel %vm12344_vm12, %v25364_v36, %v15300_v44  ;;  %v17173_v44 = vld [vmem:[%s25627_s9 + $0x178] sm:$0xff] }
0x1469   : > { %19014 = vpow2.f32 %v15606_v30 }
0x146a   : > { %19016 = vpow2.f32 %v15604_v48 }
0x146b   : > { %19018 = vpow2.f32 %v15600_v32  ;;  %v15324_v20 = vpop.permute.xlu0 %15323 }
0x146c   : > { %19020 = vpow2.f32 %v15598_v31 }
0x1472   : > { %v25450_v26 = vpop.eup %19006 }
0x1473   : > { %v25452_v49 = vpop.eup %19008  ;;  %15646 = vmatprep.subr.mxu0 %v25450_v26 }
0x1474   : > { %v25455_v4 = vpop.eup %19010  ;;  %15647 = vmatpush1.msra.mxu0 %v25452_v49 }
0x1475   : > { %v25458_v18 = vpop.eup %19012  ;;  %15648 = vmatprep.subr.mxu0 %v25455_v4 }
0x1476   : > { %v25461_v52 = vpop.eup %19014  ;;  %15649 = vmatpush1.msra.mxu0 %v25458_v18 }
0x1477   : > { %v25464_v35 = vpop.eup %19016  ;;  %15650 = vmatprep.subr.mxu0 %v25461_v52 }
0x1478   : > { %v25467_v58 = vpop.eup %19018  ;;  %15651 = vmatpush1.msra.mxu0 %v25464_v35 }
0x1479   : > { %v25470_v42 = vpop.eup %19020  ;;  %15652 = vmatprep.subr.mxu0 %v25467_v58 }
0x147a   : > { %15653 = vmatpush1.msra.mxu0 %v25470_v42 }
0x147b   : > { %17210 = vmatmul.mubr.msk.f32.vlgmr.msra.gmra.mxu0 %vm571_vm0, %v25307_v55 }
0x147c   : > { %15692 = vmatprep.mubr.f32.mxu0 %v25933_v51 }
0x147f   : > { %17211 = vmatmul.mubr.msk.f32.gmra.mxu0 %vm571_vm0, %v25319_v63 }
0x1480   : > { %15698 = vmatprep.mubr.f32.mxu0 %v25933_v51 }
0x1483   : > { %17212 = vmatmul.mubr.msk.f32.gmra.mxu0 %vm571_vm0, %v25331_v59 }
0x1484   : > { %15704 = vmatprep.mubr.f32.mxu0 %v25933_v51 }
0x1487   : > { %17213 = vmatmul.mubr.msk.f32.gmra.mxu0 %vm571_vm0, %v25345_v62 }
0x1488   : > { %18600 = vmatprep.mubr.msk.f32.mxu0 %vm571_vm0, %v25488_v53 }
0x14cb   : > { %v18588_v21 = vpop.f32.mrf.mxu1 }
0x14cd   : > { %v15777_v1 = vpop.f32.mrf.mxu1 }
0x14cf   : > { %v18591_v40 = vpop.f32.mrf.mxu1 }
0x14d0   : > { %19022 = vrcp.f32 %v18591_v40 }
0x14d1   : > { %19024 = vrcp.f32 %v18588_v21  ;;  %v15787_v25 = vpop.f32.mrf.mxu1 }
0x14d2   : > { %19026 = vrcp.f32 %v15787_v25 }
0x14d3   : > { %19028 = vrcp.f32 %v15777_v1 }
0x14dd   : > { %v19023_v55 = vpop.eup %19022 }
0x14de   : > { %v19025_v28 = vpop.eup %19024  ;;  %v15819_v9 = vmul.f32 %v19023_v55, %v25419_v6  ;;  %v15335_v6 = vsel %vm6863_vm11, %v15331_v37, %v15310_v8 }
0x14df   : > { %v19027_v14 = vpop.eup %19026  ;;  %v15813_v7 = vmul.f32 %v19025_v28, %v25426_v43  ;;  %v15339_v3 = vsel %vm12353_vm13, %v15335_v6, %v15322_v56  ;;  %v15342_v43 = vmul.f32 %v25319_v63, %v15338_v23  ;;  %v16009_v6 = vpop.permute.xlu1 %16008 }
0x14e0   : > { %18592 = vmatprep.subr.mxu0 %v15819_v9  ;;  %v15816_v57 = vmul.f32 %v19027_v14, %v25422_v46  ;;  %v19029_v19 = vpop.eup %19028  ;;  %v15336_v46 = vsel %vm6863_vm11, %v15332_v33, %v15312_v50  ;;  %v15343_v34 = vmul.f32 %v25331_v59, %v15339_v3  ;;  %v25554_v33 = vpop.permute.xlu0 %16013 }
0x14e1   : > { %18593 = vmatpush3.msra.mxu0 %v15819_v9  ;;  %v15810_v30 = vmul.f32 %v19029_v19, %v25430_v29  ;;  %v15340_v48 = vsel %vm12353_vm13, %v15336_v46, %v15324_v20 }
0x14e2   : > { %18594 = vmatprep.subr.mxu0 %v15816_v57  ;;  %v15344_v36 = vmul.f32 %v25345_v62, %v15340_v48 }
0x14e3   : > { %18595 = vmatpush3.msra.mxu0 %v15816_v57 }
0x14e4   : > { %18596 = vmatprep.subr.mxu0 %v15813_v7 }
0x14e5   : > { %18597 = vmatpush3.msra.mxu0 %v15813_v7 }
0x14e6   : > { %18598 = vmatprep.subr.mxu0 %v15810_v30 }
0x14e7   : > { %18599 = vmatpush3.msra.mxu0 %v15810_v30 }
0x14e8   : > { %18601 = vmatmul.mubr.msk.f32.vlgmr.msra.gmra.mxu0 %vm571_vm0, %v15342_v43 }
0x14e9   : > { %18603 = vmatprep.mubr.msk.f32.mxu0 %vm571_vm0, %v15343_v34 }
0x14ec   : > { %18604 = vmatmul.mubr.msk.f32.gmra.mxu0 %vm571_vm0, %v15344_v36 }
0x14ed   : > { %16102 = vmatprep.mubr.f32.mxu0 %v25933_v51 }
0x153b   : > { %v15688_v29 = vpop.f32.mrf.mxu0 }
0x153d   : > { %v15690_v32 = vpop.f32.mrf.mxu0 }
0x153f   : > { %v15694_v31 = vpop.f32.mrf.mxu0 }
0x1541   : > { %v15696_v63 = vpop.f32.mrf.mxu0 }
0x1543   : > { %v15700_v24 = vpop.f32.mrf.mxu0 }
0x1545   : > { %v15702_v61 = vpop.f32.mrf.mxu0 }
0x1546   : > { %19030 = vrcp.f32 %v15702_v61 }
0x1547   : > { %v15706_v59 = vpop.f32.mrf.mxu0 }
0x1548   : > { %19032 = vrcp.f32 %v15706_v59 }
0x1549   : > { %v15708_v39 = vpop.f32.mrf.mxu0 }
0x154a   : > { %19034 = vrcp.f32 %v15708_v39 }
0x154b   : > { %19036 = vrcp.f32 %v15700_v24 }
0x154c   : > { %19038 = vrcp.f32 %v15696_v63 }
0x154d   : > { %19040 = vrcp.f32 %v15694_v31 }
0x154e   : > { %19042 = vrcp.f32 %v15690_v32  ;;  %v25562_v32 = vpop.permute.xlu1 %16018 }
0x154f   : > { %19044 = vrcp.f32 %v15688_v29 }
0x1553   : > { %v19031_v62 = vpop.eup %19030 }
0x1554   : > { %v15815_v11 = vmul.f32 %v19031_v62, %v25455_v4  ;;  %v17170_v4 = vld [vmem:[%s25627_s9 + $0x160] sm:$0xff] }
0x1555   : > { %v19033_v16 = vpop.eup %19032 }
0x1556   : > { %v15817_v40 = vmul.f32 %v19033_v16, %v25452_v49 }
0x1557   : > { %v19035_v41 = vpop.eup %19034 }
0x1558   : > { %v19037_v45 = vpop.eup %19036  ;;  %v15818_v21 = vmul.f32 %v19035_v41, %v25450_v26 }
0x1559   : > { %v19039_v1 = vpop.eup %19038  ;;  %v15814_v8 = vmul.f32 %v19037_v45, %v25458_v18 }
0x155a   : > { %v19041_v25 = vpop.eup %19040  ;;  %15856 = vmatprep.subr.mxu1 %v15818_v21  ;;  %v15812_v55 = vmul.f32 %v19039_v1, %v25461_v52 }
0x155b   : > { %v19043_v38 = vpop.eup %19042  ;;  %15857 = vmatpush1.msra.mxu1 %v15817_v40  ;;  %v15811_v28 = vmul.f32 %v19041_v25, %v25464_v35 }
0x155c   : > { %v19045_v56 = vpop.eup %19044  ;;  %15858 = vmatprep.subr.mxu1 %v15815_v11  ;;  %v15809_v26 = vmul.f32 %v19043_v38, %v25467_v58 }
0x155d   : > { %15859 = vmatpush1.msra.mxu1 %v15814_v8  ;;  %v15808_v49 = vmul.f32 %v19045_v56, %v25470_v42  ;;  %v17171_v42 = vld [vmem:[%s25627_s9 + $0x168] sm:$0xff] }
0x155e   : > { %15860 = vmatprep.subr.mxu1 %v15812_v55 }
0x155f   : > { %15861 = vmatpush1.msra.mxu1 %v15811_v28 }
0x1560   : > { %15862 = vmatprep.subr.mxu1 %v15809_v26 }
0x1561   : > { %15863 = vmatpush1.msra.mxu1 %v15808_v49 }
0x1562   : > { %17218 = vmatmul.mubr.msk.f32.vlgmr.msra.gmra.mxu1 %vm571_vm0, %v25488_v53  ;;  %v17172_v53 = vld [vmem:[%s25627_s9 + $0x170] sm:$0xff] }
0x1563   : > { %15902 = vmatprep.mubr.f32.mxu1 %v25933_v51 }
0x1566   : > { %17219 = vmatmul.mubr.msk.f32.gmra.mxu1 %vm571_vm0, %v15342_v43 }
0x1567   : > { %15908 = vmatprep.mubr.f32.mxu1 %v25933_v51 }
0x156a   : > { %17220 = vmatmul.mubr.msk.f32.gmra.mxu1 %vm571_vm0, %v15343_v34  ;;  %v25558_v34 = vpop.permute.xlu0 %16023 }
0x156b   : > { %15914 = vmatprep.mubr.f32.mxu1 %v25933_v51 }
0x156e   : > { %17221 = vmatmul.mubr.msk.f32.gmra.mxu1 %vm571_vm0, %v15344_v36 }
0x156f   : > { %18614 = vmatprep.mubr.msk.f32.mxu1 %vm571_vm0, %v17170_v4 }
0x15a8   : > { %v18602_v18 = vpop.f32.mrf.mxu0 }
0x15aa   : > { %v15987_v52 = vpop.f32.mrf.mxu0 }
0x15ac   : > { %v18605_v35 = vpop.f32.mrf.mxu0 }
0x15ad   : > { %18606 = vmatprep.subr.mxu1 %v18605_v35 }
0x15ae   : > { %v15997_v58 = vpop.f32.mrf.mxu0  ;;  %18607 = vmatpush3.msra.mxu1 %v18605_v35 }
0x15af   : > { %18608 = vmatprep.subr.mxu1 %v15997_v58 }
0x15b0   : > { %18609 = vmatpush3.msra.mxu1 %v15997_v58 }
0x15b1   : > { %18610 = vmatprep.subr.mxu1 %v18602_v18 }
0x15b2   : > { %18611 = vmatpush3.msra.mxu1 %v18602_v18 }
0x15b3   : > { %18612 = vmatprep.subr.mxu1 %v15987_v52 }
0x15b4   : > { %18613 = vmatpush3.msra.mxu1 %v15987_v52 }
0x15b5   : > { %18615 = vmatmul.mubr.msk.f32.vlgmr.msra.gmra.mxu1 %vm571_vm0, %v17171_v42 }
0x15b6   : > { %18617 = vmatprep.mubr.msk.f32.mxu1 %vm571_vm0, %v17172_v53 }
0x15b9   : > { %18618 = vmatmul.mubr.msk.f32.gmra.mxu1 %vm571_vm0, %v17173_v44 }
0x1622   : > { %v15898_v9 = vpop.f32.mrf.mxu1 }
0x1624   : > { %v15900_v14 = vpop.f32.mrf.mxu1 }
0x1626   : > { %v15904_v37 = vpop.f32.mrf.mxu1 }
0x1628   : > { %v15906_v57 = vpop.f32.mrf.mxu1 }
0x162a   : > { %v15910_v19 = vpop.f32.mrf.mxu1 }
0x162c   : > { %v15912_v50 = vpop.f32.mrf.mxu1 }
0x162e   : > { %v15916_v7 = vpop.f32.mrf.mxu1 }
0x1630   : > { %v15918_v23 = vpop.f32.mrf.mxu1 }
0x1631   : > { %16062 = vmatprep.subr.mxu0 %v15918_v23 }
0x1632   : > { %16063 = vmatpush1.msra.mxu0 %v15916_v7 }
0x1633   : > { %16064 = vmatprep.subr.mxu0 %v15912_v50 }
0x1634   : > { %16065 = vmatpush1.msra.mxu0 %v15910_v19 }
0x1635   : > { %16066 = vmatprep.subr.mxu0 %v15906_v57 }
0x1636   : > { %16067 = vmatpush1.msra.mxu0 %v15904_v37 }
0x1637   : > { %16068 = vmatprep.subr.mxu0 %v15900_v14 }
0x1638   : > { %16069 = vmatpush1.msra.mxu0 %v15898_v9 }
0x1639   : > { %17226 = vmatmul.mubr.msk.f32.vlgmr.msra.gmra.mxu0 %vm571_vm0, %v17170_v4 }
0x163a   : > { %16108 = vmatprep.mubr.f32.mxu0 %v25933_v51 }
0x163d   : > { %17227 = vmatmul.mubr.msk.f32.gmra.mxu0 %vm571_vm0, %v17171_v42 }
0x163e   : > { %16114 = vmatprep.mubr.f32.mxu0 %v25933_v51 }
0x1641   : > { %17228 = vmatmul.mubr.msk.f32.gmra.mxu0 %vm571_vm0, %v17172_v53 }
0x1642   : > { %16120 = vmatprep.mubr.f32.mxu0 %v25933_v51 }
0x1645   : > { %17229 = vmatmul.mubr.msk.f32.gmra.mxu0 %vm571_vm0, %v17173_v44 }
0x1675   : > { %v18616_v3 = vpop.f32.mrf.mxu1 }
0x1676   : > { %v16199_v20 = vadd.f32 %v18616_v3, %v25554_v33 }
0x1677   : > { %v16193_v46 = vpop.f32.mrf.mxu1 }
0x1678   : > { %v16217_v30 = vmul.f32 %v16199_v20, %v24646_v15  ;;  %v16194_v43 = vadd.f32 %v16193_v46, %v16009_v6 }
0x1679   : > { %v18619_v48 = vpop.f32.mrf.mxu1 }
0x167a   : > { %v17239_v36 = vmul.f32 -1.442695, %v16217_v30  ;;  %v16214_v29 = vmul.f32 %v16194_v43, %v24646_v15  ;;  %v16209_v51 = vadd.f32 %v18619_v48, %v25558_v34 }
0x167b   : > { %v16203_v31 = vpop.f32.mrf.mxu1 }
0x167c   : > { %19046 = vpow2.f32 %v17239_v36  ;;  %v17236_v63 = vmul.f32 -1.442695, %v16214_v29  ;;  %v16223_v24 = vmul.f32 %v16209_v51, %v24646_v15  ;;  %v16204_v61 = vadd.f32 %v16203_v31, %v25562_v32 }
0x167e   : > { %19048 = vpow2.f32 %v17236_v63  ;;  %v17245_v59 = vmul.f32 -1.442695, %v16223_v24  ;;  %v16220_v39 = vmul.f32 %v16204_v61, %v24646_v15 }
0x1680   : > { %19050 = vpow2.f32 %v17245_v59  ;;  %v17242_v62 = vmul.f32 -1.442695, %v16220_v39 }
0x1682   : > { %19052 = vpow2.f32 %v17242_v62 }
0x1689   : > { %v19047_v16 = vpop.eup %19046 }
0x168a   : > { %v16265_v41 = vadd.f32 1.0, %v19047_v16 }
0x168b   : > { %v19049_v45 = vpop.eup %19048 }
0x168c   : > { %19054 = vrcp.f32 %v16265_v41  ;;  %v16262_v21 = vadd.f32 1.0, %v19049_v45 }
0x168d   : > { %v19051_v1 = vpop.eup %19050 }
0x168e   : > { %19056 = vrcp.f32 %v16262_v21  ;;  %v16271_v40 = vadd.f32 1.0, %v19051_v1 }
0x168f   : > { %v19053_v25 = vpop.eup %19052 }
0x1690   : > { %19058 = vrcp.f32 %v16271_v40  ;;  %v16268_v11 = vadd.f32 1.0, %v19053_v25 }
0x1692   : > { %19060 = vrcp.f32 %v16268_v11 }
0x1699   : > { %v19055_v38 = vpop.eup %19054 }
0x169a   : > { %v16301_v8 = vmul.f32 %v19055_v38, %v16217_v30 }
0x169b   : > { %v19057_v56 = vpop.eup %19056 }
0x169c   : > { %v16313_v55 = vadd.f32 %v16301_v8, %v25142_v22  ;;  %v16298_v28 = vmul.f32 %v19057_v56, %v16214_v29 }
0x169d   : > { %v19059_v26 = vpop.eup %19058 }
0x169e   : > { %16325 = vst.msk [vmem:[%s25571_s24 + $0x28] sm:$0xff] %vm5189_vm4, %v16313_v55  ;;  %v16310_v49 = vadd.f32 %v16298_v28, %v25147_v2  ;;  %v16307_v4 = vmul.f32 %v19059_v26, %v16223_v24 }
0x169f   : > { %v19061_v18 = vpop.eup %19060 }
0x16a0   : > { %16322 = vst.msk [vmem:[%s25571_s24 + $0x10] sm:$0xff] %vm5189_vm4, %v16310_v49  ;;  %v16319_v52 = vadd.f32 %v16307_v4, %v25133_v47  ;;  %v16304_v35 = vmul.f32 %v19061_v18, %v16220_v39 }
0x16a2   : > { %16331 = vst.msk [vmem:[%s25571_s24 + $0x58] sm:$0xff] %vm5189_vm4, %v16319_v52  ;;  %v16316_v58 = vadd.f32 %v16304_v35, %v25137_v12 }
0x16a4   : > { %16328 = vst.msk [vmem:[%s25571_s24 + $0x40] sm:$0xff] %vm5189_vm4, %v16316_v58 }
0x16f9   : > { %v16104_v22 = vpop.f32.mrf.mxu0 }
0x16fa   : > { %v16105_v42 = vadd.f32 %v16104_v22, %v16009_v6 }
0x16fb   : > { %v16106_v53 = vpop.f32.mrf.mxu0 }
0x16fc   : > { %v16212_v44 = vmul.f32 %v16105_v42, %v24646_v15  ;;  %v16107_v9 = vadd.f32 %v16106_v53, %v16009_v6 }
0x16fd   : > { %v16110_v2 = vpop.f32.mrf.mxu0 }
0x16fe   : > { %v17234_v14 = vmul.f32 -1.442695, %v16212_v44  ;;  %v16213_v37 = vmul.f32 %v16107_v9, %v24646_v15  ;;  %v16111_v57 = vadd.f32 %v16110_v2, %v25554_v33 }
0x16ff   : > { %v16112_v47 = vpop.f32.mrf.mxu0 }
0x1700   : > { %19062 = vpow2.f32 %v17234_v14  ;;  %v17235_v19 = vmul.f32 -1.442695, %v16213_v37  ;;  %v16215_v50 = vmul.f32 %v16111_v57, %v24646_v15  ;;  %v16113_v12 = vadd.f32 %v16112_v47, %v25554_v33 }
0x1701   : > { %v16116_v7 = vpop.f32.mrf.mxu0 }
0x1702   : > { %19064 = vpow2.f32 %v17235_v19  ;;  %v17237_v23 = vmul.f32 -1.442695, %v16215_v50  ;;  %v16216_v3 = vmul.f32 %v16113_v12, %v24646_v15  ;;  %v16117_v6 = vadd.f32 %v16116_v7, %v25562_v32 }
0x1703   : > { %v16118_v20 = vpop.f32.mrf.mxu0 }
0x1704   : > { %19066 = vpow2.f32 %v17237_v23  ;;  %v17238_v46 = vmul.f32 -1.442695, %v16216_v3  ;;  %v16218_v30 = vmul.f32 %v16117_v6, %v24646_v15  ;;  %v16119_v43 = vadd.f32 %v16118_v20, %v25562_v32 }
0x1705   : > { %v16122_v48 = vpop.f32.mrf.mxu0 }
0x1706   : > { %19068 = vpow2.f32 %v17238_v46  ;;  %v17240_v36 = vmul.f32 -1.442695, %v16218_v30  ;;  %v16219_v29 = vmul.f32 %v16119_v43, %v24646_v15  ;;  %v16123_v33 = vadd.f32 %v16122_v48, %v25558_v34 }
0x1707   : > { %v16124_v51 = vpop.f32.mrf.mxu0 }
0x1708   : > { %19070 = vpow2.f32 %v17240_v36  ;;  %v17241_v31 = vmul.f32 -1.442695, %v16219_v29  ;;  %v16221_v63 = vmul.f32 %v16123_v33, %v24646_v15  ;;  %v16125_v24 = vadd.f32 %v16124_v51, %v25558_v34 }
0x170a   : > { %19072 = vpow2.f32 %v17241_v31  ;;  %v17243_v61 = vmul.f32 -1.442695, %v16221_v63  ;;  %v16222_v59 = vmul.f32 %v16125_v24, %v24646_v15 }
0x170c   : > { %19074 = vpow2.f32 %v17243_v61  ;;  %v17244_v32 = vmul.f32 -1.442695, %v16222_v59 }
0x170d   : > { %v19063_v39 = vpop.eup %19062 }
0x170e   : > { %v16260_v62 = vadd.f32 1.0, %v19063_v39  ;;  %19076 = vpow2.f32 %v17244_v32 }
0x170f   : > { %v19065_v16 = vpop.eup %19064 }
0x1710   : > { %19078 = vrcp.f32 %v16260_v62  ;;  %v16261_v41 = vadd.f32 1.0, %v19065_v16 }
0x1711   : > { %v19067_v45 = vpop.eup %19066 }
0x1712   : > { %19080 = vrcp.f32 %v16261_v41  ;;  %v16263_v21 = vadd.f32 1.0, %v19067_v45 }
0x1713   : > { %v19069_v1 = vpop.eup %19068 }
0x1714   : > { %19082 = vrcp.f32 %v16263_v21  ;;  %v16264_v40 = vadd.f32 1.0, %v19069_v1 }
0x1715   : > { %v19071_v25 = vpop.eup %19070 }
0x1716   : > { %19084 = vrcp.f32 %v16264_v40  ;;  %v16266_v34 = vadd.f32 1.0, %v19071_v25 }
0x1717   : > { %v19073_v11 = vpop.eup %19072 }
0x1718   : > { %19086 = vrcp.f32 %v16266_v34  ;;  %v16267_v15 = vadd.f32 1.0, %v19073_v11 }
0x1719   : > { %v19075_v38 = vpop.eup %19074 }
0x171a   : > { %19088 = vrcp.f32 %v16267_v15  ;;  %v16269_v8 = vadd.f32 1.0, %v19075_v38 }
0x171b   : > { %v19077_v56 = vpop.eup %19076 }
0x171c   : > { %19090 = vrcp.f32 %v16269_v8  ;;  %v16270_v55 = vadd.f32 1.0, %v19077_v56 }
0x171d   : > { %v19079_v28 = vpop.eup %19078 }
0x171e   : > { %v16296_v26 = vmul.f32 %v19079_v28, %v16212_v44  ;;  %19092 = vrcp.f32 %v16270_v55 }
0x171f   : > { %v19081_v49 = vpop.eup %19080 }
0x1720   : > { %v16308_v4 = vadd.f32 %v16296_v26, %v25272_v10  ;;  %v16297_v18 = vmul.f32 %v19081_v49, %v16213_v37 }
0x1721   : > { %v19083_v52 = vpop.eup %19082 }
0x1722   : > { %16320 = vst [vmem:[%s25571_s24] sm:$0xff] %v16308_v4  ;;  %v16309_v35 = vadd.f32 %v16297_v18, %v25269_v54  ;;  %v16299_v58 = vmul.f32 %v19083_v52, %v16215_v50 }
0x1723   : > { %v19085_v22 = vpop.eup %19084 }
0x1724   : > { %16321 = vst [vmem:[%s25571_s24 + $0x8] sm:$0xff] %v16309_v35  ;;  %v16311_v42 = vadd.f32 %v16299_v58, %v25264_v60  ;;  %v16300_v53 = vmul.f32 %v19085_v22, %v16216_v3 }
0x1725   : > { %v19087_v9 = vpop.eup %19086 }
0x1726   : > { %16323 = vst [vmem:[%s25571_s24 + $0x18] sm:$0xff] %v16311_v42  ;;  %v16312_v44 = vadd.f32 %v16300_v53, %v25261_v27  ;;  %v16302_v10 = vmul.f32 %v19087_v9, %v16218_v30 }
0x1727   : > { %v19089_v2 = vpop.eup %19088 }
0x1728   : > { %16324 = vst [vmem:[%s25571_s24 + $0x20] sm:$0xff] %v16312_v44  ;;  %v16314_v14 = vadd.f32 %v16302_v10, %v25256_v17  ;;  %v16303_v37 = vmul.f32 %v19089_v2, %v16219_v29 }
0x1729   : > { %v19091_v54 = vpop.eup %19090 }
0x172a   : > { %16326 = vst [vmem:[%s25571_s24 + $0x30] sm:$0xff] %v16314_v14  ;;  %v16315_v57 = vadd.f32 %v16303_v37, %v25252_v5  ;;  %v16305_v47 = vmul.f32 %v19091_v54, %v16221_v63 }
0x172b   : > { %v19093_v19 = vpop.eup %19092 }
0x172c   : > { %16327 = vst [vmem:[%s25571_s24 + $0x38] sm:$0xff] %v16315_v57  ;;  %v16317_v60 = vadd.f32 %v16305_v47, %v25247_v13  ;;  %v16306_v50 = vmul.f32 %v19093_v19, %v16222_v59 }
0x172e   : > { %16329 = vst [vmem:[%s25571_s24 + $0x48] sm:$0xff] %v16317_v60  ;;  %v16318_v27 = vadd.f32 %v16306_v50, %v25243_v0 }
0x1730   : > { %16330 = vst [vmem:[%s25571_s24 + $0x50] sm:$0xff] %v16318_v27 }
0x1731 PF: > { %s23_s25 = sadd.s32 1, %s19136_s25  }
0x1732   : > { %p20_p4 = scmp.ge.s32.totalorder %s23_s25, 4  }
0x1734   :  { %22 = sbr.rel (!%p20_p4) target bundleno = 1 (0x1), region = 176 }

</bundles_post_ra>
